<compile_context>
chip_gen: v6e
topology: v6e:2x2x1
jax: 0.10.0
libtpu: 0.0.40
codegen_flags: <defaults>
</compile_context>

<pallas_src>
import jax
import jax.numpy as jnp
import numpy as np
from jax import lax
from jax.experimental import pallas as pl
from jax.experimental.pallas import tpu as pltpu


# ---------------------------------------------------------------------------
# Pallas kernel: one grid step = one attention head, ALL batch elements.
# ---------------------------------------------------------------------------
def _attn_kernel(x_ref, w_ref, ohrep_ref, basis_ref, dec_ref, o_ref):
    # x_ref:     (B*S, in_c)                 flattened NHWC input (shared across heads)
    # w_ref:     (1, in_c, 3*head_c + aug)   fused [Wq | Wk | Wv | Wq@R] for this head
    # ohrep_ref: (S, aug)                    one-hot query-position replication mask
    # basis_ref: (1, aug, S)                 per-head separable relative-position basis
    # dec_ref:   (S, S)                      multiplicative tanh decay mask
    # o_ref:     (B, 1, head_c, S)           lane-dense output (last dim = S)
    B, _, head_c, S = o_ref.shape

    # Single fused projection matmul (M = B*S): q, k, v and the replicated-q used
    # for the relative bias all come from one MXU push.
    proj = jnp.dot(x_ref[...], w_ref[0], preferred_element_type=jnp.float32)

    ohrep = ohrep_ref[...]
    basis = basis_ref[0]
    dec = dec_ref[...]

    for b in range(B):                               # B is small & static -> unrolled
        blk = proj[b * S:(b + 1) * S, :]
        q = blk[:, 0:head_c]
        k = blk[:, head_c:2 * head_c]
        v = blk[:, 2 * head_c:3 * head_c]
        q_rep = blk[:, 3 * head_c:]                  # (S, aug) q channels replicated

        # content logits: qk[s, t] = sum_c q[s, c] * k[t, c]
        logits = lax.dot_general(q, k, (((1,), (1,)), ((), ())),
                                 preferred_element_type=jnp.float32)      # (S, S)
        # separable relative-position bias as a single MXU matmul
        rel = jnp.dot(q_rep * ohrep, basis, preferred_element_type=jnp.float32)
        logits = (logits + rel) * dec

        # softmax over all key positions
        m = jnp.max(logits, axis=-1, keepdims=True)
        e = jnp.exp(logits - m)
        p = e * pl.reciprocal(jnp.sum(e, axis=-1, keepdims=True), approx=True)

        out_b = jnp.dot(p, v, preferred_element_type=jnp.float32)          # (S, head_c)
        o_ref[b, 0] = out_b.T.astype(o_ref.dtype)                          # lane-dense store


# ---------------------------------------------------------------------------
# Wrapper-side precomputation (pure parameter / index plumbing)
# ---------------------------------------------------------------------------
def _decay_mask(dims, k_attn):
    rel_dim = 2 * dims - 1
    ii, jj = np.indices((rel_dim, rel_dim))
    dec_raw = np.maximum(np.abs(ii - dims + 1), np.abs(jj - dims + 1)).astype(np.float32)
    return jnp.tanh(-5.0 * (jnp.asarray(dec_raw) - 10.0 * k_attn)) / 2.0 + 0.5


def _offset_indices(H, W):
    ys = jnp.arange(H)
    xs = jnp.arange(W)
    dy = (ys[:, None] - ys[None, :] + H - 1)[:, None, :, None]   # (H,1,H,1): y - i + H - 1
    dx = (xs[:, None] - xs[None, :] + W - 1)[None, :, None, :]   # (1,W,1,W): x - j + W - 1
    return dy, dx


def forward_pallas(x_nchw, params, *, n_head, dims, k_attn):
    B, in_c, H, W = x_nchw.shape
    assert H == dims and W == dims, "spatial size must equal `dims`"
    out_c = params["wq"].shape[0]
    head_c = out_c // n_head
    rel_c = head_c // 2
    S = H * W
    aug = rel_c * (H + W)

    # x: NCHW -> (B*S, in_c)
    x_flat = jnp.transpose(x_nchw, (0, 2, 3, 1)).reshape(B * S, in_c)

    def per_head(w):  # (out_c, in_c) -> (n_head, in_c, head_c)
        return jnp.transpose(w.reshape(n_head, head_c, in_c), (0, 2, 1))

    wq_h, wk_h, wv_h = per_head(params["wq"]), per_head(params["wk"]), per_head(params["wv"])

    # Replication matrix R (head_c, aug): channel c<rel_c -> columns [c*H, (c+1)*H),
    # channel rel_c+c -> columns [rel_c*H + c*W, rel_c*H + (c+1)*W). Folded into Wq.
    R_np = np.zeros((head_c, aug), np.float32)
    for c in range(rel_c):
        R_np[c, c * H:(c + 1) * H] = 1.0
        R_np[rel_c + c, rel_c * H + c * W: rel_c * H + (c + 1) * W] = 1.0
    w_rep_h = jnp.einsum("hik,ka->hia", wq_h, jnp.asarray(R_np))          # (n_head, in_c, aug)
    w_all = jnp.concatenate([wq_h, wk_h, wv_h, w_rep_h], axis=-1)          # (n_head, in_c, 3*head_c+aug)

    # One-hot replication mask OH_rep (S, aug): for s=(y,x), select column y in each
    # rel_x channel block and column x in each rel_y channel block.
    s_idx = np.arange(S)
    ys, xs = np.divmod(s_idx, W)
    ohrep_np = np.zeros((S, aug), np.float32)
    for c in range(rel_c):
        ohrep_np[s_idx, c * H + ys] = 1.0
        ohrep_np[s_idx, rel_c * H + c * W + xs] = 1.0
    ohrep = jnp.asarray(ohrep_np)

    # Separable relative-position basis (n_head, aug, S):
    #   row c*H + y'           -> rel_x[h, c, y' - i(t) + H - 1]   (broadcast over j)
    #   row rel_c*H + c*W + x' -> rel_y[h, c, x' - j(t) + W - 1]   (broadcast over i)
    it, jt = np.divmod(np.arange(S), W)
    dy_idx = np.arange(H)[:, None] - it[None, :] + (H - 1)                 # (H, S)
    dx_idx = np.arange(W)[:, None] - jt[None, :] + (W - 1)                 # (W, S)
    rel_x = params["rel_x"][:, :, :, 0]                                    # (n_head, rel_c, rel_dim)
    rel_y = params["rel_y"][:, :, 0, :]                                    # (n_head, rel_c, rel_dim)
    bx = rel_x[:, :, dy_idx].reshape(n_head, rel_c * H, S)
    by = rel_y[:, :, dx_idx].reshape(n_head, rel_c * W, S)
    basis = jnp.concatenate([bx, by], axis=1)                              # (n_head, aug, S)

    # tanh decay mask (S, S)
    dec_proc = _decay_mask(dims, k_attn)
    dy_f, dx_f = _offset_indices(H, W)
    dec_w = dec_proc[dy_f, dx_f].reshape(S, S)

    # ---- hot path: Pallas kernel -------------------------------------------
    proj_w = 3 * head_c + aug
    out = pl.pallas_call(
        _attn_kernel,
        out_shape=jax.ShapeDtypeStruct((B, n_head, head_c, S), jnp.float32),
        grid_spec=pltpu.PrefetchScalarGridSpec(
            num_scalar_prefetch=0,
            grid=(n_head,),
            in_specs=[
                pl.BlockSpec((B * S, in_c), lambda h: (0, 0)),
                pl.BlockSpec((1, in_c, proj_w), lambda h: (h, 0, 0)),
                pl.BlockSpec((S, aug), lambda h: (0, 0)),
                pl.BlockSpec((1, aug, S), lambda h: (h, 0, 0)),
                pl.BlockSpec((S, S), lambda h: (0, 0)),
            ],
            out_specs=pl.BlockSpec((B, 1, head_c, S), lambda h: (0, h, 0, 0)),
        ),
        compiler_params=pltpu.CompilerParams(
            dimension_semantics=("parallel",)),
    )(x_flat, w_all, ohrep, basis, dec_w)

    # (B, n_head, head_c, S) -> (B, out_c, H, W): pure view, no transpose needed.
    return out.reshape(B, out_c, H, W)


# ---------------------------------------------------------------------------
# Pure-JAX reference mirroring the PyTorch forward (for validation)
# ---------------------------------------------------------------------------
def forward_reference(x_nchw, params, *, n_head, dims, k_attn):
    B, in_c, H, W = x_nchw.shape
    out_c = params["wq"].shape[0]
    head_c = out_c // n_head
    rel_c = head_c // 2
    rel_dim = 2 * dims - 1

    def conv1x1(w):
        return jnp.einsum("oc,bchw->bohw", w, x_nchw).reshape(B, n_head, head_c, H, W)

    q, k, v = conv1x1(params["wq"]), conv1x1(params["wk"]), conv1x1(params["wv"])

    rel_full = jnp.concatenate(
        [jnp.broadcast_to(params["rel_x"], (n_head, rel_c, rel_dim, rel_dim)),
         jnp.broadcast_to(params["rel_y"], (n_head, rel_c, rel_dim, rel_dim))],
        axis=1)
    dy, dx = _offset_indices(H, W)
    pos_rel = rel_full[:, :, dy, dx]                                # (n_head, head_c, H, W, H, W)

    qk = (jnp.einsum("bhcyx,bhcij->bhyxij", q, k)
          + jnp.einsum("bhcyx,hcyxij->bhyxij", q, pos_rel))
    dec_proc = _decay_mask(dims, k_attn)
    qk = qk * dec_proc[dy, dx][None, None]

    p = jax.nn.softmax(qk.reshape(B, n_head, H, W, H * W), axis=-1)
    p = p.reshape(B, n_head, H, W, H, W)
    out = jnp.einsum("bhyxij,bhcij->bhcyx", p, v)
    return out.reshape(B, out_c, H, W)


if __name__ == "__main__":
    # module hyper-parameters (small, consistent with the PyTorch module)
    in_c, out_c, n_head, dims, k_attn = 4, 16, 2, 16, 0.3
    B = 2
    H = W = dims
    head_c = out_c // n_head
    rel_c = head_c // 2
    rel_dim = 2 * dims - 1

    key = jax.random.PRNGKey(0)
    kx, kq, kk, kv, krx, kry = jax.random.split(key, 6)
    bound = 1.0 / np.sqrt(in_c)  # PyTorch Conv2d default (kaiming-uniform) bound
    params = dict(
        wq=jax.random.uniform(kq, (out_c, in_c), jnp.float32, -bound, bound),
        wk=jax.random.uniform(kk, (out_c, in_c), jnp.float32, -bound, bound),
        wv=jax.random.uniform(kv, (out_c, in_c), jnp.float32, -bound, bound),
        rel_x=jax.random.normal(krx, (n_head, rel_c, rel_dim, 1), jnp.float32),
        rel_y=jax.random.normal(kry, (n_head, rel_c, 1, rel_dim), jnp.float32),
    )
    x = jax.random.normal(kx, (B, in_c, H, W), jnp.float32)   # NCHW like PyTorch

    out = forward_pallas(x, params, n_head=n_head, dims=dims, k_attn=k_attn)
    out = jax.block_until_ready(out)
    assert out.shape == (B, out_c, H, W)

    ref = forward_reference(x, params, n_head=n_head, dims=dims, k_attn=k_attn)
    np.testing.assert_allclose(np.asarray(out), np.asarray(ref), rtol=5e-2, atol=5e-2)

    print("KERNEL_OK")
</pallas_src>

<mosaic_0001>
module attributes {stable_mosaic.version = 11 : i64} {
  func.func @_attn_kernel(%arg0: i32, %arg1: memref<512x4xf32, #tpu.memory_space<vmem>>, %arg2: memref<1x4x152xf32, #tpu.memory_space<vmem>>, %arg3: memref<256x128xf32, #tpu.memory_space<vmem>>, %arg4: memref<1x128x256xf32, #tpu.memory_space<vmem>>, %arg5: memref<256x256xf32, #tpu.memory_space<vmem>>, %arg6: memref<2x1x8x256xf32, #tpu.memory_space<vmem>>) attributes {dimension_semantics = [#tpu.dimension_semantics<parallel>], iteration_bounds = array<i64: 2>, scalar_prefetch = 0 : i64, scratch_operands = 0 : i64, tpu.core_type = #tpu.core_type<tc>, window_params = [{pipeline_mode = #tpu.pipeline_mode<synchronous>, transform_indices = @transform_0, window_bounds = array<i64: 512, 4>}, {transform_indices = @transform_1, window_bounds = array<i64: 1, 4, 152>}, {pipeline_mode = #tpu.pipeline_mode<synchronous>, transform_indices = @transform_2, window_bounds = array<i64: 256, 128>}, {transform_indices = @transform_3, window_bounds = array<i64: 1, 128, 256>}, {pipeline_mode = #tpu.pipeline_mode<synchronous>, transform_indices = @transform_4, window_bounds = array<i64: 256, 256>}, {transform_indices = @transform_5, window_bounds = array<i64: 2, 1, 8, 256>}]} {
    %c0 = arith.constant 0 : index
    %c0_0 = arith.constant 0 : index
    %0 = vector.load %arg1[%c0, %c0_0] : memref<512x4xf32, #tpu.memory_space<vmem>>, vector<512x4xf32>
    %c0_1 = arith.constant 0 : index
    %c0_2 = arith.constant 0 : index
    %c0_3 = arith.constant 0 : index
    %1 = vector.load %arg2[%c0_1, %c0_2, %c0_3] : memref<1x4x152xf32, #tpu.memory_space<vmem>>, vector<1x4x152xf32>
    %2 = vector.shape_cast %1 : vector<1x4x152xf32> to vector<4x152xf32>
    %cst = arith.constant dense<0.000000e+00> : vector<512x152xf32>
    %3 = tpu.matmul %0, %2, %cst {dimension_numbers = #tpu.dot_dimension_numbers<[1], [0], [0], [1], [0, 0, 1, 1], [], []>} : vector<512x4xf32>, vector<4x152xf32>, vector<512x152xf32> -> vector<512x152xf32>
    %c0_4 = arith.constant 0 : index
    %c0_5 = arith.constant 0 : index
    %4 = vector.load %arg3[%c0_4, %c0_5] : memref<256x128xf32, #tpu.memory_space<vmem>>, vector<256x128xf32>
    %c0_6 = arith.constant 0 : index
    %c0_7 = arith.constant 0 : index
    %c0_8 = arith.constant 0 : index
    %5 = vector.load %arg4[%c0_6, %c0_7, %c0_8] : memref<1x128x256xf32, #tpu.memory_space<vmem>>, vector<1x128x256xf32>
    %6 = vector.shape_cast %5 : vector<1x128x256xf32> to vector<128x256xf32>
    %c0_9 = arith.constant 0 : index
    %c0_10 = arith.constant 0 : index
    %7 = vector.load %arg5[%c0_9, %c0_10] : memref<256x256xf32, #tpu.memory_space<vmem>>, vector<256x256xf32>
    %8 = vector.extract_strided_slice %3 {offsets = [0, 0], sizes = [256, 152], strides = [1, 1]} : vector<512x152xf32> to vector<256x152xf32>
    %9 = vector.extract_strided_slice %8 {offsets = [0, 0], sizes = [256, 8], strides = [1, 1]} : vector<256x152xf32> to vector<256x8xf32>
    %10 = vector.extract_strided_slice %8 {offsets = [0, 8], sizes = [256, 8], strides = [1, 1]} : vector<256x152xf32> to vector<256x8xf32>
    %11 = vector.extract_strided_slice %8 {offsets = [0, 16], sizes = [256, 8], strides = [1, 1]} : vector<256x152xf32> to vector<256x8xf32>
    %12 = vector.extract_strided_slice %8 {offsets = [0, 24], sizes = [256, 128], strides = [1, 1]} : vector<256x152xf32> to vector<256x128xf32>
    %cst_11 = arith.constant dense<0.000000e+00> : vector<256x256xf32>
    %13 = tpu.matmul %9, %10, %cst_11 {dimension_numbers = #tpu.dot_dimension_numbers<[1], [1], [0], [0], [0, 0, 1, 0], [], []>} : vector<256x8xf32>, vector<256x8xf32>, vector<256x256xf32> -> vector<256x256xf32>
    %14 = arith.mulf %12, %4 : vector<256x128xf32>
    %cst_12 = arith.constant dense<0.000000e+00> : vector<256x256xf32>
    %15 = tpu.matmul %14, %6, %cst_12 {dimension_numbers = #tpu.dot_dimension_numbers<[1], [0], [0], [1], [0, 0, 1, 1], [], []>} : vector<256x128xf32>, vector<128x256xf32>, vector<256x256xf32> -> vector<256x256xf32>
    %16 = arith.addf %13, %15 : vector<256x256xf32>
    %17 = arith.mulf %16, %7 : vector<256x256xf32>
    %cst_13 = arith.constant dense<0xFF800000> : vector<256xf32>
    %18 = vector.multi_reduction <maximumf>, %17, %cst_13 [1] : vector<256x256xf32> to vector<256xf32>
    %19 = vector.shape_cast %18 : vector<256xf32> to vector<256x1xf32>
    %20 = vector.broadcast %19 : vector<256x1xf32> to vector<256x256xf32>
    %21 = arith.subf %17, %20 : vector<256x256xf32>
    %22 = math.exp %21 : vector<256x256xf32>
    %cst_14 = arith.constant dense<0.000000e+00> : vector<256xf32>
    %23 = vector.multi_reduction <add>, %22, %cst_14 [1] : vector<256x256xf32> to vector<256xf32>
    %24 = vector.shape_cast %23 : vector<256xf32> to vector<256x1xf32>
    %25 = tpu.reciprocal %24 {approx = true} : vector<256x1xf32> -> vector<256x1xf32>
    %26 = vector.broadcast %25 : vector<256x1xf32> to vector<256x256xf32>
    %27 = arith.mulf %22, %26 : vector<256x256xf32>
    %cst_15 = arith.constant dense<0.000000e+00> : vector<256x8xf32>
    %28 = tpu.matmul %27, %11, %cst_15 {dimension_numbers = #tpu.dot_dimension_numbers<[1], [0], [0], [1], [0, 0, 1, 1], [], []>} : vector<256x256xf32>, vector<256x8xf32>, vector<256x8xf32> -> vector<256x8xf32>
    %29 = tpu.transpose %28, [1, 0] : vector<256x8xf32> -> vector<8x256xf32>
    %c0_16 = arith.constant 0 : index
    %c0_17 = arith.constant 0 : index
    %c0_18 = arith.constant 0 : index
    %c0_19 = arith.constant 0 : index
    %30 = vector.load %arg6[%c0_16, %c0_17, %c0_18, %c0_19] : memref<2x1x8x256xf32, #tpu.memory_space<vmem>>, vector<1x1x8x256xf32>
    %31 = vector.shape_cast %30 : vector<1x1x8x256xf32> to vector<8x256xf32>
    %32 = vector.shape_cast %29 : vector<8x256xf32> to vector<1x1x8x256xf32>
    tpu.vector_store %arg6[%c0_16, %c0_17, %c0_18, %c0_19], %32 {strides = array<i32>} : memref<2x1x8x256xf32, #tpu.memory_space<vmem>>, vector<1x1x8x256xf32>,
    %33 = vector.extract_strided_slice %3 {offsets = [256, 0], sizes = [256, 152], strides = [1, 1]} : vector<512x152xf32> to vector<256x152xf32>
    %34 = vector.extract_strided_slice %33 {offsets = [0, 0], sizes = [256, 8], strides = [1, 1]} : vector<256x152xf32> to vector<256x8xf32>
    %35 = vector.extract_strided_slice %33 {offsets = [0, 8], sizes = [256, 8], strides = [1, 1]} : vector<256x152xf32> to vector<256x8xf32>
    %36 = vector.extract_strided_slice %33 {offsets = [0, 16], sizes = [256, 8], strides = [1, 1]} : vector<256x152xf32> to vector<256x8xf32>
    %37 = vector.extract_strided_slice %33 {offsets = [0, 24], sizes = [256, 128], strides = [1, 1]} : vector<256x152xf32> to vector<256x128xf32>
    %cst_20 = arith.constant dense<0.000000e+00> : vector<256x256xf32>
    %38 = tpu.matmul %34, %35, %cst_20 {dimension_numbers = #tpu.dot_dimension_numbers<[1], [1], [0], [0], [0, 0, 1, 0], [], []>} : vector<256x8xf32>, vector<256x8xf32>, vector<256x256xf32> -> vector<256x256xf32>
    %39 = arith.mulf %37, %4 : vector<256x128xf32>
    %cst_21 = arith.constant dense<0.000000e+00> : vector<256x256xf32>
    %40 = tpu.matmul %39, %6, %cst_21 {dimension_numbers = #tpu.dot_dimension_numbers<[1], [0], [0], [1], [0, 0, 1, 1], [], []>} : vector<256x128xf32>, vector<128x256xf32>, vector<256x256xf32> -> vector<256x256xf32>
    %41 = arith.addf %38, %40 : vector<256x256xf32>
    %42 = arith.mulf %41, %7 : vector<256x256xf32>
    %cst_22 = arith.constant dense<0xFF800000> : vector<256xf32>
    %43 = vector.multi_reduction <maximumf>, %42, %cst_22 [1] : vector<256x256xf32> to vector<256xf32>
    %44 = vector.shape_cast %43 : vector<256xf32> to vector<256x1xf32>
    %45 = vector.broadcast %44 : vector<256x1xf32> to vector<256x256xf32>
    %46 = arith.subf %42, %45 : vector<256x256xf32>
    %47 = math.exp %46 : vector<256x256xf32>
    %cst_23 = arith.constant dense<0.000000e+00> : vector<256xf32>
    %48 = vector.multi_reduction <add>, %47, %cst_23 [1] : vector<256x256xf32> to vector<256xf32>
    %49 = vector.shape_cast %48 : vector<256xf32> to vector<256x1xf32>
    %50 = tpu.reciprocal %49 {approx = true} : vector<256x1xf32> -> vector<256x1xf32>
    %51 = vector.broadcast %50 : vector<256x1xf32> to vector<256x256xf32>
    %52 = arith.mulf %47, %51 : vector<256x256xf32>
    %cst_24 = arith.constant dense<0.000000e+00> : vector<256x8xf32>
    %53 = tpu.matmul %52, %36, %cst_24 {dimension_numbers = #tpu.dot_dimension_numbers<[1], [0], [0], [1], [0, 0, 1, 1], [], []>} : vector<256x256xf32>, vector<256x8xf32>, vector<256x8xf32> -> vector<256x8xf32>
    %54 = tpu.transpose %53, [1, 0] : vector<256x8xf32> -> vector<8x256xf32>
    %c1 = arith.constant 1 : index
    %c0_25 = arith.constant 0 : index
    %c0_26 = arith.constant 0 : index
    %c0_27 = arith.constant 0 : index
    %55 = vector.load %arg6[%c1, %c0_25, %c0_26, %c0_27] : memref<2x1x8x256xf32, #tpu.memory_space<vmem>>, vector<1x1x8x256xf32>
    %56 = vector.shape_cast %55 : vector<1x1x8x256xf32> to vector<8x256xf32>
    %57 = vector.shape_cast %54 : vector<8x256xf32> to vector<1x1x8x256xf32>
    tpu.vector_store %arg6[%c1, %c0_25, %c0_26, %c0_27], %57 {strides = array<i32>} : memref<2x1x8x256xf32, #tpu.memory_space<vmem>>, vector<1x1x8x256xf32>,
    return
  }
  func.func @transform_0(%arg0: i32) -> (i32, i32) {
    %c0_i32 = arith.constant 0 : i32
    %c0_i32_0 = arith.constant 0 : i32
    %c0_i32_1 = arith.constant 0 : i32
    return %c0_i32, %c0_i32_0 : i32, i32
  }
  func.func @transform_1(%arg0: i32) -> (i32, i32, i32) {
    %c0_i32 = arith.constant 0 : i32
    %c0_i32_0 = arith.constant 0 : i32
    %c0_i32_1 = arith.constant 0 : i32
    return %arg0, %c0_i32, %c0_i32_0 : i32, i32, i32
  }
  func.func @transform_2(%arg0: i32) -> (i32, i32) {
    %c0_i32 = arith.constant 0 : i32
    %c0_i32_0 = arith.constant 0 : i32
    %c0_i32_1 = arith.constant 0 : i32
    return %c0_i32, %c0_i32_0 : i32, i32
  }
  func.func @transform_3(%arg0: i32) -> (i32, i32, i32) {
    %c0_i32 = arith.constant 0 : i32
    %c0_i32_0 = arith.constant 0 : i32
    %c0_i32_1 = arith.constant 0 : i32
    return %arg0, %c0_i32, %c0_i32_0 : i32, i32, i32
  }
  func.func @transform_4(%arg0: i32) -> (i32, i32) {
    %c0_i32 = arith.constant 0 : i32
    %c0_i32_0 = arith.constant 0 : i32
    %c0_i32_1 = arith.constant 0 : i32
    return %c0_i32, %c0_i32_0 : i32, i32
  }
  func.func @transform_5(%arg0: i32) -> (i32, i32, i32, i32) {
    %c0_i32 = arith.constant 0 : i32
    %c0_i32_0 = arith.constant 0 : i32
    %c0_i32_1 = arith.constant 0 : i32
    %c0_i32_2 = arith.constant 0 : i32
    return %c0_i32, %arg0, %c0_i32_0, %c0_i32_1 : i32, i32, i32, i32
  }
}

</mosaic_0001>

<bundles_post_ra>
// kernel: tpu_custom_call.1
= control target key start
LH: loop header
LB: loop body
LE: loop exit
PB: predicated region body
PF: predicated region fallthrough
CT: control target
= control target key end

     0   :  { %10 = vsyncpa [#allocation3], 0  ;;  %s10326_s0 = inlined_call_operand.vmem [shape: f32[512,4], index: 0, kind: input, shape index: {}]   ;;  %s10327_s1 = inlined_call_operand.vmem [shape: f32[2,4,152], index: 1, kind: input, shape index: {}]   ;;  %s10328_s2 = inlined_call_operand.hbm [shape: f32[256,128], index: 2, kind: input, shape index: {}]   ;;  %s10329_s3 = inlined_call_operand.vmem [shape: f32[2,128,256], index: 3, kind: input, shape index: {}]   ;;  %s10330_s4 = inlined_call_operand.hbm [shape: f32[256,256], index: 4, kind: input, shape index: {}]   ;;  %s10331_s5 = inlined_call_operand.hbm [shape: f32[2,2,8,256], index: 5, kind: output, shape index: {}]  }
   0x1   :  { %11 = vsyncpa [#allocation6], 0 }
   0x2   :  { %12 = vsyncpa [#allocation4], 0 }
   0x3   :  { %14 = vsyncpa [#allocation4 + $0x1], 0  ;;  %s6847_s18 = smov 0   ;;  %s6849_s19 = smov 0  }
   0x4   :  { %s6851_s20 = smov 0   ;;  %s6853_s21 = smov 0  }
   0x5 LB: > { %s6868_s22 = sadd.s32 4294967295, %s6800_s21   ;;  %s5334_s23 = sadd.s32 4294967294, %s6800_s21   ;;  %s6800_s21 = sphi %s6853_s21, %s10965_s21   ;;  %s6796_s20 = sphi %s6851_s20, %s10964_s20   ;;  %s6792_s19 = sphi %s6849_s19, %s10963_s19   ;;  %s6788_s18 = sphi %s6847_s18, %s10962_s18  }
   0x6   : > { %s6872_s24 = sadd.s32 1, %s6800_s21   ;;  %s142_s25 = sadd.s32 1, %s6796_s20 }
   0x7   : > { %s139_s26 = ssub.s32 %s6800_s21, %s6872_s24  ;;  %p152_p0 = scmp.ne.s32.totalorder %s6796_s20, %s6792_s19 }
   0x8   : > { %p140_p1 = scmp.eq.s32.totalorder %s139_s26, 0  ;;  %p153_p2 = scmp.eq.s32.totalorder %s6868_s22, 1 }
   0x9   : > { %p158_p3 = scmp.ne.s32.totalorder %s6792_s19, %s6788_s18  ;;  %p159_p4 = scmp.eq.s32.totalorder %s5334_s23, 1 }
   0xa   : > { %s6883_s27 = scalar_select %p140_p1, %s6796_s20, %s142_s25  }
   0xb   : > { %p6885_p5 = por %p153_p2, %p152_p0  ;;  %p6889_p6 = por %p159_p4, %p158_p3 }
   0xc   : > { %p5335_p7 = scmp.ge.s32.totalorder %s6800_s21, 1  ;;  %p166_p8 = scmp.lt.s32.totalorder %s6800_s21, 3 }
   0xd   : > { %s10513_s29 = scalar_select %p6889_p6, 1, 0 }
   0xe   : > { %p10332_p9 = scmp.eq.s32.totalorder %s6868_s22, 0  ;;  %p6896_p10 = pnand %p5335_p7, %p166_p8 }
   0xf   : > { %s6802_s6 = smov [#allocation2]   ;;  %s6803_s9 = smov [#allocation5]  }
  0x10   : > { %s181_s7 = sshll.u32 %s6802_s6, 4  ;;  %p5817_p11 = pneg %p6896_p10  ;;  %s182_s7 = int_to_ptr.vmem [resolvable:$true] %s181_s7 }
  0x11   : > { %s194_s10 = sshll.u32 %s6803_s9, 4  ;;  %s6691_s11 = scalar_lea.vmem %s182_s7, 4096  ;;  %s195_s10 = int_to_ptr.vmem [resolvable:$true] %s194_s10 }
  0x12   : > { %p6904_p12 = pnand %p10332_p9, %p5817_p11  ;;  %p6692_p0 = scmp.ne.s32.totalorder %s182_s7, %s6691_s11 }
  0x13   : > { %p6699_p3 = scmp.lt.s32.totalorder %s182_s7, %s182_s7  ;;  %p6700_p4 = scmp.lt.s32.totalorder %s6691_s11, %s6691_s11 }
  0x14   : > { %p6682_p13 = pneg %p6904_p12 }
  0x15   : > { %p6701_p7 = por %p6700_p4, %p6699_p3 }
  0x16   : > { %p6694_p1 = pnand %p6692_p0, %p6682_p13 }
  0x18   : > { %p6695_p2 = pneg %p6694_p1 }
  0x1a   : > { %p6702_p8 = pnand %p6701_p7, %p6695_p2 }
  0x1c   : > { %6705 = shalt.err (!%p6702_p8)
}
  0x1d   : > { %s6804_s12 = smov 128   ;;  %s6805_s13 = smov 8  }
  0x1e   : > { %5820 = dma.hbm_to_vmem [thread:$0]  (!%p6904_p12), %s10328_s2, 4096, %s182_s7, [#allocation3], %s6804_s12, %s6804_s12, %s6805_s13  }
  0x1f   : > { %s6717_s16 = scalar_lea.vmem %s195_s10, 8192  ;;  %p6725_p9 = scmp.lt.s32.totalorder %s195_s10, %s195_s10 }
  0x20   : > { %p6718_p11 = scmp.ne.s32.totalorder %s195_s10, %s6717_s16  ;;  %p6726_p6 = scmp.lt.s32.totalorder %s6717_s16, %s6717_s16 }
  0x22   : > { %p6720_p0 = pnand %p6718_p11, %p6682_p13  ;;  %p6727_p3 = por %p6726_p6, %p6725_p9 }
  0x24   : > { %p6721_p1 = pneg %p6720_p0 }
  0x26   : > { %p6728_p2 = pnand %p6727_p3, %p6721_p1 }
  0x28   : > { %6731 = shalt.err (!%p6728_p2)
}
  0x29   : > { %s6806_s17 = smov 256   ;;  %s6807_s23 = smov 16  }
  0x2a   : > { %5823 = dma.hbm_to_vmem [thread:$0]  (!%p6904_p12), %s10330_s4, 8192, %s195_s10, [#allocation6], %s6806_s17, %s6806_s17, %s6807_s23  }
  0x2b   : > { %226 = sbr.rel (%p6896_p10) target bundleno = 2411 (0x96b), region = 40 }
  0x30   : > { %p10516_p4 = scmp.eq.s32.totalorder %s6868_s22, 0 }
  0x32   : > { %6775 = dma.done.wait (%p10516_p4), [#allocation3], 4096   ;;  %p10517_p13 = pmov %p10516_p4 }
  0x33   : > { %p10518_p6 = pmov %p10516_p4 }
  0x34   : > { %6777 = vsyncadd (%p10517_p13), [#allocation3], 4294963200 }
  0x35   : > { %6779 = dma.done.wait (%p10518_p6), [#allocation6], 8192   ;;  %p10519_p9 = pmov %p10516_p4 }
  0x36   : > { %p263_p7 = scmp.lt.s32.totalorder %s6868_s22, 1  ;;  %v10333_v0 = vmov 0.0   ;;  %vm533_vm0 = vcmask 1043456   ;;  %v273_v3 = vld [vmem:[%s10326_s0] sm:$0xff]  ;;  %vm340_vm1 = vcmask 31744   ;;  %v274_v4 = vld [vmem:[%s10326_s0 + $0x8] sm:$0xff] }
  0x37   : > { %6781 = vsyncadd (%p10519_p9), [#allocation6], 4294959104  ;;  %602 = vmatprep.mubr.f32.mxu0 %v10333_v0  ;;  %1628 = vmatprep.mubr.f32.mxu1 %v10333_v0  ;;  %v987_v5 = vld [vmem:[#allocation2] sm:$0xff]  ;;  %s6809_s14 = smov 24   ;;  %v989_v6 = vld [vmem:[#allocation2 + $0x10] sm:$0xff]  ;;  %s6810_s13 = smov 104  }
  0x38   : > { %s6940_s30 = scalar_select %p263_p7, %s6868_s22, 1  ;;  %1147 = vrot.lane.b32.xlu0 %v987_v5, %s6809_s14  ;;  %v988_v7 = vld [vmem:[#allocation2 + $0x8] sm:$0xff]  ;;  %1151 = vrot.lane.b32.xlu1 %v989_v6, %s6809_s14  ;;  %v275_v8 = vld [vmem:[%s10326_s0 + $0x10] sm:$0xff]  ;;  %v990_v9 = vld [vmem:[#allocation2 + $0x18] sm:$0xff]  ;;  %vm1499_vm2 = vcmask 850944   ;;  %vm1917_vm3 = vcmask 64512  }
  0x39   : > { %v991_v10 = vld [vmem:[#allocation2 + $0x20] sm:$0xff]  ;;  %v276_v11 = vld [vmem:[%s10326_s0 + $0x18] sm:$0xff]  ;;  %v992_v12 = vld [vmem:[#allocation2 + $0x28] sm:$0xff]  ;;  %s6812_s12 = smov 112  }
  0x3a   : > { %s5548_s6 = sshll.u32 %s6940_s30, 3  ;;  %v993_v13 = vld [vmem:[#allocation2 + $0x30] sm:$0xff]  ;;  %v277_v14 = vld [vmem:[%s10326_s0 + $0x20] sm:$0xff]  ;;  %v994_v15 = vld [vmem:[#allocation2 + $0x38] sm:$0xff]  ;;  %s5549_s17 = sshll.u32 %s6940_s30, 8 }
  0x3b   : > { %s267_s9 = scalar_lea.vmem %s10327_s1, %s5548_s6  ;;  %v995_v16 = vld [vmem:[#allocation2 + $0x40] sm:$0xff]  ;;  %v278_v17 = vld [vmem:[%s10326_s0 + $0x28] sm:$0xff]  ;;  %v997_v19 = vld [vmem:[#allocation2 + $0x50] sm:$0xff]  ;;  %s7177_s26 = scalar_lea.vmem %s10329_s3, %s5549_s17 }
  0x3c   : > { %v337_v1 = vld [vmem:[%s267_s9] sm:$0xff]  ;;  %1149 = vrot.lane.b32.xlu0 %v988_v7, %s6809_s14  ;;  %1153 = vrot.lane.b32.xlu1 %v990_v9, %s6809_s14  ;;  %v996_v18 = vld [vmem:[#allocation2 + $0x48] sm:$0xff]  ;;  %v279_v20 = vld [vmem:[%s10326_s0 + $0x30] sm:$0xff]  ;;  %s6811_s17 = smov 120  }
  0x3d   : > { %v339_v2 = vcombine.high %v337_v1, %v337_v1  ;;  %v998_v21 = vld [vmem:[#allocation2 + $0x58] sm:$0xff]  ;;  %v999_v22 = vld [vmem:[#allocation2 + $0x60] sm:$0xff]  ;;  %v1000_v24 = vld [vmem:[#allocation2 + $0x68] sm:$0xff] }
  0x3e   : > { %v280_v23 = vld [vmem:[%s10326_s0 + $0x38] sm:$0xff]  ;;  %v1001_v25 = vld [vmem:[#allocation2 + $0x70] sm:$0xff]  ;;  %v281_v26 = vld [vmem:[%s10326_s0 + $0x40] sm:$0xff] }
  0x3f   : > { %5347 = vmatprep.subr.msk.mxu0 %vm533_vm0, %v339_v2  ;;  %v1002_v27 = vld [vmem:[#allocation2 + $0x78] sm:$0xff]  ;;  %v282_v28 = vld [vmem:[%s10326_s0 + $0x48] sm:$0xff]  ;;  %v1003_v29 = vld [vmem:[#allocation2 + $0x80] sm:$0xff] }
  0x40   : > { %5348 = vmatpush1.msk.msra.mxu0 %vm533_vm0, %v337_v1  ;;  %1155 = vrot.lane.b32.xlu0 %v991_v10, %s6809_s14  ;;  %v283_v30 = vld [vmem:[%s10326_s0 + $0x50] sm:$0xff]  ;;  %v1004_v31 = vld [vmem:[#allocation2 + $0x88] sm:$0xff]  ;;  %v284_v32 = vld [vmem:[%s10326_s0 + $0x58] sm:$0xff] }
  0x41   : > { %5349 = vmatmul.mubr.msk.f32.vlgmr.msra.gmra.mxu0 %vm340_vm1, %v273_v3  ;;  %2943 = vmatprep.subr.mxu0 %v10333_v0  ;;  %v1005_v33 = vld [vmem:[#allocation2 + $0x90] sm:$0xff]  ;;  %v285_v34 = vld [vmem:[%s10326_s0 + $0x60] sm:$0xff]  ;;  %v1006_v35 = vld [vmem:[#allocation2 + $0x98] sm:$0xff] }
  0x42   : > { %608 = vmatprep.mubr.f32.mxu0 %v10333_v0  ;;  %1157 = vrot.lane.b32.xlu1 %v992_v12, %s6809_s14  ;;  %v286_v36 = vld [vmem:[%s10326_s0 + $0x68] sm:$0xff]  ;;  %v1007_v37 = vld [vmem:[#allocation2 + $0xa0] sm:$0xff]  ;;  %v287_v38 = vld [vmem:[%s10326_s0 + $0x70] sm:$0xff] }
  0x43   : > { %v1008_v39 = vld [vmem:[#allocation2 + $0xa8] sm:$0xff]  ;;  %v288_v40 = vld [vmem:[%s10326_s0 + $0x78] sm:$0xff]  ;;  %v1009_v41 = vld [vmem:[#allocation2 + $0xb0] sm:$0xff] }
  0x44   : > { %1159 = vrot.lane.b32.xlu0 %v993_v13, %s6809_s14  ;;  %v289_v42 = vld [vmem:[%s10326_s0 + $0x80] sm:$0xff]  ;;  %v1010_v43 = vld [vmem:[#allocation2 + $0xb8] sm:$0xff]  ;;  %v290_v44 = vld [vmem:[%s10326_s0 + $0x88] sm:$0xff] }
  0x45   : > { %5350 = vmatmul.mubr.msk.f32.gmra.mxu0 %vm340_vm1, %v274_v4  ;;  %v1011_v45 = vld [vmem:[#allocation2 + $0xc0] sm:$0xff]  ;;  %v291_v46 = vld [vmem:[%s10326_s0 + $0x90] sm:$0xff]  ;;  %v1012_v47 = vld [vmem:[#allocation2 + $0xc8] sm:$0xff] }
  0x46   : > { %614 = vmatprep.mubr.f32.mxu0 %v10333_v0  ;;  %1161 = vrot.lane.b32.xlu1 %v994_v15, %s6809_s14  ;;  %v292_v48 = vld [vmem:[%s10326_s0 + $0x98] sm:$0xff]  ;;  %v1013_v49 = vld [vmem:[#allocation2 + $0xd0] sm:$0xff]  ;;  %v293_v50 = vld [vmem:[%s10326_s0 + $0xa0] sm:$0xff] }
  0x47   : > { %v1014_v51 = vld [vmem:[#allocation2 + $0xd8] sm:$0xff]  ;;  %v294_v52 = vld [vmem:[%s10326_s0 + $0xa8] sm:$0xff]  ;;  %v1015_v53 = vld [vmem:[#allocation2 + $0xe0] sm:$0xff] }
  0x48   : > { %1163 = vrot.lane.b32.xlu0 %v995_v16, %s6809_s14  ;;  %v295_v54 = vld [vmem:[%s10326_s0 + $0xb0] sm:$0xff]  ;;  %v1016_v55 = vld [vmem:[#allocation2 + $0xe8] sm:$0xff]  ;;  %v296_v56 = vld [vmem:[%s10326_s0 + $0xb8] sm:$0xff] }
  0x49   : > { %5351 = vmatmul.mubr.msk.f32.gmra.mxu0 %vm340_vm1, %v275_v8  ;;  %v1017_v57 = vld [vmem:[#allocation2 + $0xf0] sm:$0xff]  ;;  %v297_v58 = vld [vmem:[%s10326_s0 + $0xc0] sm:$0xff]  ;;  %v1018_v59 = vld [vmem:[#allocation2 + $0xf8] sm:$0xff] }
  0x4a   : > { %620 = vmatprep.mubr.f32.mxu0 %v10333_v0  ;;  %1165 = vrot.lane.b32.xlu1 %v996_v18, %s6809_s14  ;;  %v298_v60 = vld [vmem:[%s10326_s0 + $0xc8] sm:$0xff]  ;;  %v299_v61 = vld [vmem:[%s10326_s0 + $0xd0] sm:$0xff]  ;;  %v300_v62 = vld [vmem:[%s10326_s0 + $0xd8] sm:$0xff] }
  0x4b   : > { %v301_v63 = vld [vmem:[%s10326_s0 + $0xe0] sm:$0xff]  ;;  %v302_v1 = vld [vmem:[%s10326_s0 + $0xe8] sm:$0xff]  ;;  %v303_v2 = vld [vmem:[%s10326_s0 + $0xf0] sm:$0xff] }
  0x4c   : > { %1167 = vrot.lane.b32.xlu0 %v997_v19, %s6809_s14  ;;  %v304_v3 = vld [vmem:[%s10326_s0 + $0xf8] sm:$0xff]  ;;  %v305_v4 = vld [vmem:[%s10326_s0 + $0x100] sm:$0xff]  ;;  %v306_v5 = vld [vmem:[%s10326_s0 + $0x108] sm:$0xff] }
  0x4d   : > { %5352 = vmatmul.mubr.msk.f32.gmra.mxu0 %vm340_vm1, %v276_v11  ;;  %v307_v6 = vld [vmem:[%s10326_s0 + $0x110] sm:$0xff]  ;;  %v308_v7 = vld [vmem:[%s10326_s0 + $0x118] sm:$0xff]  ;;  %v309_v8 = vld [vmem:[%s10326_s0 + $0x120] sm:$0xff] }
  0x4e   : > { %626 = vmatprep.mubr.f32.mxu0 %v10333_v0  ;;  %1169 = vrot.lane.b32.xlu1 %v998_v21, %s6809_s14  ;;  %v310_v9 = vld [vmem:[%s10326_s0 + $0x128] sm:$0xff]  ;;  %v311_v10 = vld [vmem:[%s10326_s0 + $0x130] sm:$0xff]  ;;  %v312_v11 = vld [vmem:[%s10326_s0 + $0x138] sm:$0xff] }
  0x4f   : > { %v1050_v12 = vld [vmem:[%s7177_s26 + $0xf8] sm:$0xff]  ;;  %v313_v13 = vld [vmem:[%s10326_s0 + $0x140] sm:$0xff]  ;;  %v1048_v15 = vld [vmem:[%s7177_s26 + $0xe8] sm:$0xff] }
  0x50   : > { %1171 = vrot.lane.b32.xlu0 %v999_v22, %s6809_s14  ;;  %1564 = vmatprep.subr.mxu1 %v1050_v12  ;;  %v1047_v16 = vld [vmem:[%s7177_s26 + $0xe0] sm:$0xff]  ;;  %v314_v18 = vld [vmem:[%s10326_s0 + $0x148] sm:$0xff]  ;;  %v1045_v19 = vld [vmem:[%s7177_s26 + $0xd0] sm:$0xff] }
  0x51   : > { %5353 = vmatmul.mubr.msk.f32.gmra.mxu0 %vm340_vm1, %v277_v14  ;;  %v1049_v14 = vld [vmem:[%s7177_s26 + $0xf0] sm:$0xff]  ;;  %v1043_v21 = vld [vmem:[%s7177_s26 + $0xc0] sm:$0xff]  ;;  %v1042_v22 = vld [vmem:[%s7177_s26 + $0xb8] sm:$0xff] }
  0x52   : > { %632 = vmatprep.mubr.f32.mxu0 %v10333_v0  ;;  %1173 = vrot.lane.b32.xlu1 %v1000_v24, %s6809_s14  ;;  %v1041_v24 = vld [vmem:[%s7177_s26 + $0xb0] sm:$0xff] }
  0x53   : > { %1565 = vmatpush1.msra.mxu1 %v1049_v14 }
  0x54   : > { %1175 = vrot.lane.b32.xlu0 %v1001_v25, %s6809_s14  ;;  %1566 = vmatprep.subr.mxu1 %v1048_v15  ;;  %v1040_v25 = vld [vmem:[%s7177_s26 + $0xa8] sm:$0xff] }
  0x55   : > { %5354 = vmatmul.mubr.msk.f32.gmra.mxu0 %vm340_vm1, %v278_v17  ;;  %1567 = vmatpush1.msra.mxu1 %v1047_v16  ;;  %v1046_v17 = vld [vmem:[%s7177_s26 + $0xd8] sm:$0xff] }
  0x56   : > { %638 = vmatprep.mubr.f32.mxu0 %v10333_v0  ;;  %1177 = vrot.lane.b32.xlu1 %v1002_v27, %s6809_s14  ;;  %v1038_v27 = vld [vmem:[%s7177_s26 + $0x98] sm:$0xff] }
  0x57   : > { %1568 = vmatprep.subr.mxu1 %v1046_v17 }
  0x58   : > { %1569 = vmatpush1.msra.mxu1 %v1045_v19 }
  0x59   : > { %5355 = vmatmul.mubr.msk.f32.gmra.mxu0 %vm340_vm1, %v279_v20  ;;  %v1044_v20 = vld [vmem:[%s7177_s26 + $0xc8] sm:$0xff] }
  0x5a   : > { %644 = vmatprep.mubr.f32.mxu0 %v10333_v0  ;;  %1179 = vrot.lane.b32.xlu1 %v1003_v29, %s6809_s14  ;;  %v1037_v29 = vld [vmem:[%s7177_s26 + $0x90] sm:$0xff] }
  0x5b   : > { %1570 = vmatprep.subr.mxu1 %v1044_v20  ;;  %v326_v20 = vld [vmem:[%s10326_s0 + $0x1a8] sm:$0xff] }
  0x5c   : > { %1571 = vmatpush1.msra.mxu1 %v1043_v21 }
  0x5d   : > { %5356 = vmatmul.mubr.msk.f32.gmra.mxu0 %vm340_vm1, %v280_v23  ;;  %v315_v23 = vld [vmem:[%s10326_s0 + $0x150] sm:$0xff]  ;;  %1572 = vmatprep.subr.mxu1 %v1042_v22 }
  0x5e   : > { %650 = vmatprep.mubr.f32.mxu0 %v10333_v0  ;;  %1181 = vrot.lane.b32.xlu1 %v1004_v31, %s6809_s14  ;;  %v1035_v31 = vld [vmem:[%s7177_s26 + $0x80] sm:$0xff] }
  0x5f   : > { %1573 = vmatpush1.msra.mxu1 %v1041_v24 }
  0x60   : > { %1574 = vmatprep.subr.mxu1 %v1040_v25 }
  0x61   : > { %5357 = vmatmul.mubr.msk.f32.gmra.mxu0 %vm340_vm1, %v281_v26  ;;  %v1039_v26 = vld [vmem:[%s7177_s26 + $0xa0] sm:$0xff] }
  0x62   : > { %656 = vmatprep.mubr.f32.mxu0 %v10333_v0  ;;  %1183 = vrot.lane.b32.xlu1 %v1005_v33, %s6809_s14  ;;  %v317_v33 = vld [vmem:[%s10326_s0 + $0x160] sm:$0xff] }
  0x63   : > { %1575 = vmatpush1.msra.mxu1 %v1039_v26 }
  0x64   : > { %1576 = vmatprep.subr.mxu1 %v1038_v27  ;;  %v327_v27 = vld [vmem:[%s10326_s0 + $0x1b0] sm:$0xff] }
  0x65   : > { %5358 = vmatmul.mubr.msk.f32.gmra.mxu0 %vm340_vm1, %v282_v28  ;;  %v316_v28 = vld [vmem:[%s10326_s0 + $0x158] sm:$0xff]  ;;  %1577 = vmatpush1.msra.mxu1 %v1037_v29 }
  0x66   : > { %662 = vmatprep.mubr.f32.mxu0 %v10333_v0  ;;  %1185 = vrot.lane.b32.xlu1 %v1006_v35, %s6809_s14  ;;  %v1032_v35 = vld [vmem:[%s7177_s26 + $0x68] sm:$0xff] }
  0x69   : > { %5359 = vmatmul.mubr.msk.f32.gmra.mxu0 %vm340_vm1, %v283_v30  ;;  %v1036_v30 = vld [vmem:[%s7177_s26 + $0x88] sm:$0xff] }
  0x6a   : > { %668 = vmatprep.mubr.f32.mxu0 %v10333_v0  ;;  %1187 = vrot.lane.b32.xlu1 %v1007_v37, %s6809_s14  ;;  %v1030_v37 = vld [vmem:[%s7177_s26 + $0x58] sm:$0xff] }
  0x6b   : > { %1578 = vmatprep.subr.mxu1 %v1036_v30 }
  0x6c   : > { %1579 = vmatpush1.msra.mxu1 %v1035_v31 }
  0x6d   : > { %5360 = vmatmul.mubr.msk.f32.gmra.mxu0 %vm340_vm1, %v284_v32  ;;  %v1034_v32 = vld [vmem:[%s7177_s26 + $0x78] sm:$0xff] }
  0x6e   : > { %674 = vmatprep.mubr.f32.mxu0 %v10333_v0  ;;  %1189 = vrot.lane.b32.xlu1 %v1008_v39, %s6809_s14  ;;  %v1029_v39 = vld [vmem:[%s7177_s26 + $0x50] sm:$0xff] }
  0x6f   : > { %1580 = vmatprep.subr.mxu1 %v1034_v32 }
  0x71   : > { %5361 = vmatmul.mubr.msk.f32.gmra.mxu0 %vm340_vm1, %v285_v34  ;;  %v1033_v34 = vld [vmem:[%s7177_s26 + $0x70] sm:$0xff] }
  0x72   : > { %680 = vmatprep.mubr.f32.mxu0 %v10333_v0  ;;  %1191 = vrot.lane.b32.xlu1 %v1009_v41, %s6809_s14  ;;  %v1027_v41 = vld [vmem:[%s7177_s26 + $0x40] sm:$0xff] }
  0x73   : > { %1581 = vmatpush1.msra.mxu1 %v1033_v34  ;;  %v328_v34 = vld [vmem:[%s10326_s0 + $0x1b8] sm:$0xff] }
  0x74   : > { %1582 = vmatprep.subr.mxu1 %v1032_v35 }
  0x75   : > { %5362 = vmatmul.mubr.msk.f32.gmra.mxu0 %vm340_vm1, %v286_v36  ;;  %v1031_v36 = vld [vmem:[%s7177_s26 + $0x60] sm:$0xff] }
  0x76   : > { %686 = vmatprep.mubr.f32.mxu0 %v10333_v0  ;;  %1193 = vrot.lane.b32.xlu1 %v1010_v43, %s6809_s14  ;;  %v319_v43 = vld [vmem:[%s10326_s0 + $0x170] sm:$0xff] }
  0x77   : > { %1583 = vmatpush1.msra.mxu1 %v1031_v36 }
  0x78   : > { %1584 = vmatprep.subr.mxu1 %v1030_v37 }
  0x79   : > { %5363 = vmatmul.mubr.msk.f32.gmra.mxu0 %vm340_vm1, %v287_v38  ;;  %v318_v38 = vld [vmem:[%s10326_s0 + $0x168] sm:$0xff]  ;;  %1585 = vmatpush1.msra.mxu1 %v1029_v39 }
  0x7a   : > { %692 = vmatprep.mubr.f32.mxu0 %v10333_v0  ;;  %1195 = vrot.lane.b32.xlu1 %v1011_v45, %s6809_s14  ;;  %v1024_v45 = vld [vmem:[%s7177_s26 + $0x28] sm:$0xff] }
  0x7d   : > { %5364 = vmatmul.mubr.msk.f32.gmra.mxu0 %vm340_vm1, %v288_v40  ;;  %v1028_v40 = vld [vmem:[%s7177_s26 + $0x48] sm:$0xff] }
  0x7e   : > { %698 = vmatprep.mubr.f32.mxu0 %v10333_v0  ;;  %1197 = vrot.lane.b32.xlu1 %v1012_v47, %s6809_s14  ;;  %v1022_v47 = vld [vmem:[%s7177_s26 + $0x18] sm:$0xff] }
  0x7f   : > { %1586 = vmatprep.subr.mxu1 %v1028_v40 }
  0x80   : > { %1587 = vmatpush1.msra.mxu1 %v1027_v41  ;;  %v329_v41 = vld [vmem:[%s10326_s0 + $0x1c0] sm:$0xff] }
  0x81   : > { %5365 = vmatmul.mubr.msk.f32.gmra.mxu0 %vm340_vm1, %v289_v42  ;;  %v1026_v42 = vld [vmem:[%s7177_s26 + $0x38] sm:$0xff] }
  0x82   : > { %704 = vmatprep.mubr.f32.mxu0 %v10333_v0  ;;  %1199 = vrot.lane.b32.xlu1 %v1013_v49, %s6809_s14  ;;  %v1021_v49 = vld [vmem:[%s7177_s26 + $0x10] sm:$0xff] }
  0x83   : > { %1588 = vmatprep.subr.mxu1 %v1026_v42 }
  0x85   : > { %5366 = vmatmul.mubr.msk.f32.gmra.mxu0 %vm340_vm1, %v290_v44  ;;  %v1025_v44 = vld [vmem:[%s7177_s26 + $0x30] sm:$0xff] }
  0x86   : > { %710 = vmatprep.mubr.f32.mxu0 %v10333_v0  ;;  %1201 = vrot.lane.b32.xlu1 %v1014_v51, %s6809_s14  ;;  %v1019_v51 = vld [vmem:[%s7177_s26] sm:$0xff] }
  0x87   : > { %1589 = vmatpush1.msra.mxu1 %v1025_v44 }
  0x88   : > { %1590 = vmatprep.subr.mxu1 %v1024_v45 }
  0x89   : > { %5367 = vmatmul.mubr.msk.f32.gmra.mxu0 %vm340_vm1, %v291_v46  ;;  %v1023_v46 = vld [vmem:[%s7177_s26 + $0x20] sm:$0xff] }
  0x8a   : > { %716 = vmatprep.mubr.f32.mxu0 %v10333_v0  ;;  %1203 = vrot.lane.b32.xlu1 %v1015_v53, %s6809_s14 }
  0x8b   : > { %1591 = vmatpush1.msra.mxu1 %v1023_v46 }
  0x8c   : > { %1592 = vmatprep.subr.mxu1 %v1022_v47 }
  0x8d   : > { %5368 = vmatmul.mubr.msk.f32.gmra.mxu0 %vm340_vm1, %v292_v48  ;;  %v320_v48 = vld [vmem:[%s10326_s0 + $0x178] sm:$0xff]  ;;  %1593 = vmatpush1.msra.mxu1 %v1021_v49 }
  0x8e   : > { %722 = vmatprep.mubr.f32.mxu0 %v10333_v0  ;;  %1205 = vrot.lane.b32.xlu1 %v1016_v55, %s6809_s14  ;;  %v322_v55 = vld [vmem:[%s10326_s0 + $0x188] sm:$0xff] }
  0x91   : > { %5369 = vmatmul.mubr.msk.f32.gmra.mxu0 %vm340_vm1, %v293_v50  ;;  %v1020_v50 = vld [vmem:[%s7177_s26 + $0x8] sm:$0xff] }
  0x92   : > { %728 = vmatprep.mubr.f32.mxu0 %v10333_v0  ;;  %1207 = vrot.lane.b32.xlu1 %v1017_v57, %s6809_s14 }
  0x93   : > { %1594 = vmatprep.subr.mxu1 %v1020_v50 }
  0x94   : > { %1595 = vmatpush1.msra.mxu1 %v1019_v51 }
  0x95   : > { %5370 = vmatmul.mubr.msk.f32.gmra.mxu0 %vm340_vm1, %v294_v52  ;;  %v321_v52 = vld [vmem:[%s10326_s0 + $0x180] sm:$0xff] }
  0x96   : > { %734 = vmatprep.mubr.f32.mxu0 %v10333_v0  ;;  %1209 = vrot.lane.b32.xlu1 %v1018_v59, %s6809_s14 }
  0x99   : > { %5371 = vmatmul.mubr.msk.f32.gmra.mxu0 %vm340_vm1, %v295_v54 }
  0x9a   : > { %740 = vmatprep.mubr.f32.mxu0 %v10333_v0 }
  0x9d   : > { %5372 = vmatmul.mubr.msk.f32.gmra.mxu0 %vm340_vm1, %v296_v56 }
  0x9e   : > { %746 = vmatprep.mubr.f32.mxu0 %v10333_v0 }
  0xa1   : > { %5373 = vmatmul.mubr.msk.f32.gmra.mxu0 %vm340_vm1, %v297_v58 }
  0xa2   : > { %752 = vmatprep.mubr.f32.mxu0 %v10333_v0 }
  0xa5   : > { %5374 = vmatmul.mubr.msk.f32.gmra.mxu0 %vm340_vm1, %v298_v60 }
  0xa6   : > { %758 = vmatprep.mubr.f32.mxu0 %v10333_v0 }
  0xa9   : > { %5375 = vmatmul.mubr.msk.f32.gmra.mxu0 %vm340_vm1, %v299_v61 }
  0xaa   : > { %764 = vmatprep.mubr.f32.mxu0 %v10333_v0  ;;  %v7260_v53 = vpop.permute.xlu0 %1147 }
  0xab   : > { %10520 = vst [vmem:[#allocation11_spill] sm:$0xff] %v7260_v53 }
  0xad   : > { %5376 = vmatmul.mubr.msk.f32.gmra.mxu0 %vm340_vm1, %v300_v62  ;;  %v323_v62 = vld [vmem:[%s10326_s0 + $0x190] sm:$0xff] }
  0xae   : > { %770 = vmatprep.mubr.f32.mxu0 %v10333_v0  ;;  %v7272_v59 = vpop.permute.xlu0 %1149 }
  0xaf   : > { %10521 = vst [vmem:[#allocation12_spill] sm:$0xff] %v7272_v59 }
  0xb1   : > { %5377 = vmatmul.mubr.msk.f32.gmra.mxu0 %vm340_vm1, %v301_v63 }
  0xb2   : > { %776 = vmatprep.mubr.f32.mxu0 %v10333_v0  ;;  %v7311_v17 = vpop.permute.xlu0 %1155 }
  0xb3   : > { %10524 = vst [vmem:[#allocation15_spill] sm:$0xff] %v7311_v17 }
  0xb5   : > { %5378 = vmatmul.mubr.msk.f32.gmra.mxu0 %vm340_vm1, %v302_v1  ;;  %v7281_v1 = vpop.permute.xlu1 %1151 }
  0xb6   : > { %782 = vmatprep.mubr.f32.mxu0 %v10333_v0  ;;  %10522 = vst [vmem:[#allocation13_spill] sm:$0xff] %v7281_v1  ;;  %v7337_v31 = vpop.permute.xlu0 %1159 }
  0xb7   : > { %10526 = vst [vmem:[#allocation17_spill] sm:$0xff] %v7337_v31 }
  0xb9   : > { %5379 = vmatmul.mubr.msk.f32.gmra.mxu0 %vm340_vm1, %v303_v2 }
  0xba   : > { %788 = vmatprep.mubr.f32.mxu0 %v10333_v0  ;;  %v7363_v45 = vpop.permute.xlu0 %1163 }
  0xbb   : > { %10528 = vst [vmem:[#allocation19_spill] sm:$0xff] %v7363_v45 }
  0xbd   : > { %5380 = vmatmul.mubr.msk.f32.gmra.mxu0 %vm340_vm1, %v304_v3 }
  0xbe   : > { %794 = vmatprep.mubr.f32.mxu0 %v10333_v0 }
  0xc1   : > { %5381 = vmatmul.mubr.msk.f32.gmra.mxu0 %vm340_vm1, %v305_v4 }
  0xc2   : > { %800 = vmatprep.mubr.f32.mxu0 %v10333_v0 }
  0xc5   : > { %5382 = vmatmul.mubr.msk.f32.gmra.mxu0 %vm340_vm1, %v306_v5 }
  0xc6   : > { %806 = vmatprep.mubr.f32.mxu0 %v10333_v0 }
  0xc9   : > { %5383 = vmatmul.mubr.msk.f32.gmra.mxu0 %vm340_vm1, %v307_v6  ;;  %v324_v6 = vld [vmem:[%s10326_s0 + $0x198] sm:$0xff] }
  0xca   : > { %812 = vmatprep.mubr.f32.mxu0 %v10333_v0 }
  0xcd   : > { %5384 = vmatmul.mubr.msk.f32.gmra.mxu0 %vm340_vm1, %v308_v7 }
  0xce   : > { %818 = vmatprep.mubr.f32.mxu0 %v10333_v0 }
  0xd1   : > { %5385 = vmatmul.mubr.msk.f32.gmra.mxu0 %vm340_vm1, %v309_v8 }
  0xd2   : > { %824 = vmatprep.mubr.f32.mxu0 %v10333_v0 }
  0xd5   : > { %5386 = vmatmul.mubr.msk.f32.gmra.mxu0 %vm340_vm1, %v310_v9 }
  0xd6   : > { %830 = vmatprep.mubr.f32.mxu0 %v10333_v0 }
  0xd9   : > { %5387 = vmatmul.mubr.msk.f32.gmra.mxu0 %vm340_vm1, %v311_v10  ;;  %v7298_v10 = vpop.permute.xlu1 %1153 }
  0xda   : > { %836 = vmatprep.mubr.f32.mxu0 %v10333_v0  ;;  %10523 = vst [vmem:[#allocation14_spill] sm:$0xff] %v7298_v10 }
  0xdd   : > { %5388 = vmatmul.mubr.msk.f32.gmra.mxu0 %vm340_vm1, %v312_v11  ;;  %v7324_v24 = vpop.permute.xlu1 %1157 }
  0xde   : > { %842 = vmatprep.mubr.f32.mxu0 %v10333_v0  ;;  %10525 = vst [vmem:[#allocation16_spill] sm:$0xff] %v7324_v24 }
  0xe1   : > { %5389 = vmatmul.mubr.msk.f32.gmra.mxu0 %vm340_vm1, %v313_v13  ;;  %v325_v13 = vld [vmem:[%s10326_s0 + $0x1a0] sm:$0xff] }
  0xe2   : > { %848 = vmatprep.mubr.f32.mxu0 %v10333_v0 }
  0xe5   : > { %5390 = vmatmul.mubr.msk.f32.gmra.mxu0 %vm340_vm1, %v314_v18 }
  0xe6   : > { %854 = vmatprep.mubr.f32.mxu0 %v10333_v0 }
  0xe9   : > { %5391 = vmatmul.mubr.msk.f32.gmra.mxu0 %vm340_vm1, %v315_v23 }
  0xea   : > { %860 = vmatprep.mubr.f32.mxu0 %v10333_v0 }
  0xed   : > { %5392 = vmatmul.mubr.msk.f32.gmra.mxu0 %vm340_vm1, %v316_v28 }
  0xee   : > { %866 = vmatprep.mubr.f32.mxu0 %v10333_v0 }
  0xf1   : > { %5393 = vmatmul.mubr.msk.f32.gmra.mxu0 %vm340_vm1, %v317_v33 }
  0xf2   : > { %872 = vmatprep.mubr.f32.mxu0 %v10333_v0 }
  0xf5   : > { %5394 = vmatmul.mubr.msk.f32.gmra.mxu0 %vm340_vm1, %v318_v38  ;;  %v7350_v38 = vpop.permute.xlu1 %1161 }
  0xf6   : > { %878 = vmatprep.mubr.f32.mxu0 %v10333_v0  ;;  %10527 = vst [vmem:[#allocation18_spill] sm:$0xff] %v7350_v38 }
  0xf9   : > { %5395 = vmatmul.mubr.msk.f32.gmra.mxu0 %vm340_vm1, %v319_v43  ;;  %v7372_v50 = vpop.permute.xlu1 %1165 }
  0xfa   : > { %884 = vmatprep.mubr.f32.mxu0 %v10333_v0  ;;  %10529 = vst [vmem:[#allocation20_spill] sm:$0xff] %v7372_v50 }
  0xfd   : > { %5396 = vmatmul.mubr.msk.f32.gmra.mxu0 %vm340_vm1, %v320_v48  ;;  %v330_v48 = vld [vmem:[%s10326_s0 + $0x1c8] sm:$0xff] }
  0xfe   : > { %890 = vmatprep.mubr.f32.mxu0 %v10333_v0 }
 0x101   : > { %v7262_v54 = vpop.f32.mrf.mxu0  ;;  %5397 = vmatmul.mubr.msk.f32.gmra.mxu0 %vm340_vm1, %v321_v52 }
 0x102   : > { %896 = vmatprep.mubr.f32.mxu0 %v10333_v0  ;;  %v1243_v57 = vmul.f32 %v7260_v53, %v7262_v54 }
 0x103   : > { %v606_v56 = vpop.f32.mrf.mxu0 }
 0x104   : > { %v1244_v58 = vmul.f32 %v7260_v53, %v606_v56 }
 0x105   : > { %v7274_v60 = vpop.f32.mrf.mxu0  ;;  %5398 = vmatmul.mubr.msk.f32.gmra.mxu0 %vm340_vm1, %v322_v55 }
 0x106   : > { %v5879_v61 = vpack.i.bf16 %v1244_v58, %v1243_v57  ;;  %902 = vmatprep.mubr.f32.mxu0 %v10333_v0  ;;  %v1245_v2 = vmul.f32 %v7272_v59, %v7274_v60  ;;  %v331_v57 = vld [vmem:[%s10326_s0 + $0x1d0] sm:$0xff] }
 0x107   : > { %v612_v63 = vpop.f32.mrf.mxu0 }
 0x108   : > { %v1246_v3 = vmul.f32 %v7272_v59, %v612_v63  ;;  %5880 = vrot.lane.b32.xlu0 %v5879_v61, %s6810_s13  ;;  %v7385_v61 = vpop.permute.xlu1 %1169 }
 0x109   : > { %v7287_v4 = vpop.f32.mrf.mxu0  ;;  %5399 = vmatmul.mubr.msk.f32.gmra.mxu0 %vm340_vm1, %v323_v62  ;;  %10530 = vst [vmem:[#allocation21_spill] sm:$0xff] %v7385_v61 }
 0x10a   : > { %v5884_v5 = vpack.i.bf16 %v1246_v3, %v1245_v2  ;;  %908 = vmatprep.mubr.f32.mxu0 %v10333_v0  ;;  %v1247_v8 = vmul.f32 %v7281_v1, %v7287_v4  ;;  %v7391_v2 = vpop.permute.xlu0 %1167 }
 0x10b   : > { %v618_v7 = vpop.f32.mrf.mxu0  ;;  %10531 = vst [vmem:[#allocation22_spill] sm:$0xff] %v7391_v2 }
 0x10c   : > { %v1248_v9 = vmul.f32 %v7281_v1, %v618_v7  ;;  %5885 = vrot.lane.b32.xlu0 %v5884_v5, %s6810_s13 }
 0x10d   : > { %v7300_v11 = vpop.f32.mrf.mxu0  ;;  %5400 = vmatmul.mubr.msk.f32.gmra.mxu0 %vm340_vm1, %v324_v6  ;;  %v332_v6 = vld [vmem:[%s10326_s0 + $0x1d8] sm:$0xff] }
 0x10e   : > { %v5889_v12 = vpack.i.bf16 %v1248_v9, %v1247_v8  ;;  %914 = vmatprep.mubr.f32.mxu0 %v10333_v0  ;;  %v1249_v15 = vmul.f32 %v7298_v10, %v7300_v11  ;;  %v7402_v8 = vpop.permute.xlu1 %1173 }
 0x10f   : > { %v624_v14 = vpop.f32.mrf.mxu0  ;;  %10532 = vst [vmem:[#allocation23_spill] sm:$0xff] %v7402_v8 }
 0x110   : > { %v1250_v16 = vmul.f32 %v7298_v10, %v624_v14  ;;  %5890 = vrot.lane.b32.xlu0 %v5889_v12, %s6810_s13 }
 0x111   : > { %v7313_v18 = vpop.f32.mrf.mxu0  ;;  %5401 = vmatmul.mubr.msk.f32.gmra.mxu0 %vm340_vm1, %v325_v13 }
 0x112   : > { %v5894_v19 = vpack.i.bf16 %v1250_v16, %v1249_v15  ;;  %920 = vmatprep.mubr.f32.mxu0 %v10333_v0  ;;  %v1251_v22 = vmul.f32 %v7311_v17, %v7313_v18  ;;  %v333_v15 = vld [vmem:[%s10326_s0 + $0x1e0] sm:$0xff] }
 0x113   : > { %v630_v21 = vpop.f32.mrf.mxu0 }
 0x114   : > { %v1252_v23 = vmul.f32 %v7311_v17, %v630_v21  ;;  %5895 = vrot.lane.b32.xlu0 %v5894_v19, %s6810_s13  ;;  %v7415_v19 = vpop.permute.xlu1 %1177 }
 0x115   : > { %v7326_v25 = vpop.f32.mrf.mxu0  ;;  %5402 = vmatmul.mubr.msk.f32.gmra.mxu0 %vm340_vm1, %v326_v20  ;;  %10533 = vst [vmem:[#allocation24_spill] sm:$0xff] %v7415_v19 }
 0x116   : > { %v5899_v26 = vpack.i.bf16 %v1252_v23, %v1251_v22  ;;  %926 = vmatprep.mubr.f32.mxu0 %v10333_v0  ;;  %v1253_v29 = vmul.f32 %v7324_v24, %v7326_v25  ;;  %v334_v22 = vld [vmem:[%s10326_s0 + $0x1e8] sm:$0xff] }
 0x117   : > { %v636_v28 = vpop.f32.mrf.mxu0 }
 0x118   : > { %v1254_v30 = vmul.f32 %v7324_v24, %v636_v28  ;;  %5900 = vrot.lane.b32.xlu0 %v5899_v26, %s6810_s13  ;;  %v10548_v24 = vmov 0.0  }
 0x119   : > { %v7339_v32 = vpop.f32.mrf.mxu0  ;;  %5403 = vmatmul.mubr.msk.f32.gmra.mxu0 %vm340_vm1, %v327_v27  ;;  %v7430_v27 = vpop.permute.xlu0 %1171 }
 0x11a   : > { %v5904_v33 = vpack.i.bf16 %v1254_v30, %v1253_v29  ;;  %932 = vmatprep.mubr.f32.mxu0 %v10333_v0  ;;  %v1255_v36 = vmul.f32 %v7337_v31, %v7339_v32  ;;  %10534 = vst [vmem:[#allocation25_spill] sm:$0xff] %v7430_v27  ;;  %v7437_v29 = vpop.permute.xlu1 %1179 }
 0x11b   : > { %v642_v35 = vpop.f32.mrf.mxu0  ;;  %10535 = vst [vmem:[#allocation26_spill] sm:$0xff] %v7437_v29 }
 0x11c   : > { %v1256_v37 = vmul.f32 %v7337_v31, %v642_v35  ;;  %5905 = vrot.lane.b32.xlu0 %v5904_v33, %s6810_s13 }
 0x11d   : > { %v7352_v39 = vpop.f32.mrf.mxu0  ;;  %5404 = vmatmul.mubr.msk.f32.gmra.mxu0 %vm340_vm1, %v328_v34  ;;  %v335_v34 = vld [vmem:[%s10326_s0 + $0x1f0] sm:$0xff] }
 0x11e   : > { %v5909_v40 = vpack.i.bf16 %v1256_v37, %v1255_v36  ;;  %938 = vmatprep.mubr.f32.mxu0 %v10333_v0  ;;  %v1257_v43 = vmul.f32 %v7350_v38, %v7352_v39 }
 0x11f   : > { %v648_v42 = vpop.f32.mrf.mxu0 }
 0x120   : > { %v1258_v44 = vmul.f32 %v7350_v38, %v648_v42  ;;  %5910 = vrot.lane.b32.xlu0 %v5909_v40, %s6810_s13 }
 0x121   : > { %v7365_v46 = vpop.f32.mrf.mxu0  ;;  %5405 = vmatmul.mubr.msk.f32.gmra.mxu0 %vm340_vm1, %v329_v41  ;;  %v336_v41 = vld [vmem:[%s10326_s0 + $0x1f8] sm:$0xff] }
 0x122   : > { %v5914_v47 = vpack.i.bf16 %v1258_v44, %v1257_v43  ;;  %944 = vmatprep.mubr.f32.mxu0 %v10333_v0  ;;  %v1259_v51 = vmul.f32 %v7363_v45, %v7365_v46  ;;  %v7456_v43 = vpop.permute.xlu1 %1181 }
 0x123   : > { %v654_v49 = vpop.f32.mrf.mxu0  ;;  %10536 = vst [vmem:[#allocation27_spill] sm:$0xff] %v7456_v43 }
 0x124   : > { %v1260_v52 = vmul.f32 %v7363_v45, %v654_v49  ;;  %5915 = vrot.lane.b32.xlu0 %v5914_v47, %s6810_s13 }
 0x125   : > { %v7378_v55 = vpop.f32.mrf.mxu0  ;;  %5406 = vmatmul.mubr.msk.f32.gmra.mxu0 %vm340_vm1, %v330_v48 }
 0x126   : > { %v5919_v56 = vpack.i.bf16 %v1260_v52, %v1259_v51  ;;  %950 = vmatprep.mubr.f32.mxu0 %v10333_v0  ;;  %v1261_v62 = vmul.f32 %v7372_v50, %v7378_v55  ;;  %v7465_v51 = vpop.permute.xlu0 %1175 }
 0x127   : > { %v660_v58 = vpop.f32.mrf.mxu0  ;;  %10537 = vst [vmem:[#allocation28_spill] sm:$0xff] %v7465_v51 }
 0x128   : > { %v1262_v63 = vmul.f32 %v7372_v50, %v660_v58  ;;  %5920 = vrot.lane.b32.xlu0 %v5919_v56, %s6810_s13  ;;  %v7471_v56 = vpop.permute.xlu1 %1183 }
 0x129   : > { %v7393_v3 = vpop.f32.mrf.mxu0  ;;  %5407 = vmatmul.mubr.msk.f32.gmra.mxu0 %vm340_vm1, %v331_v57  ;;  %10539 = vst [vmem:[#allocation30_spill] sm:$0xff] %v7471_v56 }
 0x12a   : > { %v5924_v5 = vpack.i.bf16 %v1262_v63, %v1261_v62  ;;  %1873 = vrot.lane.b32.xlu1 %v7393_v3, %s6811_s17  ;;  %956 = vmatprep.mubr.f32.mxu0 %v10333_v0  ;;  %v1263_v9 = vmul.f32 %v7391_v2, %v7393_v3 }
 0x12b   : > { %v666_v7 = vpop.f32.mrf.mxu0 }
 0x12c   : > { %v1264_v12 = vmul.f32 %v7391_v2, %v666_v7  ;;  %5925 = vrot.lane.b32.xlu0 %v5924_v5, %s6810_s13 }
 0x12d   : > { %v7408_v13 = vpop.f32.mrf.mxu0  ;;  %5408 = vmatmul.mubr.msk.f32.gmra.mxu0 %vm340_vm1, %v332_v6 }
 0x12e   : > { %v5929_v14 = vpack.i.bf16 %v1264_v12, %v1263_v9  ;;  %962 = vmatprep.mubr.f32.mxu0 %v10333_v0  ;;  %v1265_v26 = vmul.f32 %v7385_v61, %v7408_v13  ;;  %v7479_v9 = vpop.permute.xlu1 %1185 }
 0x12f   : > { %v672_v16 = vpop.f32.mrf.mxu0  ;;  %10541 = vst [vmem:[#allocation32_spill] sm:$0xff] %v7479_v9 }
 0x130   : > { %5930 = vrot.lane.b32.xlu0 %v5929_v14, %s6810_s13  ;;  %v1266_v21 = vmul.f32 %v7385_v61, %v672_v16 }
 0x131   : > { %v7418_v20 = vpop.f32.mrf.mxu0  ;;  %5409 = vmatmul.mubr.msk.f32.gmra.mxu0 %vm340_vm1, %v333_v15 }
 0x132   : > { %1877 = vrot.lane.b32.xlu1 %v7418_v20, %s6811_s17  ;;  %968 = vmatprep.mubr.f32.mxu0 %v10333_v0  ;;  %v5934_v30 = vpack.i.bf16 %v1266_v21, %v1265_v26  ;;  %v1267_v36 = vmul.f32 %v7430_v27, %v7418_v20 }
 0x133   : > { %v678_v23 = vpop.f32.mrf.mxu0 }
 0x134   : > { %1875 = vrot.lane.b32.xlu0 %v7408_v13, %s6811_s17  ;;  %v1268_v33 = vmul.f32 %v7430_v27, %v678_v23 }
 0x135   : > { %v7434_v28 = vpop.f32.mrf.mxu0  ;;  %5410 = vmatmul.mubr.msk.f32.gmra.mxu0 %vm340_vm1, %v334_v22 }
 0x136   : > { %974 = vmatprep.mubr.f32.mxu0 %v10333_v0  ;;  %v5939_v40 = vpack.i.bf16 %v1268_v33, %v1267_v36  ;;  %v1269_v49 = vmul.f32 %v7402_v8, %v7434_v28 }
 0x137   : > { %v684_v35 = vpop.f32.mrf.mxu0 }
 0x138   : > { %5935 = vrot.lane.b32.xlu0 %v5934_v30, %s6810_s13  ;;  %v1270_v47 = vmul.f32 %v7402_v8, %v684_v35  ;;  %v7495_v30 = vpop.permute.xlu1 %1187 }
 0x139   : > { %v7447_v37 = vpop.f32.mrf.mxu0  ;;  %5411 = vmatmul.mubr.msk.f32.gmra.mxu0 %vm340_vm1, %v335_v34  ;;  %10543 = vst [vmem:[#allocation34_spill] sm:$0xff] %v7495_v30 }
 0x13a   : > { %1881 = vrot.lane.b32.xlu1 %v7447_v37, %s6811_s17  ;;  %980 = vmatprep.mubr.f32.mxu0 %v10333_v0  ;;  %v5944_v57 = vpack.i.bf16 %v1270_v47, %v1269_v49  ;;  %v1271_v63 = vmul.f32 %v7465_v51, %v7447_v37 }
 0x13b   : > { %v690_v42 = vpop.f32.mrf.mxu0 }
 0x13c   : > { %5940 = vrot.lane.b32.xlu0 %v5939_v40, %s6810_s13  ;;  %v1272_v58 = vmul.f32 %v7465_v51, %v690_v42 }
 0x13d   : > { %v7459_v44 = vpop.f32.mrf.mxu0  ;;  %5412 = vmatmul.mubr.msk.f32.gmra.mxu0 %vm340_vm1, %v336_v41 }
 0x13e   : > { %v5949_v6 = vpack.i.bf16 %v1272_v58, %v1271_v63  ;;  %v1273_v23 = vmul.f32 %v7415_v19, %v7459_v44  ;;  %v7507_v58 = vpop.permute.xlu1 %1189 }
 0x13f   : > { %v696_v48 = vpop.f32.mrf.mxu0  ;;  %10544 = vst [vmem:[#allocation35_spill] sm:$0xff] %v7507_v58 }
 0x140   : > { %1879 = vrot.lane.b32.xlu0 %v7434_v28, %s6811_s17  ;;  %v1274_v16 = vmul.f32 %v7415_v19, %v696_v48 }
 0x141   : > { %v7469_v52 = vpop.f32.mrf.mxu0 }
 0x142   : > { %10538 = vst [vmem:[#allocation29_spill] sm:$0xff] %v7469_v52  ;;  %v5954_v33 = vpack.i.bf16 %v1274_v16, %v1273_v23  ;;  %v1275_v36 = vmul.f32 %v7437_v29, %v7469_v52 }
 0x143   : > { %v702_v62 = vpop.f32.mrf.mxu0 }
 0x144   : > { %5945 = vrot.lane.b32.xlu0 %v5944_v57, %s6810_s13  ;;  %v1276_v34 = vmul.f32 %v7437_v29, %v702_v62 }
 0x145   : > { %v7477_v5 = vpop.f32.mrf.mxu0 }
 0x146   : > { %10540 = vst [vmem:[#allocation31_spill] sm:$0xff] %v7477_v5  ;;  %v1277_v12 = vmul.f32 %v7456_v43, %v7477_v5  ;;  %v5959_v47 = vpack.i.bf16 %v1276_v34, %v1275_v36 }
 0x147   : > { %v708_v7 = vpop.f32.mrf.mxu0 }
 0x148   : > { %v1278_v14 = vmul.f32 %v7456_v43, %v708_v7  ;;  %5950 = vrot.lane.b32.xlu0 %v5949_v6, %s6810_s13 }
 0x149   : > { %v7485_v15 = vpop.f32.mrf.mxu0 }
 0x14a   : > { %10542 = vst [vmem:[#allocation33_spill] sm:$0xff] %v7485_v15  ;;  %v5964_v21 = vpack.i.bf16 %v1278_v14, %v1277_v12  ;;  %v1279_v62 = vmul.f32 %v7471_v56, %v7485_v15 }
 0x14b   : > { %v714_v22 = vpop.f32.mrf.mxu0 }
 0x14c   : > { %1883 = vrot.lane.b32.xlu0 %v7459_v44, %s6811_s17  ;;  %5965 = vrot.lane.b32.xlu1 %v5964_v21, %s6810_s13  ;;  %v1280_v48 = vmul.f32 %v7471_v56, %v714_v22  ;;  %v7522_v22 = vpop.permute.xlu1 %1191 }
 0x14d   : > { %v7493_v26 = vpop.f32.mrf.mxu0  ;;  %10545 = vst [vmem:[#allocation36_spill] sm:$0xff] %v7522_v22 }
 0x14e   : > { %v1281_v40 = vmul.f32 %v7479_v9, %v7493_v26  ;;  %v5969_v6 = vpack.i.bf16 %v1280_v48, %v1279_v62 }
 0x14f   : > { %v720_v35 = vpop.f32.mrf.mxu0 }
 0x150   : > { %v1282_v41 = vmul.f32 %v7479_v9, %v720_v35  ;;  %5955 = vrot.lane.b32.xlu0 %v5954_v33, %s6810_s13 }
 0x151   : > { %v7504_v42 = vpop.f32.mrf.mxu0 }
 0x152   : > { %v5974_v49 = vpack.i.bf16 %v1282_v41, %v1281_v40  ;;  %v1283_v14 = vmul.f32 %v7495_v30, %v7504_v42 }
 0x153   : > { %v726_v57 = vpop.f32.mrf.mxu0 }
 0x154   : > { %5960 = vrot.lane.b32.xlu0 %v5959_v47, %s6810_s13  ;;  %5975 = vrot.lane.b32.xlu1 %v5974_v49, %s6810_s13  ;;  %v1284_v7 = vmul.f32 %v7495_v30, %v726_v57 }
 0x155   : > { %v7513_v63 = vpop.f32.mrf.mxu0 }
 0x156   : > { %v1285_v16 = vmul.f32 %v7507_v58, %v7513_v63  ;;  %v5979_v33 = vpack.i.bf16 %v1284_v7, %v1283_v14 }
 0x157   : > { %v732_v12 = vpop.f32.mrf.mxu0 }
 0x158   : > { %v1286_v21 = vmul.f32 %v7507_v58, %v732_v12  ;;  %5970 = vrot.lane.b32.xlu0 %v5969_v6, %s6810_s13 }
 0x159   : > { %v7524_v23 = vpop.f32.mrf.mxu0 }
 0x15a   : > { %v5984_v34 = vpack.i.bf16 %v1286_v21, %v1285_v16  ;;  %v1287_v36 = vmul.f32 %v7522_v22, %v7524_v23 }
 0x15b   : > { %v738_v35 = vpop.f32.mrf.mxu0 }
 0x15c   : > { %v1288_v40 = vmul.f32 %v7522_v22, %v738_v35  ;;  %5980 = vrot.lane.b32.xlu0 %v5979_v33, %s6810_s13  ;;  %5985 = vrot.lane.b32.xlu1 %v5984_v34, %s6810_s13 }
 0x15d   : > { %v7531_v41 = vpop.f32.mrf.mxu0 }
 0x15e   : > { %v5989_v47 = vpack.i.bf16 %v1288_v40, %v1287_v36  ;;  %v7562_v36 = vpop.permute.xlu1 %1193 }
 0x15f   : > { %v744_v48 = vpop.f32.mrf.mxu0  ;;  %10546 = vst [vmem:[#allocation37_spill] sm:$0xff] %v7562_v36 }
 0x160   : > { %5990 = vrot.lane.b32.xlu0 %v5989_v47, %s6810_s13  ;;  %v1290_v10 = vmul.f32 %v7562_v36, %v744_v48 }
 0x161   : > { %v7534_v49 = vpop.f32.mrf.mxu0 }
 0x162   : > { %v7575_v61 = vpop.permute.xlu1 %1195 }
 0x163   : > { %v750_v57 = vpop.f32.mrf.mxu0  ;;  %10547 = vst [vmem:[#allocation38_spill] sm:$0xff] %v7575_v61 }
 0x165   : > { %v7536_v62 = vpop.f32.mrf.mxu0 }
 0x167   : > { %v7538_v6 = vpop.f32.mrf.mxu0 }
 0x169   : > { %v7540_v7 = vpop.f32.mrf.mxu0 }
 0x16a   : > { %1905 = vrot.lane.b32.xlu0 %v7540_v7, %s6811_s17 }
 0x16b   : > { %v762_v12 = vpop.f32.mrf.mxu0 }
 0x16d   : > { %v7544_v14 = vpop.f32.mrf.mxu0 }
 0x16e   : > { %1907 = vrot.lane.b32.xlu1 %v7544_v14, %s6811_s17 }
 0x16f   : > { %v7548_v16 = vpop.f32.mrf.mxu0 }
 0x171   : > { %v7550_v21 = vpop.f32.mrf.mxu0 }
 0x172   : > { %1909 = vrot.lane.b32.xlu0 %v7550_v21, %s6811_s17 }
 0x173   : > { %v7554_v33 = vpop.f32.mrf.mxu0 }
 0x175   : > { %v7556_v34 = vpop.f32.mrf.mxu0 }
 0x176   : > { %1911 = vrot.lane.b32.xlu1 %v7556_v34, %s6811_s17 }
 0x177   : > { %v7560_v35 = vpop.f32.mrf.mxu0 }
 0x179   : > { %v7564_v40 = vpop.f32.mrf.mxu0 }
 0x17a   : > { %v5881_v47 = vpop.permute.xlu0 %5880  ;;  %1913 = vrot.lane.b32.xlu0 %v7564_v40, %s6811_s17 }
 0x17b   : > { %v5883_v0 = vunpack.i.h.bf16 %v5881_v47  ;;  %v5882_v58 = vunpack.i.l.bf16 %v5881_v47  ;;  %v7568_v9 = vpop.f32.mrf.mxu0  ;;  %v1292_v47 = vmul.f32 %v7575_v61, %v750_v57 }
 0x17d   : > { %v7570_v43 = vpop.f32.mrf.mxu0  ;;  %v1500_v19 = vsel %vm1499_vm2, %v5882_v58, %v5883_v0 }
 0x17e   : > { %1629 = vmatmul.mubr.f32.vlgmr.msra.gmra.mxu1 %v1500_v19  ;;  %v5886_v8 = vpop.permute.xlu0 %5885  ;;  %1871 = vrot.lane.b32.xlu0 %v7378_v55, %s6811_s17  ;;  %v1291_v19 = vmul.f32 %v7575_v61, %v7534_v49 }
 0x17f   : > { %v5888_v50 = vunpack.i.h.bf16 %v5886_v8  ;;  %v5887_v38 = vunpack.i.l.bf16 %v5886_v8  ;;  %1915 = vrot.lane.b32.xlu1 %v7570_v43, %s6811_s17  ;;  %1634 = vmatprep.mubr.f32.mxu1 %v10548_v24  ;;  %v1289_v8 = vmul.f32 %v7562_v36, %v7531_v41 }
 0x180   : > { %v5999_v48 = vpack.i.bf16 %v1292_v47, %v1291_v19 }
 0x181   : > { %v1501_v0 = vsel %vm1499_vm2, %v5887_v38, %v5888_v50  ;;  %v5994_v38 = vpack.i.bf16 %v1290_v10, %v1289_v8  ;;  %v7592_v50 = vpop.permute.xlu1 %1197 }
 0x182   : > { %1635 = vmatmul.mubr.f32.gmra.mxu1 %v1501_v0  ;;  %v5891_v58 = vpop.permute.xlu0 %5890  ;;  %1901 = vrot.lane.b32.xlu0 %v7534_v49, %s6811_s17  ;;  %10549 = vst [vmem:[#allocation39_spill] sm:$0xff] %v7592_v50  ;;  %v1294_v19 = vmul.f32 %v7592_v50, %v7538_v6 }
 0x183   : > { %v5893_v59 = vunpack.i.h.bf16 %v5891_v58  ;;  %v5892_v22 = vunpack.i.l.bf16 %v5891_v58  ;;  %1903 = vrot.lane.b32.xlu1 %v7536_v62, %s6811_s17  ;;  %1640 = vmatprep.mubr.f32.mxu1 %v10548_v24 }
 0x185   : > { %v1502_v57 = vsel %vm1499_vm2, %v5892_v22, %v5893_v59  ;;  %v7601_v10 = vpop.permute.xlu1 %1199 }
 0x186   : > { %1641 = vmatmul.mubr.f32.gmra.mxu1 %v1502_v57  ;;  %v5896_v0 = vpop.permute.xlu0 %5895  ;;  %6000 = vrot.lane.b32.xlu0 %v5999_v48, %s6810_s13  ;;  %10550 = vst [vmem:[#allocation40_spill] sm:$0xff] %v7601_v10  ;;  %v1296_v47 = vmul.f32 %v7601_v10, %v762_v12 }
 0x187   : > { %v5898_v61 = vunpack.i.h.bf16 %v5896_v0  ;;  %v5897_v30 = vunpack.i.l.bf16 %v5896_v0  ;;  %5995 = vrot.lane.b32.xlu1 %v5994_v38, %s6810_s13  ;;  %1646 = vmatprep.mubr.f32.mxu1 %v10548_v24 }
 0x189   : > { %v1503_v58 = vsel %vm1499_vm2, %v5897_v30, %v5898_v61  ;;  %v1295_v30 = vmul.f32 %v7601_v10, %v7540_v7  ;;  %v7619_v57 = vpop.permute.xlu1 %1201 }
 0x18a   : > { %1647 = vmatmul.mubr.f32.gmra.mxu1 %v1503_v58  ;;  %v5901_v36 = vpop.permute.xlu0 %5900  ;;  %1867 = vrot.lane.b32.xlu0 %v7352_v39, %s6811_s17  ;;  %10551 = vst [vmem:[#allocation41_spill] sm:$0xff] %v7619_v57 }
 0x18b   : > { %v5903_v59 = vunpack.i.h.bf16 %v5901_v36  ;;  %v5902_v22 = vunpack.i.l.bf16 %v5901_v36  ;;  %1869 = vrot.lane.b32.xlu1 %v7365_v46, %s6811_s17  ;;  %1652 = vmatprep.mubr.f32.mxu1 %v10548_v24  ;;  %v1293_v36 = vmul.f32 %v7592_v50, %v7536_v62  ;;  %v6009_v6 = vpack.i.bf16 %v1296_v47, %v1295_v30 }
 0x18d   : > { %v1504_v61 = vsel %vm1499_vm2, %v5902_v22, %v5903_v59  ;;  %v6004_v12 = vpack.i.bf16 %v1294_v19, %v1293_v36  ;;  %v7628_v47 = vpop.permute.xlu1 %1203 }
 0x18e   : > { %1653 = vmatmul.mubr.f32.gmra.mxu1 %v1504_v61  ;;  %v5906_v8 = vpop.permute.xlu0 %5905  ;;  %1897 = vrot.lane.b32.xlu0 %v7524_v23, %s6811_s17  ;;  %10552 = vst [vmem:[#allocation42_spill] sm:$0xff] %v7628_v47  ;;  %v1300_v36 = vmul.f32 %v7628_v47, %v7554_v33 }
 0x18f   : > { %v5908_v48 = vunpack.i.h.bf16 %v5906_v8  ;;  %v5907_v38 = vunpack.i.l.bf16 %v5906_v8  ;;  %1899 = vrot.lane.b32.xlu1 %v7531_v41, %s6811_s17  ;;  %1658 = vmatprep.mubr.f32.mxu1 %v10548_v24 }
 0x191   : > { %v1505_v0 = vsel %vm1499_vm2, %v5907_v38, %v5908_v48  ;;  %v1298_v48 = vmul.f32 %v7619_v57, %v7548_v16 }
 0x192   : > { %1659 = vmatmul.mubr.f32.gmra.mxu1 %v1505_v0  ;;  %v5911_v58 = vpop.permute.xlu0 %5910  ;;  %6010 = vrot.lane.b32.xlu0 %v6009_v6, %s6810_s13  ;;  %v1299_v6 = vmul.f32 %v7628_v47, %v7550_v21  ;;  %v1297_v0 = vmul.f32 %v7619_v57, %v7544_v14 }
 0x193   : > { %v5913_v59 = vunpack.i.h.bf16 %v5911_v58  ;;  %v5912_v22 = vunpack.i.l.bf16 %v5911_v58  ;;  %6005 = vrot.lane.b32.xlu1 %v6004_v12, %s6810_s13  ;;  %1664 = vmatprep.mubr.f32.mxu1 %v10548_v24 }
 0x194   : > { %v6019_v16 = vpack.i.bf16 %v1300_v36, %v1299_v6  ;;  %v6014_v33 = vpack.i.bf16 %v1298_v48, %v1297_v0  ;;  %v7657_v6 = vpop.permute.xlu1 %1205 }
 0x195   : > { %v1506_v61 = vsel %vm1499_vm2, %v5912_v22, %v5913_v59  ;;  %10553 = vst [vmem:[#allocation43_spill] sm:$0xff] %v7657_v6 }
 0x196   : > { %1665 = vmatmul.mubr.f32.gmra.mxu1 %v1506_v61  ;;  %v5916_v8 = vpop.permute.xlu0 %5915  ;;  %1863 = vrot.lane.b32.xlu0 %v7326_v25, %s6811_s17 }
 0x197   : > { %v5918_v19 = vunpack.i.h.bf16 %v5916_v8  ;;  %v5917_v30 = vunpack.i.l.bf16 %v5916_v8  ;;  %1865 = vrot.lane.b32.xlu1 %v7339_v32, %s6811_s17  ;;  %1670 = vmatprep.mubr.f32.mxu1 %v10548_v24 }
 0x199   : > { %v1507_v38 = vsel %vm1499_vm2, %v5917_v30, %v5918_v19 }
 0x19a   : > { %1671 = vmatmul.mubr.f32.gmra.mxu1 %v1507_v38  ;;  %v5921_v12 = vpop.permute.xlu0 %5920  ;;  %1893 = vrot.lane.b32.xlu0 %v7504_v42, %s6811_s17 }
 0x19b   : > { %v5923_v58 = vunpack.i.h.bf16 %v5921_v12  ;;  %v5922_v59 = vunpack.i.l.bf16 %v5921_v12  ;;  %1895 = vrot.lane.b32.xlu1 %v7513_v63, %s6811_s17  ;;  %1676 = vmatprep.mubr.f32.mxu1 %v10548_v24  ;;  %v1302_v12 = vmul.f32 %v7657_v6, %v7560_v35 }
 0x19d   : > { %v1508_v22 = vsel %vm1499_vm2, %v5922_v59, %v5923_v58  ;;  %v1301_v59 = vmul.f32 %v7657_v6, %v7556_v34 }
 0x19e   : > { %1677 = vmatmul.mubr.f32.gmra.mxu1 %v1508_v22  ;;  %v5926_v61 = vpop.permute.xlu0 %5925  ;;  %6020 = vrot.lane.b32.xlu0 %v6019_v16, %s6810_s13 }
 0x19f   : > { %v5928_v8 = vunpack.i.h.bf16 %v5926_v61  ;;  %v5927_v19 = vunpack.i.l.bf16 %v5926_v61  ;;  %6015 = vrot.lane.b32.xlu1 %v6014_v33, %s6810_s13  ;;  %1682 = vmatprep.mubr.f32.mxu1 %v10548_v24  ;;  %v6024_v16 = vpack.i.bf16 %v1302_v12, %v1301_v59 }
 0x1a1   : > { %v1509_v30 = vsel %vm1499_vm2, %v5927_v19, %v5928_v8  ;;  %v7675_v8 = vpop.permute.xlu1 %1207 }
 0x1a2   : > { %1683 = vmatmul.mubr.f32.gmra.mxu1 %v1509_v30  ;;  %v5931_v38 = vpop.permute.xlu0 %5930  ;;  %1859 = vrot.lane.b32.xlu0 %v7300_v11, %s6811_s17  ;;  %10554 = vst [vmem:[#allocation44_spill] sm:$0xff] %v7675_v8  ;;  %v1303_v12 = vmul.f32 %v7675_v8, %v7564_v40 }
 0x1a3   : > { %v5933_v36 = vunpack.i.h.bf16 %v5931_v38  ;;  %v5932_v48 = vunpack.i.l.bf16 %v5931_v38  ;;  %1861 = vrot.lane.b32.xlu1 %v7313_v18, %s6811_s17  ;;  %1688 = vmatprep.mubr.f32.mxu1 %v10548_v24 }
 0x1a5   : > { %v1510_v0 = vsel %vm1499_vm2, %v5932_v48, %v5933_v36  ;;  %v1304_v36 = vmul.f32 %v7675_v8, %v7568_v9  ;;  %v7694_v9 = vpop.permute.xlu1 %1209 }
 0x1a6   : > { %1689 = vmatmul.mubr.f32.gmra.mxu1 %v1510_v0  ;;  %v7662_v58 = vpop.permute.xlu0 %1875  ;;  %1889 = vrot.lane.b32.xlu0 %v7485_v15, %s6811_s17  ;;  %v792_v0 = vpop.f32.mrf.mxu0  ;;  %10555 = vst [vmem:[#allocation45_spill] sm:$0xff] %v7694_v9 }
 0x1a7   : > { %1891 = vrot.lane.b32.xlu1 %v7493_v26, %s6811_s17  ;;  %1694 = vmatprep.mubr.f32.mxu1 %v10548_v24 }
 0x1aa   : > { %v5936_v33 = vpop.permute.xlu0 %5935  ;;  %1855 = vrot.lane.b32.xlu0 %v7274_v60, %s6811_s17 }
 0x1ab   : > { %v5938_v35 = vunpack.i.h.bf16 %v5936_v33  ;;  %v5937_v22 = vunpack.i.l.bf16 %v5936_v33  ;;  %6025 = vrot.lane.b32.xlu1 %v6024_v16, %s6810_s13  ;;  %v6029_v16 = vpack.i.bf16 %v1304_v36, %v1303_v12  ;;  %v1306_v33 = vmul.f32 %v7694_v9, %v792_v0 }
 0x1ad   : > { %v1511_v61 = vsel %vm1499_vm2, %v5937_v22, %v5938_v35  ;;  %v1305_v22 = vmul.f32 %v7694_v9, %v7570_v43 }
 0x1ae   : > { %1695 = vmatmul.mubr.f32.gmra.mxu1 %v1511_v61  ;;  %v5941_v19 = vpop.permute.xlu0 %5940  ;;  %1885 = vrot.lane.b32.xlu0 %v7469_v52, %s6811_s17 }
 0x1af   : > { %v5943_v30 = vunpack.i.h.bf16 %v5941_v19  ;;  %v5942_v38 = vunpack.i.l.bf16 %v5941_v19  ;;  %1857 = vrot.lane.b32.xlu1 %v7287_v4, %s6811_s17  ;;  %1700 = vmatprep.mubr.f32.mxu1 %v10548_v24 }
 0x1b1   : > { %v1512_v48 = vsel %vm1499_vm2, %v5942_v38, %v5943_v30  ;;  %v6034_v30 = vpack.i.bf16 %v1306_v33, %v1305_v22 }
 0x1b2   : > { %1701 = vmatmul.mubr.f32.gmra.mxu1 %v1512_v48  ;;  %v7687_v59 = vpop.permute.xlu0 %1879  ;;  %2877 = vrot.lane.b32.xlu0 %v7459_v44, %s6812_s12  ;;  %v7703_v48 = vpop.permute.xlu1 %1873 }
 0x1b3   : > { %1887 = vrot.lane.b32.xlu1 %v7477_v5, %s6811_s17  ;;  %1706 = vmatprep.mubr.f32.mxu1 %v10548_v24 }
 0x1b6   : > { %v5946_v35 = vpop.permute.xlu0 %5945  ;;  %6030 = vrot.lane.b32.xlu0 %v6029_v16, %s6810_s13 }
 0x1b7   : > { %v5948_v61 = vunpack.i.h.bf16 %v5946_v35  ;;  %v5947_v19 = vunpack.i.l.bf16 %v5946_v35  ;;  %1853 = vrot.lane.b32.xlu1 %v7262_v54, %s6811_s17  ;;  %v7710_v35 = vpop.permute.xlu1 %1877 }
 0x1b9   : > { %v1513_v38 = vsel %vm1499_vm2, %v5947_v19, %v5948_v61 }
 0x1ba   : > { %1707 = vmatmul.mubr.f32.gmra.mxu1 %v1513_v38  ;;  %v5951_v36 = vpop.permute.xlu0 %5950  ;;  %2873 = vrot.lane.b32.xlu0 %v7434_v28, %s6812_s12 }
 0x1bb   : > { %v5953_v12 = vunpack.i.h.bf16 %v5951_v36  ;;  %v5952_v0 = vunpack.i.l.bf16 %v5951_v36  ;;  %6035 = vrot.lane.b32.xlu1 %v6034_v30, %s6810_s13  ;;  %1712 = vmatprep.mubr.f32.mxu1 %v10548_v24  ;;  %v7719_v22 = vpop.permute.xlu1 %1881 }
 0x1bd   : > { %v1514_v16 = vsel %vm1499_vm2, %v5952_v0, %v5953_v12 }
 0x1be   : > { %1713 = vmatmul.mubr.f32.gmra.mxu1 %v1514_v16  ;;  %v7712_v33 = vpop.permute.xlu0 %1883  ;;  %2871 = vrot.lane.b32.xlu0 %v7418_v20, %s6812_s12 }
 0x1bf   : > { %2875 = vrot.lane.b32.xlu1 %v7447_v37, %s6812_s12  ;;  %1718 = vmatprep.mubr.f32.mxu1 %v10548_v24  ;;  %v5966_v36 = vpop.permute.xlu1 %5965 }
 0x1c0   : > { %v5968_v9 = vunpack.i.h.bf16 %v5966_v36 }
 0x1c2   : > { %v5956_v61 = vpop.permute.xlu0 %5955  ;;  %2867 = vrot.lane.b32.xlu0 %v7393_v3, %s6812_s12 }
 0x1c3   : > { %v5958_v19 = vunpack.i.h.bf16 %v5956_v61  ;;  %v5957_v30 = vunpack.i.l.bf16 %v5956_v61  ;;  %2869 = vrot.lane.b32.xlu1 %v7408_v13, %s6812_s12  ;;  %v5967_v61 = vunpack.i.l.bf16 %v5966_v36 }
 0x1c5   : > { %v1515_v38 = vsel %vm1499_vm2, %v5957_v30, %v5958_v19 }
 0x1c6   : > { %1719 = vmatmul.mubr.f32.gmra.mxu1 %v1515_v38  ;;  %v5961_v12 = vpop.permute.xlu0 %5960  ;;  %2865 = vrot.lane.b32.xlu0 %v7378_v55, %s6812_s12  ;;  %v1517_v38 = vsel %vm1499_vm2, %v5967_v61, %v5968_v9 }
 0x1c7   : > { %v5963_v0 = vunpack.i.h.bf16 %v5961_v12  ;;  %v5962_v16 = vunpack.i.l.bf16 %v5961_v12  ;;  %2861 = vrot.lane.b32.xlu1 %v7352_v39, %s6812_s12  ;;  %1724 = vmatprep.mubr.f32.mxu1 %v10548_v24  ;;  %v5976_v12 = vpop.permute.xlu1 %5975 }
 0x1c8   : > { %v5977_v36 = vunpack.i.l.bf16 %v5976_v12 }
 0x1c9   : > { %v1516_v6 = vsel %vm1499_vm2, %v5962_v16, %v5963_v0 }
 0x1ca   : > { %1725 = vmatmul.mubr.f32.gmra.mxu1 %v1516_v6  ;;  %v5971_v57 = vpop.permute.xlu0 %5970  ;;  %2863 = vrot.lane.b32.xlu0 %v7365_v46, %s6812_s12  ;;  %v5978_v6 = vunpack.i.h.bf16 %v5976_v12 }
 0x1cb   : > { %2853 = vrot.lane.b32.xlu1 %v7300_v11, %s6812_s12  ;;  %1730 = vmatprep.mubr.f32.mxu1 %v10548_v24  ;;  %v5973_v19 = vunpack.i.h.bf16 %v5971_v57  ;;  %v5972_v30 = vunpack.i.l.bf16 %v5971_v57 }
 0x1cc   : > { %v1519_v61 = vsel %vm1499_vm2, %v5977_v36, %v5978_v6 }
 0x1cd   : > { %v1518_v0 = vsel %vm1499_vm2, %v5972_v30, %v5973_v19 }
 0x1ce   : > { %1731 = vmatmul.mubr.f32.gmra.mxu1 %v1517_v38  ;;  %2859 = vrot.lane.b32.xlu0 %v7339_v32, %s6812_s12  ;;  %v5981_v16 = vpop.permute.xlu0 %5980  ;;  %v5986_v38 = vpop.permute.xlu1 %5985 }
 0x1cf   : > { %2851 = vrot.lane.b32.xlu1 %v7287_v4, %s6812_s12  ;;  %1736 = vmatprep.mubr.f32.mxu1 %v10548_v24  ;;  %v5983_v57 = vunpack.i.h.bf16 %v5981_v16  ;;  %v5982_v9 = vunpack.i.l.bf16 %v5981_v16  ;;  %v5988_v19 = vunpack.i.h.bf16 %v5986_v38  ;;  %v5987_v30 = vunpack.i.l.bf16 %v5986_v38 }
 0x1d1   : > { %v1520_v12 = vsel %vm1499_vm2, %v5982_v9, %v5983_v57  ;;  %v1521_v16 = vsel %vm1499_vm2, %v5987_v30, %v5988_v19 }
 0x1d2   : > { %1737 = vmatmul.mubr.f32.gmra.mxu1 %v1518_v0  ;;  %2857 = vrot.lane.b32.xlu0 %v7326_v25, %s6812_s12  ;;  %v5991_v0 = vpop.permute.xlu0 %5990 }
 0x1d3   : > { %2909 = vrot.lane.b32.xlu1 %v7570_v43, %s6812_s12  ;;  %1742 = vmatprep.mubr.f32.mxu1 %v10548_v24  ;;  %v5993_v6 = vunpack.i.h.bf16 %v5991_v0  ;;  %v5992_v36 = vunpack.i.l.bf16 %v5991_v0 }
 0x1d5   : > { %v1522_v57 = vsel %vm1499_vm2, %v5992_v36, %v5993_v6 }
 0x1d6   : > { %1743 = vmatmul.mubr.f32.gmra.mxu1 %v1519_v61  ;;  %2855 = vrot.lane.b32.xlu0 %v7313_v18, %s6812_s12 }
 0x1d7   : > { %2905 = vrot.lane.b32.xlu1 %v7556_v34, %s6812_s12  ;;  %1748 = vmatprep.mubr.f32.mxu1 %v10548_v24 }
 0x1da   : > { %1749 = vmatmul.mubr.f32.gmra.mxu1 %v1520_v12  ;;  %2849 = vrot.lane.b32.xlu0 %v7274_v60, %s6812_s12 }
 0x1db   : > { %2901 = vrot.lane.b32.xlu1 %v7544_v14, %s6812_s12  ;;  %1754 = vmatprep.mubr.f32.mxu1 %v10548_v24 }
 0x1dc   : > { %v1906_v9 = vpop.permute.xlu0 %1905 }
 0x1de   : > { %1755 = vmatmul.mubr.f32.gmra.mxu1 %v1521_v16  ;;  %2847 = vrot.lane.b32.xlu0 %v7262_v54, %s6812_s12 }
 0x1df   : > { %2897 = vrot.lane.b32.xlu1 %v7536_v62, %s6812_s12  ;;  %1760 = vmatprep.mubr.f32.mxu1 %v10548_v24 }
 0x1e0   : > { %v1908_v38 = vpop.permute.xlu1 %1907 }
 0x1e2   : > { %1761 = vmatmul.mubr.f32.gmra.mxu1 %v1522_v57  ;;  %2907 = vrot.lane.b32.xlu0 %v7564_v40, %s6812_s12 }
 0x1e3   : > { %2893 = vrot.lane.b32.xlu1 %v7531_v41, %s6812_s12  ;;  %1766 = vmatprep.mubr.f32.mxu1 %v10548_v24 }
 0x1e4   : > { %v1910_v61 = vpop.permute.xlu0 %1909 }
 0x1e6   : > { %2903 = vrot.lane.b32.xlu0 %v7550_v21, %s6812_s12 }
 0x1e7   : > { %2889 = vrot.lane.b32.xlu1 %v7513_v63, %s6812_s12 }
 0x1e8   : > { %v1912_v30 = vpop.permute.xlu1 %1911 }
 0x1ea   : > { %2899 = vrot.lane.b32.xlu0 %v7540_v7, %s6812_s12 }
 0x1eb   : > { %2885 = vrot.lane.b32.xlu1 %v7493_v26, %s6812_s12 }
 0x1ec   : > { %v1914_v19 = vpop.permute.xlu0 %1913 }
 0x1ee   : > { %2895 = vrot.lane.b32.xlu0 %v7534_v49, %s6812_s12 }
 0x1f0   : > { %v1872_v12 = vpop.permute.xlu0 %1871 }
 0x1f1   : > { %v1916_v0 = vpop.permute.xlu1 %1915 }
 0x1f2   : > { %5551 = vmatprep.subr.msk.mxu1 %vm1917_vm3, %v1916_v0  ;;  %2891 = vrot.lane.b32.xlu0 %v7524_v23, %s6812_s12 }
 0x1f3   : > { %5552 = vmatpush3.xpose.msk.msra.mxu1 %vm1917_vm3, %v7712_v33 }
 0x1f4   : > { %5553 = vmatprep.subr.msk.mxu1 %vm1917_vm3, %v1914_v19  ;;  %v1902_v6 = vpop.permute.xlu0 %1901 }
 0x1f5   : > { %v1904_v36 = vpop.permute.xlu1 %1903 }
 0x1f6   : > { %2887 = vrot.lane.b32.xlu0 %v7504_v42, %s6812_s12 }
 0x1f7   : > { %5554 = vmatpush3.xpose.msk.msra.mxu1 %vm1917_vm3, %v7719_v22 }
 0x1f8   : > { %5555 = vmatprep.subr.msk.mxu1 %vm1917_vm3, %v1912_v30  ;;  %v6001_v16 = vpop.permute.xlu0 %6000 }
 0x1f9   : > { %v5996_v57 = vpop.permute.xlu1 %5995  ;;  %v6003_v33 = vunpack.i.h.bf16 %v6001_v16  ;;  %v6002_v8 = vunpack.i.l.bf16 %v6001_v16 }
 0x1fa   : > { %v5998_v0 = vunpack.i.h.bf16 %v5996_v57  ;;  %v5997_v50 = vunpack.i.l.bf16 %v5996_v57 }
 0x1fb   : > { %5556 = vmatpush3.xpose.msk.msra.mxu1 %vm1917_vm3, %v7687_v59  ;;  %v1524_v30 = vsel %vm1499_vm2, %v6002_v8, %v6003_v33 }
 0x1fc   : > { %5557 = vmatprep.subr.msk.mxu1 %vm1917_vm3, %v1910_v61  ;;  %v1868_v19 = vpop.permute.xlu0 %1867  ;;  %v1523_v47 = vsel %vm1499_vm2, %v5997_v50, %v5998_v0 }
 0x1fd   : > { %v1870_v10 = vpop.permute.xlu1 %1869  ;;  %1767 = vmatmul.mubr.f32.gmra.mxu1 %v1523_v47 }
 0x1fe   : > { %1772 = vmatprep.mubr.f32.mxu1 %v10548_v24 }
 0x1ff   : > { %5558 = vmatpush3.xpose.msk.msra.mxu1 %vm1917_vm3, %v7710_v35 }
 0x200   : > { %5559 = vmatprep.subr.msk.mxu1 %vm1917_vm3, %v1908_v38  ;;  %v1898_v22 = vpop.permute.xlu0 %1897 }
 0x201   : > { %v1900_v59 = vpop.permute.xlu1 %1899  ;;  %1773 = vmatmul.mubr.f32.gmra.mxu1 %v1524_v30 }
 0x202   : > { %1778 = vmatprep.mubr.f32.mxu1 %v10548_v24 }
 0x203   : > { %5560 = vmatpush3.xpose.msk.msra.mxu1 %vm1917_vm3, %v7662_v58 }
 0x204   : > { %5561 = vmatprep.subr.msk.mxu1 %vm1917_vm3, %v1906_v9  ;;  %v6011_v50 = vpop.permute.xlu0 %6010 }
 0x205   : > { %v6006_v47 = vpop.permute.xlu1 %6005  ;;  %v6013_v35 = vunpack.i.h.bf16 %v6011_v50  ;;  %v6012_v38 = vunpack.i.l.bf16 %v6011_v50 }
 0x206   : > { %v6008_v61 = vunpack.i.h.bf16 %v6006_v47  ;;  %v6007_v16 = vunpack.i.l.bf16 %v6006_v47 }
 0x207   : > { %5562 = vmatpush3.xpose.msk.msra.mxu1 %vm1917_vm3, %v7703_v48  ;;  %v1526_v9 = vsel %vm1499_vm2, %v6012_v38, %v6013_v35 }
 0x208   : > { %5563 = vmatprep.subr.msk.mxu1 %vm1917_vm3, %v1904_v36  ;;  %v1864_v8 = vpop.permute.xlu0 %1863  ;;  %v1525_v57 = vsel %vm1499_vm2, %v6007_v16, %v6008_v61 }
 0x209   : > { %v1866_v0 = vpop.permute.xlu1 %1865  ;;  %1779 = vmatmul.mubr.f32.gmra.mxu1 %v1525_v57 }
 0x20a   : > { %1784 = vmatprep.mubr.f32.mxu1 %v10548_v24 }
 0x20b   : > { %5564 = vmatpush3.xpose.msk.msra.mxu1 %vm1917_vm3, %v1872_v12 }
 0x20c   : > { %5565 = vmatprep.subr.msk.mxu1 %vm1917_vm3, %v1902_v6  ;;  %v1894_v58 = vpop.permute.xlu0 %1893 }
 0x20d   : > { %v1896_v33 = vpop.permute.xlu1 %1895  ;;  %1785 = vmatmul.mubr.f32.gmra.mxu1 %v1526_v9 }
 0x20e   : > { %1790 = vmatprep.mubr.f32.mxu1 %v10548_v24 }
 0x20f   : > { %5566 = vmatpush3.xpose.msk.msra.mxu1 %vm1917_vm3, %v1870_v10 }
 0x210   : > { %5567 = vmatprep.subr.msk.mxu1 %vm1917_vm3, %v1900_v59  ;;  %v6021_v48 = vpop.permute.xlu0 %6020 }
 0x211   : > { %v6016_v36 = vpop.permute.xlu1 %6015  ;;  %v6023_v12 = vunpack.i.h.bf16 %v6021_v48  ;;  %v6022_v47 = vunpack.i.l.bf16 %v6021_v48 }
 0x212   : > { %v6018_v30 = vunpack.i.h.bf16 %v6016_v36  ;;  %v6017_v50 = vunpack.i.l.bf16 %v6016_v36 }
 0x213   : > { %5568 = vmatpush3.xpose.msk.msra.mxu1 %vm1917_vm3, %v1868_v19  ;;  %v1528_v59 = vsel %vm1499_vm2, %v6022_v47, %v6023_v12 }
 0x214   : > { %5569 = vmatprep.subr.msk.mxu1 %vm1917_vm3, %v1898_v22  ;;  %v1860_v6 = vpop.permute.xlu0 %1859  ;;  %v1527_v61 = vsel %vm1499_vm2, %v6017_v50, %v6018_v30 }
 0x215   : > { %v1862_v16 = vpop.permute.xlu1 %1861  ;;  %1791 = vmatmul.mubr.f32.gmra.mxu1 %v1527_v61 }
 0x216   : > { %1796 = vmatprep.mubr.f32.mxu1 %v10548_v24 }
 0x217   : > { %5570 = vmatpush3.xpose.msk.msra.mxu1 %vm1917_vm3, %v1866_v0 }
 0x218   : > { %5571 = vmatprep.subr.msk.mxu1 %vm1917_vm3, %v1896_v33  ;;  %v1890_v10 = vpop.permute.xlu0 %1889 }
 0x219   : > { %v1892_v35 = vpop.permute.xlu1 %1891  ;;  %1797 = vmatmul.mubr.f32.gmra.mxu1 %v1528_v59 }
 0x21a   : > { %1802 = vmatprep.mubr.f32.mxu1 %v10548_v24 }
 0x21b   : > { %5572 = vmatpush3.xpose.msk.msra.mxu1 %vm1917_vm3, %v1864_v8 }
 0x21c   : > { %5573 = vmatprep.subr.msk.mxu1 %vm1917_vm3, %v1894_v58  ;;  %v1856_v19 = vpop.permute.xlu0 %1855 }
 0x21d   : > { %v6026_v22 = vpop.permute.xlu1 %6025 }
 0x21e   : > { %v6028_v38 = vunpack.i.h.bf16 %v6026_v22  ;;  %v6027_v57 = vunpack.i.l.bf16 %v6026_v22 }
 0x21f   : > { %5574 = vmatpush3.xpose.msk.msra.mxu1 %vm1917_vm3, %v1862_v16 }
 0x220   : > { %5575 = vmatprep.subr.msk.mxu1 %vm1917_vm3, %v1892_v35  ;;  %v1886_v0 = vpop.permute.xlu0 %1885  ;;  %v1529_v9 = vsel %vm1499_vm2, %v6027_v57, %v6028_v38  ;;  %v6584_v35 = vld [vmem:[%s7177_s26 + $0xf8] sm:$0xff]  ;;  %v6585_v57 = vld [vmem:[%s7177_s26 + $0xf0] sm:$0xff] }
 0x221   : > { %v1858_v33 = vpop.permute.xlu1 %1857  ;;  %1803 = vmatmul.mubr.f32.gmra.mxu1 %v1529_v9  ;;  %v6586_v9 = vld [vmem:[%s7177_s26 + $0xe8] sm:$0xff] }
 0x222   : > { %1808 = vmatprep.mubr.f32.mxu1 %v10548_v24 }
 0x223   : > { %5576 = vmatpush3.xpose.msk.msra.mxu1 %vm1917_vm3, %v1860_v6 }
 0x224   : > { %5577 = vmatprep.subr.msk.mxu1 %vm1917_vm3, %v1890_v10  ;;  %v2878_v8 = vpop.permute.xlu0 %2877 }
 0x225   : > { %v1888_v58 = vpop.permute.xlu1 %1887  ;;  %2944 = vmatpush1.msra.mxu0 %v2878_v8 }
 0x226   : > { %2945 = vmatprep.subr.mxu0 %v10548_v24 }
 0x227   : > { %5578 = vmatpush3.xpose.msk.msra.mxu1 %vm1917_vm3, %v1858_v33 }
 0x228   : > { %5579 = vmatprep.subr.msk.mxu1 %vm1917_vm3, %v1888_v58  ;;  %v6031_v48 = vpop.permute.xlu0 %6030  ;;  %v6588_v58 = vld [vmem:[%s7177_s26 + $0xd8] sm:$0xff] }
 0x229   : > { %v6033_v36 = vunpack.i.h.bf16 %v6031_v48  ;;  %v6032_v30 = vunpack.i.l.bf16 %v6031_v48  ;;  %v1854_v50 = vpop.permute.xlu1 %1853 }
 0x22b   : > { %5580 = vmatpush3.xpose.msk.msra.mxu1 %vm1917_vm3, %v1856_v19  ;;  %v1530_v12 = vsel %vm1499_vm2, %v6032_v30, %v6033_v36  ;;  %v6589_v36 = vld [vmem:[%s7177_s26 + $0xd0] sm:$0xff] }
 0x22c   : > { %5581 = vmatprep.subr.msk.mxu1 %vm1917_vm3, %v1886_v0  ;;  %v2874_v47 = vpop.permute.xlu0 %2873  ;;  %1809 = vmatmul.mubr.f32.gmra.mxu1 %v1530_v12  ;;  %v6590_v12 = vld [vmem:[%s7177_s26 + $0xc8] sm:$0xff] }
 0x22d   : > { %v6036_v6 = vpop.permute.xlu1 %6035  ;;  %1814 = vmatprep.mubr.f32.mxu1 %v10548_v24 }
 0x22e   : > { %v6038_v61 = vunpack.i.h.bf16 %v6036_v6  ;;  %v6037_v16 = vunpack.i.l.bf16 %v6036_v6  ;;  %v6591_v6 = vld [vmem:[%s7177_s26 + $0xc0] sm:$0xff] }
 0x22f   : > { %5582 = vmatpush3.xpose.msk.msra.mxu1 %vm1917_vm3, %v1854_v50 }
 0x230   : > { %v2872_v10 = vpop.permute.xlu0 %2871  ;;  %v1531_v59 = vsel %vm1499_vm2, %v6037_v16, %v6038_v61  ;;  %3554 = vmatprep.subr.mxu1 %v6584_v35  ;;  %v6593_v35 = vld [vmem:[%s7177_s26 + $0xb0] sm:$0xff] }
 0x231   : > { %v2876_v19 = vpop.permute.xlu1 %2875  ;;  %1815 = vmatmul.mubr.f32.gmra.mxu1 %v1531_v59 }
 0x232   : > { %5583 = vmatprep.mubr.msk.f32.mxu1 %vm1917_vm3, %v7262_v54  ;;  %2946 = vmatpush1.msra.mxu0 %v2876_v19 }
 0x233   : > { %2947 = vmatprep.subr.mxu0 %v10548_v24 }
 0x234   : > { %2948 = vmatpush1.msra.mxu0 %v2874_v47  ;;  %v2868_v22 = vpop.permute.xlu0 %2867 }
 0x235   : > { %2949 = vmatprep.subr.mxu0 %v10548_v24  ;;  %v2870_v38 = vpop.permute.xlu1 %2869  ;;  %5584 = vmatmul.mubr.msk.f32.vlgmr.msra.gmra.mxu1 %vm1917_vm3, %v7262_v54  ;;  %v6587_v54 = vld [vmem:[%s7177_s26 + $0xe0] sm:$0xff] }
 0x236   : > { %5585 = vmatprep.mubr.msk.f32.mxu1 %vm1917_vm3, %v7274_v60  ;;  %2950 = vmatpush1.msra.mxu0 %v2872_v10  ;;  %v6592_v10 = vld [vmem:[%s7177_s26 + $0xb8] sm:$0xff] }
 0x237   : > { %2951 = vmatprep.subr.mxu0 %v10548_v24  ;;  %3555 = vmatpush1.msra.mxu1 %v6585_v57 }
 0x238   : > { %2952 = vmatpush1.msra.mxu0 %v2870_v38  ;;  %v2866_v0 = vpop.permute.xlu0 %2865  ;;  %3556 = vmatprep.subr.mxu1 %v6586_v9  ;;  %v6594_v38 = vld [vmem:[%s7177_s26 + $0xa8] sm:$0xff] }
 0x239   : > { %2953 = vmatprep.subr.mxu0 %v10548_v24  ;;  %v2862_v33 = vpop.permute.xlu1 %2861  ;;  %5586 = vmatmul.mubr.msk.f32.gmra.mxu1 %vm1917_vm3, %v7274_v60 }
 0x23a   : > { %5587 = vmatprep.mubr.msk.f32.mxu1 %vm1917_vm3, %v7287_v4  ;;  %2954 = vmatpush1.msra.mxu0 %v2868_v22 }
 0x23b   : > { %2955 = vmatprep.subr.mxu0 %v10548_v24  ;;  %3557 = vmatpush1.msra.mxu1 %v6587_v54 }
 0x23c   : > { %2956 = vmatpush1.msra.mxu0 %v2866_v0  ;;  %v2864_v8 = vpop.permute.xlu0 %2863  ;;  %3558 = vmatprep.subr.mxu1 %v6588_v58  ;;  %v6595_v0 = vld [vmem:[%s7177_s26 + $0xa0] sm:$0xff] }
 0x23d   : > { %2957 = vmatprep.subr.mxu0 %v10548_v24  ;;  %v2854_v48 = vpop.permute.xlu1 %2853  ;;  %5588 = vmatmul.mubr.msk.f32.gmra.mxu1 %vm1917_vm3, %v7287_v4 }
 0x23e   : > { %5589 = vmatprep.mubr.msk.f32.mxu1 %vm1917_vm3, %v7300_v11  ;;  %2958 = vmatpush1.msra.mxu0 %v2864_v8  ;;  %v7868_v60 = vpop.f32.mrf.mxu1  ;;  %v6597_v8 = vld [vmem:[%s7177_s26 + $0x90] sm:$0xff] }
 0x23f   : > { %2959 = vmatprep.subr.mxu0 %v10548_v24  ;;  %3559 = vmatpush1.msra.mxu1 %v6589_v36  ;;  %v6598_v36 = vld [vmem:[%s7177_s26 + $0x88] sm:$0xff] }
 0x240   : > { %2960 = vmatpush1.msra.mxu0 %v2862_v33  ;;  %v7872_v30 = vpop.f32.mrf.mxu1  ;;  %v2860_v50 = vpop.permute.xlu0 %2859  ;;  %3560 = vmatprep.subr.mxu1 %v6590_v12  ;;  %v6599_v12 = vld [vmem:[%s7177_s26 + $0x80] sm:$0xff] }
 0x241   : > { %2961 = vmatprep.subr.mxu0 %v10548_v24  ;;  %v2852_v4 = vpop.permute.xlu1 %2851  ;;  %5590 = vmatmul.mubr.msk.f32.gmra.mxu1 %vm1917_vm3, %v7300_v11 }
 0x242   : > { %5591 = vmatprep.mubr.msk.f32.mxu1 %vm1917_vm3, %v7313_v18  ;;  %2962 = vmatpush1.msra.mxu0 %v2860_v50  ;;  %v7880_v47 = vpop.f32.mrf.mxu1 }
 0x243   : > { %2963 = vmatprep.subr.mxu0 %v10548_v24  ;;  %3561 = vmatpush1.msra.mxu1 %v6591_v6 }
 0x244   : > { %v7884_v61 = vpop.f32.mrf.mxu1  ;;  %v2858_v16 = vpop.permute.xlu0 %2857  ;;  %3562 = vmatprep.subr.mxu1 %v6592_v10 }
 0x245   : > { %v2910_v59 = vpop.permute.xlu1 %2909  ;;  %5592 = vmatmul.mubr.msk.f32.gmra.mxu1 %vm1917_vm3, %v7313_v18  ;;  %2964 = vmatpush1.msra.mxu0 %v2858_v16  ;;  %v6600_v16 = vld [vmem:[%s7177_s26 + $0x78] sm:$0xff] }
 0x246   : > { %5593 = vmatprep.mubr.msk.f32.mxu1 %vm1917_vm3, %v7326_v25  ;;  %v7891_v11 = vpop.f32.mrf.mxu1  ;;  %2965 = vmatprep.subr.mxu0 %v10548_v24 }
 0x247   : > { %3563 = vmatpush1.msra.mxu1 %v6593_v35 }
 0x248   : > { %v7895_v19 = vpop.f32.mrf.mxu1  ;;  %v2856_v22 = vpop.permute.xlu0 %2855  ;;  %3564 = vmatprep.subr.mxu1 %v6594_v38 }
 0x249   : > { %5594 = vmatmul.mubr.msk.f32.gmra.mxu1 %vm1917_vm3, %v7326_v25  ;;  %2966 = vmatpush1.msra.mxu0 %v2856_v22  ;;  %v2906_v57 = vpop.permute.xlu1 %2905  ;;  %v6596_v25 = vld [vmem:[%s7177_s26 + $0x98] sm:$0xff] }
 0x24a   : > { %5595 = vmatprep.mubr.msk.f32.mxu1 %vm1917_vm3, %v7339_v32  ;;  %v7902_v18 = vpop.f32.mrf.mxu1  ;;  %2967 = vmatprep.subr.mxu0 %v10548_v24 }
 0x24b   : > { %2968 = vmatpush1.msra.mxu0 %v2854_v48  ;;  %3565 = vmatpush1.msra.mxu1 %v6595_v0 }
 0x24c   : > { %v7906_v9 = vpop.f32.mrf.mxu1  ;;  %v2850_v33 = vpop.permute.xlu0 %2849  ;;  %2969 = vmatprep.subr.mxu0 %v10548_v24  ;;  %3566 = vmatprep.subr.mxu1 %v6596_v25  ;;  %v6604_v25 = vld [vmem:[%s7177_s26 + $0x58] sm:$0xff] }
 0x24d   : > { %5596 = vmatmul.mubr.msk.f32.gmra.mxu1 %vm1917_vm3, %v7339_v32  ;;  %2970 = vmatpush1.msra.mxu0 %v2852_v4  ;;  %v2902_v32 = vpop.permute.xlu1 %2901 }
 0x24e   : > { %5597 = vmatprep.mubr.msk.f32.mxu1 %vm1917_vm3, %v7352_v39  ;;  %v7914_v54 = vpop.f32.mrf.mxu1  ;;  %2971 = vmatprep.subr.mxu0 %v10548_v24 }
 0x24f   : > { %2972 = vmatpush1.msra.mxu0 %v2850_v33  ;;  %3567 = vmatpush1.msra.mxu1 %v6597_v8 }
 0x250   : > { %v7918_v58 = vpop.f32.mrf.mxu1  ;;  %v2848_v48 = vpop.permute.xlu0 %2847  ;;  %2973 = vmatprep.subr.mxu0 %v10548_v24  ;;  %3568 = vmatprep.subr.mxu1 %v6598_v36 }
 0x251   : > { %5598 = vmatmul.mubr.msk.f32.gmra.mxu1 %vm1917_vm3, %v7352_v39  ;;  %2974 = vmatpush1.msra.mxu0 %v2848_v48  ;;  %v2898_v10 = vpop.permute.xlu1 %2897  ;;  %v6605_v48 = vld [vmem:[%s7177_s26 + $0x50] sm:$0xff] }
 0x252   : > { %5599 = vmatprep.mubr.msk.f32.mxu1 %vm1917_vm3, %v7365_v46  ;;  %v7926_v50 = vpop.f32.mrf.mxu1  ;;  %2975 = vmatprep.subr.mxu0 %v10548_v24 }
 0x253   : > { %2976 = vmatpush2.msra.mxu0 %v2910_v59  ;;  %3569 = vmatpush1.msra.mxu1 %v6599_v12  ;;  %v6601_v59 = vld [vmem:[%s7177_s26 + $0x70] sm:$0xff]  ;;  %v6606_v12 = vld [vmem:[%s7177_s26 + $0x48] sm:$0xff] }
 0x254   : > { %v7930_v4 = vpop.f32.mrf.mxu1  ;;  %v2908_v6 = vpop.permute.xlu0 %2907  ;;  %2977 = vmatprep.subr.mxu0 %v10548_v24  ;;  %3570 = vmatprep.subr.mxu1 %v6600_v16  ;;  %v6607_v16 = vld [vmem:[%s7177_s26 + $0x40] sm:$0xff] }
 0x255   : > { %5600 = vmatmul.mubr.msk.f32.gmra.mxu1 %vm1917_vm3, %v7365_v46  ;;  %2978 = vmatpush2.msra.mxu0 %v2908_v6  ;;  %v6602_v46 = vld [vmem:[%s7177_s26 + $0x68] sm:$0xff] }
 0x256   : > { %5601 = vmatprep.mubr.msk.f32.mxu1 %vm1917_vm3, %v7378_v55  ;;  %v7938_v39 = vpop.f32.mrf.mxu1  ;;  %2979 = vmatprep.subr.mxu0 %v10548_v24 }
 0x257   : > { %2980 = vmatpush2.msra.mxu0 %v2906_v57  ;;  %3571 = vmatpush1.msra.mxu1 %v6601_v59  ;;  %v6603_v57 = vld [vmem:[%s7177_s26 + $0x60] sm:$0xff] }
 0x258   : > { %v7942_v35 = vpop.f32.mrf.mxu1  ;;  %v2904_v22 = vpop.permute.xlu0 %2903  ;;  %2981 = vmatprep.subr.mxu0 %v10548_v24  ;;  %3572 = vmatprep.subr.mxu1 %v6602_v46 }
 0x259   : > { %5602 = vmatmul.mubr.msk.f32.gmra.mxu1 %vm1917_vm3, %v7378_v55  ;;  %2982 = vmatpush2.msra.mxu0 %v2904_v22  ;;  %v2894_v55 = vpop.permute.xlu1 %2893  ;;  %v6609_v22 = vld [vmem:[%s7177_s26 + $0x30] sm:$0xff] }
 0x25a   : > { %5603 = vmatprep.mubr.msk.f32.mxu1 %vm1917_vm3, %v7393_v3  ;;  %v7950_v38 = vpop.f32.mrf.mxu1  ;;  %2983 = vmatprep.subr.mxu0 %v10548_v24 }
 0x25b   : > { %2984 = vmatpush2.msra.mxu0 %v2902_v32  ;;  %3573 = vmatpush1.msra.mxu1 %v6603_v57 }
 0x25c   : > { %v7954_v0 = vpop.f32.mrf.mxu1  ;;  %v2900_v33 = vpop.permute.xlu0 %2899  ;;  %2985 = vmatprep.subr.mxu0 %v10548_v24  ;;  %3574 = vmatprep.subr.mxu1 %v6604_v25  ;;  %v6611_v25 = vld [vmem:[%s7177_s26 + $0x20] sm:$0xff] }
 0x25d   : > { %5604 = vmatmul.mubr.msk.f32.gmra.mxu1 %vm1917_vm3, %v7393_v3  ;;  %2986 = vmatpush2.msra.mxu0 %v2900_v33  ;;  %v2890_v6 = vpop.permute.xlu1 %2889  ;;  %v6610_v33 = vld [vmem:[%s7177_s26 + $0x28] sm:$0xff] }
 0x25e   : > { %5605 = vmatprep.mubr.msk.f32.mxu1 %vm1917_vm3, %v7408_v13  ;;  %v7962_v8 = vpop.f32.mrf.mxu1  ;;  %2987 = vmatprep.subr.mxu0 %v10548_v24 }
 0x25f   : > { %2988 = vmatpush2.msra.mxu0 %v2898_v10  ;;  %3575 = vmatpush1.msra.mxu1 %v6605_v48  ;;  %v6612_v48 = vld [vmem:[%s7177_s26 + $0x18] sm:$0xff] }
 0x260   : > { %v7966_v36 = vpop.f32.mrf.mxu1  ;;  %v2896_v32 = vpop.permute.xlu0 %2895  ;;  %2989 = vmatprep.subr.mxu0 %v10548_v24  ;;  %3576 = vmatprep.subr.mxu1 %v6606_v12  ;;  %v6614_v12 = vld [vmem:[%s7177_s26 + $0x8] sm:$0xff] }
 0x261   : > { %5606 = vmatmul.mubr.msk.f32.gmra.mxu1 %vm1917_vm3, %v7408_v13  ;;  %2990 = vmatpush2.msra.mxu0 %v2896_v32  ;;  %v6608_v13 = vld [vmem:[%s7177_s26 + $0x38] sm:$0xff]  ;;  %v6613_v32 = vld [vmem:[%s7177_s26 + $0x10] sm:$0xff] }
 0x262   : > { %5607 = vmatprep.mubr.msk.f32.mxu1 %vm1917_vm3, %v7418_v20  ;;  %v7974_v3 = vpop.f32.mrf.mxu1  ;;  %2991 = vmatprep.subr.mxu0 %v10548_v24 }
 0x263   : > { %2992 = vmatpush2.msra.mxu0 %v2894_v55  ;;  %3577 = vmatpush1.msra.mxu1 %v6607_v16  ;;  %v6615_v16 = vld [vmem:[%s7177_s26] sm:$0xff]  ;;  %s260_s26 = sand.u32 1, %s6792_s19  }
 0x264   : > { %v7978_v10 = vpop.f32.mrf.mxu1  ;;  %v2892_v59 = vpop.permute.xlu0 %2891  ;;  %2993 = vmatprep.subr.mxu0 %v10548_v24  ;;  %3578 = vmatprep.subr.mxu1 %v6608_v13  ;;  %s10286_s7 = scalar_lea.sflag [#allocation4], %s260_s26 }
 0x265   : > { %5608 = vmatmul.mubr.msk.f32.gmra.mxu1 %vm1917_vm3, %v7418_v20  ;;  %2994 = vmatpush2.msra.mxu0 %v2892_v59  ;;  %v2886_v20 = vpop.permute.xlu1 %2885 }
 0x266   : > { %5609 = vmatprep.mubr.msk.f32.mxu1 %vm1917_vm3, %v7434_v28  ;;  %2995 = vmatprep.subr.mxu0 %v10548_v24  ;;  %v7988_v46 = vpop.f32.mrf.mxu1 }
 0x267   : > { %2996 = vmatpush2.msra.mxu0 %v2890_v6  ;;  %3579 = vmatpush1.msra.mxu1 %v6609_v22 }
 0x268   : > { %v2888_v57 = vpop.permute.xlu0 %2887  ;;  %2997 = vmatprep.subr.mxu0 %v10548_v24  ;;  %3580 = vmatprep.subr.mxu1 %v6610_v33  ;;  %v7998_v55 = vpop.f32.mrf.mxu1 }
 0x269   : > { %5610 = vmatmul.mubr.msk.f32.gmra.mxu1 %vm1917_vm3, %v7434_v28  ;;  %2998 = vmatpush2.msra.mxu0 %v2888_v57 }
 0x26a   : > { %5611 = vmatprep.mubr.msk.f32.mxu1 %vm1917_vm3, %v7447_v37  ;;  %2999 = vmatprep.subr.mxu0 %v10548_v24 }
 0x26b   : > { %3000 = vmatpush2.msra.mxu0 %v2886_v20  ;;  %3581 = vmatpush1.msra.mxu1 %v6611_v25 }
 0x26c   : > { %3001 = vmatprep.subr.mxu0 %v10548_v24  ;;  %3582 = vmatprep.subr.mxu1 %v6612_v48 }
 0x26d   : > { %5612 = vmatmul.mubr.msk.f32.gmra.mxu1 %vm1917_vm3, %v7447_v37 }
 0x26e   : > { %5613 = vmatprep.mubr.msk.f32.mxu1 %vm1917_vm3, %v7459_v44  ;;  %v8006_v28 = vpop.f32.mrf.mxu1  ;;  %3583 = vmatpush1.msra.mxu1 %v6613_v32 }
 0x26f   : > { %3584 = vmatprep.subr.mxu1 %v6614_v12 }
 0x270   : > { %v8010_v6 = vpop.f32.mrf.mxu1  ;;  %3585 = vmatpush1.msra.mxu1 %v6615_v16 }
 0x271   : > { %5614 = vmatmul.mubr.msk.f32.gmra.mxu1 %vm1917_vm3, %v7459_v44  ;;  %5743 = vmatprep.subr.mxu1 %v10548_v24 }
 0x272   : > { %5615 = vmatprep.mubr.msk.f32.mxu1 %vm1917_vm3, %v7469_v52  ;;  %v8018_v37 = vpop.f32.mrf.mxu1 }
 0x274   : > { %v8024_v59 = vpop.f32.mrf.mxu1 }
 0x275   : > { %5616 = vmatmul.mubr.msk.f32.gmra.mxu1 %vm1917_vm3, %v7469_v52 }
 0x276   : > { %5617 = vmatprep.mubr.msk.f32.mxu1 %vm1917_vm3, %v7477_v5 }
 0x279   : > { %5618 = vmatmul.mubr.msk.f32.gmra.mxu1 %vm1917_vm3, %v7477_v5 }
 0x27a   : > { %5619 = vmatprep.mubr.msk.f32.mxu1 %vm1917_vm3, %v7485_v15  ;;  %v8030_v44 = vpop.f32.mrf.mxu1 }
 0x27c   : > { %v8032_v13 = vpop.f32.mrf.mxu1 }
 0x27d   : > { %5620 = vmatmul.mubr.msk.f32.gmra.mxu1 %vm1917_vm3, %v7485_v15 }
 0x27e   : > { %5621 = vmatprep.mubr.msk.f32.mxu1 %vm1917_vm3, %v7493_v26  ;;  %v8038_v22 = vpop.f32.mrf.mxu1 }
 0x280   : > { %v8044_v57 = vpop.f32.mrf.mxu1 }
 0x281   : > { %5622 = vmatmul.mubr.msk.f32.gmra.mxu1 %vm1917_vm3, %v7493_v26 }
 0x282   : > { %5623 = vmatprep.mubr.msk.f32.mxu1 %vm1917_vm3, %v7504_v42 }
 0x285   : > { %5624 = vmatmul.mubr.msk.f32.gmra.mxu1 %vm1917_vm3, %v7504_v42 }
 0x286   : > { %5625 = vmatprep.mubr.msk.f32.mxu1 %vm1917_vm3, %v7513_v63  ;;  %v8050_v33 = vpop.f32.mrf.mxu1 }
 0x288   : > { %v8052_v20 = vpop.f32.mrf.mxu1 }
 0x289   : > { %5626 = vmatmul.mubr.msk.f32.gmra.mxu1 %vm1917_vm3, %v7513_v63 }
 0x28a   : > { %5627 = vmatprep.mubr.msk.f32.mxu1 %vm1917_vm3, %v7524_v23  ;;  %v8058_v26 = vpop.f32.mrf.mxu1 }
 0x28c   : > { %v8060_v25 = vpop.f32.mrf.mxu1 }
 0x28d   : > { %5628 = vmatmul.mubr.msk.f32.gmra.mxu1 %vm1917_vm3, %v7524_v23 }
 0x28e   : > { %5629 = vmatprep.mubr.msk.f32.mxu1 %vm1917_vm3, %v7531_v41  ;;  %v8066_v42 = vpop.f32.mrf.mxu1 }
 0x290   : > { %v8072_v63 = vpop.f32.mrf.mxu1 }
 0x291   : > { %5630 = vmatmul.mubr.msk.f32.gmra.mxu1 %vm1917_vm3, %v7531_v41 }
 0x292   : > { %5631 = vmatprep.mubr.msk.f32.mxu1 %vm1917_vm3, %v7534_v49  ;;  %v8078_v23 = vpop.f32.mrf.mxu1 }
 0x294   : > { %v8084_v41 = vpop.f32.mrf.mxu1 }
 0x295   : > { %5632 = vmatmul.mubr.msk.f32.gmra.mxu1 %vm1917_vm3, %v7534_v49 }
 0x296   : > { %5633 = vmatprep.mubr.msk.f32.mxu1 %vm1917_vm3, %v7536_v62  ;;  %v8090_v49 = vpop.f32.mrf.mxu1 }
 0x299   : > { %5634 = vmatmul.mubr.msk.f32.gmra.mxu1 %vm1917_vm3, %v7536_v62  ;;  %v8096_v62 = vpop.f32.mrf.mxu1 }
 0x29a   : > { %5635 = vmatprep.mubr.msk.f32.mxu1 %vm1917_vm3, %v7540_v7 }
 0x29d   : > { %5636 = vmatmul.mubr.msk.f32.gmra.mxu1 %vm1917_vm3, %v7540_v7  ;;  %v8102_v7 = vpop.f32.mrf.mxu1 }
 0x29e   : > { %5637 = vmatprep.mubr.msk.f32.mxu1 %vm1917_vm3, %v7544_v14 }
 0x2a1   : > { %5638 = vmatmul.mubr.msk.f32.gmra.mxu1 %vm1917_vm3, %v7544_v14  ;;  %v8108_v14 = vpop.f32.mrf.mxu1 }
 0x2a2   : > { %5639 = vmatprep.mubr.msk.f32.mxu1 %vm1917_vm3, %v7550_v21 }
 0x2a5   : > { %5640 = vmatmul.mubr.msk.f32.gmra.mxu1 %vm1917_vm3, %v7550_v21  ;;  %v8114_v21 = vpop.f32.mrf.mxu1 }
 0x2a6   : > { %5641 = vmatprep.mubr.msk.f32.mxu1 %vm1917_vm3, %v7556_v34 }
 0x2a7   : > { %v8119_v48 = vpop.f32.mrf.mxu1 }
 0x2a9   : > { %5642 = vmatmul.mubr.msk.f32.gmra.mxu1 %vm1917_vm3, %v7556_v34  ;;  %v8121_v34 = vpop.f32.mrf.mxu1 }
 0x2aa   : > { %5643 = vmatprep.mubr.msk.f32.mxu1 %vm1917_vm3, %v7564_v40 }
 0x2ab   : > { %v8123_v32 = vpop.f32.mrf.mxu1 }
 0x2ad   : > { %5644 = vmatmul.mubr.msk.f32.gmra.mxu1 %vm1917_vm3, %v7564_v40 }
 0x2ae   : > { %5645 = vmatprep.mubr.msk.f32.mxu1 %vm1917_vm3, %v7570_v43 }
 0x2b1   : > { %5646 = vmatmul.mubr.msk.f32.gmra.mxu1 %vm1917_vm3, %v7570_v43 }
 0x2b2   : > { %3618 = vmatprep.mubr.f32.mxu1 %v10548_v24 }
 0x2bd   : > { %v8125_v12 = vpop.f32.mrf.mxu1 }
 0x2bf   : > { %v8127_v16 = vpop.f32.mrf.mxu1 }
 0x2c1   : > { %v8129_v40 = vpop.f32.mrf.mxu1 }
 0x2c2   : > { %10556 = vst [vmem:[#allocation46_spill] sm:$0xff] %v8129_v40 }
 0x2c3   : > { %v8131_v56 = vpop.f32.mrf.mxu1 }
 0x2c4   : > { %10557 = vst [vmem:[#allocation47_spill] sm:$0xff] %v8131_v56 }
 0x2c9   : > { %v8133_v29 = vpop.f32.mrf.mxu1 }
 0x2ca   : > { %10558 = vst [vmem:[#allocation48_spill] sm:$0xff] %v8133_v29  ;;  %v1054_v29 = vld [vmem:[#allocation5 + $0x18] sm:$0xff] }
 0x2cb   : > { %v8135_v51 = vpop.f32.mrf.mxu1 }
 0x2cc   : > { %10559 = vst [vmem:[#allocation49_spill] sm:$0xff] %v8135_v51 }
 0x2cd   : > { %v8137_v43 = vpop.f32.mrf.mxu1 }
 0x2ce   : > { %10560 = vst [vmem:[#allocation50_spill] sm:$0xff] %v8137_v43  ;;  %v1052_v43 = vld [vmem:[#allocation5 + $0x8] sm:$0xff] }
 0x2cf   : > { %v8139_v27 = vpop.f32.mrf.mxu1 }
 0x2d0   : > { %10561 = vst [vmem:[#allocation51_spill] sm:$0xff] %v8139_v27 }
 0x2d5   : > { %v8141_v2 = vpop.f32.mrf.mxu1 }
 0x2d6   : > { %10562 = vst [vmem:[#allocation52_spill] sm:$0xff] %v8141_v2 }
 0x2d7   : > { %v8143_v45 = vpop.f32.mrf.mxu1 }
 0x2d8   : > { %10563 = vst [vmem:[#allocation53_spill] sm:$0xff] %v8143_v45  ;;  %v1051_v45 = vld [vmem:[#allocation5] sm:$0xff] }
 0x2d9   : > { %v8145_v31 = vpop.f32.mrf.mxu1 }
 0x2da   : > { %10564 = vst [vmem:[#allocation54_spill] sm:$0xff] %v8145_v31 }
 0x2db   : > { %v8147_v17 = vpop.f32.mrf.mxu1 }
 0x2dc   : > { %10565 = vst [vmem:[#allocation55_spill] sm:$0xff] %v8147_v17 }
 0x2e1   : > { %v8149_v1 = vpop.f32.mrf.mxu1 }
 0x2e2   : > { %10566 = vst [vmem:[#allocation56_spill] sm:$0xff] %v8149_v1 }
 0x2e3   : > { %v8151_v53 = vpop.f32.mrf.mxu1 }
 0x2e4   : > { %10567 = vst [vmem:[#allocation57_spill] sm:$0xff] %v8151_v53 }
 0x2ec   : > { %v8153_v24 = vpop.f32.mrf.mxu1 }
 0x2ed   : > { %10568 = vst [vmem:[#allocation58_spill] sm:$0xff] %v8153_v24 }
 0x2ee   : > { %v8155_v52 = vpop.f32.mrf.mxu1 }
 0x2ef   : > { %10569 = vst [vmem:[#allocation59_spill] sm:$0xff] %v8155_v52  ;;  %v1053_v52 = vld [vmem:[#allocation5 + $0x10] sm:$0xff] }
 0x2f1   : > { %v8157_v15 = vpop.f32.mrf.mxu1 }
 0x2f2   : > { %10570 = vst [vmem:[#allocation60_spill] sm:$0xff] %v8157_v15 }
 0x2f3   : > { %v8159_v5 = vpop.f32.mrf.mxu1 }
 0x2f4   : > { %10571 = vst [vmem:[#allocation61_spill] sm:$0xff] %v8159_v5 }
 0x2f5   : > { %v2112_v27 = vpop.f32.mrf.mxu1 }
 0x2f6   : > { %v2113_v2 = vadd.f32 %v2112_v27, %v7868_v60  ;;  %v8171_v60 = vpop.f32.mrf.mxu0 }
 0x2f7   : > { %v2114_v31 = vpop.f32.mrf.mxu1  ;;  %10572 = vst [vmem:[#allocation62_spill] sm:$0xff] %v8171_v60 }
 0x2f8   : > { %v2115_v17 = vadd.f32 %v2114_v31, %v7872_v30  ;;  %v8163_v1 = vmul.f32 %v2113_v2, %v1051_v45  ;;  %v1055_v45 = vld [vmem:[#allocation5 + $0x20] sm:$0xff]  ;;  %v1056_v2 = vld [vmem:[#allocation5 + $0x28] sm:$0xff] }
 0x2f9   : > { %v2118_v51 = vpop.f32.mrf.mxu1 }
 0x2fa   : > { %v8165_v53 = vmul.f32 %v2115_v17, %v1052_v43  ;;  %v2119_v24 = vadd.f32 %v2118_v51, %v7880_v47  ;;  %v8181_v47 = vpop.f32.mrf.mxu0 }
 0x2fb   : > { %v2120_v15 = vpop.f32.mrf.mxu1  ;;  %10573 = vst [vmem:[#allocation63_spill] sm:$0xff] %v8181_v47 }
 0x2fc   : > { %v2121_v5 = vadd.f32 %v2120_v15, %v7884_v61  ;;  %v2367_v27 = vmax.f32 %v8163_v1, %v8165_v53  ;;  %v8173_v40 = vmul.f32 %v2119_v24, %v1053_v52  ;;  %v1057_v52 = vld [vmem:[#allocation5 + $0x30] sm:$0xff] }
 0x2fd   : > { %v2124_v56 = vpop.f32.mrf.mxu1 }
 0x2fe   : > { %v8175_v31 = vmul.f32 %v2121_v5, %v1054_v29  ;;  %v2125_v17 = vadd.f32 %v2124_v56, %v7891_v11  ;;  %2368 = vmax.xlane.f32.xlu0 %v2367_v27  ;;  %v1058_v56 = vld [vmem:[#allocation5 + $0x38] sm:$0xff]  ;;  %v8191_v27 = vpop.f32.mrf.mxu0 }
 0x2ff   : > { %v2126_v51 = vpop.f32.mrf.mxu1  ;;  %10574 = vst [vmem:[#allocation64_spill] sm:$0xff] %v8191_v27 }
 0x300   : > { %v2127_v30 = vadd.f32 %v2126_v51, %v7895_v19  ;;  %v2370_v15 = vmax.f32 %v8173_v40, %v8175_v31  ;;  %v8183_v43 = vmul.f32 %v2125_v17, %v1055_v45 }
 0x301   : > { %v2130_v61 = vpop.f32.mrf.mxu1 }
 0x302   : > { %v8185_v24 = vmul.f32 %v2127_v30, %v1056_v2  ;;  %v2131_v29 = vadd.f32 %v2130_v61, %v7902_v18  ;;  %2371 = vmax.xlane.f32.xlu1 %v2370_v15  ;;  %v1059_v18 = vld [vmem:[#allocation5 + $0x40] sm:$0xff]  ;;  %v1060_v2 = vld [vmem:[#allocation5 + $0x48] sm:$0xff]  ;;  %v8201_v61 = vpop.f32.mrf.mxu0 }
 0x303   : > { %v2132_v5 = vpop.f32.mrf.mxu1  ;;  %10575 = vst [vmem:[#allocation65_spill] sm:$0xff] %v8201_v61 }
 0x304   : > { %v2133_v11 = vadd.f32 %v2132_v5, %v7906_v9  ;;  %v2373_v19 = vmax.f32 %v8183_v43, %v8185_v24  ;;  %v8193_v60 = vmul.f32 %v2131_v29, %v1057_v52 }
 0x305   : > { %v2136_v51 = vpop.f32.mrf.mxu1 }
 0x306   : > { %v8195_v17 = vmul.f32 %v2133_v11, %v1058_v56  ;;  %v2137_v45 = vadd.f32 %v2136_v51, %v7914_v54  ;;  %2374 = vmax.xlane.f32.xlu0 %v2373_v19  ;;  %v1061_v54 = vld [vmem:[#allocation5 + $0x50] sm:$0xff]  ;;  %v1062_v56 = vld [vmem:[#allocation5 + $0x58] sm:$0xff]  ;;  %v8211_v51 = vpop.f32.mrf.mxu0 }
 0x307   : > { %v2138_v30 = vpop.f32.mrf.mxu1  ;;  %10576 = vst [vmem:[#allocation66_spill] sm:$0xff] %v8211_v51 }
 0x308   : > { %v2139_v15 = vadd.f32 %v2138_v30, %v7918_v58  ;;  %v2376_v9 = vmax.f32 %v8193_v60, %v8195_v17  ;;  %v8203_v27 = vmul.f32 %v2137_v45, %v1059_v18 }
 0x309   : > { %v2142_v5 = vpop.f32.mrf.mxu1 }
 0x30a   : > { %v8205_v29 = vmul.f32 %v2139_v15, %v1060_v2  ;;  %v2143_v52 = vadd.f32 %v2142_v5, %v7926_v50  ;;  %2377 = vmax.xlane.f32.xlu0 %v2376_v9  ;;  %v1063_v50 = vld [vmem:[#allocation5 + $0x60] sm:$0xff]  ;;  %v1064_v2 = vld [vmem:[#allocation5 + $0x68] sm:$0xff]  ;;  %v8221_v5 = vpop.f32.mrf.mxu0 }
 0x30b   : > { %v2144_v11 = vpop.f32.mrf.mxu1  ;;  %10577 = vst [vmem:[#allocation67_spill] sm:$0xff] %v8221_v5 }
 0x30c   : > { %v2145_v19 = vadd.f32 %v2144_v11, %v7930_v4  ;;  %v2379_v58 = vmax.f32 %v8203_v27, %v8205_v29  ;;  %v8213_v61 = vmul.f32 %v2143_v52, %v1061_v54 }
 0x30d   : > { %v2148_v30 = vpop.f32.mrf.mxu1 }
 0x30e   : > { %v8215_v45 = vmul.f32 %v2145_v19, %v1062_v56  ;;  %v2149_v18 = vadd.f32 %v2148_v30, %v7938_v39  ;;  %2380 = vmax.xlane.f32.xlu1 %v2379_v58  ;;  %v1065_v39 = vld [vmem:[#allocation5 + $0x70] sm:$0xff]  ;;  %v1066_v56 = vld [vmem:[#allocation5 + $0x78] sm:$0xff]  ;;  %v8231_v30 = vpop.f32.mrf.mxu0 }
 0x30f   : > { %v2150_v15 = vpop.f32.mrf.mxu1  ;;  %10578 = vst [vmem:[#allocation68_spill] sm:$0xff] %v8231_v30 }
 0x310   : > { %v2151_v9 = vadd.f32 %v2150_v15, %v7942_v35  ;;  %v2382_v4 = vmax.f32 %v8213_v61, %v8215_v45  ;;  %v8223_v51 = vmul.f32 %v2149_v18, %v1063_v50 }
 0x311   : > { %v2154_v11 = vpop.f32.mrf.mxu1 }
 0x312   : > { %v8225_v52 = vmul.f32 %v2151_v9, %v1064_v2  ;;  %v2155_v54 = vadd.f32 %v2154_v11, %v7950_v38  ;;  %2383 = vmax.xlane.f32.xlu0 %v2382_v4  ;;  %v1067_v38 = vld [vmem:[#allocation5 + $0x80] sm:$0xff]  ;;  %v1068_v2 = vld [vmem:[#allocation5 + $0x88] sm:$0xff]  ;;  %v8241_v11 = vpop.f32.mrf.mxu0 }
 0x313   : > { %v2156_v19 = vpop.f32.mrf.mxu1  ;;  %10579 = vst [vmem:[#allocation69_spill] sm:$0xff] %v8241_v11 }
 0x314   : > { %v2157_v58 = vadd.f32 %v2156_v19, %v7954_v0  ;;  %v2385_v35 = vmax.f32 %v8223_v51, %v8225_v52  ;;  %v8233_v5 = vmul.f32 %v2155_v54, %v1065_v39 }
 0x315   : > { %v2160_v15 = vpop.f32.mrf.mxu1 }
 0x316   : > { %v8235_v18 = vmul.f32 %v2157_v58, %v1066_v56  ;;  %v2161_v50 = vadd.f32 %v2160_v15, %v7962_v8  ;;  %2386 = vmax.xlane.f32.xlu1 %v2385_v35  ;;  %v1069_v8 = vld [vmem:[#allocation5 + $0x90] sm:$0xff]  ;;  %v1070_v56 = vld [vmem:[#allocation5 + $0x98] sm:$0xff]  ;;  %v8251_v15 = vpop.f32.mrf.mxu0 }
 0x317   : > { %v2162_v9 = vpop.f32.mrf.mxu1  ;;  %10580 = vst [vmem:[#allocation70_spill] sm:$0xff] %v8251_v15 }
 0x318   : > { %v2163_v4 = vadd.f32 %v2162_v9, %v7966_v36  ;;  %v2388_v0 = vmax.f32 %v8233_v5, %v8235_v18  ;;  %v8243_v30 = vmul.f32 %v2161_v50, %v1067_v38 }
 0x319   : > { %v2166_v19 = vpop.f32.mrf.mxu1 }
 0x31a   : > { %v8245_v54 = vmul.f32 %v2163_v4, %v1068_v2  ;;  %v2167_v39 = vadd.f32 %v2166_v19, %v7974_v3  ;;  %2389 = vmax.xlane.f32.xlu0 %v2388_v0  ;;  %v1071_v3 = vld [vmem:[#allocation5 + $0xa0] sm:$0xff]  ;;  %v1072_v2 = vld [vmem:[#allocation5 + $0xa8] sm:$0xff]  ;;  %v8261_v19 = vpop.f32.mrf.mxu0 }
 0x31b   : > { %v2168_v58 = vpop.f32.mrf.mxu1  ;;  %10581 = vst [vmem:[#allocation71_spill] sm:$0xff] %v8261_v19 }
 0x31c   : > { %v2169_v35 = vadd.f32 %v2168_v58, %v7978_v10  ;;  %v2391_v36 = vmax.f32 %v8243_v30, %v8245_v54  ;;  %v8253_v11 = vmul.f32 %v2167_v39, %v1069_v8 }
 0x31d   : > { %v2172_v9 = vpop.f32.mrf.mxu1 }
 0x31e   : > { %v8255_v50 = vmul.f32 %v2169_v35, %v1070_v56  ;;  %v2173_v38 = vadd.f32 %v2172_v9, %v7988_v46  ;;  %2392 = vmax.xlane.f32.xlu1 %v2391_v36  ;;  %v1073_v46 = vld [vmem:[#allocation5 + $0xb0] sm:$0xff]  ;;  %v1074_v56 = vld [vmem:[#allocation5 + $0xb8] sm:$0xff]  ;;  %v8271_v9 = vpop.f32.mrf.mxu0 }
 0x31f   : > { %v2174_v4 = vpop.f32.mrf.mxu1  ;;  %10582 = vst [vmem:[#allocation72_spill] sm:$0xff] %v8271_v9 }
 0x320   : > { %v2175_v0 = vadd.f32 %v2174_v4, %v7998_v55  ;;  %v2394_v10 = vmax.f32 %v8253_v11, %v8255_v50  ;;  %v8263_v15 = vmul.f32 %v2173_v38, %v1071_v3 }
 0x321   : > { %v2178_v58 = vpop.f32.mrf.mxu1 }
 0x322   : > { %v8265_v39 = vmul.f32 %v2175_v0, %v1072_v2  ;;  %v2179_v8 = vadd.f32 %v2178_v58, %v8006_v28  ;;  %2395 = vmax.xlane.f32.xlu0 %v2394_v10  ;;  %v1075_v28 = vld [vmem:[#allocation5 + $0xc0] sm:$0xff]  ;;  %v1076_v2 = vld [vmem:[#allocation5 + $0xc8] sm:$0xff]  ;;  %v8281_v58 = vpop.f32.mrf.mxu0 }
 0x323   : > { %v2180_v35 = vpop.f32.mrf.mxu1  ;;  %10583 = vst [vmem:[#allocation73_spill] sm:$0xff] %v8281_v58 }
 0x324   : > { %v2181_v36 = vadd.f32 %v2180_v35, %v8010_v6  ;;  %v2397_v55 = vmax.f32 %v8263_v15, %v8265_v39  ;;  %v8273_v19 = vmul.f32 %v2179_v8, %v1073_v46 }
 0x325   : > { %v2184_v4 = vpop.f32.mrf.mxu1 }
 0x326   : > { %v8275_v38 = vmul.f32 %v2181_v36, %v1074_v56  ;;  %v2185_v3 = vadd.f32 %v2184_v4, %v8018_v37  ;;  %2398 = vmax.xlane.f32.xlu1 %v2397_v55  ;;  %v1077_v37 = vld [vmem:[#allocation5 + $0xd0] sm:$0xff]  ;;  %v1078_v56 = vld [vmem:[#allocation5 + $0xd8] sm:$0xff]  ;;  %v8291_v4 = vpop.f32.mrf.mxu0 }
 0x327   : > { %v2186_v0 = vpop.f32.mrf.mxu1  ;;  %10584 = vst [vmem:[#allocation74_spill] sm:$0xff] %v8291_v4 }
 0x328   : > { %v2187_v10 = vadd.f32 %v2186_v0, %v8024_v59  ;;  %v2400_v6 = vmax.f32 %v8273_v19, %v8275_v38  ;;  %v8283_v47 = vmul.f32 %v2185_v3, %v1075_v28 }
 0x329   : > { %v2190_v35 = vpop.f32.mrf.mxu1 }
 0x32a   : > { %v8285_v8 = vmul.f32 %v2187_v10, %v1076_v2  ;;  %v2191_v46 = vadd.f32 %v2190_v35, %v8030_v44  ;;  %2401 = vmax.xlane.f32.xlu0 %v2400_v6  ;;  %v1079_v44 = vld [vmem:[#allocation5 + $0xe0] sm:$0xff]  ;;  %v1080_v2 = vld [vmem:[#allocation5 + $0xe8] sm:$0xff]  ;;  %v8301_v35 = vpop.f32.mrf.mxu0 }
 0x32b   : > { %v2192_v36 = vpop.f32.mrf.mxu1  ;;  %10585 = vst [vmem:[#allocation75_spill] sm:$0xff] %v8301_v35 }
 0x32c   : > { %v2193_v55 = vadd.f32 %v2192_v36, %v8032_v13  ;;  %v2403_v59 = vmax.f32 %v8283_v47, %v8285_v8  ;;  %v8293_v58 = vmul.f32 %v2191_v46, %v1077_v37 }
 0x32d   : > { %v2196_v0 = vpop.f32.mrf.mxu1 }
 0x32e   : > { %v8295_v3 = vmul.f32 %v2193_v55, %v1078_v56  ;;  %v2197_v28 = vadd.f32 %v2196_v0, %v8038_v22  ;;  %2404 = vmax.xlane.f32.xlu1 %v2403_v59  ;;  %v1081_v22 = vld [vmem:[#allocation5 + $0xf0] sm:$0xff]  ;;  %v1082_v56 = vld [vmem:[#allocation5 + $0xf8] sm:$0xff]  ;;  %v8311_v0 = vpop.f32.mrf.mxu0 }
 0x32f   : > { %v2198_v10 = vpop.f32.mrf.mxu1  ;;  %10586 = vst [vmem:[#allocation76_spill] sm:$0xff] %v8311_v0 }
 0x330   : > { %v2199_v6 = vadd.f32 %v2198_v10, %v8044_v57  ;;  %v2406_v13 = vmax.f32 %v8293_v58, %v8295_v3  ;;  %v8303_v4 = vmul.f32 %v2197_v28, %v1079_v44 }
 0x331   : > { %v2202_v36 = vpop.f32.mrf.mxu1 }
 0x332   : > { %v8305_v46 = vmul.f32 %v2199_v6, %v1080_v2  ;;  %v2203_v37 = vadd.f32 %v2202_v36, %v8050_v33  ;;  %2407 = vmax.xlane.f32.xlu0 %v2406_v13  ;;  %v1083_v33 = vld [vmem:[#allocation5 + $0x100] sm:$0xff]  ;;  %v1084_v2 = vld [vmem:[#allocation5 + $0x108] sm:$0xff]  ;;  %v8321_v36 = vpop.f32.mrf.mxu0 }
 0x333   : > { %v2204_v55 = vpop.f32.mrf.mxu1  ;;  %10587 = vst [vmem:[#allocation77_spill] sm:$0xff] %v8321_v36 }
 0x334   : > { %v2205_v59 = vadd.f32 %v2204_v55, %v8052_v20  ;;  %v2409_v57 = vmax.f32 %v8303_v4, %v8305_v46  ;;  %v8313_v35 = vmul.f32 %v2203_v37, %v1081_v22 }
 0x335   : > { %v2208_v10 = vpop.f32.mrf.mxu1 }
 0x336   : > { %v8315_v28 = vmul.f32 %v2205_v59, %v1082_v56  ;;  %v2209_v44 = vadd.f32 %v2208_v10, %v8058_v26  ;;  %2410 = vmax.xlane.f32.xlu1 %v2409_v57  ;;  %v1085_v26 = vld [vmem:[#allocation5 + $0x110] sm:$0xff]  ;;  %v1086_v56 = vld [vmem:[#allocation5 + $0x118] sm:$0xff]  ;;  %v8331_v10 = vpop.f32.mrf.mxu0 }
 0x337   : > { %v2210_v6 = vpop.f32.mrf.mxu1  ;;  %10588 = vst [vmem:[#allocation78_spill] sm:$0xff] %v8331_v10 }
 0x338   : > { %v2211_v13 = vadd.f32 %v2210_v6, %v8060_v25  ;;  %v2412_v20 = vmax.f32 %v8313_v35, %v8315_v28  ;;  %v8323_v0 = vmul.f32 %v2209_v44, %v1083_v33 }
 0x339   : > { %v2214_v55 = vpop.f32.mrf.mxu1 }
 0x33a   : > { %v8325_v37 = vmul.f32 %v2211_v13, %v1084_v2  ;;  %v2215_v22 = vadd.f32 %v2214_v55, %v8066_v42  ;;  %2413 = vmax.xlane.f32.xlu1 %v2412_v20  ;;  %v1087_v42 = vld [vmem:[#allocation5 + $0x120] sm:$0xff]  ;;  %v1088_v2 = vld [vmem:[#allocation5 + $0x128] sm:$0xff]  ;;  %v8341_v55 = vpop.f32.mrf.mxu0 }
 0x33b   : > { %v2216_v59 = vpop.f32.mrf.mxu1  ;;  %10589 = vst [vmem:[#allocation79_spill] sm:$0xff] %v8341_v55 }
 0x33c   : > { %v2217_v57 = vadd.f32 %v2216_v59, %v8072_v63  ;;  %v2415_v25 = vmax.f32 %v8323_v0, %v8325_v37  ;;  %v8333_v36 = vmul.f32 %v2215_v22, %v1085_v26 }
 0x33d   : > { %v2220_v6 = vpop.f32.mrf.mxu1 }
 0x33e   : > { %v8335_v44 = vmul.f32 %v2217_v57, %v1086_v56  ;;  %v2221_v33 = vadd.f32 %v2220_v6, %v8078_v23  ;;  %2416 = vmax.xlane.f32.xlu0 %v2415_v25  ;;  %v1089_v23 = vld [vmem:[#allocation5 + $0x130] sm:$0xff]  ;;  %v1090_v56 = vld [vmem:[#allocation5 + $0x138] sm:$0xff]  ;;  %v8351_v6 = vpop.f32.mrf.mxu0 }
 0x33f   : > { %v2222_v13 = vpop.f32.mrf.mxu1  ;;  %10590 = vst [vmem:[#allocation80_spill] sm:$0xff] %v8351_v6 }
 0x340   : > { %v2223_v20 = vadd.f32 %v2222_v13, %v8084_v41  ;;  %v2418_v63 = vmax.f32 %v8333_v36, %v8335_v44  ;;  %v8343_v9 = vmul.f32 %v2221_v33, %v1087_v42 }
 0x341   : > { %v2226_v59 = vpop.f32.mrf.mxu1 }
 0x342   : > { %v8345_v22 = vmul.f32 %v2223_v20, %v1088_v2  ;;  %v2227_v26 = vadd.f32 %v2226_v59, %v8090_v49  ;;  %2419 = vmax.xlane.f32.xlu1 %v2418_v63  ;;  %v1091_v49 = vld [vmem:[#allocation5 + $0x140] sm:$0xff]  ;;  %v1092_v2 = vld [vmem:[#allocation5 + $0x148] sm:$0xff]  ;;  %v8361_v59 = vpop.f32.mrf.mxu0 }
 0x343   : > { %v2228_v57 = vpop.f32.mrf.mxu1  ;;  %10591 = vst [vmem:[#allocation81_spill] sm:$0xff] %v8361_v59 }
 0x344   : > { %v2229_v25 = vadd.f32 %v2228_v57, %v8096_v62  ;;  %v2421_v41 = vmax.f32 %v8343_v9, %v8345_v22  ;;  %v8353_v55 = vmul.f32 %v2227_v26, %v1089_v23 }
 0x345   : > { %v2232_v13 = vpop.f32.mrf.mxu1 }
 0x346   : > { %v8355_v33 = vmul.f32 %v2229_v25, %v1090_v56  ;;  %v2233_v42 = vadd.f32 %v2232_v13, %v8102_v7  ;;  %2422 = vmax.xlane.f32.xlu0 %v2421_v41  ;;  %v1093_v7 = vld [vmem:[#allocation5 + $0x150] sm:$0xff]  ;;  %v1094_v56 = vld [vmem:[#allocation5 + $0x158] sm:$0xff]  ;;  %v8371_v13 = vpop.f32.mrf.mxu0 }
 0x347   : > { %v2234_v20 = vpop.f32.mrf.mxu1  ;;  %10592 = vst [vmem:[#allocation82_spill] sm:$0xff] %v8371_v13 }
 0x348   : > { %v2235_v63 = vadd.f32 %v2234_v20, %v8108_v14  ;;  %v2424_v62 = vmax.f32 %v8353_v55, %v8355_v33  ;;  %v8363_v6 = vmul.f32 %v2233_v42, %v1091_v49 }
 0x349   : > { %v2238_v57 = vpop.f32.mrf.mxu1 }
 0x34a   : > { %v8365_v26 = vmul.f32 %v2235_v63, %v1092_v2  ;;  %v2239_v23 = vadd.f32 %v2238_v57, %v8114_v21  ;;  %2425 = vmax.xlane.f32.xlu1 %v2424_v62  ;;  %v1095_v21 = vld [vmem:[#allocation5 + $0x160] sm:$0xff]  ;;  %v1096_v2 = vld [vmem:[#allocation5 + $0x168] sm:$0xff]  ;;  %v8381_v57 = vpop.f32.mrf.mxu0 }
 0x34b   : > { %v2240_v25 = vpop.f32.mrf.mxu1  ;;  %10593 = vst [vmem:[#allocation83_spill] sm:$0xff] %v8381_v57 }
 0x34c   : > { %v2241_v41 = vadd.f32 %v2240_v25, %v8119_v48  ;;  %v2427_v14 = vmax.f32 %v8363_v6, %v8365_v26  ;;  %v8373_v59 = vmul.f32 %v2239_v23, %v1093_v7 }
 0x34d   : > { %v2244_v20 = vpop.f32.mrf.mxu1 }
 0x34e   : > { %v8375_v42 = vmul.f32 %v2241_v41, %v1094_v56  ;;  %v2245_v49 = vadd.f32 %v2244_v20, %v8121_v34  ;;  %2428 = vmax.xlane.f32.xlu0 %v2427_v14  ;;  %v1097_v34 = vld [vmem:[#allocation5 + $0x170] sm:$0xff]  ;;  %v1098_v56 = vld [vmem:[#allocation5 + $0x178] sm:$0xff]  ;;  %v8391_v20 = vpop.f32.mrf.mxu0 }
 0x34f   : > { %v2246_v63 = vpop.f32.mrf.mxu1  ;;  %10596 = vst [vmem:[#allocation86_spill] sm:$0xff] %v8391_v20 }
 0x350   : > { %v2247_v62 = vadd.f32 %v2246_v63, %v8123_v32  ;;  %v2430_v48 = vmax.f32 %v8373_v59, %v8375_v42  ;;  %v8383_v13 = vmul.f32 %v2245_v49, %v1095_v21  ;;  %v10599_v21 = vld [vmem:[#allocation46_spill] sm:$0xff] }
 0x351   : > { %v2250_v25 = vpop.f32.mrf.mxu1 }
 0x352   : > { %10594 = vst [vmem:[#allocation84_spill] sm:$0xff] %v8383_v13  ;;  %v8385_v23 = vmul.f32 %v2247_v62, %v1096_v2  ;;  %v2251_v7 = vadd.f32 %v2250_v25, %v8125_v12  ;;  %2431 = vmax.xlane.f32.xlu1 %v2430_v48  ;;  %v1099_v12 = vld [vmem:[#allocation5 + $0x180] sm:$0xff]  ;;  %v1100_v62 = vld [vmem:[#allocation5 + $0x188] sm:$0xff] }
 0x353   : > { %v2252_v41 = vpop.f32.mrf.mxu1  ;;  %v10600_v25 = vld [vmem:[#allocation47_spill] sm:$0xff] }
 0x354   : > { %10595 = vst [vmem:[#allocation85_spill] sm:$0xff] %v8385_v23  ;;  %v2253_v14 = vadd.f32 %v2252_v41, %v8127_v16  ;;  %v2433_v32 = vmax.f32 %v8383_v13, %v8385_v23  ;;  %v8393_v57 = vmul.f32 %v2251_v7, %v1097_v34  ;;  %v8401_v41 = vpop.f32.mrf.mxu0  ;;  %v10604_v34 = vld [vmem:[#allocation48_spill] sm:$0xff] }
 0x355   : > { %v2256_v63 = vpop.f32.mrf.mxu1  ;;  %10601 = vst [vmem:[#allocation46_spill] sm:$0xff] %v8401_v41 }
 0x356   : > { %10597 = vst [vmem:[#allocation87_spill] sm:$0xff] %v8393_v57  ;;  %v8395_v49 = vmul.f32 %v2253_v14, %v1098_v56  ;;  %v2257_v2 = vadd.f32 %v2256_v63, %v10599_v21  ;;  %2434 = vmax.xlane.f32.xlu0 %v2433_v32  ;;  %v1101_v14 = vld [vmem:[#allocation5 + $0x190] sm:$0xff]  ;;  %v1102_v32 = vld [vmem:[#allocation5 + $0x198] sm:$0xff] }
 0x357   : > { %v2258_v48 = vpop.f32.mrf.mxu1  ;;  %v10605_v21 = vld [vmem:[#allocation49_spill] sm:$0xff] }
 0x358   : > { %10598 = vst [vmem:[#allocation88_spill] sm:$0xff] %v8395_v49  ;;  %v2259_v10 = vadd.f32 %v2258_v48, %v10600_v25  ;;  %v2436_v16 = vmax.f32 %v8393_v57, %v8395_v49  ;;  %v8403_v20 = vmul.f32 %v2257_v2, %v1099_v12  ;;  %v8411_v25 = vpop.f32.mrf.mxu0 }
 0x359   : > { %v2262_v23 = vpop.f32.mrf.mxu1  ;;  %10606 = vst [vmem:[#allocation48_spill] sm:$0xff] %v8411_v25 }
 0x35a   : > { %10602 = vst [vmem:[#allocation47_spill] sm:$0xff] %v8403_v20  ;;  %v8405_v7 = vmul.f32 %v2259_v10, %v1100_v62  ;;  %v2263_v56 = vadd.f32 %v2262_v23, %v10604_v34  ;;  %2437 = vmax.xlane.f32.xlu0 %v2436_v16  ;;  %v10609_v10 = vld [vmem:[#allocation50_spill] sm:$0xff]  ;;  %v1103_v23 = vld [vmem:[#allocation5 + $0x1a0] sm:$0xff]  ;;  %v1104_v62 = vld [vmem:[#allocation5 + $0x1a8] sm:$0xff] }
 0x35b   : > { %v2264_v63 = vpop.f32.mrf.mxu1  ;;  %v10610_v34 = vld [vmem:[#allocation51_spill] sm:$0xff] }
 0x35c   : > { %10603 = vst [vmem:[#allocation89_spill] sm:$0xff] %v8405_v7  ;;  %v2265_v13 = vadd.f32 %v2264_v63, %v10605_v21  ;;  %v2439_v48 = vmax.f32 %v8403_v20, %v8405_v7  ;;  %v8413_v41 = vmul.f32 %v2263_v56, %v1101_v14  ;;  %v8421_v21 = vpop.f32.mrf.mxu0  ;;  %v10621_v20 = vld [vmem:[#allocation55_spill] sm:$0xff] }
 0x35d   : > { %v2268_v49 = vpop.f32.mrf.mxu1  ;;  %10611 = vst [vmem:[#allocation50_spill] sm:$0xff] %v8421_v21 }
 0x35e   : > { %10607 = vst [vmem:[#allocation49_spill] sm:$0xff] %v8413_v41  ;;  %v8415_v2 = vmul.f32 %v2265_v13, %v1102_v32  ;;  %v2269_v12 = vadd.f32 %v2268_v49, %v10609_v10  ;;  %2440 = vmax.xlane.f32.xlu0 %v2439_v48  ;;  %v10614_v13 = vld [vmem:[#allocation52_spill] sm:$0xff]  ;;  %v1105_v49 = vld [vmem:[#allocation5 + $0x1b0] sm:$0xff]  ;;  %v1106_v32 = vld [vmem:[#allocation5 + $0x1b8] sm:$0xff]  ;;  %v8433_v21 = vpop.f32.mrf.mxu0 }
 0x35f   : > { %v2270_v16 = vpop.f32.mrf.mxu1  ;;  %v10615_v10 = vld [vmem:[#allocation31_spill] sm:$0xff]  ;;  %10617 = vst [vmem:[#allocation52_spill] sm:$0xff] %v8433_v21 }
 0x360   : > { %10608 = vst [vmem:[#allocation90_spill] sm:$0xff] %v8415_v2  ;;  %v2271_v57 = vadd.f32 %v2270_v16, %v10610_v34  ;;  %v2442_v63 = vmax.f32 %v8413_v41, %v8415_v2  ;;  %v8423_v25 = vmul.f32 %v2269_v12, %v1103_v23  ;;  %v10616_v16 = vld [vmem:[#allocation53_spill] sm:$0xff] }
 0x361   : > { %v2274_v7 = vpop.f32.mrf.mxu1 }
 0x362   : > { %10612 = vst [vmem:[#allocation51_spill] sm:$0xff] %v8423_v25  ;;  %v8425_v56 = vmul.f32 %v2271_v57, %v1104_v62  ;;  %v2275_v14 = vadd.f32 %v2274_v7, %v10614_v13  ;;  %2443 = vmax.xlane.f32.xlu0 %v2442_v63  ;;  %v10620_v7 = vld [vmem:[#allocation54_spill] sm:$0xff]  ;;  %v1107_v63 = vld [vmem:[#allocation5 + $0x1c0] sm:$0xff]  ;;  %v1108_v13 = vld [vmem:[#allocation5 + $0x1c8] sm:$0xff] }
 0x363   : > { %v2276_v48 = vpop.f32.mrf.mxu1  ;;  %2881 = vrot.lane.b32.xlu1 %v10615_v10, %s6812_s12 }
 0x364   : > { %10613 = vst [vmem:[#allocation91_spill] sm:$0xff] %v8425_v56  ;;  %v2277_v34 = vadd.f32 %v2276_v48, %v10616_v16  ;;  %v2445_v2 = vmax.f32 %v8423_v25, %v8425_v56  ;;  %v8435_v23 = vmul.f32 %v2275_v14, %v1105_v49  ;;  %v8443_v16 = vpop.f32.mrf.mxu0 }
 0x365   : > { %v2280_v12 = vpop.f32.mrf.mxu1  ;;  %10622 = vst [vmem:[#allocation54_spill] sm:$0xff] %v8443_v16  ;;  %v1114_v16 = vld [vmem:[#allocation5 + $0x1f8] sm:$0xff] }
 0x366   : > { %10618 = vst [vmem:[#allocation31_spill] sm:$0xff] %v8435_v23  ;;  %v8437_v57 = vmul.f32 %v2277_v34, %v1106_v32  ;;  %v2281_v62 = vadd.f32 %v2280_v12, %v10620_v7  ;;  %2446 = vmax.xlane.f32.xlu0 %v2445_v2  ;;  %v8453_v32 = vpop.f32.mrf.mxu0 }
 0x367   : > { %v2282_v41 = vpop.f32.mrf.mxu1  ;;  %10625 = vst [vmem:[#allocation93_spill] sm:$0xff] %v8453_v32  ;;  %v10634_v32 = vld [vmem:[#allocation33_spill] sm:$0xff] }
 0x368   : > { %10619 = vst [vmem:[#allocation53_spill] sm:$0xff] %v8437_v57  ;;  %v2283_v10 = vadd.f32 %v2282_v41, %v10621_v20  ;;  %v2448_v48 = vmax.f32 %v8435_v23, %v8437_v57  ;;  %v8447_v21 = vmul.f32 %v2281_v62, %v1107_v63  ;;  %v8457_v20 = vpop.f32.mrf.mxu0  ;;  %v1113_v57 = vld [vmem:[#allocation5 + $0x1f0] sm:$0xff] }
 0x369   : > { %v8445_v56 = vpop.f32.mrf.mxu1  ;;  %10626 = vst [vmem:[#allocation94_spill] sm:$0xff] %v8457_v20 }
 0x36a   : > { %10623 = vst [vmem:[#allocation55_spill] sm:$0xff] %v8447_v21  ;;  %v8449_v14 = vmul.f32 %v2283_v10, %v1108_v13  ;;  %2449 = vmax.xlane.f32.xlu0 %v2448_v48  ;;  %v8461_v12 = vpop.f32.mrf.mxu0  ;;  %v10629_v10 = vld [vmem:[#allocation61_spill] sm:$0xff] }
 0x36b   : > { %v2288_v49 = vpop.f32.mrf.mxu1 }
 0x36c   : > { %10624 = vst [vmem:[#allocation92_spill] sm:$0xff] %v8449_v14  ;;  %v2451_v2 = vmax.f32 %v8447_v21, %v8449_v14  ;;  %v8463_v62 = vpop.f32.mrf.mxu0  ;;  %v10630_v14 = vld [vmem:[#allocation60_spill] sm:$0xff] }
 0x36d   : > { %v8455_v34 = vpop.f32.mrf.mxu1  ;;  %10627 = vst [vmem:[#allocation95_spill] sm:$0xff] %v8463_v62 }
 0x36e   : > { %2452 = vmax.xlane.f32.xlu0 %v2451_v2  ;;  %v8465_v13 = vpop.f32.mrf.mxu0 }
 0x36f   : > { %v8459_v41 = vpop.f32.mrf.mxu1  ;;  %10628 = vst [vmem:[#allocation96_spill] sm:$0xff] %v8465_v13 }
 0x370   : > { %v8469_v23 = vpop.f32.mrf.mxu0 }
 0x371   : > { %v2298_v7 = vpop.f32.mrf.mxu1  ;;  %10631 = vst [vmem:[#allocation61_spill] sm:$0xff] %v8469_v23 }
 0x372   : > { %v2299_v21 = vadd.f32 %v2298_v7, %v10630_v14  ;;  %v8477_v25 = vpop.f32.mrf.mxu0 }
 0x373   : > { %v2300_v63 = vpop.f32.mrf.mxu1  ;;  %10635 = vst [vmem:[#allocation33_spill] sm:$0xff] %v8477_v25 }
 0x374   : > { %v2301_v48 = vadd.f32 %v2300_v63, %v10629_v10  ;;  %v8473_v20 = vmul.f32 %v2299_v21, %v1113_v57  ;;  %v8483_v7 = vpop.f32.mrf.mxu0 }
 0x375   : > { %10636 = vst [vmem:[#allocation98_spill] sm:$0xff] %v8483_v7 }
 0x376   : > { %v8471_v2 = vmul.f32 %v2301_v48, %v1114_v16  ;;  %10633 = vst [vmem:[#allocation97_spill] sm:$0xff] %v8473_v20  ;;  %v8487_v23 = vpop.f32.mrf.mxu0 }
 0x377   : > { %10637 = vst [vmem:[#allocation99_spill] sm:$0xff] %v8487_v23 }
 0x378   : > { %10632 = vst [vmem:[#allocation60_spill] sm:$0xff] %v8471_v2  ;;  %v2460_v62 = vmax.f32 %v8473_v20, %v8471_v2 }
 0x384   : > { %2883 = vrot.lane.b32.xlu0 %v10634_v32, %s6812_s12 }
 0x387   : > { %2461 = vmax.xlane.f32.xlu1 %v2460_v62  ;;  %v2369_v63 = vpop.xlane.xlu0 %2368 }
 0x388   : > { %v2463_v10 = vsub.f32 %v8163_v1, %v2369_v63  ;;  %v2464_v14 = vsub.f32 %v8165_v53, %v2369_v63  ;;  %v8491_v63 = vpop.f32.mrf.mxu0 }
 0x389   : > { %10638 = vst [vmem:[#allocation100_spill] sm:$0xff] %v8491_v63 }
 0x38a   : > { %v2527_v16 = vmul.f32 1.442695, %v2463_v10  ;;  %v2529_v48 = vmul.f32 1.442695, %v2464_v14 }
 0x38b   : > { %v2372_v21 = vpop.xlane.xlu1 %2371 }
 0x38c   : > { %6200 = vpow2.f32 %v2527_v16  ;;  %v2465_v57 = vsub.f32 %v8173_v40, %v2372_v21  ;;  %v2466_v32 = vsub.f32 %v8175_v31, %v2372_v21 }
 0x38d   : > { %6202 = vpow2.f32 %v2529_v48  ;;  %v8495_v48 = vpop.f32.mrf.mxu0 }
 0x38e   : > { %v2531_v13 = vmul.f32 1.442695, %v2465_v57  ;;  %v2533_v62 = vmul.f32 1.442695, %v2466_v32  ;;  %10639 = vst [vmem:[#allocation101_spill] sm:$0xff] %v8495_v48 }
 0x38f   : > { %v2375_v25 = vpop.xlane.xlu0 %2374  ;;  %v8501_v32 = vpop.f32.mrf.mxu0 }
 0x390   : > { %6204 = vpow2.f32 %v2531_v13  ;;  %v2467_v1 = vsub.f32 %v8183_v43, %v2375_v25  ;;  %v2468_v53 = vsub.f32 %v8185_v24, %v2375_v25  ;;  %10640 = vst [vmem:[#allocation102_spill] sm:$0xff] %v8501_v32 }
 0x391   : > { %6206 = vpow2.f32 %v2533_v62  ;;  %v10641_v62 = vld [vmem:[#allocation57_spill] sm:$0xff] }
 0x392   : > { %v2535_v10 = vmul.f32 1.442695, %v2467_v1  ;;  %v2537_v14 = vmul.f32 1.442695, %v2468_v53  ;;  %v2289_v1 = vadd.f32 %v2288_v49, %v10641_v62 }
 0x393   : > { %v2378_v16 = vpop.xlane.xlu0 %2377 }
 0x394   : > { %6208 = vpow2.f32 %v2535_v10  ;;  %v2469_v40 = vsub.f32 %v8193_v60, %v2378_v16  ;;  %v2470_v31 = vsub.f32 %v8195_v17, %v2378_v16  ;;  %v1110_v17 = vld [vmem:[#allocation5 + $0x1d8] sm:$0xff] }
 0x395   : > { %6210 = vpow2.f32 %v2537_v14  ;;  %v10642_v14 = vld [vmem:[#allocation56_spill] sm:$0xff] }
 0x396   : > { %v2539_v21 = vmul.f32 1.442695, %v2469_v40  ;;  %v2541_v13 = vmul.f32 1.442695, %v2470_v31  ;;  %v2287_v16 = vadd.f32 %v8445_v56, %v10642_v14 }
 0x397   : > { %v2381_v57 = vpop.xlane.xlu1 %2380 }
 0x398   : > { %6212 = vpow2.f32 %v2539_v21  ;;  %v2471_v43 = vsub.f32 %v8203_v27, %v2381_v57  ;;  %v2472_v24 = vsub.f32 %v8205_v29, %v2381_v57  ;;  %v1109_v29 = vld [vmem:[#allocation5 + $0x1d0] sm:$0xff]  ;;  %v8516_v57 = vmul.f32 %v2289_v1, %v1110_v17 }
 0x399   : > { %v8499_v25 = vpop.eup %6200  ;;  %6214 = vpow2.f32 %v2541_v13  ;;  %v8514_v13 = vpop.f32.mrf.mxu0  ;;  %v8520_v62 = vmul.f32 %v2287_v16, %v1109_v29 }
 0x39a   : > { %v8504_v60 = vpop.eup %6202  ;;  %v2543_v53 = vmul.f32 1.442695, %v2471_v43  ;;  %v2545_v10 = vmul.f32 1.442695, %v2472_v24  ;;  %10643 = vst [vmem:[#allocation57_spill] sm:$0xff] %v8514_v13 }
 0x39b   : > { %v2384_v40 = vpop.xlane.xlu0 %2383  ;;  %v2655_v27 = vadd.f32 %v8504_v60, %v8499_v25  ;;  %v8528_v1 = vpop.f32.mrf.mxu0  ;;  %v2454_v17 = vmax.f32 %v8520_v62, %v8516_v57 }
 0x39c   : > { %6216 = vpow2.f32 %v2543_v53  ;;  %v2473_v31 = vsub.f32 %v8213_v61, %v2384_v40  ;;  %v2474_v21 = vsub.f32 %v8215_v45, %v2384_v40  ;;  %10644 = vst [vmem:[#allocation56_spill] sm:$0xff] %v8528_v1 }
 0x39d   : > { %v8512_v49 = vpop.eup %6204  ;;  %6218 = vpow2.f32 %v2545_v10  ;;  %2656 = vadd.xlane.f32.xlu1 %v2655_v27 }
 0x39e   : > { %v8518_v43 = vpop.eup %6206  ;;  %v2547_v56 = vmul.f32 1.442695, %v2473_v31  ;;  %v2549_v24 = vmul.f32 1.442695, %v2474_v21 }
 0x39f   : > { %v2387_v14 = vpop.xlane.xlu1 %2386  ;;  %v2658_v61 = vadd.f32 %v8518_v43, %v8512_v49 }
 0x3a0   : > { %6220 = vpow2.f32 %v2547_v56  ;;  %v2475_v45 = vsub.f32 %v8223_v51, %v2387_v14  ;;  %v2476_v53 = vsub.f32 %v8225_v52, %v2387_v14  ;;  %v8540_v56 = vpop.f32.mrf.mxu0 }
 0x3a1   : > { %v8526_v40 = vpop.eup %6208  ;;  %6222 = vpow2.f32 %v2549_v24  ;;  %2659 = vadd.xlane.f32.xlu1 %v2658_v61  ;;  %10645 = vst [vmem:[#allocation103_spill] sm:$0xff] %v8540_v56 }
 0x3a2   : > { %v8532_v10 = vpop.eup %6210  ;;  %v2551_v16 = vmul.f32 1.442695, %v2475_v45  ;;  %v2553_v27 = vmul.f32 1.442695, %v2476_v53 }
 0x3a3   : > { %2455 = vmax.xlane.f32.xlu0 %v2454_v17  ;;  %v2390_v29 = vpop.xlane.xlu0 %2389  ;;  %v2661_v51 = vadd.f32 %v8532_v10, %v8526_v40 }
 0x3a4   : > { %6224 = vpow2.f32 %v2551_v16  ;;  %v2477_v52 = vsub.f32 %v8233_v5, %v2390_v29  ;;  %v2478_v31 = vsub.f32 %v8235_v18, %v2390_v29  ;;  %v8550_v16 = vpop.f32.mrf.mxu0 }
 0x3a5   : > { %v8538_v21 = vpop.eup %6212  ;;  %6226 = vpow2.f32 %v2553_v27  ;;  %2662 = vadd.xlane.f32.xlu1 %v2661_v51  ;;  %10646 = vst [vmem:[#allocation104_spill] sm:$0xff] %v8550_v16 }
 0x3a6   : > { %v8542_v24 = vpop.eup %6214  ;;  %v2555_v14 = vmul.f32 1.442695, %v2477_v52  ;;  %v2557_v61 = vmul.f32 1.442695, %v2478_v31 }
 0x3a7   : > { %v2393_v45 = vpop.xlane.xlu1 %2392  ;;  %v2664_v53 = vadd.f32 %v8542_v24, %v8538_v21 }
 0x3a8   : > { %6228 = vpow2.f32 %v2555_v14  ;;  %v2479_v17 = vsub.f32 %v8243_v30, %v2393_v45  ;;  %v2480_v5 = vsub.f32 %v8245_v54, %v2393_v45  ;;  %v8560_v45 = vpop.f32.mrf.mxu0 }
 0x3a9   : > { %v8548_v18 = vpop.eup %6216  ;;  %6230 = vpow2.f32 %v2557_v61  ;;  %2665 = vadd.xlane.f32.xlu1 %v2664_v53  ;;  %10647 = vst [vmem:[#allocation105_spill] sm:$0xff] %v8560_v45 }
 0x3aa   : > { %v8552_v27 = vpop.eup %6218  ;;  %v2559_v29 = vmul.f32 1.442695, %v2479_v17  ;;  %v2561_v51 = vmul.f32 1.442695, %v2480_v5 }
 0x3ab   : > { %v2396_v52 = vpop.xlane.xlu0 %2395  ;;  %v2667_v31 = vadd.f32 %v8552_v27, %v8548_v18 }
 0x3ac   : > { %6232 = vpow2.f32 %v2559_v29  ;;  %v2481_v14 = vsub.f32 %v8253_v11, %v2396_v52  ;;  %v2482_v30 = vsub.f32 %v8255_v50, %v2396_v52  ;;  %v8570_v52 = vpop.f32.mrf.mxu0 }
 0x3ad   : > { %v8558_v54 = vpop.eup %6220  ;;  %6234 = vpow2.f32 %v2561_v51  ;;  %2668 = vadd.xlane.f32.xlu1 %v2667_v31  ;;  %10648 = vst [vmem:[#allocation106_spill] sm:$0xff] %v8570_v52 }
 0x3ae   : > { %v8562_v61 = vpop.eup %6222  ;;  %v2563_v53 = vmul.f32 1.442695, %v2481_v14  ;;  %v2565_v17 = vmul.f32 1.442695, %v2482_v30 }
 0x3af   : > { %v2399_v5 = vpop.xlane.xlu1 %2398  ;;  %v2670_v16 = vadd.f32 %v8562_v61, %v8558_v54 }
 0x3b0   : > { %6236 = vpow2.f32 %v2563_v53  ;;  %v2483_v29 = vsub.f32 %v8263_v15, %v2399_v5  ;;  %v2484_v11 = vsub.f32 %v8265_v39, %v2399_v5  ;;  %v8580_v5 = vpop.f32.mrf.mxu0 }
 0x3b1   : > { %v8568_v50 = vpop.eup %6224  ;;  %6238 = vpow2.f32 %v2565_v17  ;;  %2671 = vadd.xlane.f32.xlu1 %v2670_v16  ;;  %10649 = vst [vmem:[#allocation107_spill] sm:$0xff] %v8580_v5 }
 0x3b2   : > { %v8572_v51 = vpop.eup %6226  ;;  %v2567_v31 = vmul.f32 1.442695, %v2483_v29  ;;  %v2569_v14 = vmul.f32 1.442695, %v2484_v11 }
 0x3b3   : > { %v2402_v30 = vpop.xlane.xlu0 %2401  ;;  %v2673_v32 = vadd.f32 %v8572_v51, %v8568_v50 }
 0x3b4   : > { %6240 = vpow2.f32 %v2567_v31  ;;  %v2485_v53 = vsub.f32 %v8273_v19, %v2402_v30  ;;  %v2486_v15 = vsub.f32 %v8275_v38, %v2402_v30  ;;  %v8590_v30 = vpop.f32.mrf.mxu0 }
 0x3b5   : > { %v8578_v39 = vpop.eup %6228  ;;  %6242 = vpow2.f32 %v2569_v14  ;;  %2674 = vadd.xlane.f32.xlu1 %v2673_v32  ;;  %10650 = vst [vmem:[#allocation108_spill] sm:$0xff] %v8590_v30  ;;  %v10651_v32 = vld [vmem:[#allocation29_spill] sm:$0xff] }
 0x3b6   : > { %v8582_v16 = vpop.eup %6230  ;;  %v2571_v17 = vmul.f32 1.442695, %v2485_v53  ;;  %v2573_v29 = vmul.f32 1.442695, %v2486_v15 }
 0x3b7   : > { %v2405_v11 = vpop.xlane.xlu1 %2404  ;;  %v2676_v7 = vadd.f32 %v8582_v16, %v8578_v39 }
 0x3b8   : > { %6244 = vpow2.f32 %v2571_v17  ;;  %v2487_v31 = vsub.f32 %v8283_v47, %v2405_v11  ;;  %v2488_v19 = vsub.f32 %v8285_v8, %v2405_v11  ;;  %v8600_v8 = vpop.f32.mrf.mxu0 }
 0x3b9   : > { %v8588_v38 = vpop.eup %6232  ;;  %6246 = vpow2.f32 %v2573_v29  ;;  %2677 = vadd.xlane.f32.xlu1 %v2676_v7  ;;  %2879 = vrot.lane.b32.xlu0 %v10651_v32, %s6812_s12  ;;  %10652 = vst [vmem:[#allocation29_spill] sm:$0xff] %v8600_v8 }
 0x3ba   : > { %v8594_v14 = vpop.eup %6234  ;;  %v2575_v53 = vmul.f32 1.442695, %v2487_v31  ;;  %v2577_v15 = vmul.f32 1.442695, %v2488_v19 }
 0x3bb   : > { %v2679_v17 = vadd.f32 %v8594_v14, %v8588_v38  ;;  %v2408_v7 = vpop.xlane.xlu0 %2407 }
 0x3bc   : > { %6248 = vpow2.f32 %v2575_v53  ;;  %v8610_v53 = vpop.f32.mrf.mxu0  ;;  %v2489_v52 = vsub.f32 %v8293_v58, %v2408_v7 }
 0x3bd   : > { %v8598_v47 = vpop.eup %6236  ;;  %6250 = vpow2.f32 %v2577_v15  ;;  %2680 = vadd.xlane.f32.xlu1 %v2679_v17  ;;  %10653 = vst [vmem:[#allocation109_spill] sm:$0xff] %v8610_v53  ;;  %v2490_v17 = vsub.f32 %v8295_v3, %v2408_v7 }
 0x3be   : > { %v8602_v11 = vpop.eup %6238  ;;  %v2579_v53 = vmul.f32 1.442695, %v2489_v52 }
 0x3bf   : > { %v2411_v29 = vpop.xlane.xlu1 %2410  ;;  %v2682_v32 = vadd.f32 %v8602_v11, %v8598_v47 }
 0x3c0   : > { %v2491_v31 = vsub.f32 %v8303_v4, %v2411_v29  ;;  %v2492_v19 = vsub.f32 %v8305_v46, %v2411_v29  ;;  %v8621_v29 = vpop.f32.mrf.mxu0 }
 0x3c1   : > { %v8608_v30 = vpop.eup %6240  ;;  %2683 = vadd.xlane.f32.xlu1 %v2682_v32  ;;  %10654 = vst [vmem:[#allocation110_spill] sm:$0xff] %v8621_v29  ;;  %v2581_v32 = vmul.f32 1.442695, %v2490_v17 }
 0x3c2   : > { %v8613_v15 = vpop.eup %6242  ;;  %v2583_v1 = vmul.f32 1.442695, %v2491_v31  ;;  %v2585_v48 = vmul.f32 1.442695, %v2492_v19  ;;  %v8632_v45 = vpop.f32.mrf.mxu0 }
 0x3c3   : > { %v2414_v63 = vpop.xlane.xlu1 %2413  ;;  %v2685_v13 = vadd.f32 %v8613_v15, %v8608_v30  ;;  %10655 = vst [vmem:[#allocation111_spill] sm:$0xff] %v8632_v45 }
 0x3c4   : > { %6252 = vpow2.f32 %v2583_v1  ;;  %v2493_v4 = vsub.f32 %v8313_v35, %v2414_v63  ;;  %v2494_v3 = vsub.f32 %v8315_v28, %v2414_v63 }
 0x3c5   : > { %v8619_v46 = vpop.eup %6244  ;;  %6254 = vpow2.f32 %v2585_v48  ;;  %2686 = vadd.xlane.f32.xlu1 %v2685_v13 }
 0x3c6   : > { %v8623_v58 = vpop.eup %6246  ;;  %v2587_v7 = vmul.f32 1.442695, %v2493_v4  ;;  %6256 = vpow2.f32 %v2579_v53  ;;  %v2589_v13 = vmul.f32 1.442695, %v2494_v3  ;;  %v8640_v4 = vpop.f32.mrf.mxu0  ;;  %v10656_v53 = vld [vmem:[#allocation59_spill] sm:$0xff] }
 0x3c7   : > { %v2417_v31 = vpop.xlane.xlu0 %2416  ;;  %v2688_v19 = vadd.f32 %v8623_v58, %v8619_v46  ;;  %6258 = vpow2.f32 %v2581_v32  ;;  %v2295_v32 = vadd.f32 %v8459_v41, %v10656_v53 }
 0x3c8   : > { %v2495_v1 = vsub.f32 %v8323_v0, %v2417_v31  ;;  %v2496_v35 = vsub.f32 %v8325_v37, %v2417_v31  ;;  %6260 = vpow2.f32 %v2587_v7  ;;  %v1112_v7 = vld [vmem:[#allocation5 + $0x1e8] sm:$0xff] }
 0x3c9   : > { %v8630_v56 = vpop.eup %6248  ;;  %2689 = vadd.xlane.f32.xlu1 %v2688_v19  ;;  %v8654_v41 = vmul.f32 %v2295_v32, %v1112_v7 }
 0x3ca   : > { %v8634_v48 = vpop.eup %6250  ;;  %v2591_v28 = vmul.f32 1.442695, %v2495_v1  ;;  %v2593_v63 = vmul.f32 1.442695, %v2496_v35  ;;  %v10657_v1 = vld [vmem:[#allocation58_spill] sm:$0xff] }
 0x3cb   : > { %v2420_v52 = vpop.xlane.xlu1 %2419  ;;  %v2691_v17 = vadd.f32 %v8634_v48, %v8630_v56  ;;  %v2293_v35 = vadd.f32 %v8455_v34, %v10657_v1  ;;  %10659 = vst [vmem:[#allocation58_spill] sm:$0xff] %v8654_v41 }
 0x3cc   : > { %6262 = vpow2.f32 %v2591_v28  ;;  %v2497_v0 = vsub.f32 %v8333_v36, %v2420_v52  ;;  %v2498_v37 = vsub.f32 %v8335_v44, %v2420_v52  ;;  %v8650_v52 = vpop.f32.mrf.mxu0 }
 0x3cd   : > { %6264 = vpow2.f32 %v2593_v63  ;;  %2692 = vadd.xlane.f32.xlu1 %v2691_v17  ;;  %10658 = vst [vmem:[#allocation59_spill] sm:$0xff] %v8650_v52  ;;  %v1111_v63 = vld [vmem:[#allocation5 + $0x1e0] sm:$0xff] }
 0x3ce   : > { %6266 = vpow2.f32 %v2589_v13  ;;  %v2595_v3 = vmul.f32 1.442695, %v2497_v0  ;;  %v2597_v31 = vmul.f32 1.442695, %v2498_v37 }
 0x3cf   : > { %v2423_v19 = vpop.xlane.xlu0 %2422 }
 0x3d0   : > { %v2499_v28 = vsub.f32 %v8343_v9, %v2423_v19  ;;  %v2500_v36 = vsub.f32 %v8345_v22, %v2423_v19  ;;  %6268 = vpow2.f32 %v2595_v3  ;;  %v8658_v9 = vmul.f32 %v2293_v35, %v1111_v63  ;;  %v8662_v19 = vpop.f32.mrf.mxu0 }
 0x3d1   : > { %v8648_v44 = vpop.eup %6252  ;;  %6270 = vpow2.f32 %v2597_v31 }
 0x3d2   : > { %v8652_v17 = vpop.eup %6254  ;;  %v2599_v13 = vmul.f32 1.442695, %v2499_v28  ;;  %v2601_v0 = vmul.f32 1.442695, %v2500_v36  ;;  %10660 = vst [vmem:[#allocation112_spill] sm:$0xff] %v8658_v9  ;;  %v2457_v7 = vmax.f32 %v8658_v9, %v8654_v41 }
 0x3d3   : > { %v2426_v37 = vpop.xlane.xlu1 %2425  ;;  %v2697_v34 = vadd.f32 %v8652_v17, %v8648_v44  ;;  %v8664_v32 = vpop.eup %6256 }
 0x3d4   : > { %6272 = vpow2.f32 %v2599_v13  ;;  %v2501_v22 = vsub.f32 %v8353_v55, %v2426_v37  ;;  %v2502_v53 = vsub.f32 %v8355_v33, %v2426_v37  ;;  %v8668_v1 = vpop.eup %6258  ;;  %v8674_v33 = vpop.f32.mrf.mxu0 }
 0x3d5   : > { %6274 = vpow2.f32 %v2601_v0  ;;  %2698 = vadd.xlane.f32.xlu1 %v2697_v34  ;;  %v8670_v35 = vpop.eup %6260  ;;  %10662 = vst [vmem:[#allocation114_spill] sm:$0xff] %v8674_v33  ;;  %v2694_v36 = vadd.f32 %v8668_v1, %v8664_v32 }
 0x3d6   : > { %v2603_v3 = vmul.f32 1.442695, %v2501_v22  ;;  %v2605_v31 = vmul.f32 1.442695, %v2502_v53  ;;  %v8686_v53 = vpop.f32.mrf.mxu0 }
 0x3d7   : > { %v2429_v13 = vpop.xlane.xlu0 %2428 }
 0x3d8   : > { %6276 = vpow2.f32 %v2603_v3  ;;  %2458 = vmax.xlane.f32.xlu0 %v2457_v7 }
 0x3d9   : > { %v8672_v55 = vpop.eup %6262  ;;  %6278 = vpow2.f32 %v2605_v31 }
 0x3da   : > { %10661 = vst [vmem:[#allocation113_spill] sm:$0xff] %v8672_v55  ;;  %v8676_v28 = vpop.eup %6264 }
 0x3db   : > { %v8680_v63 = vpop.eup %6266  ;;  %v2432_v0 = vpop.xlane.xlu1 %2431  ;;  %v2703_v37 = vadd.f32 %v8676_v28, %v8672_v55 }
 0x3dc   : > { %v2505_v34 = vsub.f32 %v8373_v59, %v2432_v0  ;;  %v2506_v22 = vsub.f32 %v8375_v42, %v2432_v0  ;;  %2695 = vadd.xlane.f32.xlu0 %v2694_v36  ;;  %v2700_v33 = vadd.f32 %v8680_v63, %v8670_v35  ;;  %v8696_v59 = vpop.f32.mrf.mxu0 }
 0x3dd   : > { %2704 = vadd.xlane.f32.xlu1 %v2703_v37  ;;  %v8688_v3 = vpop.eup %6268  ;;  %10666 = vst [vmem:[#allocation118_spill] sm:$0xff] %v8696_v59 }
 0x3de   : > { %10663 = vst [vmem:[#allocation115_spill] sm:$0xff] %v8688_v3  ;;  %v2611_v31 = vmul.f32 1.442695, %v2505_v34  ;;  %v2613_v7 = vmul.f32 1.442695, %v2506_v22  ;;  %v8692_v45 = vpop.eup %6270  ;;  %v8706_v22 = vpop.f32.mrf.mxu0 }
 0x3df   : > { %10664 = vst [vmem:[#allocation116_spill] sm:$0xff] %v8692_v45  ;;  %v2435_v52 = vpop.xlane.xlu0 %2434  ;;  %v2706_v36 = vadd.f32 %v8692_v45, %v8688_v3  ;;  %10669 = vst [vmem:[#allocation121_spill] sm:$0xff] %v8706_v22  ;;  %v10679_v3 = vld [vmem:[#allocation85_spill] sm:$0xff] }
 0x3e0   : > { %6280 = vpow2.f32 %v2611_v31  ;;  %2701 = vadd.xlane.f32.xlu0 %v2700_v33  ;;  %v8712_v59 = vpop.f32.mrf.mxu0 }
 0x3e1   : > { %v8694_v5 = vpop.eup %6272  ;;  %6282 = vpow2.f32 %v2613_v7  ;;  %10671 = vst [vmem:[#allocation123_spill] sm:$0xff] %v8712_v59 }
 0x3e2   : > { %10665 = vst [vmem:[#allocation117_spill] sm:$0xff] %v8694_v5  ;;  %v8698_v42 = vpop.eup %6274  ;;  %v8718_v9 = vpop.f32.mrf.mxu0 }
 0x3e3   : > { %10667 = vst [vmem:[#allocation119_spill] sm:$0xff] %v8698_v42  ;;  %v2438_v0 = vpop.xlane.xlu0 %2437  ;;  %v2709_v37 = vadd.f32 %v8698_v42, %v8694_v5 }
 0x3e4   : > { %2707 = vadd.xlane.f32.xlu0 %v2706_v36  ;;  %v8726_v2 = vpop.f32.mrf.mxu0 }
 0x3e5   : > { %v8704_v34 = vpop.eup %6276  ;;  %2710 = vadd.xlane.f32.xlu1 %v2709_v37  ;;  %10674 = vst [vmem:[#allocation126_spill] sm:$0xff] %v8726_v2 }
 0x3e6   : > { %10668 = vst [vmem:[#allocation120_spill] sm:$0xff] %v8704_v34  ;;  %v8708_v33 = vpop.eup %6278  ;;  %v8730_v59 = vpop.f32.mrf.mxu0 }
 0x3e7   : > { %10670 = vst [vmem:[#allocation122_spill] sm:$0xff] %v8708_v33  ;;  %v2441_v31 = vpop.xlane.xlu0 %2440  ;;  %v2712_v7 = vadd.f32 %v8708_v33, %v8704_v34  ;;  %10675 = vst [vmem:[#allocation127_spill] sm:$0xff] %v8730_v59  ;;  %v2882_v34 = vpop.permute.xlu1 %2881  ;;  %v10677_v33 = vmov 0.0  }
 0x3e9   : > { %2713 = vadd.xlane.f32.xlu0 %v2712_v7 }
 0x3eb   : > { %v8714_v23 = vpop.xlane.xlu0 %2443 }
 0x3ed   : > { %v8716_v41 = vpop.eup %6280 }
 0x3ee   : > { %10672 = vst [vmem:[#allocation124_spill] sm:$0xff] %v8716_v41  ;;  %v8720_v36 = vpop.eup %6282 }
 0x3ef   : > { %10673 = vst [vmem:[#allocation125_spill] sm:$0xff] %v8720_v36  ;;  %v8722_v29 = vpop.xlane.xlu0 %2446  ;;  %v2718_v37 = vadd.f32 %v8720_v36, %v8716_v41  ;;  %v2503_v41 = vsub.f32 %v8363_v6, %v2429_v13  ;;  %v10678_v36 = vld [vmem:[#allocation84_spill] sm:$0xff]  ;;  %v10681_v6 = vld [vmem:[#allocation89_spill] sm:$0xff] }
 0x3f0   : > { %v2507_v5 = vsub.f32 %v10678_v36, %v2435_v52  ;;  %v2512_v55 = vsub.f32 %v10681_v6, %v2441_v31 }
 0x3f1   : > { %2719 = vadd.xlane.f32.xlu0 %v2718_v37  ;;  %v2504_v37 = vsub.f32 %v8365_v26, %v2429_v13  ;;  %v2607_v2 = vmul.f32 1.442695, %v2503_v41  ;;  %v10683_v13 = vld [vmem:[#allocation88_spill] sm:$0xff] }
 0x3f2   : > { %v2615_v45 = vmul.f32 1.442695, %v2507_v5  ;;  %v2510_v36 = vsub.f32 %v10683_v13, %v2438_v0 }
 0x3f3   : > { %v8728_v20 = vpop.xlane.xlu0 %2449  ;;  %v2609_v42 = vmul.f32 1.442695, %v2504_v37  ;;  %6284 = vpow2.f32 %v2607_v2  ;;  %v2625_v37 = vmul.f32 1.442695, %v2512_v55 }
 0x3f4   : > { %v2621_v2 = vmul.f32 1.442695, %v2510_v36 }
 0x3f5   : > { %6286 = vpow2.f32 %v2609_v42 }
 0x3f6   : > { %3905 = vrot.lane.b32.xlu1 %v8730_v59, %s6811_s17  ;;  %v2508_v59 = vsub.f32 %v10679_v3, %v2435_v52  ;;  %6288 = vpow2.f32 %v2615_v45 }
 0x3f7   : > { %v8734_v7 = vpop.xlane.xlu0 %2452 }
 0x3f8   : > { %10676 = vst [vmem:[#allocation128_spill] sm:$0xff] %v8734_v7  ;;  %v10680_v7 = vld [vmem:[#allocation47_spill] sm:$0xff] }
 0x3fb   : > { %v2884_v8 = vpop.permute.xlu0 %2883 }
 0x3fc   : > { %3002 = vmatpush2.msra.mxu0 %v2884_v8  ;;  %v2511_v8 = vsub.f32 %v10680_v7, %v2441_v31 }
 0x3fd   : > { %3003 = vmatprep.subr.mxu0 %v10677_v33 }
 0x3fe   : > { %3004 = vmatpush2.msra.mxu0 %v2882_v34  ;;  %v2617_v34 = vmul.f32 1.442695, %v2508_v59  ;;  %v2623_v41 = vmul.f32 1.442695, %v2511_v8 }
 0x3ff   : > { %3005 = vmatprep.subr.mxu0 %v10677_v33  ;;  %v10682_v33 = vld [vmem:[#allocation87_spill] sm:$0xff] }
 0x400   : > { %v2509_v26 = vsub.f32 %v10682_v33, %v2438_v0  ;;  %6290 = vpow2.f32 %v2617_v34  ;;  %v8748_v5 = vpop.eup %6284 }
 0x401   : > { %6292 = vpow2.f32 %v2623_v41 }
 0x402   : > { %v2619_v52 = vmul.f32 1.442695, %v2509_v26  ;;  %6294 = vpow2.f32 %v2625_v37  ;;  %v8750_v3 = vpop.eup %6286 }
 0x403   : > { %v8752_v59 = vpop.eup %6288  ;;  %v2715_v45 = vadd.f32 %v8750_v3, %v8748_v5 }
 0x404   : > { %6296 = vpow2.f32 %v2619_v52 }
 0x405   : > { %6298 = vpow2.f32 %v2621_v2 }
 0x407   : > { %3873 = vrot.lane.b32.xlu0 %v8461_v12, %s6811_s17 }
 0x40d   : > { %v8756_v42 = vpop.eup %6290 }
 0x40e   : > { %v8758_v0 = vpop.eup %6292  ;;  %v2721_v55 = vadd.f32 %v8756_v42, %v8752_v59 }
 0x40f   : > { %v8762_v33 = vpop.eup %6294 }
 0x410   : > { %v2727_v7 = vadd.f32 %v8762_v33, %v8758_v0  ;;  %v8770_v34 = vpop.xlane.xlu1 %2461 }
 0x411   : > { %v8764_v31 = vpop.eup %6296 }
 0x412   : > { %v8768_v8 = vpop.eup %6298 }
 0x413   : > { %v2724_v6 = vadd.f32 %v8768_v8, %v8764_v31 }
 0x41a   : > { %2716 = vadd.xlane.f32.xlu1 %v2715_v45 }
 0x41e   : > { %2722 = vadd.xlane.f32.xlu1 %v2721_v55 }
 0x422   : > { %2728 = vadd.xlane.f32.xlu1 %v2727_v7 }
 0x426   : > { %v2657_v26 = vpop.xlane.xlu1 %2656  ;;  %2725 = vadd.xlane.f32.xlu0 %v2724_v6 }
 0x427   : > { %6300 = vrcp.f32 %v2657_v26 }
 0x42a   : > { %v2660_v41 = vpop.xlane.xlu1 %2659 }
 0x42b   : > { %6302 = vrcp.f32 %v2660_v41 }
 0x42c   : > { %v8774_v13 = vpop.xlane.xlu0 %2455 }
 0x42e   : > { %v2663_v36 = vpop.xlane.xlu1 %2662 }
 0x42f   : > { %6304 = vrcp.f32 %v2663_v36 }
 0x430   : > { %v2880_v37 = vpop.permute.xlu0 %2879 }
 0x431   : > { %3006 = vmatpush2.msra.mxu0 %v2880_v37 }
 0x432   : > { %v2666_v52 = vpop.xlane.xlu1 %2665 }
 0x433   : > { %6306 = vrcp.f32 %v2666_v52  ;;  %3901 = vrot.lane.b32.xlu1 %v8706_v22, %s6811_s17  ;;  %v10684_v52 = vld [vmem:[#allocation51_spill] sm:$0xff] }
 0x434   : > { %v6301_v2 = vpop.eup %6300  ;;  %v2515_v22 = vsub.f32 %v10684_v52, %v8722_v29 }
 0x435   : > { %v2783_v45 = vmul.f32 %v6301_v2, %v8499_v25  ;;  %v2784_v55 = vmul.f32 %v6301_v2, %v8504_v60  ;;  %v10685_v25 = vld [vmem:[#allocation91_spill] sm:$0xff] }
 0x436   : > { %v2669_v7 = vpop.xlane.xlu1 %2668  ;;  %v2516_v60 = vsub.f32 %v10685_v25, %v8722_v29 }
 0x437   : > { %6308 = vrcp.f32 %v2669_v7  ;;  %3007 = vmatprep.mubr.f32.mxu0 %v2784_v55  ;;  %v2631_v55 = vmul.f32 1.442695, %v2515_v22  ;;  %v10686_v7 = vld [vmem:[#allocation93_spill] sm:$0xff]  ;;  %v10688_v22 = vld [vmem:[#allocation90_spill] sm:$0xff] }
 0x438   : > { %v6303_v6 = vpop.eup %6302  ;;  %3008 = vmatmul.mubr.f32.vlgmr.msra.gmra.mxu0 %v2783_v45 }
 0x439   : > { %v2786_v26 = vmul.f32 %v6303_v6, %v8518_v43  ;;  %v2785_v41 = vmul.f32 %v6303_v6, %v8512_v49  ;;  %v2633_v6 = vmul.f32 1.442695, %v2516_v60 }
 0x43a   : > { %v2672_v36 = vpop.xlane.xlu1 %2671 }
 0x43b   : > { %6310 = vrcp.f32 %v2672_v36  ;;  %3012 = vmatprep.mubr.f32.mxu0 %v2786_v26 }
 0x43c   : > { %v6305_v37 = vpop.eup %6304  ;;  %3013 = vmatmul.mubr.f32.gmra.mxu0 %v2785_v41  ;;  %3903 = vrot.lane.b32.xlu0 %v8718_v9, %s6811_s17 }
 0x43d   : > { %v2788_v2 = vmul.f32 %v6305_v37, %v8532_v10  ;;  %v2787_v43 = vmul.f32 %v6305_v37, %v8526_v40  ;;  %v10687_v40 = vld [vmem:[#allocation49_spill] sm:$0xff]  ;;  %v2514_v37 = vsub.f32 %v10688_v22, %v8714_v23 }
 0x43e   : > { %v2675_v45 = vpop.xlane.xlu1 %2674  ;;  %v2513_v29 = vsub.f32 %v10687_v40, %v8714_v23 }
 0x43f   : > { %6312 = vrcp.f32 %v2675_v45  ;;  %3017 = vmatprep.mubr.f32.mxu0 %v2788_v2  ;;  %v2629_v2 = vmul.f32 1.442695, %v2514_v37 }
 0x440   : > { %v6307_v49 = vpop.eup %6306  ;;  %3018 = vmatmul.mubr.f32.gmra.mxu0 %v2787_v43  ;;  %3871 = vrot.lane.b32.xlu0 %v10686_v7, %s6811_s17  ;;  %v2627_v60 = vmul.f32 1.442695, %v2513_v29 }
 0x441   : > { %v2790_v26 = vmul.f32 %v6307_v49, %v8542_v24  ;;  %v2789_v41 = vmul.f32 %v6307_v49, %v8538_v21 }
 0x442   : > { %v2678_v36 = vpop.xlane.xlu1 %2677 }
 0x443   : > { %6314 = vrcp.f32 %v2678_v36  ;;  %3022 = vmatprep.mubr.f32.mxu0 %v2790_v26 }
 0x444   : > { %v6309_v10 = vpop.eup %6308  ;;  %6316 = vpow2.f32 %v2631_v55  ;;  %3023 = vmatmul.mubr.f32.gmra.mxu0 %v2789_v41 }
 0x445   : > { %6318 = vpow2.f32 %v2633_v6  ;;  %v2792_v52 = vmul.f32 %v6309_v10, %v8552_v27  ;;  %v2791_v25 = vmul.f32 %v6309_v10, %v8548_v18 }
 0x446   : > { %v2681_v24 = vpop.xlane.xlu1 %2680 }
 0x447   : > { %6320 = vrcp.f32 %v2681_v24  ;;  %3027 = vmatprep.mubr.f32.mxu0 %v2792_v52 }
 0x448   : > { %v6311_v21 = vpop.eup %6310  ;;  %3028 = vmatmul.mubr.f32.gmra.mxu0 %v2791_v25 }
 0x449   : > { %v2794_v43 = vmul.f32 %v6311_v21, %v8562_v61  ;;  %v2793_v45 = vmul.f32 %v6311_v21, %v8558_v54 }
 0x44a   : > { %v2684_v49 = vpop.xlane.xlu1 %2683 }
 0x44b   : > { %6322 = vrcp.f32 %v2684_v49  ;;  %3032 = vmatprep.mubr.f32.mxu0 %v2794_v43 }
 0x44c   : > { %v6313_v23 = vpop.eup %6312  ;;  %6324 = vpow2.f32 %v2627_v60  ;;  %3033 = vmatmul.mubr.f32.gmra.mxu0 %v2793_v45 }
 0x44d   : > { %6326 = vpow2.f32 %v2629_v2  ;;  %v2796_v18 = vmul.f32 %v6313_v23, %v8572_v51  ;;  %v2795_v27 = vmul.f32 %v6313_v23, %v8568_v50 }
 0x44e   : > { %v2687_v55 = vpop.xlane.xlu1 %2686 }
 0x44f   : > { %6328 = vrcp.f32 %v2687_v55  ;;  %3037 = vmatprep.mubr.f32.mxu0 %v2796_v18 }
 0x450   : > { %v6315_v6 = vpop.eup %6314  ;;  %3038 = vmatmul.mubr.f32.gmra.mxu0 %v2795_v27  ;;  %v10690_v27 = vld [vmem:[#allocation52_spill] sm:$0xff] }
 0x451   : > { %v8804_v26 = vpop.eup %6316  ;;  %v2798_v54 = vmul.f32 %v6315_v6, %v8582_v16  ;;  %v2797_v61 = vmul.f32 %v6315_v6, %v8578_v39 }
 0x452   : > { %v8808_v41 = vpop.eup %6318  ;;  %v2690_v36 = vpop.xlane.xlu1 %2689 }
 0x453   : > { %6330 = vrcp.f32 %v2690_v36  ;;  %3042 = vmatprep.mubr.f32.mxu0 %v2798_v54  ;;  %v2733_v51 = vadd.f32 %v8808_v41, %v8804_v26  ;;  %v2521_v36 = vsub.f32 %v8520_v62, %v8774_v13 }
 0x454   : > { %v6321_v10 = vpop.eup %6320  ;;  %3043 = vmatmul.mubr.f32.gmra.mxu0 %v2797_v61 }
 0x455   : > { %v2800_v50 = vmul.f32 %v6321_v10, %v8594_v14  ;;  %v2799_v40 = vmul.f32 %v6321_v10, %v8588_v38 }
 0x456   : > { %v2693_v29 = vpop.xlane.xlu1 %2692 }
 0x457   : > { %6332 = vrcp.f32 %v2693_v29  ;;  %3047 = vmatprep.mubr.f32.mxu0 %v2800_v50  ;;  %2734 = vadd.xlane.f32.xlu1 %v2733_v51  ;;  %v2522_v51 = vsub.f32 %v8516_v57, %v8774_v13  ;;  %v10691_v29 = vld [vmem:[#allocation48_spill] sm:$0xff]  ;;  %v10692_v13 = vld [vmem:[#allocation31_spill] sm:$0xff] }
 0x458   : > { %v6323_v16 = vpop.eup %6322  ;;  %3048 = vmatmul.mubr.f32.gmra.mxu0 %v2799_v40 }
 0x459   : > { %v8814_v39 = vpop.eup %6324  ;;  %v2802_v22 = vmul.f32 %v6323_v16, %v8602_v11  ;;  %v2801_v37 = vmul.f32 %v6323_v16, %v8598_v47  ;;  %v2645_v16 = vmul.f32 1.442695, %v2522_v51 }
 0x45a   : > { %v8818_v52 = vpop.eup %6326 }
 0x45b   : > { %3052 = vmatprep.mubr.f32.mxu0 %v2802_v22  ;;  %v2730_v38 = vadd.f32 %v8818_v52, %v8814_v39 }
 0x45c   : > { %v6329_v14 = vpop.eup %6328  ;;  %3053 = vmatmul.mubr.f32.gmra.mxu0 %v2801_v37  ;;  %v2517_v37 = vsub.f32 %v10692_v13, %v8728_v20 }
 0x45d   : > { %v2804_v25 = vmul.f32 %v6329_v14, %v8613_v15  ;;  %v2803_v24 = vmul.f32 %v6329_v14, %v8608_v30 }
 0x45e   : > { %v2699_v43 = vpop.xlane.xlu1 %2698 }
 0x45f   : > { %3057 = vmatprep.mubr.f32.mxu0 %v2804_v25  ;;  %2731 = vadd.xlane.f32.xlu0 %v2730_v38  ;;  %6334 = vrcp.f32 %v2699_v43  ;;  %v10694_v38 = vld [vmem:[#allocation113_spill] sm:$0xff] }
 0x460   : > { %v6331_v21 = vpop.eup %6330  ;;  %3058 = vmatmul.mubr.f32.gmra.mxu0 %v2803_v24 }
 0x461   : > { %v8824_v60 = vpop.xlane.xlu0 %2458  ;;  %v2806_v47 = vmul.f32 %v6331_v21, %v8623_v58  ;;  %v2805_v11 = vmul.f32 %v6331_v21, %v8619_v46  ;;  %v10689_v46 = vld [vmem:[#allocation86_spill] sm:$0xff]  ;;  %v2635_v21 = vmul.f32 1.442695, %v2517_v37  ;;  %v10704_v37 = vld [vmem:[#allocation29_spill] sm:$0xff] }
 0x463   : > { %3062 = vmatprep.mubr.f32.mxu0 %v2806_v47  ;;  %v10695_v47 = vld [vmem:[#allocation128_spill] sm:$0xff] }
 0x464   : > { %v6333_v2 = vpop.eup %6332  ;;  %3063 = vmatmul.mubr.f32.gmra.mxu0 %v2805_v11  ;;  %v10696_v11 = vld [vmem:[#allocation55_spill] sm:$0xff] }
 0x465   : > { %v2696_v15 = vpop.xlane.xlu0 %2695  ;;  %v2808_v45 = vmul.f32 %v6333_v2, %v8634_v48  ;;  %v2807_v49 = vmul.f32 %v6333_v2, %v8630_v56  ;;  %v2519_v2 = vsub.f32 %v10696_v11, %v10695_v47 }
 0x466   : > { %6336 = vrcp.f32 %v2696_v15  ;;  %v2705_v30 = vpop.xlane.xlu1 %2704 }
 0x467   : > { %3067 = vmatprep.mubr.f32.mxu0 %v2808_v45 }
 0x468   : > { %3068 = vmatmul.mubr.f32.gmra.mxu0 %v2807_v49  ;;  %3897 = vrot.lane.b32.xlu1 %v8662_v19, %s6811_s17  ;;  %v10698_v49 = vld [vmem:[#allocation92_spill] sm:$0xff] }
 0x469   : > { %v2702_v58 = vpop.xlane.xlu0 %2701 }
 0x46a   : > { %6338 = vrcp.f32 %v2702_v58  ;;  %v2639_v58 = vmul.f32 1.442695, %v2519_v2  ;;  %v10707_v2 = vld [vmem:[#allocation60_spill] sm:$0xff] }
 0x46b   : > { %6340 = vrcp.f32 %v2705_v30  ;;  %v10699_v30 = vld [vmem:[#allocation115_spill] sm:$0xff] }
 0x46c   : > { %3865 = vrot.lane.b32.xlu1 %v10689_v46, %s6811_s17  ;;  %v6335_v48 = vpop.eup %6334 }
 0x46d   : > { %v2708_v18 = vpop.xlane.xlu0 %2707  ;;  %v2812_v10 = vmul.f32 %v6335_v48, %v8652_v17 }
 0x46e   : > { %v2711_v23 = vpop.xlane.xlu1 %2710  ;;  %6342 = vrcp.f32 %v2708_v18 }
 0x46f   : > { %6344 = vrcp.f32 %v2711_v23  ;;  %v10700_v23 = vld [vmem:[#allocation119_spill] sm:$0xff] }
 0x470   : > { %3895 = vrot.lane.b32.xlu1 %v8640_v4, %s6811_s17 }
 0x472   : > { %v3906_v56 = vpop.permute.xlu1 %3905  ;;  %v2714_v6 = vpop.xlane.xlu0 %2713 }
 0x473   : > { %5647 = vmatprep.subr.msk.mxu0 %vm1917_vm3, %v3906_v56  ;;  %v6337_v55 = vpop.eup %6336  ;;  %6346 = vrcp.f32 %v2714_v6 }
 0x474   : > { %v2810_v54 = vmul.f32 %v6337_v55, %v8668_v1  ;;  %v2809_v61 = vmul.f32 %v6337_v55, %v8664_v32  ;;  %v2811_v1 = vmul.f32 %v6335_v48, %v8648_v44  ;;  %v2643_v32 = vmul.f32 1.442695, %v2521_v36  ;;  %v10701_v55 = vld [vmem:[#allocation117_spill] sm:$0xff] }
 0x475   : > { %3869 = vrot.lane.b32.xlu0 %v10690_v27, %s6811_s17 }
 0x476   : > { %3072 = vmatprep.mubr.f32.mxu0 %v2810_v54  ;;  %6348 = vpow2.f32 %v2643_v32  ;;  %v10702_v54 = vld [vmem:[#allocation122_spill] sm:$0xff] }
 0x477   : > { %v6339_v50 = vpop.eup %6338  ;;  %3073 = vmatmul.mubr.f32.gmra.mxu0 %v2809_v61  ;;  %6350 = vpow2.f32 %v2645_v16 }
 0x478   : > { %3077 = vmatprep.mubr.f32.mxu0 %v2812_v10  ;;  %v2814_v62 = vmul.f32 %v6339_v50, %v8680_v63  ;;  %v6341_v17 = vpop.eup %6340  ;;  %v2813_v57 = vmul.f32 %v6339_v50, %v8670_v35  ;;  %v10693_v63 = vld [vmem:[#allocation53_spill] sm:$0xff]  ;;  %v10697_v35 = vld [vmem:[#allocation116_spill] sm:$0xff]  ;;  %6352 = vpow2.f32 %v2635_v21 }
 0x479   : > { %3899 = vrot.lane.b32.xlu0 %v8686_v53, %s6811_s17  ;;  %v2816_v44 = vmul.f32 %v6341_v17, %v8676_v28  ;;  %v2518_v25 = vsub.f32 %v10693_v63, %v8728_v20  ;;  %v2815_v24 = vmul.f32 %v6341_v17, %v10694_v38  ;;  %v2520_v28 = vsub.f32 %v10698_v49, %v10695_v47  ;;  %v10703_v50 = vld [vmem:[#allocation120_spill] sm:$0xff]  ;;  %v10706_v21 = vld [vmem:[#allocation97_spill] sm:$0xff] }
 0x47a   : > { %v2720_v40 = vpop.xlane.xlu0 %2719  ;;  %v2525_v47 = vsub.f32 %v10706_v21, %v8770_v34  ;;  %v10718_v21 = vld [vmem:[#allocation63_spill] sm:$0xff] }
 0x47b   : > { %3078 = vmatmul.mubr.f32.gmra.mxu0 %v2811_v1  ;;  %v6343_v14 = vpop.eup %6342  ;;  %v2637_v45 = vmul.f32 1.442695, %v2518_v25  ;;  %v2641_v48 = vmul.f32 1.442695, %v2520_v28 }
 0x47c   : > { %3082 = vmatprep.mubr.f32.mxu0 %v2814_v62  ;;  %v2818_v43 = vmul.f32 %v6343_v14, %v10697_v35  ;;  %v6345_v15 = vpop.eup %6344  ;;  %v2817_v20 = vmul.f32 %v6343_v14, %v10699_v30  ;;  %v10705_v14 = vld [vmem:[#allocation78_spill] sm:$0xff]  ;;  %v2526_v35 = vsub.f32 %v10707_v2, %v8770_v34  ;;  %v2651_v28 = vmul.f32 1.442695, %v2525_v47  ;;  %v10719_v47 = vld [vmem:[#allocation11_spill] sm:$0xff] }
 0x47d   : > { %3867 = vrot.lane.b32.xlu0 %v10691_v29, %s6811_s17  ;;  %v2820_v18 = vmul.f32 %v6345_v15, %v10700_v23  ;;  %6354 = vpow2.f32 %v2637_v45  ;;  %v2819_v6 = vmul.f32 %v6345_v15, %v10701_v55  ;;  %v10708_v15 = vld [vmem:[#allocation125_spill] sm:$0xff]  ;;  %v10709_v30 = vld [vmem:[#allocation82_spill] sm:$0xff] }
 0x47e   : > { %v3874_v22 = vpop.permute.xlu0 %3873  ;;  %6356 = vpow2.f32 %v2639_v58  ;;  %v10710_v58 = vld [vmem:[#allocation124_spill] sm:$0xff]  ;;  %v10720_v2 = vld [vmem:[#allocation62_spill] sm:$0xff] }
 0x47f   : > { %5648 = vmatpush3.xpose.msk.msra.mxu0 %vm1917_vm3, %v3874_v22  ;;  %6358 = vpow2.f32 %v2641_v48 }
 0x480   : > { %3083 = vmatmul.mubr.f32.gmra.mxu0 %v2813_v57  ;;  %v6347_v56 = vpop.eup %6346  ;;  %6360 = vrcp.f32 %v2720_v40 }
 0x481   : > { %3087 = vmatprep.mubr.f32.mxu0 %v2816_v44  ;;  %v2822_v61 = vmul.f32 %v6347_v56, %v10702_v54  ;;  %v2821_v51 = vmul.f32 %v6347_v56, %v10703_v50  ;;  %v10713_v50 = vld [vmem:[#allocation112_spill] sm:$0xff] }
 0x483   : > { %v8869_v36 = vpop.eup %6348 }
 0x484   : > { %3088 = vmatmul.mubr.f32.gmra.mxu0 %v2815_v24  ;;  %v8871_v10 = vpop.eup %6350 }
 0x485   : > { %3092 = vmatprep.mubr.f32.mxu0 %v2818_v43  ;;  %v2742_v1 = vadd.f32 %v8871_v10, %v8869_v36  ;;  %v8876_v32 = vpop.eup %6352 }
 0x488   : > { %3093 = vmatmul.mubr.f32.gmra.mxu0 %v2817_v20  ;;  %v2653_v20 = vmul.f32 1.442695, %v2526_v35  ;;  %v3234_v35 = vmul.f32 %v10719_v47, %v10720_v2 }
 0x489   : > { %3097 = vmatprep.mubr.f32.mxu0 %v2820_v18  ;;  %v10711_v18 = vld [vmem:[#allocation110_spill] sm:$0xff] }
 0x48a   : > { %v8878_v62 = vpop.eup %6354 }
 0x48b   : > { %v8880_v17 = vpop.eup %6356  ;;  %v2736_v16 = vadd.f32 %v8878_v62, %v8876_v32 }
 0x48c   : > { %3098 = vmatmul.mubr.f32.gmra.mxu0 %v2819_v6  ;;  %v8884_v22 = vpop.eup %6358  ;;  %v10712_v6 = vld [vmem:[#allocation80_spill] sm:$0xff] }
 0x48d   : > { %3102 = vmatprep.mubr.f32.mxu0 %v2822_v61  ;;  %v2739_v57 = vadd.f32 %v8884_v22, %v8880_v17  ;;  %v6361_v38 = vpop.eup %6360 }
 0x48e   : > { %v2826_v45 = vmul.f32 %v6361_v38, %v10708_v15 }
 0x490   : > { %3103 = vmatmul.mubr.f32.gmra.mxu0 %v2821_v51  ;;  %v2523_v51 = vsub.f32 %v10713_v50, %v8824_v60 }
 0x494   : > { %2743 = vadd.xlane.f32.xlu1 %v2742_v1 }
 0x49c   : > { %2737 = vadd.xlane.f32.xlu0 %v2736_v16 }
 0x4a0   : > { %2740 = vadd.xlane.f32.xlu0 %v2739_v57  ;;  %v2647_v57 = vmul.f32 1.442695, %v2523_v51  ;;  %v10729_v51 = vld [vmem:[#allocation75_spill] sm:$0xff] }
 0x4a3   : > { %v2717_v13 = vpop.xlane.xlu1 %2716 }
 0x4a4   : > { %6362 = vrcp.f32 %v2717_v13 }
 0x4a5   : > { %3891 = vrot.lane.b32.xlu1 %v10704_v37, %s6811_s17 }
 0x4a7   : > { %v2723_v44 = vpop.xlane.xlu1 %2722 }
 0x4a8   : > { %6364 = vrcp.f32 %v2723_v44 }
 0x4a9   : > { %3859 = vrot.lane.b32.xlu1 %v10705_v14, %s6811_s17 }
 0x4ab   : > { %v2729_v63 = vpop.xlane.xlu1 %2728 }
 0x4ac   : > { %6366 = vrcp.f32 %v2729_v63 }
 0x4af   : > { %v2726_v25 = vpop.xlane.xlu0 %2725  ;;  %v3902_v23 = vpop.permute.xlu1 %3901 }
 0x4b0   : > { %6368 = vrcp.f32 %v2726_v25  ;;  %v10716_v25 = vld [vmem:[#allocation99_spill] sm:$0xff] }
 0x4b1   : > { %v6363_v24 = vpop.eup %6362  ;;  %6370 = vpow2.f32 %v2651_v28 }
 0x4b2   : > { %v2824_v40 = vmul.f32 %v6363_v24, %v8750_v3  ;;  %v2823_v11 = vmul.f32 %v6363_v24, %v8748_v5  ;;  %v2825_v5 = vmul.f32 %v6361_v38, %v10710_v58  ;;  %6372 = vpow2.f32 %v2653_v20  ;;  %v10717_v38 = vld [vmem:[#allocation33_spill] sm:$0xff] }
 0x4b3   : > { %v3904_v43 = vpop.permute.xlu0 %3903  ;;  %6374 = vpow2.f32 %v2647_v57 }
 0x4b4   : > { %3107 = vmatprep.mubr.f32.mxu0 %v2824_v40  ;;  %5649 = vmatprep.subr.msk.mxu0 %vm1917_vm3, %v3904_v43  ;;  %v3235_v40 = vmul.f32 %v10719_v47, %v10718_v21  ;;  %v10721_v43 = vld [vmem:[#allocation96_spill] sm:$0xff] }
 0x4b5   : > { %v6365_v49 = vpop.eup %6364  ;;  %3108 = vmatmul.mubr.f32.gmra.mxu0 %v2823_v11  ;;  %v10732_v47 = vld [vmem:[#allocation76_spill] sm:$0xff] }
 0x4b6   : > { %3863 = vrot.lane.b32.xlu0 %v10709_v30, %s6811_s17  ;;  %3112 = vmatprep.mubr.f32.mxu0 %v2826_v45  ;;  %v2828_v34 = vmul.f32 %v6365_v49, %v8756_v42  ;;  %v2827_v56 = vmul.f32 %v6365_v49, %v8752_v59  ;;  %v10714_v59 = vld [vmem:[#allocation58_spill] sm:$0xff]  ;;  %v6039_v15 = vpack.i.bf16 %v3235_v40, %v3234_v35  ;;  %v10722_v45 = vld [vmem:[#allocation67_spill] sm:$0xff]  ;;  %v10723_v49 = vld [vmem:[#allocation13_spill] sm:$0xff] }
 0x4b7   : > { %v3872_v3 = vpop.permute.xlu0 %3871  ;;  %v2524_v1 = vsub.f32 %v10714_v59, %v8824_v60  ;;  %v10715_v60 = vld [vmem:[#allocation72_spill] sm:$0xff]  ;;  %v3239_v28 = vmul.f32 %v10723_v49, %v10722_v45  ;;  %v10730_v59 = vld [vmem:[#allocation17_spill] sm:$0xff]  ;;  %v10734_v45 = vld [vmem:[#allocation19_spill] sm:$0xff] }
 0x4b8   : > { %5650 = vmatpush3.xpose.msk.msra.mxu0 %vm1917_vm3, %v3872_v3  ;;  %v10724_v3 = vld [vmem:[#allocation66_spill] sm:$0xff] }
 0x4b9   : > { %3113 = vmatmul.mubr.f32.gmra.mxu0 %v2825_v5  ;;  %5651 = vmatprep.subr.msk.mxu0 %vm1917_vm3, %v3902_v23  ;;  %v6367_v48 = vpop.eup %6366  ;;  %v3238_v58 = vmul.f32 %v10723_v49, %v10724_v3 }
 0x4ba   : > { %3893 = vrot.lane.b32.xlu0 %v10711_v18, %s6811_s17  ;;  %3117 = vmatprep.mubr.f32.mxu0 %v2828_v34  ;;  %v2832_v61 = vmul.f32 %v6367_v48, %v8762_v33  ;;  %v2831_v16 = vmul.f32 %v6367_v48, %v8758_v0  ;;  %v10725_v34 = vld [vmem:[#allocation71_spill] sm:$0xff] }
 0x4bb   : > { %v6049_v23 = vpack.i.bf16 %v3239_v28, %v3238_v58 }
 0x4bd   : > { %v6369_v55 = vpop.eup %6368  ;;  %3118 = vmatmul.mubr.f32.gmra.mxu0 %v2827_v56  ;;  %v10726_v56 = vld [vmem:[#allocation15_spill] sm:$0xff] }
 0x4be   : > { %3861 = vrot.lane.b32.xlu0 %v10712_v6, %s6811_s17  ;;  %v2830_v54 = vmul.f32 %v6369_v55, %v8768_v8  ;;  %v2829_v42 = vmul.f32 %v6369_v55, %v8764_v31  ;;  %v8919_v13 = vpop.eup %6370  ;;  %v2649_v8 = vmul.f32 1.442695, %v2524_v1  ;;  %v3243_v48 = vmul.f32 %v10726_v56, %v10725_v34  ;;  %v10737_v34 = vld [vmem:[#allocation83_spill] sm:$0xff] }
 0x4bf   : > { %v8921_v44 = vpop.eup %6372  ;;  %v3247_v1 = vmul.f32 %v10730_v59, %v10729_v51 }
 0x4c0   : > { %3122 = vmatprep.mubr.f32.mxu0 %v2830_v54  ;;  %6376 = vpow2.f32 %v2649_v8  ;;  %v2748_v33 = vadd.f32 %v8921_v44, %v8919_v13  ;;  %v8925_v31 = vpop.eup %6374  ;;  %v10727_v54 = vld [vmem:[#allocation70_spill] sm:$0xff] }
 0x4c1   : > { %3123 = vmatmul.mubr.f32.gmra.mxu0 %v2829_v42  ;;  %v3242_v42 = vmul.f32 %v10726_v56, %v10727_v54  ;;  %v10738_v56 = vld [vmem:[#allocation22_spill] sm:$0xff] }
 0x4c2   : > { %3127 = vmatprep.mubr.f32.mxu0 %v2832_v61  ;;  %v10728_v61 = vld [vmem:[#allocation107_spill] sm:$0xff] }
 0x4c3   : > { %v6059_v50 = vpack.i.bf16 %v3243_v48, %v3242_v42  ;;  %v3255_v48 = vmul.f32 %v10738_v56, %v10737_v34 }
 0x4c5   : > { %3128 = vmatmul.mubr.f32.gmra.mxu0 %v2831_v16 }
 0x4cd   : > { %2749 = vadd.xlane.f32.xlu1 %v2748_v33  ;;  %v8927_v63 = vpop.eup %6376  ;;  %v10731_v33 = vld [vmem:[#allocation74_spill] sm:$0xff] }
 0x4ce   : > { %v2745_v0 = vadd.f32 %v8927_v63, %v8925_v31 }
 0x4dd   : > { %2746 = vadd.xlane.f32.xlu0 %v2745_v0  ;;  %v3246_v0 = vmul.f32 %v10730_v59, %v10731_v33  ;;  %v10740_v59 = vld [vmem:[#allocation50_spill] sm:$0xff] }
 0x4de   : > { %3853 = vrot.lane.b32.xlu1 %v10715_v60, %s6811_s17 }
 0x4df   : > { %v6069_v35 = vpack.i.bf16 %v3247_v1, %v3246_v0  ;;  %v10741_v1 = vld [vmem:[#allocation25_spill] sm:$0xff]  ;;  %v10743_v0 = vld [vmem:[#allocation103_spill] sm:$0xff] }
 0x4e0   : > { %v2735_v24 = vpop.xlane.xlu1 %2734 }
 0x4e2   : > { %3879 = vrot.lane.b32.xlu1 %v10716_v25, %s6811_s17 }
 0x4e4   : > { %v3898_v5 = vpop.permute.xlu1 %3897 }
 0x4e6   : > { %3877 = vrot.lane.b32.xlu1 %v10717_v38, %s6811_s17 }
 0x4e8   : > { %v2732_v11 = vpop.xlane.xlu0 %2731  ;;  %v3866_v16 = vpop.permute.xlu1 %3865 }
 0x4e9   : > { %6378 = vrcp.f32 %v2732_v11 }
 0x4ea   : > { %6380 = vrcp.f32 %v2735_v24  ;;  %3875 = vrot.lane.b32.xlu1 %v10721_v43, %s6811_s17  ;;  %v8962_v24 = vpop.f32.mrf.mxu0 }
 0x4ec   : > { %v3870_v20 = vpop.permute.xlu0 %3869  ;;  %v3896_v58 = vpop.permute.xlu1 %3895 }
 0x4ed   : > { %5652 = vmatpush3.xpose.msk.msra.mxu0 %vm1917_vm3, %v3870_v20  ;;  %v3250_v20 = vmul.f32 %v10734_v45, %v10705_v14 }
 0x4ee   : > { %6040 = vrot.lane.b32.xlu1 %v6039_v15, %s6810_s13  ;;  %v10733_v15 = vld [vmem:[#allocation79_spill] sm:$0xff] }
 0x4ef   : > { %v3251_v49 = vmul.f32 %v10734_v45, %v10733_v15 }
 0x4f0   : > { %v3900_v55 = vpop.permute.xlu0 %3899 }
 0x4f1   : > { %5653 = vmatprep.subr.msk.mxu0 %vm1917_vm3, %v3900_v55 }
 0x4f2   : > { %6050 = vrot.lane.b32.xlu1 %v6049_v23, %s6810_s13  ;;  %v6079_v23 = vpack.i.bf16 %v3251_v49, %v3250_v20  ;;  %v10747_v20 = vld [vmem:[#allocation57_spill] sm:$0xff] }
 0x4f3   : > { %3889 = vrot.lane.b32.xlu0 %v10728_v61, %s6811_s17 }
 0x4f4   : > { %v3868_v57 = vpop.permute.xlu0 %3867 }
 0x4f5   : > { %5654 = vmatpush3.xpose.msk.msra.mxu0 %vm1917_vm3, %v3868_v57 }
 0x4f6   : > { %v6379_v8 = vpop.eup %6378  ;;  %6060 = vrot.lane.b32.xlu1 %v6059_v50, %s6810_s13  ;;  %5655 = vmatprep.subr.msk.mxu0 %vm1917_vm3, %v3898_v5  ;;  %v3254_v50 = vmul.f32 %v10738_v56, %v10709_v30 }
 0x4f7   : > { %v6381_v21 = vpop.eup %6380  ;;  %3857 = vrot.lane.b32.xlu0 %v10732_v47, %s6811_s17  ;;  %v2834_v40 = vmul.f32 %v6379_v8, %v8818_v52  ;;  %v2833_v11 = vmul.f32 %v6379_v8, %v8814_v39  ;;  %v10736_v39 = vld [vmem:[#allocation105_spill] sm:$0xff]  ;;  %v3258_v8 = vmul.f32 %v10741_v1, %v10691_v29 }
 0x4f8   : > { %v8972_v28 = vpop.f32.mrf.mxu0  ;;  %v2836_v52 = vmul.f32 %v6381_v21, %v8808_v41  ;;  %v2835_v42 = vmul.f32 %v6381_v21, %v8804_v26  ;;  %v6089_v51 = vpack.i.bf16 %v3255_v48, %v3254_v50  ;;  %v10751_v50 = vld [vmem:[#allocation100_spill] sm:$0xff] }
 0x4f9   : > { %10735 = vst [vmem:[#allocation84_spill] sm:$0xff] %v8972_v28  ;;  %3132 = vmatprep.mubr.f32.mxu0 %v2834_v40  ;;  %5656 = vmatpush3.xpose.msk.msra.mxu0 %vm1917_vm3, %v3866_v16  ;;  %v3259_v16 = vmul.f32 %v10741_v1, %v10740_v59  ;;  %v10744_v40 = vld [vmem:[#allocation94_spill] sm:$0xff] }
 0x4fa   : > { %6070 = vrot.lane.b32.xlu1 %v6069_v35, %s6810_s13  ;;  %v3011_v5 = vpop.f32.mrf.mxu0  ;;  %3133 = vmatmul.mubr.f32.gmra.mxu0 %v2833_v11  ;;  %v10745_v11 = vld [vmem:[#allocation28_spill] sm:$0xff]  ;;  %v6629_v28 = vld [vmem:[#allocation5 + $0x98] sm:$0xff] }
 0x4fb   : > { %5657 = vmatprep.subr.msk.mxu0 %vm1917_vm3, %v3896_v58  ;;  %3887 = vrot.lane.b32.xlu0 %v10736_v39, %s6811_s17  ;;  %v6099_v21 = vpack.i.bf16 %v3259_v16, %v3258_v8  ;;  %v3263_v35 = vmul.f32 %v10745_v11, %v10744_v40  ;;  %v3262_v45 = vmul.f32 %v10745_v11, %v10686_v7  ;;  %v10748_v5 = vld [vmem:[#allocation61_spill] sm:$0xff]  ;;  %v10756_v40 = vld [vmem:[#allocation34_spill] sm:$0xff] }
 0x4fc   : > { %3137 = vmatprep.mubr.f32.mxu0 %v2836_v52  ;;  %v8984_v55 = vpop.f32.mrf.mxu0  ;;  %v10749_v52 = vld [vmem:[#allocation26_spill] sm:$0xff]  ;;  %v10754_v8 = vld [vmem:[#allocation101_spill] sm:$0xff] }
 0x4fd   : > { %10739 = vst [vmem:[#allocation85_spill] sm:$0xff] %v8984_v55  ;;  %v6109_v58 = vpack.i.bf16 %v3263_v35, %v3262_v45  ;;  %v3266_v56 = vmul.f32 %v10749_v52, %v10721_v43  ;;  %v3274_v45 = vmul.f32 %v10756_v40, %v10747_v20  ;;  %v6627_v55 = vld [vmem:[#allocation5 + $0x88] sm:$0xff] }
 0x4fe   : > { %6080 = vrot.lane.b32.xlu1 %v6079_v23, %s6810_s13  ;;  %v3016_v41 = vpop.f32.mrf.mxu0  ;;  %3138 = vmatmul.mubr.f32.gmra.mxu0 %v2835_v42  ;;  %v3267_v23 = vmul.f32 %v10749_v52, %v10748_v5  ;;  %v10759_v52 = vld [vmem:[#allocation106_spill] sm:$0xff] }
 0x4ff   : > { %3855 = vrot.lane.b32.xlu0 %v10731_v33, %s6811_s17  ;;  %v10752_v41 = vld [vmem:[#allocation30_spill] sm:$0xff] }
 0x500   : > { %v8994_v57 = vpop.f32.mrf.mxu0  ;;  %v6119_v42 = vpack.i.bf16 %v3267_v23, %v3266_v56  ;;  %v3270_v1 = vmul.f32 %v10752_v41, %v10716_v25  ;;  %v10760_v23 = vld [vmem:[#allocation36_spill] sm:$0xff] }
 0x501   : > { %10742 = vst [vmem:[#allocation47_spill] sm:$0xff] %v8994_v57  ;;  %v3279_v56 = vmul.f32 %v10760_v23, %v10759_v52  ;;  %v6625_v57 = vld [vmem:[#allocation5 + $0x78] sm:$0xff] }
 0x502   : > { %6090 = vrot.lane.b32.xlu1 %v6089_v51, %s6810_s13  ;;  %v3021_v26 = vpop.f32.mrf.mxu0  ;;  %v3271_v51 = vmul.f32 %v10752_v41, %v10751_v50 }
 0x503   : > { %3885 = vrot.lane.b32.xlu0 %v10743_v0, %s6811_s17 }
 0x504   : > { %v9003_v15 = vpop.f32.mrf.mxu0  ;;  %v6129_v26 = vpack.i.bf16 %v3271_v51, %v3270_v1  ;;  %v10762_v51 = vld [vmem:[#allocation109_spill] sm:$0xff]  ;;  %v10763_v1 = vld [vmem:[#allocation38_spill] sm:$0xff] }
 0x505   : > { %10746 = vst [vmem:[#allocation89_spill] sm:$0xff] %v9003_v15 }
 0x506   : > { %6100 = vrot.lane.b32.xlu1 %v6099_v21, %s6810_s13  ;;  %v3026_v49 = vpop.f32.mrf.mxu0  ;;  %v10755_v21 = vld [vmem:[#allocation56_spill] sm:$0xff] }
 0x507   : > { %3883 = vrot.lane.b32.xlu0 %v10747_v20, %s6811_s17  ;;  %v3275_v11 = vmul.f32 %v10756_v40, %v10755_v21  ;;  %v3282_v21 = vmul.f32 %v10763_v1, %v10704_v37 }
 0x508   : > { %v9012_v34 = vpop.f32.mrf.mxu0 }
 0x509   : > { %10750 = vst [vmem:[#allocation87_spill] sm:$0xff] %v9012_v34  ;;  %v6139_v5 = vpack.i.bf16 %v3275_v11, %v3274_v45  ;;  %v10765_v11 = vld [vmem:[#allocation64_spill] sm:$0xff] }
 0x50a   : > { %6110 = vrot.lane.b32.xlu1 %v6109_v58, %s6810_s13  ;;  %v3031_v48 = vpop.f32.mrf.mxu0  ;;  %v10758_v58 = vld [vmem:[#allocation68_spill] sm:$0xff] }
 0x50b   : > { %3851 = vrot.lane.b32.xlu0 %v10727_v54, %s6811_s17 }
 0x50c   : > { %v9021_v59 = vpop.f32.mrf.mxu0 }
 0x50d   : > { %10753 = vst [vmem:[#allocation88_spill] sm:$0xff] %v9021_v59 }
 0x50e   : > { %6120 = vrot.lane.b32.xlu1 %v6119_v42, %s6810_s13  ;;  %v3036_v16 = vpop.f32.mrf.mxu0  ;;  %v3278_v42 = vmul.f32 %v10760_v23, %v10736_v39 }
 0x50f   : > { %3881 = vrot.lane.b32.xlu0 %v10754_v8, %s6811_s17  ;;  %v3283_v16 = vmul.f32 %v10763_v1, %v10762_v51 }
 0x510   : > { %v9030_v35 = vpop.f32.mrf.mxu0  ;;  %v6149_v41 = vpack.i.bf16 %v3279_v56, %v3278_v42  ;;  %v10769_v56 = vld [vmem:[#allocation65_spill] sm:$0xff]  ;;  %v10770_v42 = vld [vmem:[#allocation12_spill] sm:$0xff] }
 0x511   : > { %10757 = vst [vmem:[#allocation51_spill] sm:$0xff] %v9030_v35  ;;  %v6159_v45 = vpack.i.bf16 %v3283_v16, %v3282_v21  ;;  %v10771_v21 = vld [vmem:[#allocation118_spill] sm:$0xff] }
 0x512   : > { %6130 = vrot.lane.b32.xlu1 %v6129_v26, %s6810_s13  ;;  %v3041_v49 = vpop.f32.mrf.mxu0 }
 0x513   : > { %3849 = vrot.lane.b32.xlu0 %v10758_v58, %s6811_s17  ;;  %v10766_v49 = vld [vmem:[#allocation59_spill] sm:$0xff] }
 0x514   : > { %v9039_v48 = vpop.f32.mrf.mxu0 }
 0x515   : > { %10761 = vst [vmem:[#allocation91_spill] sm:$0xff] %v9039_v48  ;;  %v10775_v48 = vld [vmem:[#allocation14_spill] sm:$0xff] }
 0x516   : > { %6140 = vrot.lane.b32.xlu1 %v6139_v5, %s6810_s13  ;;  %v3046_v50 = vpop.f32.mrf.mxu0  ;;  %v10767_v5 = vld [vmem:[#allocation40_spill] sm:$0xff] }
 0x517   : > { %3847 = vrot.lane.b32.xlu0 %v10724_v3, %s6811_s17  ;;  %v3287_v52 = vmul.f32 %v10767_v5, %v10766_v49  ;;  %v3237_v50 = vmul.f32 %v10770_v42, %v10769_v56  ;;  %v3286_v51 = vmul.f32 %v10767_v5, %v8640_v4  ;;  %v10774_v56 = vld [vmem:[#allocation69_spill] sm:$0xff] }
 0x518   : > { %v9048_v26 = vpop.f32.mrf.mxu0  ;;  %v3241_v35 = vmul.f32 %v10775_v48, %v10774_v56  ;;  %v10780_v56 = vld [vmem:[#allocation16_spill] sm:$0xff] }
 0x519   : > { %10764 = vst [vmem:[#allocation93_spill] sm:$0xff] %v9048_v26  ;;  %v6169_v16 = vpack.i.bf16 %v3287_v52, %v3286_v51  ;;  %v10776_v51 = vld [vmem:[#allocation126_spill] sm:$0xff] }
 0x51a   : > { %6150 = vrot.lane.b32.xlu1 %v6149_v41, %s6810_s13  ;;  %v3051_v40 = vpop.f32.mrf.mxu0  ;;  %v3236_v41 = vmul.f32 %v10770_v42, %v10765_v11  ;;  %v3240_v42 = vmul.f32 %v10775_v48, %v10758_v58 }
 0x51b   : > { %3845 = vrot.lane.b32.xlu0 %v10765_v11, %s6811_s17  ;;  %v10772_v40 = vld [vmem:[#allocation42_spill] sm:$0xff] }
 0x51c   : > { %v9057_v23 = vpop.f32.mrf.mxu0  ;;  %v3291_v49 = vmul.f32 %v10772_v40, %v10771_v21  ;;  %v6044_v26 = vpack.i.bf16 %v3237_v50, %v3236_v41  ;;  %v6054_v50 = vpack.i.bf16 %v3241_v35, %v3240_v42  ;;  %v10779_v41 = vld [vmem:[#allocation73_spill] sm:$0xff]  ;;  %v10783_v42 = vld [vmem:[#allocation18_spill] sm:$0xff] }
 0x51d   : > { %10768 = vst [vmem:[#allocation49_spill] sm:$0xff] %v9057_v23  ;;  %v3245_v59 = vmul.f32 %v10780_v56, %v10779_v41 }
 0x51e   : > { %6160 = vrot.lane.b32.xlu1 %v6159_v45, %s6810_s13  ;;  %v3056_v1 = vpop.f32.mrf.mxu0  ;;  %v3290_v45 = vmul.f32 %v10772_v40, %v8686_v53  ;;  %v2744_v40 = vpop.xlane.xlu1 %2743 }
 0x51f   : > { %3843 = vrot.lane.b32.xlu0 %v10720_v2, %s6811_s17  ;;  %v10777_v1 = vld [vmem:[#allocation44_spill] sm:$0xff]  ;;  %s5550_s17 = sshll.u32 %s6868_s22, 8  ;;  %s6813_s22 = smov [#allocation7]  }
 0x520   : > { %v9070_v23 = vpop.f32.mrf.mxu0  ;;  %v6179_v52 = vpack.i.bf16 %v3291_v49, %v3290_v45  ;;  %v3295_v21 = vmul.f32 %v10777_v1, %v10776_v51  ;;  %s10281_s6 = scalar_lea.hbm %s10331_s5, %s5550_s17  ;;  %s6736_s8 = sshll.u32 %s6813_s22, 4  ;;  %s6737_s8 = int_to_ptr.vmem [resolvable:$false] %s6736_s8 }
 0x521   : > { %10773 = vst [vmem:[#allocation90_spill] sm:$0xff] %v9070_v23  ;;  %s6738_s14 = scalar_lea.vmem %s6737_s8, 1024 }
 0x522   : > { %6170 = vrot.lane.b32.xlu1 %v6169_v16, %s6810_s13  ;;  %v3061_v5 = vpop.f32.mrf.mxu0  ;;  %v3294_v16 = vmul.f32 %v10777_v1, %v8718_v9 }
 0x523   : > { %6045 = vrot.lane.b32.xlu0 %v6044_v26, %s6810_s13  ;;  %v3244_v26 = vmul.f32 %v10780_v56, %v10715_v60  ;;  %v10782_v5 = vld [vmem:[#allocation77_spill] sm:$0xff] }
 0x524   : > { %v9082_v23 = vpop.f32.mrf.mxu0  ;;  %v6189_v49 = vpack.i.bf16 %v3295_v21, %v3294_v16  ;;  %v3249_v51 = vmul.f32 %v10783_v42, %v10782_v5  ;;  %v10785_v21 = vld [vmem:[#allocation20_spill] sm:$0xff] }
 0x525   : > { %10778 = vst [vmem:[#allocation86_spill] sm:$0xff] %v9082_v23  ;;  %v2738_v34 = vpop.xlane.xlu0 %2737  ;;  %v6064_v35 = vpack.i.bf16 %v3245_v59, %v3244_v26  ;;  %v3252_v59 = vmul.f32 %v10785_v21, %v10712_v6  ;;  %v10787_v26 = vld [vmem:[#allocation21_spill] sm:$0xff] }
 0x526   : > { %6382 = vrcp.f32 %v2738_v34  ;;  %6180 = vrot.lane.b32.xlu1 %v6179_v52, %s6810_s13  ;;  %v3066_v48 = vpop.f32.mrf.mxu0  ;;  %v3248_v52 = vmul.f32 %v10783_v42, %v10732_v47  ;;  %v3256_v42 = vmul.f32 %v10787_v26, %v10689_v46 }
 0x527   : > { %6055 = vrot.lane.b32.xlu0 %v6054_v50, %s6810_s13  ;;  %6384 = vrcp.f32 %v2744_v40  ;;  %v10784_v50 = vld [vmem:[#allocation81_spill] sm:$0xff]  ;;  %v10786_v48 = vld [vmem:[#allocation46_spill] sm:$0xff] }
 0x528   : > { %v9092_v45 = vpop.f32.mrf.mxu0  ;;  %v6074_v1 = vpack.i.bf16 %v3249_v51, %v3248_v52  ;;  %v3253_v56 = vmul.f32 %v10785_v21, %v10784_v50  ;;  %v3892_v51 = vpop.permute.xlu1 %3891  ;;  %v10789_v50 = vld [vmem:[#allocation23_spill] sm:$0xff] }
 0x529   : > { %10781 = vst [vmem:[#allocation52_spill] sm:$0xff] %v9092_v45  ;;  %v2741_v41 = vpop.xlane.xlu0 %2740 }
 0x52a   : > { %6386 = vrcp.f32 %v2741_v41  ;;  %6190 = vrot.lane.b32.xlu1 %v6189_v49, %s6810_s13  ;;  %v3071_v34 = vpop.f32.mrf.mxu0  ;;  %v6084_v40 = vpack.i.bf16 %v3253_v56, %v3252_v59  ;;  %v3257_v49 = vmul.f32 %v10787_v26, %v10786_v48  ;;  %v3260_v48 = vmul.f32 %v10789_v50, %v10690_v27  ;;  %v10790_v26 = vld [vmem:[#allocation95_spill] sm:$0xff] }
 0x52b   : > { %6065 = vrot.lane.b32.xlu0 %v6064_v35, %s6810_s13 }
 0x52c   : > { %v6094_v52 = vpack.i.bf16 %v3257_v49, %v3256_v42  ;;  %v10791_v49 = vld [vmem:[#allocation24_spill] sm:$0xff] }
 0x52d   : > { %v3864_v16 = vpop.permute.xlu0 %3863 }
 0x52e   : > { %4866 = vrot.lane.b32.xlu1 %v8461_v12, %s6812_s12  ;;  %5658 = vmatpush3.xpose.msk.msra.mxu0 %vm1917_vm3, %v3864_v16 }
 0x52f   : > { %6075 = vrot.lane.b32.xlu0 %v6074_v1, %s6810_s13  ;;  %v10788_v1 = vld [vmem:[#allocation54_spill] sm:$0xff] }
 0x530   : > { %v3261_v21 = vmul.f32 %v10789_v50, %v10788_v1 }
 0x531   : > { %v3894_v35 = vpop.permute.xlu0 %3893 }
 0x532   : > { %4858 = vrot.lane.b32.xlu1 %v10689_v46, %s6812_s12  ;;  %5659 = vmatprep.subr.msk.mxu0 %vm1917_vm3, %v3894_v35  ;;  %v3265_v35 = vmul.f32 %v10791_v49, %v10790_v26 }
 0x533   : > { %v6383_v5 = vpop.eup %6382  ;;  %6085 = vrot.lane.b32.xlu0 %v6084_v40, %s6810_s13  ;;  %v6104_v40 = vpack.i.bf16 %v3261_v21, %v3260_v48  ;;  %v10796_v48 = vld [vmem:[#allocation102_spill] sm:$0xff] }
 0x534   : > { %v2838_v41 = vmul.f32 %v6383_v5, %v8878_v62  ;;  %v2837_v34 = vmul.f32 %v6383_v5, %v8876_v32  ;;  %v6385_v16 = vpop.eup %6384  ;;  %v3860_v5 = vpop.permute.xlu1 %3859 }
 0x535   : > { %v3862_v56 = vpop.permute.xlu0 %3861  ;;  %v2841_v50 = vmul.f32 %v6385_v16, %v8869_v36 }
 0x536   : > { %3142 = vmatprep.mubr.f32.mxu0 %v2838_v41  ;;  %5660 = vmatpush3.xpose.msk.msra.mxu0 %vm1917_vm3, %v3862_v56  ;;  %v2842_v41 = vmul.f32 %v6385_v16, %v8871_v10 }
 0x537   : > { %v6387_v59 = vpop.eup %6386  ;;  %6095 = vrot.lane.b32.xlu0 %v6094_v52, %s6810_s13  ;;  %3143 = vmatmul.mubr.f32.gmra.mxu0 %v2837_v34  ;;  %v9129_v42 = vpop.f32.mrf.mxu0  ;;  %v3264_v34 = vmul.f32 %v10791_v49, %v8461_v12  ;;  %v10794_v52 = vld [vmem:[#allocation27_spill] sm:$0xff]  ;;  %v10799_v49 = vld [vmem:[#allocation104_spill] sm:$0xff] }
 0x538   : > { %5661 = vmatprep.subr.msk.mxu0 %vm1917_vm3, %v3892_v51  ;;  %v2840_v32 = vmul.f32 %v6387_v59, %v8884_v22  ;;  %v2839_v62 = vmul.f32 %v6387_v59, %v8880_v17  ;;  %10792 = vst [vmem:[#allocation48_spill] sm:$0xff] %v9129_v42  ;;  %v10793_v51 = vld [vmem:[#allocation98_spill] sm:$0xff]  ;;  %v3268_v56 = vmul.f32 %v10794_v52, %v10717_v38 }
 0x539   : > { %v3076_v22 = vpop.f32.mrf.mxu0  ;;  %v6114_v17 = vpack.i.bf16 %v3265_v35, %v3264_v34  ;;  %v3269_v1 = vmul.f32 %v10794_v52, %v10793_v51  ;;  %v10800_v35 = vld [vmem:[#allocation35_spill] sm:$0xff]  ;;  %v10802_v51 = vld [vmem:[#allocation108_spill] sm:$0xff]  ;;  %v10803_v52 = vld [vmem:[#allocation37_spill] sm:$0xff] }
 0x53a   : > { %3147 = vmatprep.mubr.f32.mxu0 %v2840_v32  ;;  %5662 = vmatpush3.xpose.msk.msra.mxu0 %vm1917_vm3, %v3860_v5  ;;  %v10797_v32 = vld [vmem:[#allocation32_spill] sm:$0xff]  ;;  %v3277_v5 = vmul.f32 %v10800_v35, %v10799_v49  ;;  %v3276_v34 = vmul.f32 %v10800_v35, %v10743_v0  ;;  %v10808_v35 = vld [vmem:[#allocation114_spill] sm:$0xff] }
 0x53b   : > { %6105 = vrot.lane.b32.xlu0 %v6104_v40, %s6810_s13  ;;  %3148 = vmatmul.mubr.f32.gmra.mxu0 %v2839_v62  ;;  %v9139_v21 = vpop.f32.mrf.mxu0  ;;  %v6124_v59 = vpack.i.bf16 %v3269_v1, %v3268_v56  ;;  %v3273_v62 = vmul.f32 %v10797_v32, %v10796_v48  ;;  %v3272_v26 = vmul.f32 %v10797_v32, %v10754_v8  ;;  %v10805_v48 = vld [vmem:[#allocation111_spill] sm:$0xff] }
 0x53c   : > { %3152 = vmatprep.mubr.f32.mxu0 %v2842_v41  ;;  %10795 = vst [vmem:[#allocation31_spill] sm:$0xff] %v9139_v21  ;;  %v3281_v1 = vmul.f32 %v10803_v52, %v10802_v51  ;;  %v3280_v56 = vmul.f32 %v10803_v52, %v10728_v61  ;;  %v10806_v32 = vld [vmem:[#allocation39_spill] sm:$0xff] }
 0x53d   : > { %v3081_v10 = vpop.f32.mrf.mxu0  ;;  %v6134_v16 = vpack.i.bf16 %v3273_v62, %v3272_v26  ;;  %v3285_v62 = vmul.f32 %v10806_v32, %v10805_v48 }
 0x53f   : > { %6115 = vrot.lane.b32.xlu0 %v6114_v17, %s6810_s13  ;;  %3153 = vmatmul.mubr.f32.gmra.mxu0 %v2841_v50  ;;  %v6144_v17 = vpack.i.bf16 %v3277_v5, %v3276_v34  ;;  %v10809_v5 = vld [vmem:[#allocation41_spill] sm:$0xff] }
 0x540   : > { %v9146_v40 = vpop.f32.mrf.mxu0  ;;  %v3289_v34 = vmul.f32 %v10809_v5, %v10808_v35 }
 0x541   : > { %10798 = vst [vmem:[#allocation53_spill] sm:$0xff] %v9146_v40  ;;  %v10815_v40 = vld [vmem:[#allocation127_spill] sm:$0xff] }
 0x542   : > { %v3086_v36 = vpop.f32.mrf.mxu0 }
 0x543   : > { %6125 = vrot.lane.b32.xlu0 %v6124_v59, %s6810_s13  ;;  %v6154_v59 = vpack.i.bf16 %v3281_v1, %v3280_v56  ;;  %v3284_v36 = vmul.f32 %v10806_v32, %v10711_v18  ;;  %v10811_v1 = vld [vmem:[#allocation123_spill] sm:$0xff]  ;;  %v10813_v32 = vld [vmem:[#allocation121_spill] sm:$0xff] }
 0x544   : > { %v9153_v41 = vpop.f32.mrf.mxu0  ;;  %v10812_v56 = vld [vmem:[#allocation43_spill] sm:$0xff] }
 0x545   : > { %10801 = vst [vmem:[#allocation113_spill] sm:$0xff] %v9153_v41  ;;  %v6164_v49 = vpack.i.bf16 %v3285_v62, %v3284_v36  ;;  %v10814_v36 = vld [vmem:[#allocation45_spill] sm:$0xff] }
 0x546   : > { %v3091_v22 = vpop.f32.mrf.mxu0 }
 0x547   : > { %6135 = vrot.lane.b32.xlu0 %v6134_v16, %s6810_s13 }
 0x548   : > { %v9160_v50 = vpop.f32.mrf.mxu0 }
 0x549   : > { %10804 = vst [vmem:[#allocation128_spill] sm:$0xff] %v9160_v50 }
 0x54a   : > { %v3096_v10 = vpop.f32.mrf.mxu0 }
 0x54b   : > { %6145 = vrot.lane.b32.xlu0 %v6144_v17, %s6810_s13  ;;  %v3288_v17 = vmul.f32 %v10809_v5, %v8662_v19  ;;  %v3293_v10 = vmul.f32 %v10812_v56, %v10811_v1  ;;  %v3296_v5 = vmul.f32 %v10814_v36, %v10815_v40 }
 0x54c   : > { %v9167_v26 = vpop.f32.mrf.mxu0 }
 0x54d   : > { %10807 = vst [vmem:[#allocation55_spill] sm:$0xff] %v9167_v26  ;;  %v6174_v52 = vpack.i.bf16 %v3289_v34, %v3288_v17 }
 0x54e   : > { %v3101_v16 = vpop.f32.mrf.mxu0 }
 0x54f   : > { %6155 = vrot.lane.b32.xlu0 %v6154_v59, %s6810_s13  ;;  %v3292_v59 = vmul.f32 %v10812_v56, %v10813_v32  ;;  %v3297_v16 = vmul.f32 %v10814_v36, %v8962_v24  ;;  %v10816_v36 = vmov 0.0  }
 0x550   : > { %v9174_v22 = vpop.f32.mrf.mxu0 }
 0x551   : > { %10810 = vst [vmem:[#allocation116_spill] sm:$0xff] %v9174_v22  ;;  %v6184_v62 = vpack.i.bf16 %v3293_v10, %v3292_v59 }
 0x552   : > { %v3106_v51 = vpop.f32.mrf.mxu0 }
 0x553   : > { %6165 = vrot.lane.b32.xlu0 %v6164_v49, %s6810_s13  ;;  %v6194_v49 = vpack.i.bf16 %v3297_v16, %v3296_v5 }
 0x556   : > { %v2750_v48 = vpop.xlane.xlu1 %2749 }
 0x557   : > { %6175 = vrot.lane.b32.xlu0 %v6174_v52, %s6810_s13  ;;  %6388 = vrcp.f32 %v2750_v48 }
 0x55a   : > { %v3854_v35 = vpop.permute.xlu1 %3853 }
 0x55b   : > { %6185 = vrot.lane.b32.xlu0 %v6184_v62, %s6810_s13 }
 0x55e   : > { %v9189_v34 = vpop.permute.xlu1 %3879 }
 0x55f   : > { %6195 = vrot.lane.b32.xlu0 %v6194_v49, %s6810_s13  ;;  %s5342_s13 = sshll.u32 %s260_s26, 5 }
 0x560   : > { %s10263_s15 = scalar_lea.vmem [#allocation7], %s5342_s13 }
 0x561   : > { %s5238_s16 = sshll.u32 %s10263_s15, 4  ;;  %s10275_s16 = int_to_ptr.vmem [resolvable:$true] %s5238_s16 }
 0x562   : > { %v9192_v17 = vpop.permute.xlu1 %3877  ;;  %s6732_s30 = scalar_lea.vmem %s10275_s16, 512  ;;  %p6739_p11 = scmp.lt.s32.totalorder %s10275_s16, %s6737_s8 }
 0x563   : > { %4864 = vrot.lane.b32.xlu0 %v10686_v7, %s6812_s12  ;;  %p6733_p10 = scmp.ne.s32.totalorder %s10275_s16, %s6732_s30  ;;  %p6740_p0 = scmp.lt.s32.totalorder %s6738_s14, %s6732_s30 }
 0x564   : > { %v6389_v49 = vpop.eup %6388 }
 0x565   : > { %v2846_v21 = vmul.f32 %v6389_v49, %v8921_v44  ;;  %p6734_p12 = pnand %p6733_p10, %p6885_p5  ;;  %p6741_p1 = por %p6740_p0, %p6739_p11 }
 0x566   : > { %v2747_v51 = vpop.xlane.xlu0 %2746  ;;  %v9196_v52 = vpop.permute.xlu1 %3875 }
 0x567   : > { %6390 = vrcp.f32 %v2747_v51  ;;  %4862 = vrot.lane.b32.xlu0 %v10690_v27, %s6812_s12  ;;  %p6735_p8 = pneg %p6734_p12 }
 0x569   : > { %p6742_p3 = pnand %p6741_p1, %p6735_p8 }
 0x56a   : > { %v3890_v24 = vpop.permute.xlu0 %3889  ;;  %v6041_v1 = vpop.permute.xlu1 %6040 }
 0x56b   : > { %v6043_v56 = vunpack.i.h.bf16 %v6041_v1  ;;  %v6042_v10 = vunpack.i.l.bf16 %v6041_v1  ;;  %5663 = vmatprep.subr.msk.mxu0 %vm1917_vm3, %v3890_v24  ;;  %4860 = vrot.lane.b32.xlu0 %v10691_v29, %s6812_s12 }
 0x56d   : > { %v3490_v59 = vsel %vm1499_vm2, %v6042_v10, %v6043_v56 }
 0x56e   : > { %v3858_v62 = vpop.permute.xlu0 %3857  ;;  %v9204_v48 = vpop.permute.xlu1 %6050  ;;  %3619 = vmatmul.mubr.f32.vlgmr.msra.gmra.mxu1 %v3490_v59 }
 0x56f   : > { %5664 = vmatpush3.xpose.msk.msra.mxu0 %vm1917_vm3, %v3858_v62  ;;  %4856 = vrot.lane.b32.xlu0 %v10709_v30, %s6812_s12 }
 0x570   : > { %3624 = vmatprep.mubr.f32.mxu1 %v10816_v36 }
 0x572   : > { %v3888_v16 = vpop.permute.xlu0 %3887  ;;  %v9210_v5 = vpop.permute.xlu1 %6060 }
 0x573   : > { %5665 = vmatprep.subr.msk.mxu0 %vm1917_vm3, %v3888_v16  ;;  %4854 = vrot.lane.b32.xlu0 %v10712_v6, %s6812_s12 }
 0x574   : > { %v6391_v51 = vpop.eup %6390 }
 0x575   : > { %v9215_v24 = vpop.f32.mrf.mxu0  ;;  %v2844_v1 = vmul.f32 %v6391_v51, %v8927_v63  ;;  %v2843_v56 = vmul.f32 %v6391_v51, %v8925_v31  ;;  %v2845_v31 = vmul.f32 %v6389_v49, %v8919_v13 }
 0x576   : > { %10817 = vst [vmem:[#allocation92_spill] sm:$0xff] %v9215_v24  ;;  %v3856_v10 = vpop.permute.xlu0 %3855  ;;  %v9219_v59 = vpop.permute.xlu1 %6070 }
 0x577   : > { %3157 = vmatprep.mubr.f32.mxu0 %v2844_v1  ;;  %5666 = vmatpush3.xpose.msk.msra.mxu0 %vm1917_vm3, %v3856_v10  ;;  %v3111_v62 = vpop.f32.mrf.mxu0 }
 0x578   : > { %4852 = vrot.lane.b32.xlu0 %v10705_v14, %s6812_s12  ;;  %3158 = vmatmul.mubr.f32.gmra.mxu0 %v2843_v56 }
 0x579   : > { %v9225_v16 = vpop.f32.mrf.mxu0  ;;  %3162 = vmatprep.mubr.f32.mxu0 %v2846_v21 }
 0x57a   : > { %10818 = vst [vmem:[#allocation115_spill] sm:$0xff] %v9225_v16  ;;  %v3886_v42 = vpop.permute.xlu0 %3885  ;;  %v9227_v63 = vpop.permute.xlu1 %6080 }
 0x57b   : > { %v3116_v51 = vpop.f32.mrf.mxu0  ;;  %5667 = vmatprep.subr.msk.mxu0 %vm1917_vm3, %v3886_v42 }
 0x57c   : > { %3163 = vmatmul.mubr.f32.gmra.mxu0 %v2845_v31 }
 0x57d   : > { %5668 = vmatpush3.xpose.msk.msra.mxu0 %vm1917_vm3, %v3854_v35  ;;  %v9232_v1 = vpop.f32.mrf.mxu0  ;;  %5679 = vmatprep.mubr.msk.f32.mxu0 %vm1917_vm3, %v10720_v2 }
 0x57e   : > { %10819 = vst [vmem:[#allocation119_spill] sm:$0xff] %v9232_v1  ;;  %v3884_v44 = vpop.permute.xlu0 %3883  ;;  %v9236_v56 = vpop.permute.xlu1 %6090 }
 0x57f   : > { %v3121_v21 = vpop.f32.mrf.mxu0  ;;  %5669 = vmatprep.subr.msk.mxu0 %vm1917_vm3, %v3884_v44 }
 0x581   : > { %v9239_v10 = vpop.f32.mrf.mxu0 }
 0x582   : > { %10820 = vst [vmem:[#allocation117_spill] sm:$0xff] %v9239_v10  ;;  %v3852_v13 = vpop.permute.xlu0 %3851  ;;  %v9241_v49 = vpop.permute.xlu1 %6100 }
 0x583   : > { %v3126_v42 = vpop.f32.mrf.mxu0  ;;  %5670 = vmatpush3.xpose.msk.msra.mxu0 %vm1917_vm3, %v3852_v13 }
 0x585   : > { %v9244_v35 = vpop.f32.mrf.mxu0 }
 0x586   : > { %10821 = vst [vmem:[#allocation122_spill] sm:$0xff] %v9244_v35  ;;  %v3882_v62 = vpop.permute.xlu0 %3881  ;;  %v9246_v31 = vpop.permute.xlu1 %6110 }
 0x587   : > { %v3131_v51 = vpop.f32.mrf.mxu0  ;;  %5671 = vmatprep.subr.msk.mxu0 %vm1917_vm3, %v3882_v62 }
 0x58a   : > { %v3850_v45 = vpop.permute.xlu0 %3849  ;;  %v9249_v21 = vpop.permute.xlu1 %6120 }
 0x58b   : > { %5672 = vmatpush3.xpose.msk.msra.mxu0 %vm1917_vm3, %v3850_v45 }
 0x58c   : > { %5673 = vmatprep.subr.msk.mxu0 %vm1917_vm3, %v9189_v34 }
 0x58e   : > { %v3848_v44 = vpop.permute.xlu0 %3847  ;;  %v9254_v42 = vpop.permute.xlu1 %6130 }
 0x58f   : > { %5674 = vmatpush3.xpose.msk.msra.mxu0 %vm1917_vm3, %v3848_v44 }
 0x590   : > { %5675 = vmatprep.subr.msk.mxu0 %vm1917_vm3, %v9192_v17 }
 0x592   : > { %v3846_v13 = vpop.permute.xlu0 %3845  ;;  %v9259_v51 = vpop.permute.xlu1 %6140 }
 0x593   : > { %5676 = vmatpush3.xpose.msk.msra.mxu0 %vm1917_vm3, %v3846_v13  ;;  %v6052_v13 = vunpack.i.l.bf16 %v9204_v48 }
 0x594   : > { %5677 = vmatprep.subr.msk.mxu0 %vm1917_vm3, %v9196_v52  ;;  %v6053_v52 = vunpack.i.h.bf16 %v9204_v48  ;;  %v6063_v48 = vunpack.i.h.bf16 %v9210_v5 }
 0x596   : > { %v3844_v45 = vpop.permute.xlu0 %3843  ;;  %v9264_v62 = vpop.permute.xlu1 %6150  ;;  %v3492_v16 = vsel %vm1499_vm2, %v6052_v13, %v6053_v52 }
 0x597   : > { %5678 = vmatpush3.xpose.msk.msra.mxu0 %vm1917_vm3, %v3844_v45 }
 0x598   : > { %4932 = vmatprep.subr.mxu0 %v10816_v36 }
 0x59a   : > { %v6046_v34 = vpop.permute.xlu0 %6045  ;;  %5680 = vmatmul.mubr.msk.f32.vlgmr.msra.gmra.mxu0 %vm1917_vm3, %v10720_v2  ;;  %v9270_v17 = vpop.permute.xlu1 %6160 }
 0x59b   : > { %v6048_v44 = vunpack.i.h.bf16 %v6046_v34  ;;  %v6047_v23 = vunpack.i.l.bf16 %v6046_v34  ;;  %5681 = vmatprep.mubr.msk.f32.mxu0 %vm1917_vm3, %v10765_v11 }
 0x59d   : > { %v3491_v35 = vsel %vm1499_vm2, %v6047_v23, %v6048_v44 }
 0x59e   : > { %v6056_v45 = vpop.permute.xlu0 %6055  ;;  %5682 = vmatmul.mubr.msk.f32.gmra.mxu0 %vm1917_vm3, %v10765_v11  ;;  %v9279_v10 = vpop.permute.xlu1 %6170  ;;  %3625 = vmatmul.mubr.f32.gmra.mxu1 %v3491_v35  ;;  %v6062_v35 = vunpack.i.l.bf16 %v9210_v5 }
 0x59f   : > { %5683 = vmatprep.mubr.msk.f32.mxu0 %vm1917_vm3, %v10724_v3  ;;  %3630 = vmatprep.mubr.f32.mxu1 %v10816_v36  ;;  %v6058_v34 = vunpack.i.h.bf16 %v6056_v45  ;;  %v6057_v1 = vunpack.i.l.bf16 %v6056_v45 }
 0x5a0   : > { %v3494_v15 = vsel %vm1499_vm2, %v6062_v35, %v6063_v48 }
 0x5a1   : > { %v3493_v44 = vsel %vm1499_vm2, %v6057_v1, %v6058_v34  ;;  %v6073_v1 = vunpack.i.h.bf16 %v9219_v59  ;;  %v6072_v34 = vunpack.i.l.bf16 %v9219_v59 }
 0x5a2   : > { %v6066_v24 = vpop.permute.xlu0 %6065  ;;  %5684 = vmatmul.mubr.msk.f32.gmra.mxu0 %vm1917_vm3, %v10724_v3  ;;  %v9287_v23 = vpop.permute.xlu1 %6180  ;;  %3631 = vmatmul.mubr.f32.gmra.mxu1 %v3492_v16 }
 0x5a3   : > { %5685 = vmatprep.mubr.msk.f32.mxu0 %vm1917_vm3, %v10758_v58  ;;  %3636 = vmatprep.mubr.f32.mxu1 %v10816_v36  ;;  %v6068_v16 = vunpack.i.h.bf16 %v6066_v24  ;;  %v6067_v13 = vunpack.i.l.bf16 %v6066_v24  ;;  %v3496_v59 = vsel %vm1499_vm2, %v6072_v34, %v6073_v1 }
 0x5a5   : > { %v3495_v24 = vsel %vm1499_vm2, %v6067_v13, %v6068_v16  ;;  %v6083_v16 = vunpack.i.h.bf16 %v9227_v63  ;;  %v6082_v13 = vunpack.i.l.bf16 %v9227_v63 }
 0x5a6   : > { %v6076_v45 = vpop.permute.xlu0 %6075  ;;  %5686 = vmatmul.mubr.msk.f32.gmra.mxu0 %vm1917_vm3, %v10758_v58  ;;  %v9297_v52 = vpop.permute.xlu1 %6190  ;;  %3637 = vmatmul.mubr.f32.gmra.mxu1 %v3493_v44 }
 0x5a7   : > { %5687 = vmatprep.mubr.msk.f32.mxu0 %vm1917_vm3, %v10727_v54  ;;  %3642 = vmatprep.mubr.f32.mxu1 %v10816_v36  ;;  %v6077_v35 = vunpack.i.l.bf16 %v6076_v45  ;;  %v3498_v34 = vsel %vm1499_vm2, %v6082_v13, %v6083_v16 }
 0x5aa   : > { %v6086_v22 = vpop.permute.xlu0 %6085  ;;  %5688 = vmatmul.mubr.msk.f32.gmra.mxu0 %vm1917_vm3, %v10727_v54  ;;  %v4867_v5 = vpop.permute.xlu1 %4866  ;;  %3643 = vmatmul.mubr.f32.gmra.mxu1 %v3494_v15  ;;  %v6078_v15 = vunpack.i.h.bf16 %v6076_v45 }
 0x5ab   : > { %5689 = vmatprep.mubr.msk.f32.mxu0 %vm1917_vm3, %v10715_v60  ;;  %4933 = vmatpush1.msra.mxu0 %v4867_v5  ;;  %v6088_v45 = vunpack.i.h.bf16 %v6086_v22  ;;  %v6087_v1 = vunpack.i.l.bf16 %v6086_v22  ;;  %v6092_v22 = vunpack.i.l.bf16 %v9236_v56 }
 0x5ac   : > { %5775 = vmatpush1.msra.mxu1 %v4867_v5  ;;  %3648 = vmatprep.mubr.f32.mxu1 %v10816_v36  ;;  %v3497_v5 = vsel %vm1499_vm2, %v6077_v35, %v6078_v15  ;;  %v6093_v35 = vunpack.i.h.bf16 %v9236_v56 }
 0x5ad   : > { %4934 = vmatprep.subr.mxu0 %v10816_v36  ;;  %5744 = vmatprep.subr.mxu1 %v10816_v36  ;;  %v3499_v16 = vsel %vm1499_vm2, %v6087_v1, %v6088_v45  ;;  %v6102_v45 = vunpack.i.l.bf16 %v9241_v49 }
 0x5ae   : > { %v6096_v48 = vpop.permute.xlu0 %6095  ;;  %5690 = vmatmul.mubr.msk.f32.gmra.mxu0 %vm1917_vm3, %v10715_v60  ;;  %3649 = vmatmul.mubr.f32.gmra.mxu1 %v3495_v24  ;;  %v3500_v56 = vsel %vm1499_vm2, %v6092_v22, %v6093_v35 }
 0x5af   : > { %5691 = vmatprep.mubr.msk.f32.mxu0 %vm1917_vm3, %v10731_v33  ;;  %3654 = vmatprep.mubr.f32.mxu1 %v10816_v36 }
 0x5b2   : > { %v6106_v44 = vpop.permute.xlu0 %6105  ;;  %3655 = vmatmul.mubr.f32.gmra.mxu1 %v3496_v59  ;;  %5692 = vmatmul.mubr.msk.f32.gmra.mxu0 %vm1917_vm3, %v10731_v33 }
 0x5b3   : > { %5693 = vmatprep.mubr.msk.f32.mxu0 %vm1917_vm3, %v10732_v47  ;;  %3660 = vmatprep.mubr.f32.mxu1 %v10816_v36  ;;  %v6107_v35 = vunpack.i.l.bf16 %v6106_v44 }
 0x5b6   : > { %v9327_v24 = vpop.permute.xlu0 %6115  ;;  %3661 = vmatmul.mubr.f32.gmra.mxu1 %v3497_v5  ;;  %5694 = vmatmul.mubr.msk.f32.gmra.mxu0 %vm1917_vm3, %v10732_v47 }
 0x5b7   : > { %5695 = vmatprep.mubr.msk.f32.mxu0 %vm1917_vm3, %v10705_v14  ;;  %3666 = vmatprep.mubr.f32.mxu1 %v10816_v36 }
 0x5ba   : > { %v9335_v59 = vpop.permute.xlu0 %6125  ;;  %v9337_v63 = vpop.f32.mrf.mxu0  ;;  %3667 = vmatmul.mubr.f32.gmra.mxu1 %v3498_v34  ;;  %5696 = vmatmul.mubr.msk.f32.gmra.mxu0 %vm1917_vm3, %v10705_v14  ;;  %v6098_v34 = vunpack.i.h.bf16 %v6096_v48 }
 0x5bb   : > { %10822 = vst [vmem:[#allocation120_spill] sm:$0xff] %v9337_v63  ;;  %5697 = vmatprep.mubr.msk.f32.mxu0 %vm1917_vm3, %v10712_v6  ;;  %3672 = vmatprep.mubr.f32.mxu1 %v10816_v36 }
 0x5bc   : > { %v3136_v15 = vpop.f32.mrf.mxu0 }
 0x5bd   : > { %v6097_v15 = vunpack.i.l.bf16 %v6096_v48 }
 0x5be   : > { %v9347_v13 = vpop.permute.xlu0 %6135  ;;  %v9349_v5 = vpop.f32.mrf.mxu0  ;;  %3673 = vmatmul.mubr.f32.gmra.mxu1 %v3499_v16  ;;  %5698 = vmatmul.mubr.msk.f32.gmra.mxu0 %vm1917_vm3, %v10712_v6  ;;  %v6103_v6 = vunpack.i.h.bf16 %v9241_v49  ;;  %v6112_v49 = vunpack.i.l.bf16 %v9246_v31 }
 0x5bf   : > { %10823 = vst [vmem:[#allocation29_spill] sm:$0xff] %v9349_v5  ;;  %5699 = vmatprep.mubr.msk.f32.mxu0 %vm1917_vm3, %v10709_v30  ;;  %3678 = vmatprep.mubr.f32.mxu1 %v10816_v36  ;;  %v3501_v1 = vsel %vm1499_vm2, %v6097_v15, %v6098_v34  ;;  %v6117_v34 = vunpack.i.l.bf16 %v9327_v24 }
 0x5c0   : > { %v3141_v14 = vpop.f32.mrf.mxu0  ;;  %v3502_v22 = vsel %vm1499_vm2, %v6102_v45, %v6103_v6  ;;  %v6127_v45 = vunpack.i.l.bf16 %v9335_v59 }
 0x5c2   : > { %v9357_v63 = vpop.permute.xlu0 %6145  ;;  %3679 = vmatmul.mubr.f32.gmra.mxu1 %v3500_v56  ;;  %5700 = vmatmul.mubr.msk.f32.gmra.mxu0 %vm1917_vm3, %v10709_v30  ;;  %v6108_v30 = vunpack.i.h.bf16 %v6106_v44  ;;  %v6122_v56 = vunpack.i.l.bf16 %v9249_v21 }
 0x5c3   : > { %5701 = vmatprep.mubr.msk.f32.mxu0 %vm1917_vm3, %v10689_v46  ;;  %3684 = vmatprep.mubr.f32.mxu1 %v10816_v36 }
 0x5c4   : > { %v3503_v14 = vsel %vm1499_vm2, %v6107_v35, %v6108_v30  ;;  %v6132_v30 = vunpack.i.l.bf16 %v9254_v42 }
 0x5c6   : > { %v9367_v48 = vpop.permute.xlu0 %6155  ;;  %3685 = vmatmul.mubr.f32.gmra.mxu1 %v3501_v1  ;;  %5702 = vmatmul.mubr.msk.f32.gmra.mxu0 %vm1917_vm3, %v10689_v46  ;;  %v6113_v46 = vunpack.i.h.bf16 %v9246_v31 }
 0x5c7   : > { %5703 = vmatprep.mubr.msk.f32.mxu0 %vm1917_vm3, %v10691_v29  ;;  %3690 = vmatprep.mubr.f32.mxu1 %v10816_v36 }
 0x5c8   : > { %v3504_v15 = vsel %vm1499_vm2, %v6112_v49, %v6113_v46  ;;  %v6137_v46 = vunpack.i.l.bf16 %v9347_v13 }
 0x5ca   : > { %v9375_v16 = vpop.permute.xlu0 %6165  ;;  %3691 = vmatmul.mubr.f32.gmra.mxu1 %v3502_v22  ;;  %5704 = vmatmul.mubr.msk.f32.gmra.mxu0 %vm1917_vm3, %v10691_v29  ;;  %v6118_v29 = vunpack.i.h.bf16 %v9327_v24  ;;  %v6138_v22 = vunpack.i.h.bf16 %v9347_v13  ;;  %v6142_v13 = vunpack.i.l.bf16 %v9259_v51 }
 0x5cb   : > { %5705 = vmatprep.mubr.msk.f32.mxu0 %vm1917_vm3, %v10690_v27  ;;  %3696 = vmatprep.mubr.f32.mxu1 %v10816_v36 }
 0x5cc   : > { %v3505_v6 = vsel %vm1499_vm2, %v6117_v34, %v6118_v29  ;;  %v6143_v29 = vunpack.i.h.bf16 %v9259_v51  ;;  %v3509_v34 = vsel %vm1499_vm2, %v6137_v46, %v6138_v22  ;;  %v6147_v51 = vunpack.i.l.bf16 %v9357_v63 }
 0x5cd   : > { %v6168_v22 = vunpack.i.h.bf16 %v9375_v16  ;;  %v6167_v46 = vunpack.i.l.bf16 %v9375_v16 }
 0x5ce   : > { %v9385_v44 = vpop.permute.xlu0 %6175  ;;  %3697 = vmatmul.mubr.f32.gmra.mxu1 %v3503_v14  ;;  %5706 = vmatmul.mubr.msk.f32.gmra.mxu0 %vm1917_vm3, %v10690_v27  ;;  %v6123_v27 = vunpack.i.h.bf16 %v9249_v21  ;;  %v4859_v14 = vpop.permute.xlu1 %4858 }
 0x5cf   : > { %5707 = vmatprep.mubr.msk.f32.mxu0 %vm1917_vm3, %v10686_v7  ;;  %3702 = vmatprep.mubr.f32.mxu1 %v10816_v36  ;;  %v3515_v16 = vsel %vm1499_vm2, %v6167_v46, %v6168_v22 }
 0x5d0   : > { %v3506_v1 = vsel %vm1499_vm2, %v6122_v56, %v6123_v27  ;;  %v6148_v27 = vunpack.i.h.bf16 %v9357_v63  ;;  %v3510_v56 = vsel %vm1499_vm2, %v6142_v13, %v6143_v29  ;;  %v6153_v63 = vunpack.i.h.bf16 %v9264_v62 }
 0x5d1   : > { %v6173_v29 = vunpack.i.h.bf16 %v9279_v10  ;;  %v6172_v13 = vunpack.i.l.bf16 %v9279_v10 }
 0x5d2   : > { %v9395_v31 = vpop.permute.xlu0 %6185  ;;  %3703 = vmatmul.mubr.f32.gmra.mxu1 %v3504_v15  ;;  %5708 = vmatmul.mubr.msk.f32.gmra.mxu0 %vm1917_vm3, %v10686_v7  ;;  %v6128_v7 = vunpack.i.h.bf16 %v9335_v59 }
 0x5d3   : > { %5709 = vmatprep.mubr.msk.f32.mxu0 %vm1917_vm3, %v8461_v12  ;;  %3708 = vmatprep.mubr.f32.mxu1 %v10816_v36  ;;  %v3516_v10 = vsel %vm1499_vm2, %v6172_v13, %v6173_v29 }
 0x5d4   : > { %v3507_v59 = vsel %vm1499_vm2, %v6127_v45, %v6128_v7  ;;  %v6152_v7 = vunpack.i.l.bf16 %v9264_v62  ;;  %v3511_v45 = vsel %vm1499_vm2, %v6147_v51, %v6148_v27  ;;  %v6158_v62 = vunpack.i.h.bf16 %v9367_v48 }
 0x5d5   : > { %v6178_v27 = vunpack.i.h.bf16 %v9385_v44  ;;  %v6177_v51 = vunpack.i.l.bf16 %v9385_v44  ;;  %v6188_v44 = vunpack.i.h.bf16 %v9395_v31 }
 0x5d6   : > { %3709 = vmatmul.mubr.f32.gmra.mxu1 %v3505_v6  ;;  %5710 = vmatmul.mubr.msk.f32.gmra.mxu0 %vm1917_vm3, %v8461_v12  ;;  %v9407_v24 = vpop.permute.xlu0 %6195  ;;  %v6133_v12 = vunpack.i.h.bf16 %v9254_v42 }
 0x5d7   : > { %5711 = vmatprep.mubr.msk.f32.mxu0 %vm1917_vm3, %v10721_v43  ;;  %3714 = vmatprep.mubr.f32.mxu1 %v10816_v36 }
 0x5d8   : > { %v3508_v42 = vsel %vm1499_vm2, %v6132_v30, %v6133_v12  ;;  %v3512_v12 = vsel %vm1499_vm2, %v6152_v7, %v6153_v63  ;;  %v6162_v30 = vunpack.i.l.bf16 %v9270_v17  ;;  %v3517_v63 = vsel %vm1499_vm2, %v6177_v51, %v6178_v27 }
 0x5d9   : > { %v6187_v7 = vunpack.i.l.bf16 %v9395_v31  ;;  %v6198_v31 = vunpack.i.h.bf16 %v9407_v24 }
 0x5da   : > { %3715 = vmatmul.mubr.f32.gmra.mxu1 %v3506_v1  ;;  %5712 = vmatmul.mubr.msk.f32.gmra.mxu0 %vm1917_vm3, %v10721_v43  ;;  %v4865_v21 = vpop.permute.xlu0 %4864  ;;  %v6631_v43 = vld [vmem:[#allocation5 + $0xa8] sm:$0xff] }
 0x5db   : > { %5713 = vmatprep.mubr.msk.f32.mxu0 %vm1917_vm3, %v10717_v38  ;;  %4935 = vmatpush1.msra.mxu0 %v4865_v21 }
 0x5dc   : > { %5776 = vmatpush1.msra.mxu1 %v4865_v21  ;;  %3720 = vmatprep.mubr.f32.mxu1 %v10816_v36  ;;  %v6157_v21 = vunpack.i.l.bf16 %v9367_v48  ;;  %v6163_v48 = vunpack.i.h.bf16 %v9270_v17 }
 0x5dd   : > { %4936 = vmatprep.subr.mxu0 %v10816_v36  ;;  %5745 = vmatprep.subr.mxu1 %v10816_v36 }
 0x5de   : > { %3721 = vmatmul.mubr.f32.gmra.mxu1 %v3507_v59  ;;  %5714 = vmatmul.mubr.msk.f32.gmra.mxu0 %vm1917_vm3, %v10717_v38  ;;  %v4863_v35 = vpop.permute.xlu0 %4862  ;;  %v3513_v59 = vsel %vm1499_vm2, %v6157_v21, %v6158_v62  ;;  %v3514_v17 = vsel %vm1499_vm2, %v6162_v30, %v6163_v48  ;;  %v3519_v62 = vsel %vm1499_vm2, %v6187_v7, %v6188_v44  ;;  %v6197_v21 = vunpack.i.l.bf16 %v9407_v24 }
 0x5df   : > { %5715 = vmatprep.mubr.msk.f32.mxu0 %vm1917_vm3, %v10716_v25  ;;  %4937 = vmatpush1.msra.mxu0 %v4863_v35 }
 0x5e0   : > { %5777 = vmatpush1.msra.mxu1 %v4863_v35  ;;  %3726 = vmatprep.mubr.f32.mxu1 %v10816_v36 }
 0x5e1   : > { %4938 = vmatprep.subr.mxu0 %v10816_v36  ;;  %5746 = vmatprep.subr.mxu1 %v10816_v36 }
 0x5e2   : > { %3727 = vmatmul.mubr.f32.gmra.mxu1 %v3508_v42  ;;  %5716 = vmatmul.mubr.msk.f32.gmra.mxu0 %vm1917_vm3, %v10716_v25  ;;  %v4861_v49 = vpop.permute.xlu0 %4860 }
 0x5e3   : > { %5717 = vmatprep.mubr.msk.f32.mxu0 %vm1917_vm3, %v10754_v8  ;;  %4939 = vmatpush1.msra.mxu0 %v4861_v49 }
 0x5e4   : > { %5778 = vmatpush1.msra.mxu1 %v4861_v49  ;;  %4940 = vmatprep.subr.mxu0 %v10816_v36 }
 0x5e5   : > { %5747 = vmatprep.subr.mxu1 %v10816_v36  ;;  %3732 = vmatprep.mubr.f32.mxu1 %v10816_v36 }
 0x5e6   : > { %4941 = vmatpush1.msra.mxu0 %v4859_v14  ;;  %5779 = vmatpush1.msra.mxu1 %v4859_v14  ;;  %v4857_v15 = vpop.permute.xlu0 %4856 }
 0x5e7   : > { %3733 = vmatmul.mubr.f32.gmra.mxu1 %v3509_v34  ;;  %5718 = vmatmul.mubr.msk.f32.gmra.mxu0 %vm1917_vm3, %v10754_v8 }
 0x5e8   : > { %4942 = vmatprep.subr.mxu0 %v10816_v36  ;;  %5748 = vmatprep.subr.mxu1 %v10816_v36 }
 0x5e9   : > { %5719 = vmatprep.mubr.msk.f32.mxu0 %vm1917_vm3, %v10747_v20  ;;  %4943 = vmatpush1.msra.mxu0 %v4857_v15 }
 0x5ea   : > { %5780 = vmatpush1.msra.mxu1 %v4857_v15  ;;  %3738 = vmatprep.mubr.f32.mxu1 %v10816_v36  ;;  %v4855_v6 = vpop.permute.xlu0 %4854 }
 0x5eb   : > { %3739 = vmatmul.mubr.f32.gmra.mxu1 %v3510_v56  ;;  %5720 = vmatmul.mubr.msk.f32.gmra.mxu0 %vm1917_vm3, %v10747_v20  ;;  %v6183_v56 = vunpack.i.h.bf16 %v9287_v23 }
 0x5ec   : > { %4944 = vmatprep.subr.mxu0 %v10816_v36  ;;  %5749 = vmatprep.subr.mxu1 %v10816_v36 }
 0x5ed   : > { %5721 = vmatprep.mubr.msk.f32.mxu0 %vm1917_vm3, %v10743_v0  ;;  %4945 = vmatpush1.msra.mxu0 %v4855_v6 }
 0x5ee   : > { %5781 = vmatpush1.msra.mxu1 %v4855_v6  ;;  %3744 = vmatprep.mubr.f32.mxu1 %v10816_v36  ;;  %v4853_v1 = vpop.permute.xlu0 %4852  ;;  %v6182_v6 = vunpack.i.l.bf16 %v9287_v23  ;;  %v6193_v23 = vunpack.i.h.bf16 %v9297_v52 }
 0x5ef   : > { %3745 = vmatmul.mubr.f32.gmra.mxu1 %v3511_v45  ;;  %5722 = vmatmul.mubr.msk.f32.gmra.mxu0 %vm1917_vm3, %v10743_v0 }
 0x5f0   : > { %4946 = vmatprep.subr.mxu0 %v10816_v36  ;;  %5750 = vmatprep.subr.mxu1 %v10816_v36  ;;  %v3518_v45 = vsel %vm1499_vm2, %v6182_v6, %v6183_v56 }
 0x5f1   : > { %5723 = vmatprep.mubr.msk.f32.mxu0 %vm1917_vm3, %v10736_v39  ;;  %4947 = vmatpush1.msra.mxu0 %v4853_v1 }
 0x5f2   : > { %5782 = vmatpush1.msra.mxu1 %v4853_v1  ;;  %3750 = vmatprep.mubr.f32.mxu1 %v10816_v36  ;;  %v6192_v1 = vunpack.i.l.bf16 %v9297_v52  ;;  %v3521_v52 = vsel %vm1499_vm2, %v6197_v21, %v6198_v31 }
 0x5f3   : > { %3751 = vmatmul.mubr.f32.gmra.mxu1 %v3512_v12  ;;  %5724 = vmatmul.mubr.msk.f32.gmra.mxu0 %vm1917_vm3, %v10736_v39 }
 0x5f4   : > { %5725 = vmatprep.mubr.msk.f32.mxu0 %vm1917_vm3, %v10728_v61  ;;  %3756 = vmatprep.mubr.f32.mxu1 %v10816_v36  ;;  %v3520_v12 = vsel %vm1499_vm2, %v6192_v1, %v6193_v23 }
 0x5f5   : > { %4948 = vmatprep.subr.mxu0 %v10816_v36  ;;  %5751 = vmatprep.subr.mxu1 %v10816_v36 }
 0x5f7   : > { %3757 = vmatmul.mubr.f32.gmra.mxu1 %v3513_v59  ;;  %5726 = vmatmul.mubr.msk.f32.gmra.mxu0 %vm1917_vm3, %v10728_v61  ;;  %v9487_v35 = vpop.f32.mrf.mxu0 }
 0x5f8   : > { %10824 = vst [vmem:[#allocation78_spill] sm:$0xff] %v9487_v35  ;;  %5727 = vmatprep.mubr.msk.f32.mxu0 %vm1917_vm3, %v10704_v37  ;;  %3762 = vmatprep.mubr.f32.mxu1 %v10816_v36  ;;  %v6623_v35 = vld [vmem:[#allocation5 + $0x68] sm:$0xff] }
 0x5f9   : > { %v3146_v42 = vpop.f32.mrf.mxu0 }
 0x5fb   : > { %3763 = vmatmul.mubr.f32.gmra.mxu1 %v3514_v17  ;;  %5728 = vmatmul.mubr.msk.f32.gmra.mxu0 %vm1917_vm3, %v10704_v37  ;;  %v9497_v49 = vpop.f32.mrf.mxu0 }
 0x5fc   : > { %10825 = vst [vmem:[#allocation97_spill] sm:$0xff] %v9497_v49  ;;  %5729 = vmatprep.mubr.msk.f32.mxu0 %vm1917_vm3, %v10711_v18  ;;  %3768 = vmatprep.mubr.f32.mxu1 %v10816_v36 }
 0x5fd   : > { %v3151_v14 = vpop.f32.mrf.mxu0 }
 0x5ff   : > { %3769 = vmatmul.mubr.f32.gmra.mxu1 %v3515_v16  ;;  %5730 = vmatmul.mubr.msk.f32.gmra.mxu0 %vm1917_vm3, %v10711_v18  ;;  %v9507_v34 = vpop.f32.mrf.mxu0 }
 0x600   : > { %10826 = vst [vmem:[#allocation60_spill] sm:$0xff] %v9507_v34  ;;  %5731 = vmatprep.mubr.msk.f32.mxu0 %vm1917_vm3, %v8640_v4  ;;  %3774 = vmatprep.mubr.f32.mxu1 %v10816_v36  ;;  %v6621_v34 = vld [vmem:[#allocation5 + $0x58] sm:$0xff] }
 0x601   : > { %v3156_v15 = vpop.f32.mrf.mxu0 }
 0x603   : > { %3775 = vmatmul.mubr.f32.gmra.mxu1 %v3516_v10  ;;  %5732 = vmatmul.mubr.msk.f32.gmra.mxu0 %vm1917_vm3, %v8640_v4 }
 0x604   : > { %5733 = vmatprep.mubr.msk.f32.mxu0 %vm1917_vm3, %v8662_v19  ;;  %3780 = vmatprep.mubr.f32.mxu1 %v10816_v36 }
 0x607   : > { %3781 = vmatmul.mubr.f32.gmra.mxu1 %v3517_v63  ;;  %5734 = vmatmul.mubr.msk.f32.gmra.mxu0 %vm1917_vm3, %v8662_v19 }
 0x608   : > { %5735 = vmatprep.mubr.msk.f32.mxu0 %vm1917_vm3, %v8686_v53  ;;  %3786 = vmatprep.mubr.f32.mxu1 %v10816_v36 }
 0x60b   : > { %3787 = vmatmul.mubr.f32.gmra.mxu1 %v3518_v45  ;;  %5736 = vmatmul.mubr.msk.f32.gmra.mxu0 %vm1917_vm3, %v8686_v53 }
 0x60c   : > { %5737 = vmatprep.mubr.msk.f32.mxu0 %vm1917_vm3, %v10813_v32  ;;  %3792 = vmatprep.mubr.f32.mxu1 %v10816_v36 }
 0x60f   : > { %3793 = vmatmul.mubr.f32.gmra.mxu1 %v3519_v62  ;;  %5738 = vmatmul.mubr.msk.f32.gmra.mxu0 %vm1917_vm3, %v10813_v32 }
 0x610   : > { %5739 = vmatprep.mubr.msk.f32.mxu0 %vm1917_vm3, %v8718_v9  ;;  %3798 = vmatprep.mubr.f32.mxu1 %v10816_v36 }
 0x613   : > { %3799 = vmatmul.mubr.f32.gmra.mxu1 %v3520_v12  ;;  %5740 = vmatmul.mubr.msk.f32.gmra.mxu0 %vm1917_vm3, %v8718_v9  ;;  %v6616_v12 = vld [vmem:[#allocation5 + $0x30] sm:$0xff] }
 0x614   : > { %5741 = vmatprep.mubr.msk.f32.mxu0 %vm1917_vm3, %v10815_v40  ;;  %3804 = vmatprep.mubr.f32.mxu1 %v10816_v36 }
 0x617   : > { %3805 = vmatmul.mubr.f32.gmra.mxu1 %v3521_v52  ;;  %5742 = vmatmul.mubr.msk.f32.gmra.mxu0 %vm1917_vm3, %v10815_v40 }
 0x62e   : > { %v3620_v42 = vpop.f32.mrf.mxu1 }
 0x630   : > { %v9561_v17 = vpop.f32.mrf.mxu1 }
 0x638   : > { %v9555_v48 = vpop.f32.mrf.mxu0 }
 0x639   : > { %10827 = vst [vmem:[#allocation125_spill] sm:$0xff] %v9555_v48 }
 0x63a   : > { %v3161_v24 = vpop.f32.mrf.mxu0 }
 0x63b   : > { %v6617_v24 = vld [vmem:[#allocation5 + $0x38] sm:$0xff] }
 0x63c   : > { %v9557_v30 = vpop.f32.mrf.mxu0 }
 0x63d   : > { %10828 = vst [vmem:[#allocation82_spill] sm:$0xff] %v9557_v30 }
 0x63e   : > { %v3166_v59 = vpop.f32.mrf.mxu0 }
 0x65a   : > { %v4101_v22 = vpop.f32.mrf.mxu0 }
 0x65b   : > { %v9559_v46 = vadd.f32 %v4101_v22, %v3620_v42 }
 0x65c   : > { %v9563_v14 = vpop.f32.mrf.mxu0 }
 0x65e   : > { %v3626_v29 = vpop.f32.mrf.mxu1  ;;  %v4107_v13 = vpop.f32.mrf.mxu0 }
 0x65f   : > { %v9565_v16 = vadd.f32 %v4107_v13, %v3626_v29 }
 0x660   : > { %v9567_v15 = vpop.f32.mrf.mxu1  ;;  %v9569_v27 = vpop.f32.mrf.mxu0 }
 0x662   : > { %v3632_v51 = vpop.f32.mrf.mxu1  ;;  %v4113_v10 = vpop.f32.mrf.mxu0 }
 0x663   : > { %v9571_v56 = vadd.f32 %v4113_v10, %v3632_v51 }
 0x664   : > { %v9573_v6 = vpop.f32.mrf.mxu1  ;;  %v9575_v63 = vpop.f32.mrf.mxu0 }
 0x666   : > { %v3638_v44 = vpop.f32.mrf.mxu1  ;;  %v4119_v7 = vpop.f32.mrf.mxu0 }
 0x667   : > { %v4120_v45 = vadd.f32 %v4119_v7, %v3638_v44  ;;  %v6618_v7 = vld [vmem:[#allocation5 + $0x40] sm:$0xff] }
 0x668   : > { %v3640_v23 = vpop.f32.mrf.mxu1  ;;  %v4121_v1 = vpop.f32.mrf.mxu0 }
 0x669   : > { %v4122_v62 = vadd.f32 %v4121_v1, %v3640_v23  ;;  %v9577_v52 = vmul.f32 %v6616_v12, %v4120_v45  ;;  %v6619_v23 = vld [vmem:[#allocation5 + $0x48] sm:$0xff] }
 0x66a   : > { %v3644_v31 = vpop.f32.mrf.mxu1  ;;  %v4125_v21 = vpop.f32.mrf.mxu0 }
 0x66b   : > { %v9579_v59 = vmul.f32 %v6617_v24, %v4122_v62  ;;  %v4126_v42 = vadd.f32 %v4125_v21, %v3644_v31 }
 0x66c   : > { %v3646_v22 = vpop.f32.mrf.mxu1  ;;  %v4127_v29 = vpop.f32.mrf.mxu0 }
 0x66d   : > { %v4128_v13 = vadd.f32 %v4127_v29, %v3646_v22  ;;  %v4365_v51 = vmax.f32 %v9577_v52, %v9579_v59  ;;  %v9583_v30 = vmul.f32 %v6618_v7, %v4126_v42  ;;  %v6620_v29 = vld [vmem:[#allocation5 + $0x50] sm:$0xff] }
 0x66e   : > { %v3650_v10 = vpop.f32.mrf.mxu1  ;;  %v4131_v44 = vpop.f32.mrf.mxu0 }
 0x66f   : > { %v9585_v1 = vmul.f32 %v6619_v23, %v4128_v13  ;;  %v4132_v45 = vadd.f32 %v4131_v44, %v3650_v10  ;;  %4366 = vmax.xlane.f32.xlu1 %v4365_v51 }
 0x670   : > { %v3652_v12 = vpop.f32.mrf.mxu1  ;;  %v4133_v62 = vpop.f32.mrf.mxu0 }
 0x671   : > { %v4134_v24 = vadd.f32 %v4133_v62, %v3652_v12  ;;  %v4368_v31 = vmax.f32 %v9583_v30, %v9585_v1  ;;  %v9589_v48 = vmul.f32 %v6620_v29, %v4132_v45  ;;  %v6622_v12 = vld [vmem:[#allocation5 + $0x60] sm:$0xff] }
 0x672   : > { %v3656_v21 = vpop.f32.mrf.mxu1  ;;  %v4137_v22 = vpop.f32.mrf.mxu0 }
 0x673   : > { %v9591_v49 = vmul.f32 %v6621_v34, %v4134_v24  ;;  %v4138_v42 = vadd.f32 %v4137_v22, %v3656_v21  ;;  %4369 = vmax.xlane.f32.xlu0 %v4368_v31 }
 0x674   : > { %v3658_v13 = vpop.f32.mrf.mxu1  ;;  %v4139_v7 = vpop.f32.mrf.mxu0 }
 0x675   : > { %v4140_v10 = vadd.f32 %v4139_v7, %v3658_v13  ;;  %v4371_v51 = vmax.f32 %v9589_v48, %v9591_v49  ;;  %v9595_v62 = vmul.f32 %v6622_v12, %v4138_v42  ;;  %v6624_v13 = vld [vmem:[#allocation5 + $0x70] sm:$0xff] }
 0x676   : > { %v3662_v44 = vpop.f32.mrf.mxu1  ;;  %v4143_v23 = vpop.f32.mrf.mxu0 }
 0x677   : > { %v9597_v5 = vmul.f32 %v6623_v35, %v4140_v10  ;;  %v4144_v45 = vadd.f32 %v4143_v23, %v3662_v44  ;;  %4372 = vmax.xlane.f32.xlu0 %v4371_v51 }
 0x678   : > { %v3664_v34 = vpop.f32.mrf.mxu1  ;;  %v4145_v24 = vpop.f32.mrf.mxu0 }
 0x679   : > { %v4146_v21 = vadd.f32 %v4145_v24, %v3664_v34  ;;  %v4374_v31 = vmax.f32 %v9595_v62, %v9597_v5  ;;  %v9601_v7 = vmul.f32 %v6624_v13, %v4144_v45  ;;  %v6626_v34 = vld [vmem:[#allocation5 + $0x80] sm:$0xff] }
 0x67a   : > { %v3668_v22 = vpop.f32.mrf.mxu1  ;;  %v4149_v29 = vpop.f32.mrf.mxu0 }
 0x67b   : > { %v9603_v26 = vmul.f32 %v6625_v57, %v4146_v21  ;;  %v4150_v42 = vadd.f32 %v4149_v29, %v3668_v22  ;;  %4375 = vmax.xlane.f32.xlu1 %v4374_v31 }
 0x67c   : > { %v3670_v35 = vpop.f32.mrf.mxu1  ;;  %v4151_v10 = vpop.f32.mrf.mxu0 }
 0x67d   : > { %v4152_v44 = vadd.f32 %v4151_v10, %v3670_v35  ;;  %v4377_v51 = vmax.f32 %v9601_v7, %v9603_v26  ;;  %v9607_v24 = vmul.f32 %v6626_v34, %v4150_v42  ;;  %v6628_v35 = vld [vmem:[#allocation5 + $0x90] sm:$0xff] }
 0x67e   : > { %v3674_v23 = vpop.f32.mrf.mxu1  ;;  %v4155_v12 = vpop.f32.mrf.mxu0 }
 0x67f   : > { %v9609_v50 = vmul.f32 %v6627_v55, %v4152_v44  ;;  %v4156_v45 = vadd.f32 %v4155_v12, %v3674_v23  ;;  %4378 = vmax.xlane.f32.xlu0 %v4377_v51 }
 0x680   : > { %v3676_v57 = vpop.f32.mrf.mxu1  ;;  %v4157_v21 = vpop.f32.mrf.mxu0 }
 0x681   : > { %v4158_v22 = vadd.f32 %v4157_v21, %v3676_v57  ;;  %v4380_v31 = vmax.f32 %v9607_v24, %v9609_v50  ;;  %v9613_v10 = vmul.f32 %v6628_v35, %v4156_v45  ;;  %v6630_v57 = vld [vmem:[#allocation5 + $0xa0] sm:$0xff] }
 0x682   : > { %v3680_v29 = vpop.f32.mrf.mxu1  ;;  %v4161_v13 = vpop.f32.mrf.mxu0 }
 0x683   : > { %10829 = vst [vmem:[#allocation124_spill] sm:$0xff] %v9613_v10  ;;  %v9615_v41 = vmul.f32 %v6629_v28, %v4158_v22  ;;  %v4162_v42 = vadd.f32 %v4161_v13, %v3680_v29  ;;  %4381 = vmax.xlane.f32.xlu1 %v4380_v31 }
 0x684   : > { %v3682_v55 = vpop.f32.mrf.mxu1  ;;  %v4163_v44 = vpop.f32.mrf.mxu0 }
 0x685   : > { %10830 = vst [vmem:[#allocation110_spill] sm:$0xff] %v9615_v41  ;;  %v4164_v23 = vadd.f32 %v4163_v44, %v3682_v55  ;;  %v4383_v51 = vmax.f32 %v9613_v10, %v9615_v41  ;;  %v9619_v21 = vmul.f32 %v6630_v57, %v4162_v42  ;;  %v6632_v55 = vld [vmem:[#allocation5 + $0xb0] sm:$0xff]  ;;  %v6633_v41 = vld [vmem:[#allocation5 + $0xb8] sm:$0xff] }
 0x686   : > { %v3686_v12 = vpop.f32.mrf.mxu1  ;;  %v4167_v34 = vpop.f32.mrf.mxu0 }
 0x687   : > { %10831 = vst [vmem:[#allocation80_spill] sm:$0xff] %v9619_v21  ;;  %v9621_v36 = vmul.f32 %v6631_v43, %v4164_v23  ;;  %v4168_v45 = vadd.f32 %v4167_v34, %v3686_v12  ;;  %4384 = vmax.xlane.f32.xlu0 %v4383_v51 }
 0x688   : > { %v3688_v28 = vpop.f32.mrf.mxu1  ;;  %v4169_v22 = vpop.f32.mrf.mxu0 }
 0x689   : > { %10832 = vst [vmem:[#allocation112_spill] sm:$0xff] %v9621_v36  ;;  %v4170_v29 = vadd.f32 %v4169_v22, %v3688_v28  ;;  %v4386_v31 = vmax.f32 %v9619_v21, %v9621_v36  ;;  %v9625_v44 = vmul.f32 %v6632_v55, %v4168_v45  ;;  %v6634_v28 = vld [vmem:[#allocation5 + $0xc0] sm:$0xff]  ;;  %v6635_v36 = vld [vmem:[#allocation5 + $0xc8] sm:$0xff] }
 0x68a   : > { %v3692_v13 = vpop.f32.mrf.mxu1  ;;  %v4173_v35 = vpop.f32.mrf.mxu0 }
 0x68b   : > { %10833 = vst [vmem:[#allocation58_spill] sm:$0xff] %v9625_v44  ;;  %v9627_v10 = vmul.f32 %v6633_v41, %v4170_v29  ;;  %v4174_v42 = vadd.f32 %v4173_v35, %v3692_v13  ;;  %4387 = vmax.xlane.f32.xlu1 %v4386_v31 }
 0x68c   : > { %v3694_v43 = vpop.f32.mrf.mxu1  ;;  %v4175_v23 = vpop.f32.mrf.mxu0 }
 0x68d   : > { %10834 = vst [vmem:[#allocation72_spill] sm:$0xff] %v9627_v10  ;;  %v4176_v12 = vadd.f32 %v4175_v23, %v3694_v43  ;;  %v4389_v51 = vmax.f32 %v9625_v44, %v9627_v10  ;;  %v9631_v22 = vmul.f32 %v6634_v28, %v4174_v42  ;;  %v6636_v43 = vld [vmem:[#allocation5 + $0xd0] sm:$0xff]  ;;  %v6637_v10 = vld [vmem:[#allocation5 + $0xd8] sm:$0xff] }
 0x68e   : > { %v3698_v34 = vpop.f32.mrf.mxu1  ;;  %v4179_v57 = vpop.f32.mrf.mxu0 }
 0x68f   : > { %10835 = vst [vmem:[#allocation99_spill] sm:$0xff] %v9631_v22  ;;  %v9633_v21 = vmul.f32 %v6635_v36, %v4176_v12  ;;  %v4180_v45 = vadd.f32 %v4179_v57, %v3698_v34  ;;  %4390 = vmax.xlane.f32.xlu0 %v4389_v51 }
 0x690   : > { %v3700_v41 = vpop.f32.mrf.mxu1  ;;  %v4181_v29 = vpop.f32.mrf.mxu0 }
 0x691   : > { %10836 = vst [vmem:[#allocation33_spill] sm:$0xff] %v9633_v21  ;;  %v4182_v13 = vadd.f32 %v4181_v29, %v3700_v41  ;;  %v4392_v31 = vmax.f32 %v9631_v22, %v9633_v21  ;;  %v9637_v23 = vmul.f32 %v6636_v43, %v4180_v45  ;;  %v6638_v41 = vld [vmem:[#allocation5 + $0xe0] sm:$0xff]  ;;  %v6639_v21 = vld [vmem:[#allocation5 + $0xe8] sm:$0xff] }
 0x692   : > { %v3704_v35 = vpop.f32.mrf.mxu1  ;;  %v4185_v55 = vpop.f32.mrf.mxu0 }
 0x693   : > { %10837 = vst [vmem:[#allocation63_spill] sm:$0xff] %v9637_v23  ;;  %v9639_v44 = vmul.f32 %v6637_v10, %v4182_v13  ;;  %v4186_v42 = vadd.f32 %v4185_v55, %v3704_v35  ;;  %4393 = vmax.xlane.f32.xlu1 %v4392_v31 }
 0x694   : > { %v3706_v36 = vpop.f32.mrf.mxu1  ;;  %v4187_v12 = vpop.f32.mrf.mxu0 }
 0x695   : > { %10838 = vst [vmem:[#allocation11_spill] sm:$0xff] %v9639_v44  ;;  %v4188_v34 = vadd.f32 %v4187_v12, %v3706_v36  ;;  %v4395_v51 = vmax.f32 %v9637_v23, %v9639_v44  ;;  %v9643_v29 = vmul.f32 %v6638_v41, %v4186_v42  ;;  %v6640_v36 = vld [vmem:[#allocation5 + $0xf0] sm:$0xff]  ;;  %v6641_v44 = vld [vmem:[#allocation5 + $0xf8] sm:$0xff] }
 0x696   : > { %v3710_v57 = vpop.f32.mrf.mxu1  ;;  %v4191_v28 = vpop.f32.mrf.mxu0 }
 0x697   : > { %10839 = vst [vmem:[#allocation62_spill] sm:$0xff] %v9643_v29  ;;  %v9645_v22 = vmul.f32 %v6639_v21, %v4188_v34  ;;  %v4192_v45 = vadd.f32 %v4191_v28, %v3710_v57  ;;  %4396 = vmax.xlane.f32.xlu0 %v4395_v51 }
 0x698   : > { %v3712_v10 = vpop.f32.mrf.mxu1  ;;  %v4193_v13 = vpop.f32.mrf.mxu0 }
 0x699   : > { %10840 = vst [vmem:[#allocation67_spill] sm:$0xff] %v9645_v22  ;;  %v4194_v35 = vadd.f32 %v4193_v13, %v3712_v10  ;;  %v4398_v31 = vmax.f32 %v9643_v29, %v9645_v22  ;;  %v9649_v12 = vmul.f32 %v6640_v36, %v4192_v45  ;;  %v6642_v10 = vld [vmem:[#allocation5 + $0x100] sm:$0xff]  ;;  %v6643_v22 = vld [vmem:[#allocation5 + $0x108] sm:$0xff] }
 0x69a   : > { %v3716_v55 = vpop.f32.mrf.mxu1  ;;  %v4197_v43 = vpop.f32.mrf.mxu0 }
 0x69b   : > { %10841 = vst [vmem:[#allocation13_spill] sm:$0xff] %v9649_v12  ;;  %v9651_v23 = vmul.f32 %v6641_v44, %v4194_v35  ;;  %v4198_v42 = vadd.f32 %v4197_v43, %v3716_v55  ;;  %4399 = vmax.xlane.f32.xlu1 %v4398_v31 }
 0x69c   : > { %v3718_v21 = vpop.f32.mrf.mxu1  ;;  %v4199_v34 = vpop.f32.mrf.mxu0 }
 0x69d   : > { %10842 = vst [vmem:[#allocation66_spill] sm:$0xff] %v9651_v23  ;;  %v4200_v57 = vadd.f32 %v4199_v34, %v3718_v21  ;;  %v4401_v51 = vmax.f32 %v9649_v12, %v9651_v23  ;;  %v9655_v13 = vmul.f32 %v6642_v10, %v4198_v42  ;;  %v6644_v21 = vld [vmem:[#allocation5 + $0x110] sm:$0xff]  ;;  %v6645_v23 = vld [vmem:[#allocation5 + $0x118] sm:$0xff] }
 0x69e   : > { %v3722_v28 = vpop.f32.mrf.mxu1  ;;  %v4203_v41 = vpop.f32.mrf.mxu0 }
 0x69f   : > { %10843 = vst [vmem:[#allocation71_spill] sm:$0xff] %v9655_v13  ;;  %v9657_v29 = vmul.f32 %v6643_v22, %v4200_v57  ;;  %v4204_v45 = vadd.f32 %v4203_v41, %v3722_v28  ;;  %4402 = vmax.xlane.f32.xlu0 %v4401_v51  ;;  %v6646_v41 = vld [vmem:[#allocation5 + $0x120] sm:$0xff] }
 0x6a0   : > { %v3724_v44 = vpop.f32.mrf.mxu1  ;;  %v4205_v35 = vpop.f32.mrf.mxu0 }
 0x6a1   : > { %10844 = vst [vmem:[#allocation15_spill] sm:$0xff] %v9657_v29  ;;  %v4206_v55 = vadd.f32 %v4205_v35, %v3724_v44  ;;  %v4404_v31 = vmax.f32 %v9655_v13, %v9657_v29  ;;  %v9661_v34 = vmul.f32 %v6644_v21, %v4204_v45  ;;  %v6647_v44 = vld [vmem:[#allocation5 + $0x128] sm:$0xff] }
 0x6a2   : > { %v3728_v43 = vpop.f32.mrf.mxu1  ;;  %v4209_v36 = vpop.f32.mrf.mxu0 }
 0x6a3   : > { %10845 = vst [vmem:[#allocation70_spill] sm:$0xff] %v9661_v34  ;;  %v9663_v12 = vmul.f32 %v6645_v23, %v4206_v55  ;;  %v4210_v42 = vadd.f32 %v4209_v36, %v3728_v43  ;;  %4405 = vmax.xlane.f32.xlu1 %v4404_v31 }
 0x6a4   : > { %v3730_v22 = vpop.f32.mrf.mxu1  ;;  %v4211_v57 = vpop.f32.mrf.mxu0 }
 0x6a5   : > { %10846 = vst [vmem:[#allocation107_spill] sm:$0xff] %v9663_v12  ;;  %v4212_v28 = vadd.f32 %v4211_v57, %v3730_v22  ;;  %v4407_v51 = vmax.f32 %v9661_v34, %v9663_v12  ;;  %v9667_v10 = vmul.f32 %v6646_v41, %v4210_v42  ;;  %v6648_v57 = vld [vmem:[#allocation5 + $0x130] sm:$0xff]  ;;  %v6649_v42 = vld [vmem:[#allocation5 + $0x138] sm:$0xff] }
 0x6a7   : > { %10847 = vst [vmem:[#allocation75_spill] sm:$0xff] %v9667_v10  ;;  %v9669_v35 = vmul.f32 %v6647_v44, %v4212_v28  ;;  %v3734_v29 = vpop.f32.mrf.mxu1  ;;  %v4215_v45 = vpop.f32.mrf.mxu0  ;;  %4408 = vmax.xlane.f32.xlu0 %v4407_v51 }
 0x6a8   : > { %v4216_v21 = vadd.f32 %v4215_v45, %v3734_v29 }
 0x6a9   : > { %10848 = vst [vmem:[#allocation17_spill] sm:$0xff] %v9669_v35  ;;  %v3736_v23 = vpop.f32.mrf.mxu1  ;;  %v4217_v55 = vpop.f32.mrf.mxu0  ;;  %v4410_v31 = vmax.f32 %v9667_v10, %v9669_v35  ;;  %v6650_v35 = vld [vmem:[#allocation5 + $0x140] sm:$0xff] }
 0x6aa   : > { %v4218_v43 = vadd.f32 %v4217_v55, %v3736_v23  ;;  %v9673_v12 = vmul.f32 %v6648_v57, %v4216_v21  ;;  %v6651_v55 = vld [vmem:[#allocation5 + $0x148] sm:$0xff] }
 0x6ab   : > { %v3740_v36 = vpop.f32.mrf.mxu1  ;;  %v4221_v22 = vpop.f32.mrf.mxu0  ;;  %4411 = vmax.xlane.f32.xlu1 %v4410_v31 }
 0x6ac   : > { %10849 = vst [vmem:[#allocation74_spill] sm:$0xff] %v9673_v12  ;;  %v9675_v41 = vmul.f32 %v6649_v42, %v4218_v43  ;;  %v4222_v28 = vadd.f32 %v4221_v22, %v3740_v36 }
 0x6ad   : > { %v3742_v44 = vpop.f32.mrf.mxu1  ;;  %v4223_v34 = vpop.f32.mrf.mxu0 }
 0x6ae   : > { %10850 = vst [vmem:[#allocation76_spill] sm:$0xff] %v9675_v41  ;;  %v4224_v51 = vadd.f32 %v4223_v34, %v3742_v44  ;;  %v4413_v29 = vmax.f32 %v9673_v12, %v9675_v41  ;;  %v9679_v23 = vmul.f32 %v6650_v35, %v4222_v28  ;;  %v6652_v44 = vld [vmem:[#allocation5 + $0x150] sm:$0xff]  ;;  %v6653_v12 = vld [vmem:[#allocation5 + $0x158] sm:$0xff] }
 0x6af   : > { %v3746_v45 = vpop.f32.mrf.mxu1  ;;  %v4227_v13 = vpop.f32.mrf.mxu0 }
 0x6b0   : > { %v9681_v31 = vmul.f32 %v6651_v55, %v4224_v51  ;;  %v4228_v21 = vadd.f32 %v4227_v13, %v3746_v45  ;;  %4414 = vmax.xlane.f32.xlu0 %v4413_v29  ;;  %v4104_v13 = vadd.f32 %v9563_v14, %v9561_v17 }
 0x6b1   : > { %v3748_v57 = vpop.f32.mrf.mxu1  ;;  %v4229_v43 = vpop.f32.mrf.mxu0 }
 0x6b2   : > { %10851 = vst [vmem:[#allocation79_spill] sm:$0xff] %v9681_v31  ;;  %v4230_v42 = vadd.f32 %v4229_v43, %v3748_v57  ;;  %v4416_v36 = vmax.f32 %v9679_v23, %v9681_v31  ;;  %v9685_v41 = vmul.f32 %v6652_v44, %v4228_v21  ;;  %v6654_v43 = vld [vmem:[#allocation5 + $0x160] sm:$0xff]  ;;  %v6655_v21 = vld [vmem:[#allocation5 + $0x168] sm:$0xff] }
 0x6b3   : > { %v3752_v34 = vpop.f32.mrf.mxu1  ;;  %v4233_v22 = vpop.f32.mrf.mxu0 }
 0x6b4   : > { %10852 = vst [vmem:[#allocation19_spill] sm:$0xff] %v9685_v41  ;;  %v9687_v10 = vmul.f32 %v6653_v12, %v4230_v42  ;;  %v4234_v35 = vadd.f32 %v4233_v22, %v3752_v34  ;;  %4417 = vmax.xlane.f32.xlu1 %v4416_v36  ;;  %v6656_v36 = vld [vmem:[#allocation5 + $0x8] sm:$0xff] }
 0x6b5   : > { %v3754_v28 = vpop.f32.mrf.mxu1  ;;  %v4235_v51 = vpop.f32.mrf.mxu0  ;;  %v9697_v34 = vmul.f32 %v6656_v36, %v4104_v13 }
 0x6b6   : > { %10853 = vst [vmem:[#allocation105_spill] sm:$0xff] %v9687_v10  ;;  %v4236_v29 = vadd.f32 %v4235_v51, %v3754_v28  ;;  %v4419_v45 = vmax.f32 %v9685_v41, %v9687_v10  ;;  %v9693_v31 = vmul.f32 %v6654_v43, %v4234_v35  ;;  %v6657_v51 = vld [vmem:[#allocation5] sm:$0xff]  ;;  %v6659_v41 = vld [vmem:[#allocation5 + $0x170] sm:$0xff] }
 0x6b7   : > { %v3758_v55 = vpop.f32.mrf.mxu1  ;;  %v4239_v57 = vpop.f32.mrf.mxu0  ;;  %10855 = vst [vmem:[#allocation22_spill] sm:$0xff] %v9697_v34  ;;  %v9702_v10 = vmul.f32 %v6657_v51, %v9559_v46 }
 0x6b8   : > { %v9695_v44 = vmul.f32 %v6655_v21, %v4236_v29  ;;  %4420 = vmax.xlane.f32.xlu0 %v4419_v45  ;;  %v4240_v35 = vadd.f32 %v4239_v57, %v3758_v55  ;;  %v4110_v45 = vadd.f32 %v9569_v27, %v9567_v15  ;;  %v6658_v21 = vld [vmem:[#allocation5 + $0x178] sm:$0xff] }
 0x6b9   : > { %v3760_v12 = vpop.f32.mrf.mxu1  ;;  %v4241_v42 = vpop.f32.mrf.mxu0  ;;  %10856 = vst [vmem:[#allocation50_spill] sm:$0xff] %v9702_v10  ;;  %v6660_v57 = vld [vmem:[#allocation5 + $0x18] sm:$0xff] }
 0x6ba   : > { %10854 = vst [vmem:[#allocation83_spill] sm:$0xff] %v9695_v44  ;;  %v4242_v22 = vadd.f32 %v4241_v42, %v3760_v12  ;;  %v4422_v17 = vmax.f32 %v9693_v31, %v9695_v44  ;;  %v4356_v12 = vmax.f32 %v9702_v10, %v9697_v34  ;;  %v9710_v44 = vmul.f32 %v6659_v41, %v4240_v35 }
 0x6bb   : > { %v3764_v14 = vpop.f32.mrf.mxu1  ;;  %v4245_v28 = vpop.f32.mrf.mxu0 }
 0x6bc   : > { %4423 = vmax.xlane.f32.xlu0 %v4422_v17  ;;  %v9706_v13 = vmul.f32 %v6658_v21, %v4242_v22  ;;  %10858 = vst [vmem:[#allocation103_spill] sm:$0xff] %v9710_v44  ;;  %v9712_v17 = vmul.f32 %v6660_v57, %v4110_v45  ;;  %v6661_v21 = vld [vmem:[#allocation5 + $0x10] sm:$0xff]  ;;  %v4246_v10 = vadd.f32 %v4245_v28, %v3764_v14 }
 0x6bd   : > { %v3766_v29 = vpop.f32.mrf.mxu1  ;;  %v4247_v43 = vpop.f32.mrf.mxu0  ;;  %v9717_v34 = vmul.f32 %v6661_v21, %v9565_v16  ;;  %v4116_v45 = vadd.f32 %v9575_v63, %v9573_v6  ;;  %v6663_v16 = vld [vmem:[#allocation5 + $0x180] sm:$0xff] }
 0x6be   : > { %10857 = vst [vmem:[#allocation25_spill] sm:$0xff] %v9706_v13  ;;  %10859 = vst [vmem:[#allocation94_spill] sm:$0xff] %v9712_v17  ;;  %v4248_v51 = vadd.f32 %v4247_v43, %v3766_v29  ;;  %v4425_v15 = vmax.f32 %v9710_v44, %v9706_v13  ;;  %v6662_v29 = vld [vmem:[#allocation5 + $0x188] sm:$0xff]  ;;  %v9727_v21 = vmul.f32 %v6663_v16, %v4246_v10 }
 0x6bf   : > { %v3770_v42 = vpop.f32.mrf.mxu1  ;;  %v4251_v36 = vpop.f32.mrf.mxu0  ;;  %10860 = vst [vmem:[#allocation28_spill] sm:$0xff] %v9717_v34 }
 0x6c0   : > { %4357 = vmax.xlane.f32.xlu0 %v4356_v12  ;;  %v9723_v43 = vmul.f32 %v6662_v29, %v4248_v51  ;;  %v4359_v12 = vmax.f32 %v9717_v34, %v9712_v17  ;;  %10862 = vst [vmem:[#allocation61_spill] sm:$0xff] %v9727_v21  ;;  %v6665_v17 = vld [vmem:[#allocation5 + $0x20] sm:$0xff]  ;;  %v4252_v10 = vadd.f32 %v4251_v36, %v3770_v42 }
 0x6c1   : > { %v3772_v46 = vpop.f32.mrf.mxu1  ;;  %v4253_v55 = vpop.f32.mrf.mxu0  ;;  %v9736_v34 = vmul.f32 %v6665_v17, %v9571_v56 }
 0x6c2   : > { %10861 = vst [vmem:[#allocation57_spill] sm:$0xff] %v9723_v43  ;;  %v4254_v6 = vadd.f32 %v4253_v55, %v3772_v46  ;;  %v4428_v63 = vmax.f32 %v9727_v21, %v9723_v43  ;;  %v6667_v21 = vld [vmem:[#allocation5 + $0x190] sm:$0xff] }
 0x6c3   : > { %v3776_v27 = vpop.f32.mrf.mxu1  ;;  %v4257_v22 = vpop.f32.mrf.mxu0  ;;  %v9744_v44 = vmul.f32 %v6667_v21, %v4252_v10 }
 0x6c4   : > { %4426 = vmax.xlane.f32.xlu0 %v4425_v15  ;;  %v4258_v56 = vadd.f32 %v4257_v22, %v3776_v27  ;;  %v6670_v27 = vld [vmem:[#allocation5 + $0x1b8] sm:$0xff] }
 0x6c5   : > { %v3778_v41 = vpop.f32.mrf.mxu1  ;;  %v4259_v35 = vpop.f32.mrf.mxu0  ;;  %4850 = vrot.lane.b32.xlu1 %v10732_v47, %s6812_s12  ;;  %v6664_v47 = vld [vmem:[#allocation5 + $0x28] sm:$0xff] }
 0x6c6   : > { %v9731_v15 = vmul.f32 %v6664_v47, %v4116_v45  ;;  %v4260_v46 = vadd.f32 %v4259_v35, %v3778_v41 }
 0x6c7   : > { %v3782_v57 = vpop.f32.mrf.mxu1  ;;  %v4263_v13 = vpop.f32.mrf.mxu0 }
 0x6c8   : > { %4360 = vmax.xlane.f32.xlu0 %v4359_v12  ;;  %10863 = vst [vmem:[#allocation26_spill] sm:$0xff] %v9731_v15  ;;  %v4362_v55 = vmax.f32 %v9736_v34, %v9731_v15  ;;  %v4264_v21 = vadd.f32 %v4263_v13, %v3782_v57  ;;  %v6672_v13 = vld [vmem:[#allocation5 + $0x1c8] sm:$0xff] }
 0x6c9   : > { %v3784_v14 = vpop.f32.mrf.mxu1  ;;  %v4265_v28 = vpop.f32.mrf.mxu0  ;;  %4848 = vrot.lane.b32.xlu1 %v10731_v33, %s6812_s12  ;;  %v6666_v33 = vld [vmem:[#allocation5 + $0x198] sm:$0xff] }
 0x6ca   : > { %v9740_v45 = vmul.f32 %v6666_v33, %v4254_v6  ;;  %v4266_v6 = vadd.f32 %v4265_v28, %v3784_v14  ;;  %v6669_v33 = vld [vmem:[#allocation5 + $0x1a0] sm:$0xff] }
 0x6cb   : > { %v3788_v51 = vpop.f32.mrf.mxu1  ;;  %v4269_v29 = vpop.f32.mrf.mxu0  ;;  %v9752_v15 = vmul.f32 %v6669_v33, %v4258_v56 }
 0x6cc   : > { %4429 = vmax.xlane.f32.xlu0 %v4428_v63  ;;  %v4431_v41 = vmax.f32 %v9744_v44, %v9740_v45  ;;  %v9756_v22 = vmul.f32 %v6670_v27, %v4266_v6  ;;  %v6673_v6 = vld [vmem:[#allocation5 + $0x1c0] sm:$0xff]  ;;  %v6675_v27 = vld [vmem:[#allocation5 + $0x1d0] sm:$0xff] }
 0x6cd   : > { %v3790_v12 = vpop.f32.mrf.mxu1  ;;  %v4271_v16 = vpop.f32.mrf.mxu0  ;;  %4846 = vrot.lane.b32.xlu1 %v10715_v60, %s6812_s12  ;;  %v6668_v60 = vld [vmem:[#allocation5 + $0x1a8] sm:$0xff] }
 0x6ce   : > { %v9748_v17 = vmul.f32 %v6668_v60, %v4260_v46  ;;  %v6671_v46 = vld [vmem:[#allocation5 + $0x1b0] sm:$0xff]  ;;  %v4270_v60 = vadd.f32 %v4269_v29, %v3788_v51  ;;  %v6674_v51 = vld [vmem:[#allocation5 + $0x1d8] sm:$0xff] }
 0x6cf   : > { %v3794_v47 = vpop.f32.mrf.mxu1  ;;  %v4275_v43 = vpop.f32.mrf.mxu0 }
 0x6d0   : > { %4363 = vmax.xlane.f32.xlu0 %v4362_v55  ;;  %v4434_v14 = vmax.f32 %v9752_v15, %v9748_v17  ;;  %v9760_v55 = vmul.f32 %v6671_v46, %v4264_v21  ;;  %v4276_v33 = vadd.f32 %v4275_v43, %v3794_v47  ;;  %v6676_v43 = vld [vmem:[#allocation5 + $0x1e8] sm:$0xff] }
 0x6d1   : > { %v3796_v42 = vpop.f32.mrf.mxu1  ;;  %v4277_v36 = vpop.f32.mrf.mxu0  ;;  %4844 = vrot.lane.b32.xlu1 %v10727_v54, %s6812_s12  ;;  %v4272_v54 = vadd.f32 %v4271_v16, %v3790_v12 }
 0x6d2   : > { %v4437_v12 = vmax.f32 %v9760_v55, %v9756_v22 }
 0x6d3   : > { %v3800_v35 = vpop.f32.mrf.mxu1  ;;  %v4281_v63 = vpop.f32.mrf.mxu0  ;;  %v9764_v57 = vmul.f32 %v6672_v13, %v4272_v54  ;;  %v9776_v54 = vmul.f32 %v6675_v27, %v4276_v33  ;;  %v6679_v13 = vld [vmem:[#allocation5 + $0x1f0] sm:$0xff] }
 0x6d4   : > { %4432 = vmax.xlane.f32.xlu0 %v4431_v41  ;;  %v9768_v41 = vmul.f32 %v6673_v6, %v4270_v60 }
 0x6d5   : > { %4842 = vrot.lane.b32.xlu1 %v10758_v58, %s6812_s12  ;;  %v3802_v28 = vpop.f32.mrf.mxu1  ;;  %v4283_v10 = vpop.f32.mrf.mxu0  ;;  %v4278_v58 = vadd.f32 %v4277_v36, %v3796_v42 }
 0x6d6   : > { %v4440_v42 = vmax.f32 %v9768_v41, %v9764_v57 }
 0x6d7   : > { %v3806_v16 = vpop.f32.mrf.mxu1  ;;  %v4287_v56 = vpop.f32.mrf.mxu0  ;;  %v9772_v29 = vmul.f32 %v6674_v51, %v4278_v58 }
 0x6d8   : > { %4435 = vmax.xlane.f32.xlu0 %v4434_v14  ;;  %v4282_v14 = vadd.f32 %v4281_v63, %v3800_v35  ;;  %v4288_v60 = vadd.f32 %v4287_v56, %v3806_v16  ;;  %v6678_v35 = vld [vmem:[#allocation5 + $0x1f8] sm:$0xff] }
 0x6d9   : > { %4840 = vrot.lane.b32.xlu1 %v10724_v3, %s6812_s12  ;;  %v4284_v3 = vadd.f32 %v4283_v10, %v3802_v28  ;;  %v3808_v36 = vpop.f32.mrf.mxu1  ;;  %v4289_v21 = vpop.f32.mrf.mxu0  ;;  %v4443_v28 = vmax.f32 %v9776_v54, %v9772_v29  ;;  %v6677_v10 = vld [vmem:[#allocation5 + $0x1e0] sm:$0xff] }
 0x6da   : > { %v9784_v46 = vmul.f32 %v6677_v10, %v4282_v14  ;;  %v9792_v58 = vmul.f32 %v6679_v13, %v4288_v60  ;;  %v10866_v60 = vld [vmem:[#allocation80_spill] sm:$0xff] }
 0x6db   : > { %v9780_v47 = vmul.f32 %v6676_v43, %v4284_v3  ;;  %v10865_v43 = vld [vmem:[#allocation110_spill] sm:$0xff] }
 0x6dc   : > { %4438 = vmax.xlane.f32.xlu0 %v4437_v12 }
 0x6dd   : > { %4838 = vrot.lane.b32.xlu1 %v10765_v11, %s6812_s12  ;;  %v4290_v11 = vadd.f32 %v4289_v21, %v3808_v36 }
 0x6df   : > { %v9788_v63 = vmul.f32 %v6678_v35, %v4290_v11 }
 0x6e0   : > { %4441 = vmax.xlane.f32.xlu0 %v4440_v42 }
 0x6e1   : > { %4836 = vrot.lane.b32.xlu1 %v10720_v2, %s6812_s12  ;;  %v4446_v2 = vmax.f32 %v9784_v46, %v9780_v47  ;;  %v4449_v12 = vmax.f32 %v9792_v58, %v9788_v63 }
 0x6e4   : > { %4444 = vmax.xlane.f32.xlu0 %v4443_v28 }
 0x6e5   : > { %4898 = vrot.lane.b32.xlu1 %v10815_v40, %s6812_s12 }
 0x6e8   : > { %4447 = vmax.xlane.f32.xlu0 %v4446_v2 }
 0x6e9   : > { %4896 = vrot.lane.b32.xlu1 %v8718_v9, %s6812_s12 }
 0x6ec   : > { %4450 = vmax.xlane.f32.xlu0 %v4449_v12  ;;  %v10867_v12 = vld [vmem:[#allocation112_spill] sm:$0xff] }
 0x6ed   : > { %4894 = vrot.lane.b32.xlu1 %v10813_v32, %s6812_s12 }
 0x6f1   : > { %4892 = vrot.lane.b32.xlu1 %v8686_v53, %s6812_s12 }
 0x6f5   : > { %4890 = vrot.lane.b32.xlu1 %v8662_v19, %s6812_s12 }
 0x6f8   : > { %v4367_v9 = vpop.xlane.xlu1 %4366 }
 0x6f9   : > { %4888 = vrot.lane.b32.xlu1 %v8640_v4, %s6812_s12  ;;  %v4458_v53 = vsub.f32 %v9577_v52, %v4367_v9  ;;  %v4459_v19 = vsub.f32 %v9579_v59, %v4367_v9 }
 0x6fb   : > { %v4528_v4 = vmul.f32 1.442695, %v4458_v53  ;;  %v4530_v32 = vmul.f32 1.442695, %v4459_v19 }
 0x6fc   : > { %v4370_v40 = vpop.xlane.xlu0 %4369 }
 0x6fd   : > { %4886 = vrot.lane.b32.xlu1 %v10711_v18, %s6812_s12  ;;  %v4460_v18 = vsub.f32 %v9583_v30, %v4370_v40  ;;  %6392 = vpow2.f32 %v4528_v4 }
 0x6fe   : > { %6394 = vpow2.f32 %v4530_v32  ;;  %v10868_v32 = vld [vmem:[#allocation99_spill] sm:$0xff] }
 0x700   : > { %v4373_v16 = vpop.xlane.xlu0 %4372 }
 0x701   : > { %4884 = vrot.lane.b32.xlu1 %v10704_v37, %s6812_s12  ;;  %v4461_v37 = vsub.f32 %v9585_v1, %v4370_v40  ;;  %v4463_v59 = vsub.f32 %v9591_v49, %v4373_v16 }
 0x702   : > { %4870 = vrot.lane.b32.xlu0 %v10717_v38, %s6812_s12  ;;  %v4532_v38 = vmul.f32 1.442695, %v4460_v18 }
 0x703   : > { %v4534_v52 = vmul.f32 1.442695, %v4461_v37  ;;  %v4538_v1 = vmul.f32 1.442695, %v4463_v59 }
 0x704   : > { %v4376_v56 = vpop.xlane.xlu1 %4375  ;;  %6396 = vpow2.f32 %v4532_v38 }
 0x705   : > { %4882 = vrot.lane.b32.xlu1 %v10728_v61, %s6812_s12  ;;  %v4462_v61 = vsub.f32 %v9589_v48, %v4373_v16  ;;  %v4464_v30 = vsub.f32 %v9595_v62, %v4376_v56  ;;  %6398 = vpow2.f32 %v4534_v52 }
 0x707   : > { %v4540_v48 = vmul.f32 1.442695, %v4464_v30 }
 0x708   : > { %v4379_v6 = vpop.xlane.xlu0 %4378 }
 0x709   : > { %4880 = vrot.lane.b32.xlu1 %v10736_v39, %s6812_s12  ;;  %v4536_v39 = vmul.f32 1.442695, %v4462_v61  ;;  %v4466_v49 = vsub.f32 %v9601_v7, %v4379_v6  ;;  %v10869_v61 = vld [vmem:[#allocation33_spill] sm:$0xff] }
 0x70a   : > { %v9835_v3 = vpop.eup %6392 }
 0x70b   : > { %6400 = vpow2.f32 %v4536_v39  ;;  %v4544_v62 = vmul.f32 1.442695, %v4466_v49  ;;  %v9838_v7 = vpop.eup %6394  ;;  %v10871_v49 = vld [vmem:[#allocation11_spill] sm:$0xff] }
 0x70c   : > { %6402 = vpow2.f32 %v4538_v1  ;;  %v4382_v51 = vpop.xlane.xlu1 %4381  ;;  %v4653_v28 = vadd.f32 %v9838_v7, %v9835_v3  ;;  %v10870_v1 = vld [vmem:[#allocation63_spill] sm:$0xff] }
 0x70d   : > { %4878 = vrot.lane.b32.xlu1 %v10743_v0, %s6812_s12  ;;  %v4465_v0 = vsub.f32 %v9597_v5, %v4376_v56  ;;  %6404 = vpow2.f32 %v4540_v48  ;;  %v4468_v5 = vsub.f32 %v9607_v24, %v4382_v51  ;;  %v4469_v42 = vsub.f32 %v9609_v50, %v4382_v51 }
 0x70f   : > { %v4542_v33 = vmul.f32 1.442695, %v4465_v0  ;;  %v4548_v21 = vmul.f32 1.442695, %v4468_v5 }
 0x710   : > { %v4385_v36 = vpop.xlane.xlu0 %4384 }
 0x711   : > { %4876 = vrot.lane.b32.xlu1 %v10747_v20, %s6812_s12  ;;  %v4467_v20 = vsub.f32 %v9603_v26, %v4379_v6  ;;  %6406 = vpow2.f32 %v4542_v33  ;;  %v10864_v26 = vld [vmem:[#allocation124_spill] sm:$0xff]  ;;  %v9841_v14 = vpop.eup %6396  ;;  %v4471_v11 = vsub.f32 %v10865_v43, %v4385_v36 }
 0x712   : > { %6408 = vpow2.f32 %v4544_v62  ;;  %v4470_v27 = vsub.f32 %v10864_v26, %v4385_v36  ;;  %v9846_v10 = vpop.eup %6398  ;;  %v10873_v26 = vld [vmem:[#allocation67_spill] sm:$0xff] }
 0x713   : > { %v4554_v13 = vmul.f32 1.442695, %v4471_v11  ;;  %v4656_v19 = vadd.f32 %v9846_v10, %v9841_v14 }
 0x714   : > { %v4388_v24 = vpop.xlane.xlu1 %4387  ;;  %v4552_v50 = vmul.f32 1.442695, %v4470_v27 }
 0x715   : > { %4874 = vrot.lane.b32.xlu1 %v10754_v8, %s6812_s12  ;;  %v4546_v8 = vmul.f32 1.442695, %v4467_v20  ;;  %v4472_v35 = vsub.f32 %v10866_v60, %v4388_v24  ;;  %v4473_v9 = vsub.f32 %v10867_v12, %v4388_v24 }
 0x717   : > { %6410 = vpow2.f32 %v4546_v8  ;;  %v4556_v18 = vmul.f32 1.442695, %v4472_v35  ;;  %v4558_v38 = vmul.f32 1.442695, %v4473_v9  ;;  %v10872_v8 = vld [vmem:[#allocation62_spill] sm:$0xff] }
 0x718   : > { %6412 = vpow2.f32 %v4548_v21  ;;  %v9849_v2 = vpop.eup %6400  ;;  %v9852_v40 = vpop.xlane.xlu0 %4390 }
 0x719   : > { %4872 = vrot.lane.b32.xlu1 %v10716_v25, %s6812_s12  ;;  %v4550_v25 = vmul.f32 1.442695, %v4469_v42  ;;  %v9856_v4 = vpop.eup %6402 }
 0x71a   : > { %v9859_v16 = vpop.eup %6404  ;;  %v4659_v56 = vadd.f32 %v9856_v4, %v9849_v2 }
 0x71b   : > { %6414 = vpow2.f32 %v4550_v25 }
 0x71c   : > { %v4394_v53 = vpop.xlane.xlu1 %4393  ;;  %6416 = vpow2.f32 %v4552_v50 }
 0x71d   : > { %v4476_v37 = vsub.f32 %v10868_v32, %v4394_v53  ;;  %6418 = vpow2.f32 %v4554_v13  ;;  %v4477_v52 = vsub.f32 %v10869_v61, %v4394_v53  ;;  %v10875_v13 = vld [vmem:[#allocation66_spill] sm:$0xff]  ;;  %v10876_v32 = vld [vmem:[#allocation71_spill] sm:$0xff] }
 0x71e   : > { %v9864_v39 = vpop.eup %6406  ;;  %6420 = vpow2.f32 %v4556_v18 }
 0x71f   : > { %v4564_v30 = vmul.f32 1.442695, %v4476_v37  ;;  %v9867_v6 = vpop.eup %6408  ;;  %6422 = vpow2.f32 %v4558_v38  ;;  %v4566_v48 = vmul.f32 1.442695, %v4477_v52  ;;  %v4662_v51 = vadd.f32 %v9864_v39, %v9859_v16  ;;  %v10877_v52 = vld [vmem:[#allocation15_spill] sm:$0xff] }
 0x720   : > { %v4397_v59 = vpop.xlane.xlu0 %4396 }
 0x721   : > { %4654 = vadd.xlane.f32.xlu0 %v4653_v28  ;;  %v4478_v0 = vsub.f32 %v10870_v1, %v4397_v59  ;;  %v4479_v33 = vsub.f32 %v10871_v49, %v4397_v59  ;;  %6424 = vpow2.f32 %v4564_v30  ;;  %v10874_v28 = vld [vmem:[#allocation13_spill] sm:$0xff]  ;;  %v10878_v49 = vld [vmem:[#allocation75_spill] sm:$0xff] }
 0x722   : > { %6426 = vpow2.f32 %v4566_v48 }
 0x723   : > { %v4568_v5 = vmul.f32 1.442695, %v4478_v0  ;;  %v4570_v21 = vmul.f32 1.442695, %v4479_v33 }
 0x724   : > { %v4400_v20 = vpop.xlane.xlu1 %4399  ;;  %v9872_v62 = vpop.eup %6410 }
 0x725   : > { %4657 = vadd.xlane.f32.xlu0 %v4656_v19  ;;  %v4480_v42 = vsub.f32 %v10872_v8, %v4400_v20  ;;  %v9875_v36 = vpop.eup %6412  ;;  %v4481_v27 = vsub.f32 %v10873_v26, %v4400_v20  ;;  %v4665_v43 = vadd.f32 %v9872_v62, %v9867_v6  ;;  %6428 = vpow2.f32 %v4568_v5  ;;  %v10879_v5 = vld [vmem:[#allocation17_spill] sm:$0xff] }
 0x726   : > { %6430 = vpow2.f32 %v4570_v21 }
 0x727   : > { %v4572_v24 = vmul.f32 1.442695, %v4480_v42  ;;  %v4574_v35 = vmul.f32 1.442695, %v4481_v27 }
 0x728   : > { %v4403_v25 = vpop.xlane.xlu0 %4402  ;;  %v9880_v11 = vpop.eup %6414 }
 0x729   : > { %4660 = vadd.xlane.f32.xlu0 %v4659_v56  ;;  %v4482_v50 = vsub.f32 %v10874_v28, %v4403_v25  ;;  %v9883_v60 = vpop.eup %6416  ;;  %v4483_v12 = vsub.f32 %v10875_v13, %v4403_v25  ;;  %v4668_v53 = vadd.f32 %v9880_v11, %v9875_v36  ;;  %6432 = vpow2.f32 %v4572_v24 }
 0x72a   : > { %v9888_v19 = vpop.eup %6418  ;;  %6434 = vpow2.f32 %v4574_v35 }
 0x72b   : > { %v4576_v18 = vmul.f32 1.442695, %v4482_v50  ;;  %v9891_v38 = vpop.eup %6420  ;;  %v4578_v61 = vmul.f32 1.442695, %v4483_v12  ;;  %v4671_v30 = vadd.f32 %v9888_v19, %v9883_v60  ;;  %v10880_v50 = vld [vmem:[#allocation79_spill] sm:$0xff] }
 0x72c   : > { %v4406_v9 = vpop.xlane.xlu1 %4405  ;;  %v9896_v1 = vpop.eup %6422 }
 0x72d   : > { %4663 = vadd.xlane.f32.xlu0 %v4662_v51  ;;  %v4484_v37 = vsub.f32 %v10876_v32, %v4406_v9  ;;  %v4485_v59 = vsub.f32 %v10877_v52, %v4406_v9  ;;  %6436 = vpow2.f32 %v4576_v18  ;;  %v4674_v42 = vadd.f32 %v9896_v1, %v9891_v38 }
 0x72e   : > { %v9901_v20 = vpop.eup %6424  ;;  %6438 = vpow2.f32 %v4578_v61  ;;  %v10881_v61 = vmov 0.0  }
 0x72f   : > { %v4580_v48 = vmul.f32 1.442695, %v4484_v37  ;;  %v4582_v51 = vmul.f32 1.442695, %v4485_v59  ;;  %v9906_v21 = vpop.eup %6426 }
 0x730   : > { %v9898_v0 = vpop.xlane.xlu0 %4408  ;;  %v4680_v13 = vadd.f32 %v9906_v21, %v9901_v20 }
 0x731   : > { %4666 = vadd.xlane.f32.xlu0 %v4665_v43  ;;  %6440 = vpow2.f32 %v4580_v48  ;;  %v10882_v48 = vld [vmem:[#allocation83_spill] sm:$0xff] }
 0x732   : > { %v9911_v24 = vpop.eup %6428  ;;  %6442 = vpow2.f32 %v4582_v51 }
 0x733   : > { %v9916_v12 = vpop.eup %6430 }
 0x734   : > { %v4412_v56 = vpop.xlane.xlu1 %4411  ;;  %v4683_v37 = vadd.f32 %v9916_v12, %v9911_v24 }
 0x735   : > { %4669 = vadd.xlane.f32.xlu0 %v4668_v53  ;;  %v4488_v33 = vsub.f32 %v10878_v49, %v4412_v56  ;;  %v4489_v8 = vsub.f32 %v10879_v5, %v4412_v56 }
 0x737   : > { %v4588_v25 = vmul.f32 1.442695, %v4488_v33  ;;  %v4590_v28 = vmul.f32 1.442695, %v4489_v8 }
 0x739   : > { %4672 = vadd.xlane.f32.xlu0 %v4671_v30  ;;  %v9908_v26 = vpop.xlane.xlu0 %4414  ;;  %6444 = vpow2.f32 %v4588_v25 }
 0x73a   : > { %6446 = vpow2.f32 %v4590_v28 }
 0x73d   : > { %4675 = vadd.xlane.f32.xlu1 %v4674_v42  ;;  %v4418_v27 = vpop.xlane.xlu1 %4417 }
 0x73e   : > { %v4492_v43 = vsub.f32 %v9679_v23, %v4418_v27  ;;  %v4493_v35 = vsub.f32 %v10880_v50, %v4418_v27  ;;  %v9920_v23 = vpop.eup %6432 }
 0x73f   : > { %v9926_v52 = vpop.eup %6434 }
 0x740   : > { %v4596_v18 = vmul.f32 1.442695, %v4492_v43  ;;  %v4598_v32 = vmul.f32 1.442695, %v4493_v35  ;;  %v9930_v33 = vpop.eup %6436  ;;  %v4686_v51 = vadd.f32 %v9926_v52, %v9920_v23 }
 0x741   : > { %v9918_v9 = vpop.xlane.xlu0 %4420  ;;  %4681 = vadd.xlane.f32.xlu1 %v4680_v13  ;;  %v4851_v53 = vpop.permute.xlu1 %4850  ;;  %v10885_v13 = vld [vmem:[#allocation103_spill] sm:$0xff] }
 0x742   : > { %4949 = vmatpush1.msra.mxu0 %v4851_v53  ;;  %5783 = vmatpush1.msra.mxu1 %v4851_v53  ;;  %6448 = vpow2.f32 %v4596_v18  ;;  %v9936_v5 = vpop.eup %6438  ;;  %v10886_v18 = vld [vmem:[#allocation25_spill] sm:$0xff] }
 0x743   : > { %4950 = vmatprep.subr.mxu0 %v10881_v61  ;;  %5752 = vmatprep.subr.mxu1 %v10881_v61  ;;  %6450 = vpow2.f32 %v4598_v32  ;;  %v9940_v25 = vpop.eup %6440  ;;  %v4689_v43 = vadd.f32 %v9936_v5, %v9930_v33 }
 0x744   : > { %10883 = vst [vmem:[#allocation100_spill] sm:$0xff] %v9940_v25  ;;  %v9946_v28 = vpop.eup %6442 }
 0x745   : > { %v4424_v59 = vpop.xlane.xlu0 %4423  ;;  %4684 = vadd.xlane.f32.xlu1 %v4683_v37  ;;  %v4849_v56 = vpop.permute.xlu1 %4848  ;;  %10884 = vst [vmem:[#allocation30_spill] sm:$0xff] %v9946_v28 }
 0x746   : > { %v4496_v30 = vsub.f32 %v9693_v31, %v4424_v59  ;;  %v4497_v49 = vsub.f32 %v10882_v48, %v4424_v59  ;;  %4951 = vmatpush1.msra.mxu0 %v4849_v56  ;;  %5784 = vmatpush1.msra.mxu1 %v4849_v56  ;;  %v9950_v37 = vpop.eup %6444  ;;  %v10888_v59 = vld [vmem:[#allocation96_spill] sm:$0xff]  ;;  %v4692_v56 = vadd.f32 %v9946_v28, %v9940_v25  ;;  %v10895_v25 = vld [vmem:[#allocation107_spill] sm:$0xff] }
 0x747   : > { %4952 = vmatprep.subr.mxu0 %v10881_v61  ;;  %5753 = vmatprep.subr.mxu1 %v10881_v61  ;;  %10887 = vst [vmem:[#allocation101_spill] sm:$0xff] %v9950_v37 }
 0x748   : > { %v4604_v8 = vmul.f32 1.442695, %v4496_v30  ;;  %v4606_v42 = vmul.f32 1.442695, %v4497_v49  ;;  %v9957_v30 = vpop.eup %6446 }
 0x749   : > { %4687 = vadd.xlane.f32.xlu1 %v4686_v51  ;;  %v4847_v31 = vpop.permute.xlu1 %4846  ;;  %v9938_v27 = vpop.xlane.xlu0 %4357  ;;  %10889 = vst [vmem:[#allocation56_spill] sm:$0xff] %v9957_v30 }
 0x74a   : > { %6452 = vpow2.f32 %v4604_v8  ;;  %4953 = vmatpush1.msra.mxu0 %v4847_v31  ;;  %5785 = vmatpush1.msra.mxu1 %v4847_v31  ;;  %v4698_v31 = vadd.f32 %v9957_v30, %v9950_v37 }
 0x74b   : > { %6454 = vpow2.f32 %v4606_v42  ;;  %4954 = vmatprep.subr.mxu0 %v10881_v61  ;;  %5754 = vmatprep.subr.mxu1 %v10881_v61 }
 0x74d   : > { %4690 = vadd.xlane.f32.xlu1 %v4689_v43  ;;  %v4845_v50 = vpop.permute.xlu1 %4844  ;;  %v4427_v35 = vpop.xlane.xlu0 %4426 }
 0x74e   : > { %v4498_v53 = vsub.f32 %v10885_v13, %v4427_v35  ;;  %v4499_v32 = vsub.f32 %v10886_v18, %v4427_v35  ;;  %4955 = vmatpush1.msra.mxu0 %v4845_v50  ;;  %5786 = vmatpush1.msra.mxu1 %v4845_v50  ;;  %v10890_v50 = vld [vmem:[#allocation58_spill] sm:$0xff]  ;;  %v10891_v13 = vld [vmem:[#allocation72_spill] sm:$0xff] }
 0x74f   : > { %4868 = vrot.lane.b32.xlu0 %v10888_v59, %s6812_s12  ;;  %4956 = vmatprep.subr.mxu0 %v10881_v61  ;;  %v9962_v42 = vpop.eup %6448  ;;  %v4474_v35 = vsub.f32 %v10890_v50, %v9852_v40  ;;  %v10892_v59 = vld [vmem:[#allocation70_spill] sm:$0xff]  ;;  %v4487_v50 = vsub.f32 %v10895_v25, %v9898_v0 }
 0x750   : > { %v4608_v48 = vmul.f32 1.442695, %v4498_v53  ;;  %v4610_v49 = vmul.f32 1.442695, %v4499_v32  ;;  %5755 = vmatprep.subr.mxu1 %v10881_v61  ;;  %v9968_v43 = vpop.eup %6450  ;;  %v4475_v53 = vsub.f32 %v10891_v13, %v9852_v40 }
 0x751   : > { %4693 = vadd.xlane.f32.xlu1 %v4692_v56  ;;  %v4843_v51 = vpop.permute.xlu1 %4842  ;;  %v9960_v8 = vpop.xlane.xlu0 %4360  ;;  %v4486_v56 = vsub.f32 %v10892_v59, %v9898_v0  ;;  %v4704_v40 = vadd.f32 %v9968_v43, %v9962_v42  ;;  %v4560_v13 = vmul.f32 1.442695, %v4474_v35  ;;  %v4586_v0 = vmul.f32 1.442695, %v4487_v50  ;;  %v10898_v50 = vld [vmem:[#allocation19_spill] sm:$0xff] }
 0x752   : > { %6456 = vpow2.f32 %v4608_v48  ;;  %4957 = vmatpush1.msra.mxu0 %v4843_v51  ;;  %5787 = vmatpush1.msra.mxu1 %v4843_v51  ;;  %v10893_v48 = vld [vmem:[#allocation61_spill] sm:$0xff] }
 0x753   : > { %6458 = vpow2.f32 %v4610_v49  ;;  %4958 = vmatprep.subr.mxu0 %v10881_v61  ;;  %5756 = vmatprep.subr.mxu1 %v10881_v61  ;;  %v10894_v51 = vld [vmem:[#allocation57_spill] sm:$0xff]  ;;  %v4584_v28 = vmul.f32 1.442695, %v4486_v56 }
 0x755   : > { %4699 = vadd.xlane.f32.xlu1 %v4698_v31  ;;  %v4841_v18 = vpop.permute.xlu1 %4840  ;;  %v4430_v32 = vpop.xlane.xlu0 %4429 }
 0x756   : > { %v4500_v49 = vsub.f32 %v10893_v48, %v4430_v32  ;;  %v4501_v37 = vsub.f32 %v10894_v51, %v4430_v32  ;;  %4959 = vmatpush1.msra.mxu0 %v4841_v18  ;;  %5788 = vmatpush1.msra.mxu1 %v4841_v18  ;;  %v4562_v32 = vmul.f32 1.442695, %v4475_v53  ;;  %v10897_v53 = vld [vmem:[#allocation76_spill] sm:$0xff] }
 0x757   : > { %v9978_v30 = vpop.eup %6452  ;;  %4960 = vmatprep.subr.mxu0 %v10881_v61  ;;  %5757 = vmatprep.subr.mxu1 %v10881_v61  ;;  %v4491_v56 = vsub.f32 %v10897_v53, %v9908_v26 }
 0x758   : > { %v9986_v31 = vpop.eup %6454  ;;  %v4612_v59 = vmul.f32 1.442695, %v4500_v49  ;;  %v4614_v48 = vmul.f32 1.442695, %v4501_v37  ;;  %v10896_v37 = vld [vmem:[#allocation74_spill] sm:$0xff] }
 0x759   : > { %4705 = vadd.xlane.f32.xlu1 %v4704_v40  ;;  %v4839_v18 = vpop.permute.xlu1 %4838  ;;  %v9988_v51 = vpop.xlane.xlu0 %4363  ;;  %v4710_v25 = vadd.f32 %v9986_v31, %v9978_v30  ;;  %v4490_v35 = vsub.f32 %v10896_v37, %v9908_v26 }
 0x75a   : > { %6460 = vpow2.f32 %v4612_v59  ;;  %4961 = vmatpush1.msra.mxu0 %v4839_v18  ;;  %5789 = vmatpush1.msra.mxu1 %v4839_v18  ;;  %v4494_v59 = vsub.f32 %v10898_v50, %v9918_v9 }
 0x75b   : > { %6462 = vpow2.f32 %v4614_v48  ;;  %4962 = vmatprep.subr.mxu0 %v10881_v61  ;;  %5758 = vmatprep.subr.mxu1 %v10881_v61 }
 0x75c   : > { %6464 = vpow2.f32 %v4560_v13 }
 0x75d   : > { %6466 = vpow2.f32 %v4562_v32  ;;  %4711 = vadd.xlane.f32.xlu1 %v4710_v25  ;;  %v4837_v49 = vpop.permute.xlu1 %4836  ;;  %v4433_v40 = vpop.xlane.xlu0 %4432  ;;  %v10899_v32 = vld [vmem:[#allocation105_spill] sm:$0xff] }
 0x75e   : > { %6468 = vpow2.f32 %v4584_v28  ;;  %v4502_v48 = vsub.f32 %v9744_v44, %v4433_v40  ;;  %v4503_v18 = vsub.f32 %v9740_v45, %v4433_v40  ;;  %4963 = vmatpush1.msra.mxu0 %v4837_v49  ;;  %5790 = vmatpush1.msra.mxu1 %v4837_v49  ;;  %v4495_v37 = vsub.f32 %v10899_v32, %v9918_v9 }
 0x75f   : > { %v10002_v13 = vpop.eup %6456  ;;  %6470 = vpow2.f32 %v4586_v0  ;;  %4964 = vmatprep.subr.mxu0 %v10881_v61  ;;  %5759 = vmatprep.subr.mxu1 %v10881_v61  ;;  %v4592_v28 = vmul.f32 1.442695, %v4490_v35  ;;  %v4594_v44 = vmul.f32 1.442695, %v4491_v56  ;;  %v4600_v0 = vmul.f32 1.442695, %v4494_v59 }
 0x760   : > { %v10008_v26 = vpop.eup %6458  ;;  %v4616_v25 = vmul.f32 1.442695, %v4502_v48  ;;  %v4618_v53 = vmul.f32 1.442695, %v4503_v18  ;;  %v4602_v9 = vmul.f32 1.442695, %v4495_v37 }
 0x761   : > { %v4899_v50 = vpop.permute.xlu1 %4898  ;;  %v10010_v45 = vpop.xlane.xlu0 %4435  ;;  %v4713_v49 = vadd.f32 %v10008_v26, %v10002_v13  ;;  %v10900_v35 = vld [vmem:[#allocation50_spill] sm:$0xff] }
 0x762   : > { %6472 = vpow2.f32 %v4616_v25  ;;  %4965 = vmatpush2.msra.mxu0 %v4899_v50  ;;  %5791 = vmatpush2.msra.mxu1 %v4899_v50  ;;  %v4452_v40 = vsub.f32 %v10900_v35, %v9938_v27  ;;  %v10901_v56 = vld [vmem:[#allocation22_spill] sm:$0xff] }
 0x763   : > { %6474 = vpow2.f32 %v4618_v53  ;;  %4714 = vadd.xlane.f32.xlu1 %v4713_v49  ;;  %4966 = vmatprep.subr.mxu0 %v10881_v61  ;;  %v4453_v48 = vsub.f32 %v10901_v56, %v9938_v27  ;;  %v10904_v27 = vld [vmem:[#allocation28_spill] sm:$0xff] }
 0x764   : > { %6476 = vpow2.f32 %v4592_v28  ;;  %5760 = vmatprep.subr.mxu1 %v10881_v61  ;;  %v4516_v53 = vmul.f32 1.442695, %v4452_v40 }
 0x765   : > { %6478 = vpow2.f32 %v4594_v44  ;;  %v4897_v18 = vpop.permute.xlu1 %4896  ;;  %v4439_v59 = vpop.xlane.xlu0 %4438  ;;  %v4454_v44 = vsub.f32 %v10904_v27, %v9960_v8  ;;  %v10906_v27 = vld [vmem:[#allocation26_spill] sm:$0xff] }
 0x766   : > { %6480 = vpow2.f32 %v4600_v0  ;;  %v4506_v32 = vsub.f32 %v9760_v55, %v4439_v59  ;;  %v4507_v37 = vsub.f32 %v9756_v22, %v4439_v59  ;;  %4967 = vmatpush2.msra.mxu0 %v4897_v18  ;;  %5792 = vmatpush2.msra.mxu1 %v4897_v18  ;;  %v4518_v22 = vmul.f32 1.442695, %v4453_v48  ;;  %v10905_v0 = vld [vmem:[#allocation94_spill] sm:$0xff] }
 0x767   : > { %v10022_v25 = vpop.eup %6460  ;;  %6482 = vpow2.f32 %v4602_v9  ;;  %4968 = vmatprep.subr.mxu0 %v10881_v61  ;;  %5761 = vmatprep.subr.mxu1 %v10881_v61  ;;  %v4455_v35 = vsub.f32 %v10905_v0, %v9960_v8  ;;  %v4520_v8 = vmul.f32 1.442695, %v4454_v44 }
 0x768   : > { %10902 = vst [vmem:[#allocation34_spill] sm:$0xff] %v10022_v25  ;;  %v10026_v28 = vpop.eup %6462  ;;  %v4624_v50 = vmul.f32 1.442695, %v4506_v32  ;;  %v4626_v49 = vmul.f32 1.442695, %v4507_v37  ;;  %v4456_v32 = vsub.f32 %v9736_v34, %v9988_v51  ;;  %v4504_v34 = vsub.f32 %v9752_v15, %v10010_v45 }
 0x769   : > { %10903 = vst [vmem:[#allocation68_spill] sm:$0xff] %v10026_v28  ;;  %v10030_v55 = vpop.eup %6464  ;;  %v4895_v56 = vpop.permute.xlu1 %4894  ;;  %v4716_v18 = vadd.f32 %v10026_v28, %v10022_v25  ;;  %v4522_v37 = vmul.f32 1.442695, %v4455_v35  ;;  %v4505_v15 = vsub.f32 %v9748_v17, %v10010_v45 }
 0x76a   : > { %v10034_v9 = vpop.xlane.xlu0 %4441  ;;  %v10038_v59 = vpop.eup %6466  ;;  %6484 = vpow2.f32 %v4624_v50  ;;  %4969 = vmatpush2.msra.mxu0 %v4895_v56  ;;  %5793 = vmatpush2.msra.mxu1 %v4895_v56  ;;  %v4457_v50 = vsub.f32 %v10906_v27, %v9988_v51  ;;  %v4524_v35 = vmul.f32 1.442695, %v4456_v32  ;;  %v4620_v32 = vmul.f32 1.442695, %v4504_v34 }
 0x76b   : > { %v10040_v40 = vpop.eup %6468  ;;  %6486 = vpow2.f32 %v4626_v49  ;;  %4717 = vadd.xlane.f32.xlu1 %v4716_v18  ;;  %4970 = vmatprep.subr.mxu0 %v10881_v61  ;;  %v4677_v49 = vadd.f32 %v10038_v59, %v10030_v55  ;;  %v4508_v17 = vsub.f32 %v9768_v41, %v10034_v9  ;;  %v4622_v45 = vmul.f32 1.442695, %v4505_v15 }
 0x76c   : > { %v10043_v48 = vpop.eup %6470  ;;  %6488 = vpow2.f32 %v4516_v53  ;;  %5762 = vmatprep.subr.mxu1 %v10881_v61 }
 0x76d   : > { %6490 = vpow2.f32 %v4518_v22  ;;  %v4893_v0 = vpop.permute.xlu1 %4892  ;;  %v4695_v51 = vadd.f32 %v10043_v48, %v10040_v40 }
 0x76e   : > { %v4445_v56 = vpop.xlane.xlu0 %4444  ;;  %4971 = vmatpush2.msra.mxu0 %v4893_v0  ;;  %5794 = vmatpush2.msra.mxu1 %v4893_v0  ;;  %6492 = vpow2.f32 %v4520_v8  ;;  %v4526_v0 = vmul.f32 1.442695, %v4457_v50  ;;  %v4509_v50 = vsub.f32 %v9764_v57, %v10034_v9 }
 0x76f   : > { %v4510_v18 = vsub.f32 %v9776_v54, %v4445_v56  ;;  %v4511_v53 = vsub.f32 %v9772_v29, %v4445_v56  ;;  %v10054_v44 = vpop.eup %6472  ;;  %4678 = vadd.xlane.f32.xlu0 %v4677_v49  ;;  %4972 = vmatprep.subr.mxu0 %v10881_v61  ;;  %6494 = vpow2.f32 %v4522_v37 }
 0x770   : > { %v10061_v22 = vpop.eup %6474  ;;  %5763 = vmatprep.subr.mxu1 %v10881_v61 }
 0x771   : > { %v4632_v54 = vmul.f32 1.442695, %v4510_v18  ;;  %v4634_v27 = vmul.f32 1.442695, %v4511_v53  ;;  %v10064_v29 = vpop.eup %6476  ;;  %v4891_v56 = vpop.permute.xlu1 %4890  ;;  %v4719_v25 = vadd.f32 %v10061_v22, %v10054_v44 }
 0x772   : > { %v4448_v49 = vpop.xlane.xlu0 %4447  ;;  %v10070_v28 = vpop.eup %6478  ;;  %4973 = vmatpush2.msra.mxu0 %v4891_v56  ;;  %5795 = vmatpush2.msra.mxu1 %v4891_v56 }
 0x773   : > { %6496 = vpow2.f32 %v4632_v54  ;;  %v10072_v8 = vpop.eup %6480  ;;  %4696 = vadd.xlane.f32.xlu0 %v4695_v51  ;;  %4720 = vadd.xlane.f32.xlu1 %v4719_v25  ;;  %v4701_v25 = vadd.f32 %v10070_v28, %v10064_v29  ;;  %v4512_v54 = vsub.f32 %v9784_v46, %v4448_v49  ;;  %v4513_v15 = vsub.f32 %v9780_v47, %v4448_v49 }
 0x774   : > { %6498 = vpow2.f32 %v4634_v27  ;;  %v10074_v37 = vpop.eup %6482  ;;  %4974 = vmatprep.subr.mxu0 %v10881_v61  ;;  %5764 = vmatprep.subr.mxu1 %v10881_v61 }
 0x775   : > { %6500 = vpow2.f32 %v4524_v35  ;;  %v4889_v18 = vpop.permute.xlu1 %4888  ;;  %v4707_v57 = vadd.f32 %v10074_v37, %v10072_v8  ;;  %v4628_v35 = vmul.f32 1.442695, %v4508_v17  ;;  %v4636_v46 = vmul.f32 1.442695, %v4512_v54 }
 0x776   : > { %6502 = vpow2.f32 %v4526_v0  ;;  %v4451_v53 = vpop.xlane.xlu0 %4450  ;;  %4975 = vmatpush2.msra.mxu0 %v4889_v18  ;;  %5796 = vmatpush2.msra.mxu1 %v4889_v18  ;;  %v4630_v0 = vmul.f32 1.442695, %v4509_v50  ;;  %v4638_v47 = vmul.f32 1.442695, %v4513_v15 }
 0x777   : > { %v4514_v34 = vsub.f32 %v9792_v58, %v4451_v53  ;;  %v4515_v51 = vsub.f32 %v9788_v63, %v4451_v53  ;;  %v10086_v41 = vpop.eup %6484  ;;  %6504 = vpow2.f32 %v4620_v32  ;;  %4702 = vadd.xlane.f32.xlu0 %v4701_v25  ;;  %4976 = vmatprep.subr.mxu0 %v10881_v61 }
 0x778   : > { %v10091_v9 = vpop.eup %6486  ;;  %5765 = vmatprep.subr.mxu1 %v10881_v61  ;;  %6506 = vpow2.f32 %v4622_v45 }
 0x779   : > { %v4640_v27 = vmul.f32 1.442695, %v4514_v34  ;;  %v4642_v58 = vmul.f32 1.442695, %v4515_v51  ;;  %v10095_v63 = vpop.eup %6488  ;;  %v4887_v56 = vpop.permute.xlu1 %4886  ;;  %v4725_v32 = vadd.f32 %v10091_v9, %v10086_v41 }
 0x77a   : > { %v10100_v18 = vpop.eup %6490  ;;  %4977 = vmatpush2.msra.mxu0 %v4887_v56  ;;  %5797 = vmatpush2.msra.mxu1 %v4887_v56 }
 0x77b   : > { %6508 = vpow2.f32 %v4640_v27  ;;  %4708 = vadd.xlane.f32.xlu0 %v4707_v57  ;;  %4726 = vadd.xlane.f32.xlu1 %v4725_v32  ;;  %v10104_v17 = vpop.eup %6492  ;;  %v4644_v45 = vadd.f32 %v10100_v18, %v10095_v63 }
 0x77c   : > { %6510 = vpow2.f32 %v4642_v58  ;;  %4978 = vmatprep.subr.mxu0 %v10881_v61  ;;  %5766 = vmatprep.subr.mxu1 %v10881_v61  ;;  %v10108_v50 = vpop.eup %6494 }
 0x77d   : > { %6512 = vpow2.f32 %v4628_v35  ;;  %v4885_v49 = vpop.permute.xlu1 %4884  ;;  %v4647_v57 = vadd.f32 %v10108_v50, %v10104_v17 }
 0x77e   : > { %6514 = vpow2.f32 %v4630_v0  ;;  %4979 = vmatpush2.msra.mxu0 %v4885_v49  ;;  %5798 = vmatpush2.msra.mxu1 %v4885_v49 }
 0x77f   : > { %4645 = vadd.xlane.f32.xlu0 %v4644_v45  ;;  %4980 = vmatprep.subr.mxu0 %v10881_v61  ;;  %6516 = vpow2.f32 %v4636_v46 }
 0x780   : > { %v10110_v53 = vpop.eup %6496  ;;  %5767 = vmatprep.subr.mxu1 %v10881_v61  ;;  %6518 = vpow2.f32 %v4638_v47 }
 0x781   : > { %10907 = vst [vmem:[#allocation106_spill] sm:$0xff] %v10110_v53  ;;  %v10113_v25 = vpop.eup %6498  ;;  %v4883_v51 = vpop.permute.xlu1 %4882 }
 0x782   : > { %10908 = vst [vmem:[#allocation36_spill] sm:$0xff] %v10113_v25  ;;  %v10116_v34 = vpop.eup %6500  ;;  %v4731_v35 = vadd.f32 %v10113_v25, %v10110_v53  ;;  %4981 = vmatpush2.msra.mxu0 %v4883_v51  ;;  %5799 = vmatpush2.msra.mxu1 %v4883_v51  ;;  %v10917_v25 = vld [vmem:[#allocation128_spill] sm:$0xff] }
 0x783   : > { %v10122_v54 = vpop.eup %6502  ;;  %4648 = vadd.xlane.f32.xlu0 %v4647_v57  ;;  %4982 = vmatprep.subr.mxu0 %v10881_v61 }
 0x784   : > { %4732 = vadd.xlane.f32.xlu1 %v4731_v35  ;;  %v10124_v27 = vpop.eup %6504  ;;  %5768 = vmatprep.subr.mxu1 %v10881_v61  ;;  %v4650_v0 = vadd.f32 %v10122_v54, %v10116_v34 }
 0x785   : > { %v4881_v58 = vpop.permute.xlu1 %4880  ;;  %v10130_v15 = vpop.eup %6506 }
 0x786   : > { %4983 = vmatpush2.msra.mxu0 %v4881_v58  ;;  %5800 = vmatpush2.msra.mxu1 %v4881_v58  ;;  %v4722_v49 = vadd.f32 %v10130_v15, %v10124_v27 }
 0x787   : > { %4651 = vadd.xlane.f32.xlu0 %v4650_v0  ;;  %4984 = vmatprep.subr.mxu0 %v10881_v61 }
 0x788   : > { %v10132_v56 = vpop.eup %6508  ;;  %5769 = vmatprep.subr.mxu1 %v10881_v61 }
 0x789   : > { %10909 = vst [vmem:[#allocation109_spill] sm:$0xff] %v10132_v56  ;;  %v10135_v32 = vpop.eup %6510  ;;  %v4879_v47 = vpop.permute.xlu1 %4878 }
 0x78a   : > { %10910 = vst [vmem:[#allocation38_spill] sm:$0xff] %v10135_v32  ;;  %v10138_v46 = vpop.eup %6512  ;;  %v4737_v45 = vadd.f32 %v10135_v32, %v10132_v56  ;;  %4985 = vmatpush2.msra.mxu0 %v4879_v47  ;;  %5801 = vmatpush2.msra.mxu1 %v4879_v47 }
 0x78b   : > { %10911 = vst [vmem:[#allocation64_spill] sm:$0xff] %v10138_v46  ;;  %v10144_v51 = vpop.eup %6514  ;;  %4723 = vadd.xlane.f32.xlu0 %v4722_v49  ;;  %4986 = vmatprep.subr.mxu0 %v10881_v61 }
 0x78c   : > { %10912 = vst [vmem:[#allocation59_spill] sm:$0xff] %v10144_v51  ;;  %4738 = vadd.xlane.f32.xlu1 %v4737_v45  ;;  %5770 = vmatprep.subr.mxu1 %v10881_v61  ;;  %v10148_v57 = vpop.eup %6516  ;;  %v4728_v58 = vadd.f32 %v10144_v51, %v10138_v46  ;;  %v10918_v46 = vld [vmem:[#allocation85_spill] sm:$0xff]  ;;  %v10919_v51 = vld [vmem:[#allocation55_spill] sm:$0xff] }
 0x78d   : > { %10913 = vst [vmem:[#allocation40_spill] sm:$0xff] %v10148_v57  ;;  %v4877_v35 = vpop.permute.xlu1 %4876  ;;  %v10152_v0 = vpop.eup %6518 }
 0x78e   : > { %10914 = vst [vmem:[#allocation65_spill] sm:$0xff] %v10152_v0  ;;  %4987 = vmatpush2.msra.mxu0 %v4877_v35  ;;  %5802 = vmatpush2.msra.mxu1 %v4877_v35  ;;  %v4734_v49 = vadd.f32 %v10152_v0, %v10148_v57  ;;  %v4871_v35 = vpop.permute.xlu0 %4870  ;;  %v10915_v0 = vld [vmem:[#allocation113_spill] sm:$0xff] }
 0x78f   : > { %4729 = vadd.xlane.f32.xlu0 %v4728_v58  ;;  %4988 = vmatprep.subr.mxu0 %v10881_v61 }
 0x790   : > { %5771 = vmatprep.subr.mxu1 %v10881_v61 }
 0x791   : > { %v4875_v47 = vpop.permute.xlu1 %4874 }
 0x792   : > { %4989 = vmatpush2.msra.mxu0 %v4875_v47  ;;  %5803 = vmatpush2.msra.mxu1 %v4875_v47 }
 0x793   : > { %4735 = vadd.xlane.f32.xlu0 %v4734_v49  ;;  %4990 = vmatprep.subr.mxu0 %v10881_v61 }
 0x794   : > { %5772 = vmatprep.subr.mxu1 %v10881_v61 }
 0x795   : > { %v4873_v45 = vpop.permute.xlu1 %4872 }
 0x796   : > { %4991 = vmatpush2.msra.mxu0 %v4873_v45  ;;  %5804 = vmatpush2.msra.mxu1 %v4873_v45 }
 0x797   : > { %4992 = vmatprep.subr.mxu0 %v10881_v61  ;;  %5773 = vmatprep.subr.mxu1 %v10881_v61 }
 0x798   : > { %4993 = vmatpush2.msra.mxu0 %v4871_v35  ;;  %5805 = vmatpush2.msra.mxu1 %v4871_v35  ;;  %v10916_v35 = vld [vmem:[#allocation84_spill] sm:$0xff] }
 0x799   : > { %4994 = vmatprep.subr.mxu0 %v10881_v61  ;;  %5774 = vmatprep.subr.mxu1 %v10881_v61 }
 0x7aa   : > { %v4655_v58 = vpop.xlane.xlu0 %4654 }
 0x7ab   : > { %6520 = vrcp.f32 %v4655_v58 }
 0x7ae   : > { %v4658_v47 = vpop.xlane.xlu0 %4657 }
 0x7af   : > { %6522 = vrcp.f32 %v4658_v47 }
 0x7b2   : > { %v4661_v49 = vpop.xlane.xlu0 %4660 }
 0x7b3   : > { %6524 = vrcp.f32 %v4661_v49  ;;  %v10920_v49 = vld [vmem:[#allocation47_spill] sm:$0xff] }
 0x7b6   : > { %v4664_v56 = vpop.xlane.xlu0 %4663 }
 0x7b7   : > { %6526 = vrcp.f32 %v4664_v56 }
 0x7b8   : > { %v6521_v32 = vpop.eup %6520 }
 0x7b9   : > { %v4779_v45 = vmul.f32 %v6521_v32, %v9838_v7  ;;  %v4778_v47 = vmul.f32 %v6521_v32, %v9835_v3 }
 0x7ba   : > { %v4667_v57 = vpop.xlane.xlu0 %4666 }
 0x7bb   : > { %5011 = vmatprep.mubr.f32.mxu1 %v4779_v45  ;;  %6528 = vrcp.f32 %v4667_v57 }
 0x7bc   : > { %v6523_v58 = vpop.eup %6522 }
 0x7bd   : > { %v4780_v57 = vmul.f32 %v6523_v58, %v9841_v14  ;;  %v10925_v14 = vld [vmem:[#allocation115_spill] sm:$0xff] }
 0x7be   : > { %v4670_v53 = vpop.xlane.xlu0 %4669 }
 0x7bf   : > { %3200 = vxpose.xlu1.b32.start [1/16] (narrow) %v10915_v0, 8  ;;  %6530 = vrcp.f32 %v4670_v53  ;;  %v4781_v0 = vmul.f32 %v6523_v58, %v9846_v10  ;;  %v10923_v53 = vld [vmem:[#allocation92_spill] sm:$0xff] }
 0x7c0   : > { %3168 = vxpose.xlu0.b32.start [1/16] (narrow) %v10916_v35, 8  ;;  %v6525_v56 = vpop.eup %6524 }
 0x7c1   : > { %v4783_v3 = vmul.f32 %v6525_v56, %v9856_v4  ;;  %v4782_v10 = vmul.f32 %v6525_v56, %v9849_v2  ;;  %v10927_v2 = vld [vmem:[#allocation119_spill] sm:$0xff] }
 0x7c2   : > { %v4673_v61 = vpop.xlane.xlu0 %4672 }
 0x7c3   : > { %3201 = vxpose.xlu1.b32.cont [2/16] (narrow) %v10917_v25, 8  ;;  %v10921_v25 = vld [vmem:[#allocation116_spill] sm:$0xff]  ;;  %6532 = vrcp.f32 %v4673_v61 }
 0x7c4   : > { %3169 = vxpose.xlu0.b32.cont [2/16] (narrow) %v10918_v46, 8  ;;  %v6527_v32 = vpop.eup %6526 }
 0x7c5   : > { %v4785_v45 = vmul.f32 %v6527_v32, %v9864_v39  ;;  %v4784_v4 = vmul.f32 %v6527_v32, %v9859_v16  ;;  %v10931_v32 = vld [vmem:[#allocation122_spill] sm:$0xff] }
 0x7c6   : > { %v4869_v7 = vpop.permute.xlu0 %4868  ;;  %v4676_v46 = vpop.xlane.xlu1 %4675 }
 0x7c7   : > { %3202 = vxpose.xlu1.b32.cont [3/16] (narrow) %v10919_v51, 8  ;;  %4995 = vmatpush2.msra.mxu0 %v4869_v7  ;;  %v10922_v51 = vld [vmem:[#allocation89_spill] sm:$0xff]  ;;  %6534 = vrcp.f32 %v4676_v46 }
 0x7c8   : > { %5806 = vmatpush2.msra.mxu1 %v4869_v7  ;;  %3170 = vxpose.xlu0.b32.cont [3/16] (narrow) %v10920_v49, 8  ;;  %v6529_v35 = vpop.eup %6528  ;;  %v10926_v7 = vld [vmem:[#allocation88_spill] sm:$0xff]  ;;  %v10928_v49 = vld [vmem:[#allocation51_spill] sm:$0xff]  ;;  %v10932_v46 = vld [vmem:[#allocation93_spill] sm:$0xff] }
 0x7c9   : > { %5012 = vmatmul.mubr.f32.vlgmr.msra.gmra.mxu1 %v4778_v47  ;;  %v10924_v47 = vld [vmem:[#allocation87_spill] sm:$0xff]  ;;  %v4787_v61 = vmul.f32 %v6529_v35, %v9872_v62  ;;  %v4786_v39 = vmul.f32 %v6529_v35, %v9867_v6  ;;  %v10939_v35 = vld [vmem:[#allocation97_spill] sm:$0xff] }
 0x7ca   : > { %5016 = vmatprep.mubr.f32.mxu1 %v4781_v0 }
 0x7cb   : > { %3203 = vxpose.xlu1.b32.cont [4/16] (narrow) %v10921_v25, 8  ;;  %v10929_v25 = vld [vmem:[#allocation117_spill] sm:$0xff] }
 0x7cc   : > { %3171 = vxpose.xlu0.b32.cont [4/16] (narrow) %v10922_v51, 8  ;;  %v6531_v58 = vpop.eup %6530  ;;  %v10933_v51 = vld [vmem:[#allocation120_spill] sm:$0xff] }
 0x7cd   : > { %5017 = vmatmul.mubr.f32.gmra.mxu1 %v4780_v57  ;;  %v4789_v0 = vmul.f32 %v6531_v58, %v9880_v11  ;;  %v4788_v16 = vmul.f32 %v6531_v58, %v9875_v36  ;;  %v10944_v58 = vld [vmem:[#allocation31_spill] sm:$0xff] }
 0x7ce   : > { %5021 = vmatprep.mubr.f32.mxu1 %v4783_v3  ;;  %v10930_v3 = vld [vmem:[#allocation91_spill] sm:$0xff] }
 0x7cf   : > { %3204 = vxpose.xlu1.b32.cont [5/16] (narrow) %v10923_v53, 8  ;;  %v10935_v53 = vld [vmem:[#allocation29_spill] sm:$0xff] }
 0x7d0   : > { %3172 = vxpose.xlu0.b32.cont [5/16] (narrow) %v10924_v47, 8  ;;  %v6533_v56 = vpop.eup %6532  ;;  %v10940_v47 = vld [vmem:[#allocation52_spill] sm:$0xff] }
 0x7d1   : > { %5022 = vmatmul.mubr.f32.gmra.mxu1 %v4782_v10  ;;  %v4791_v62 = vmul.f32 %v6533_v56, %v9888_v19  ;;  %v4790_v6 = vmul.f32 %v6533_v56, %v9883_v60  ;;  %v10934_v19 = vld [vmem:[#allocation49_spill] sm:$0xff]  ;;  %v10936_v10 = vld [vmem:[#allocation90_spill] sm:$0xff] }
 0x7d2   : > { %5026 = vmatprep.mubr.f32.mxu1 %v4785_v45  ;;  %v10937_v45 = vld [vmem:[#allocation78_spill] sm:$0xff] }
 0x7d3   : > { %3205 = vxpose.xlu1.b32.cont [6/16] (narrow) %v10925_v14, 8  ;;  %v10938_v60 = vld [vmem:[#allocation86_spill] sm:$0xff]  ;;  %v10941_v14 = vld [vmem:[#allocation60_spill] sm:$0xff] }
 0x7d4   : > { %3173 = vxpose.xlu0.b32.cont [6/16] (narrow) %v10926_v7, 8  ;;  %v6535_v57 = vpop.eup %6534 }
 0x7d5   : > { %5027 = vmatmul.mubr.f32.gmra.mxu1 %v4784_v4  ;;  %v4793_v11 = vmul.f32 %v6535_v57, %v9896_v1  ;;  %v4792_v36 = vmul.f32 %v6535_v57, %v9891_v38  ;;  %v4682_v1 = vpop.xlane.xlu1 %4681  ;;  %v10942_v38 = vld [vmem:[#allocation48_spill] sm:$0xff] }
 0x7d6   : > { %5031 = vmatprep.mubr.f32.mxu1 %v4787_v61  ;;  %v10943_v61 = vld [vmem:[#allocation125_spill] sm:$0xff]  ;;  %6536 = vrcp.f32 %v4682_v1 }
 0x7d7   : > { %3206 = vxpose.xlu1.b32.cont [7/16] (narrow) %v10927_v2, 8 }
 0x7d8   : > { %3174 = vxpose.xlu0.b32.cont [7/16] (narrow) %v10928_v49, 8 }
 0x7d9   : > { %5032 = vmatmul.mubr.f32.gmra.mxu1 %v4786_v39  ;;  %v4685_v4 = vpop.xlane.xlu1 %4684  ;;  %v10945_v39 = vld [vmem:[#allocation82_spill] sm:$0xff] }
 0x7da   : > { %5036 = vmatprep.mubr.f32.mxu1 %v4789_v0  ;;  %v10946_v0 = vld [vmem:[#allocation53_spill] sm:$0xff] }
 0x7db   : > { %3207 = vxpose.xlu1.b32.cont [8/16] (narrow) %v10929_v25, 8 }
 0x7dc   : > { %3175 = vxpose.xlu0.b32.cont [8/16] (narrow) %v10930_v3, 8 }
 0x7dd   : > { %5037 = vmatmul.mubr.f32.gmra.mxu1 %v4788_v16  ;;  %v4688_v2 = vpop.xlane.xlu1 %4687 }
 0x7de   : > { %5041 = vmatprep.mubr.f32.mxu1 %v4791_v62 }
 0x7df   : > { %3208 = vxpose.xlu1.b32.cont [9/16] (narrow) %v10931_v32, 8 }
 0x7e0   : > { %3176 = vxpose.xlu0.b32.cont [9/16] (narrow) %v10932_v46, 8 }
 0x7e1   : > { %5042 = vmatmul.mubr.f32.gmra.mxu1 %v4790_v6  ;;  %v4691_v49 = vpop.xlane.xlu1 %4690 }
 0x7e2   : > { %5046 = vmatprep.mubr.f32.mxu1 %v4793_v11 }
 0x7e3   : > { %3209 = vxpose.xlu1.b32.cont [10/16] (narrow) %v10933_v51, 8  ;;  %v6537_v62 = vpop.eup %6536 }
 0x7e4   : > { %3177 = vxpose.xlu0.b32.cont [10/16] (narrow) %v10934_v19, 8  ;;  %v4797_v46 = vmul.f32 %v6537_v62, %v9906_v21  ;;  %v4796_v19 = vmul.f32 %v6537_v62, %v9901_v20 }
 0x7e5   : > { %5047 = vmatmul.mubr.f32.gmra.mxu1 %v4792_v36  ;;  %v4694_v57 = vpop.xlane.xlu1 %4693 }
 0x7e7   : > { %3210 = vxpose.xlu1.b32.cont [11/16] (narrow) %v10935_v53, 8 }
 0x7e8   : > { %3178 = vxpose.xlu0.b32.cont [11/16] (narrow) %v10936_v10, 8 }
 0x7e9   : > { %v4700_v53 = vpop.xlane.xlu1 %4699 }
 0x7eb   : > { %3211 = vxpose.xlu1.b32.cont [12/16] (narrow) %v10937_v45, 8 }
 0x7ec   : > { %3179 = vxpose.xlu0.b32.cont [12/16] (narrow) %v10938_v60, 8 }
 0x7ef   : > { %3212 = vxpose.xlu1.b32.cont [13/16] (narrow) %v10939_v35, 8 }
 0x7f0   : > { %3180 = vxpose.xlu0.b32.cont [13/16] (narrow) %v10940_v47, 8  ;;  %v4706_v47 = vpop.xlane.xlu1 %4705 }
 0x7f3   : > { %3213 = vxpose.xlu1.b32.cont [14/16] (narrow) %v10941_v14, 8 }
 0x7f4   : > { %3181 = vxpose.xlu0.b32.cont [14/16] (narrow) %v10942_v38, 8 }
 0x7f7   : > { %3214 = vxpose.xlu1.b32.cont [15/16] (narrow) %v10943_v61, 8 }
 0x7f8   : > { %3182 = vxpose.xlu0.b32.cont [15/16] (narrow) %v10944_v58, 8  ;;  %v4679_v7 = vpop.xlane.xlu0 %4678 }
 0x7f9   : > { %6538 = vrcp.f32 %v4679_v7 }
 0x7fa   : > { %6540 = vrcp.f32 %v4685_v4 }
 0x7fb   : > { %3215 = vxpose.xlu1.b32.end [16/16] (narrow) %v10945_v39, 8  ;;  %6542 = vrcp.f32 %v4688_v2 }
 0x7fc   : > { %3183 = vxpose.xlu0.b32.end [16/16] (narrow) %v10946_v0, 8  ;;  %v4697_v56 = vpop.xlane.xlu0 %4696  ;;  %6544 = vrcp.f32 %v4691_v49 }
 0x7fd   : > { %6546 = vrcp.f32 %v4694_v57 }
 0x800   : > { %v4703_v25 = vpop.xlane.xlu0 %4702 }
 0x804   : > { %v4709_v16 = vpop.xlane.xlu0 %4708 }
 0x806   : > { %v6539_v3 = vpop.eup %6538 }
 0x807   : > { %v4795_v32 = vmul.f32 %v6539_v3, %v10038_v59  ;;  %v4794_v6 = vmul.f32 %v6539_v3, %v10030_v55  ;;  %v6541_v51 = vpop.eup %6540 }
 0x808   : > { %v4646_v11 = vpop.xlane.xlu0 %4645  ;;  %v4799_v10 = vmul.f32 %v6541_v51, %v9916_v12  ;;  %v6543_v45 = vpop.eup %6542  ;;  %v4798_v59 = vmul.f32 %v6541_v51, %v9911_v24 }
 0x809   : > { %6548 = vrcp.f32 %v4646_v11  ;;  %5051 = vmatprep.mubr.f32.mxu1 %v4795_v32  ;;  %v4801_v21 = vmul.f32 %v6543_v45, %v9926_v52  ;;  %v6545_v60 = vpop.eup %6544  ;;  %v4800_v20 = vmul.f32 %v6543_v45, %v9920_v23  ;;  %v10947_v52 = vld [vmem:[#allocation30_spill] sm:$0xff] }
 0x80a   : > { %5052 = vmatmul.mubr.f32.gmra.mxu1 %v4794_v6  ;;  %6550 = vrcp.f32 %v4697_v56  ;;  %v6547_v1 = vpop.eup %6546  ;;  %v4803_v12 = vmul.f32 %v6545_v60, %v9936_v5  ;;  %v4802_v4 = vmul.f32 %v6545_v60, %v9930_v33  ;;  %v4712_v5 = vpop.xlane.xlu1 %4711 }
 0x80b   : > { %5056 = vmatprep.mubr.f32.mxu1 %v4797_v46  ;;  %v4805_v38 = vmul.f32 %v6547_v1, %v10947_v52 }
 0x80c   : > { %v4649_v36 = vpop.xlane.xlu0 %4648 }
 0x80d   : > { %6552 = vrcp.f32 %v4649_v36 }
 0x80e   : > { %5057 = vmatmul.mubr.f32.gmra.mxu1 %v4796_v19  ;;  %6554 = vrcp.f32 %v4700_v53  ;;  %v4715_v62 = vpop.xlane.xlu1 %4714 }
 0x80f   : > { %5061 = vmatprep.mubr.f32.mxu1 %v4799_v10 }
 0x810   : > { %v4652_v55 = vpop.xlane.xlu0 %4651 }
 0x811   : > { %6556 = vrcp.f32 %v4652_v55 }
 0x812   : > { %5062 = vmatmul.mubr.f32.gmra.mxu1 %v4798_v59  ;;  %6558 = vrcp.f32 %v4703_v25 }
 0x813   : > { %5066 = vmatprep.mubr.f32.mxu1 %v4801_v21  ;;  %6560 = vrcp.f32 %v4706_v47  ;;  %v10952_v21 = vld [vmem:[#allocation34_spill] sm:$0xff] }
 0x814   : > { %6562 = vrcp.f32 %v4709_v16 }
 0x815   : > { %6564 = vrcp.f32 %v4712_v5 }
 0x816   : > { %v6549_v35 = vpop.eup %6548  ;;  %5067 = vmatmul.mubr.f32.gmra.mxu1 %v4800_v20  ;;  %6566 = vrcp.f32 %v4715_v62 }
 0x817   : > { %v4772_v14 = vmul.f32 %v6549_v35, %v10095_v63  ;;  %5071 = vmatprep.mubr.f32.mxu1 %v4803_v12  ;;  %v4773_v24 = vmul.f32 %v6549_v35, %v10100_v18  ;;  %v6551_v61 = vpop.eup %6550  ;;  %v10948_v63 = vld [vmem:[#allocation100_spill] sm:$0xff] }
 0x818   : > { %v4804_v2 = vmul.f32 %v6547_v1, %v10948_v63  ;;  %v4807_v33 = vmul.f32 %v6551_v61, %v10043_v48  ;;  %v4806_v49 = vmul.f32 %v6551_v61, %v10040_v40  ;;  %v10950_v48 = vld [vmem:[#allocation101_spill] sm:$0xff]  ;;  %v10955_v61 = vld [vmem:[#allocation36_spill] sm:$0xff] }
 0x819   : > { %4996 = vmatprep.mubr.f32.mxu0 %v4773_v24 }
 0x81a   : > { %4997 = vmatmul.mubr.f32.vlgmr.msra.gmra.mxu0 %v4772_v14  ;;  %5072 = vmatmul.mubr.f32.gmra.mxu1 %v4802_v4  ;;  %v6553_v23 = vpop.eup %6552  ;;  %v10953_v4 = vld [vmem:[#allocation59_spill] sm:$0xff] }
 0x81b   : > { %5076 = vmatprep.mubr.f32.mxu1 %v4805_v38  ;;  %v4775_v58 = vmul.f32 %v6553_v23, %v10108_v50  ;;  %v4774_v7 = vmul.f32 %v6553_v23, %v10104_v17  ;;  %v6555_v39 = vpop.eup %6554  ;;  %v10949_v17 = vld [vmem:[#allocation56_spill] sm:$0xff] }
 0x81c   : > { %v4809_v50 = vmul.f32 %v6555_v39, %v10949_v17  ;;  %v4808_v16 = vmul.f32 %v6555_v39, %v10950_v48  ;;  %v10959_v39 = vld [vmem:[#allocation38_spill] sm:$0xff] }
 0x81d   : > { %5001 = vmatprep.mubr.f32.mxu0 %v4775_v58 }
 0x81e   : > { %v6557_v18 = vpop.eup %6556  ;;  %5077 = vmatmul.mubr.f32.gmra.mxu1 %v4804_v2  ;;  %5002 = vmatmul.mubr.f32.gmra.mxu0 %v4774_v7 }
 0x81f   : > { %5081 = vmatprep.mubr.f32.mxu1 %v4807_v33  ;;  %v4777_v0 = vmul.f32 %v6557_v18, %v10122_v54  ;;  %v4776_v56 = vmul.f32 %v6557_v18, %v10116_v34  ;;  %v6559_v25 = vpop.eup %6558  ;;  %v4718_v54 = vpop.xlane.xlu1 %4717  ;;  %v10960_v18 = vld [vmem:[#allocation109_spill] sm:$0xff] }
 0x820   : > { %v4811_v57 = vmul.f32 %v6559_v25, %v10070_v28  ;;  %v6561_v3 = vpop.eup %6560  ;;  %v4810_v40 = vmul.f32 %v6559_v25, %v10064_v29  ;;  %6568 = vrcp.f32 %v4718_v54  ;;  %v4724_v28 = vpop.xlane.xlu0 %4723 }
 0x821   : > { %5006 = vmatprep.mubr.f32.mxu0 %v4777_v0  ;;  %v4813_v34 = vmul.f32 %v6561_v3, %v9968_v43  ;;  %v6563_v32 = vpop.eup %6562  ;;  %v4812_v11 = vmul.f32 %v6561_v3, %v9962_v42 }
 0x822   : > { %5082 = vmatmul.mubr.f32.gmra.mxu1 %v4806_v49  ;;  %5007 = vmatmul.mubr.f32.gmra.mxu0 %v4776_v56  ;;  %v4815_v46 = vmul.f32 %v6563_v32, %v10074_v37  ;;  %v6565_v51 = vpop.eup %6564  ;;  %v4814_v36 = vmul.f32 %v6563_v32, %v10072_v8  ;;  %v10951_v8 = vld [vmem:[#allocation68_spill] sm:$0xff] }
 0x823   : > { %5086 = vmatprep.mubr.f32.mxu1 %v4809_v50  ;;  %v4721_v6 = vpop.xlane.xlu1 %4720  ;;  %v4817_v29 = vmul.f32 %v6565_v51, %v9986_v31  ;;  %v6567_v19 = vpop.eup %6566  ;;  %v4816_v53 = vmul.f32 %v6565_v51, %v9978_v30 }
 0x824   : > { %6570 = vrcp.f32 %v4721_v6  ;;  %v4819_v42 = vmul.f32 %v6567_v19, %v10008_v26  ;;  %v4730_v37 = vpop.xlane.xlu0 %4729  ;;  %v4818_v45 = vmul.f32 %v6567_v19, %v10002_v13 }
 0x825   : > { %6572 = vrcp.f32 %v4724_v28 }
 0x826   : > { %5087 = vmatmul.mubr.f32.gmra.mxu1 %v4808_v16 }
 0x827   : > { %5091 = vmatprep.mubr.f32.mxu1 %v4811_v57  ;;  %v4727_v43 = vpop.xlane.xlu1 %4726 }
 0x828   : > { %6574 = vrcp.f32 %v4727_v43  ;;  %v4736_v26 = vpop.xlane.xlu0 %4735 }
 0x829   : > { %6576 = vrcp.f32 %v4730_v37 }
 0x82a   : > { %5092 = vmatmul.mubr.f32.gmra.mxu1 %v4810_v40 }
 0x82b   : > { %5096 = vmatprep.mubr.f32.mxu1 %v4813_v34  ;;  %v4733_v31 = vpop.xlane.xlu1 %4732 }
 0x82c   : > { %6578 = vrcp.f32 %v4733_v31 }
 0x82d   : > { %v6569_v10 = vpop.eup %6568  ;;  %6580 = vrcp.f32 %v4736_v26 }
 0x82e   : > { %5097 = vmatmul.mubr.f32.gmra.mxu1 %v4812_v11  ;;  %v4821_v55 = vmul.f32 %v6569_v10, %v10951_v8  ;;  %v4820_v60 = vmul.f32 %v6569_v10, %v10952_v21 }
 0x82f   : > { %5101 = vmatprep.mubr.f32.mxu1 %v4815_v46  ;;  %v4739_v35 = vpop.xlane.xlu1 %4738 }
 0x830   : > { %6582 = vrcp.f32 %v4739_v35 }
 0x831   : > { %v6571_v59 = vpop.eup %6570 }
 0x832   : > { %5102 = vmatmul.mubr.f32.gmra.mxu1 %v4814_v36  ;;  %v4823_v30 = vmul.f32 %v6571_v59, %v10061_v22  ;;  %v6573_v20 = vpop.eup %6572  ;;  %v4822_v1 = vmul.f32 %v6571_v59, %v10054_v44 }
 0x833   : > { %5106 = vmatprep.mubr.f32.mxu1 %v4817_v29  ;;  %v4825_v13 = vmul.f32 %v6573_v20, %v10130_v15  ;;  %v4824_v47 = vmul.f32 %v6573_v20, %v10124_v27  ;;  %v10954_v15 = vld [vmem:[#allocation64_spill] sm:$0xff]  ;;  %v10956_v27 = vld [vmem:[#allocation106_spill] sm:$0xff] }
 0x835   : > { %v6575_v12 = vpop.eup %6574 }
 0x836   : > { %5107 = vmatmul.mubr.f32.gmra.mxu1 %v4816_v53  ;;  %v4827_v14 = vmul.f32 %v6575_v12, %v10091_v9  ;;  %v6577_v24 = vpop.eup %6576  ;;  %v4826_v22 = vmul.f32 %v6575_v12, %v10086_v41  ;;  %v10957_v9 = vld [vmem:[#allocation65_spill] sm:$0xff]  ;;  %v10958_v41 = vld [vmem:[#allocation40_spill] sm:$0xff] }
 0x837   : > { %5111 = vmatprep.mubr.f32.mxu1 %v4819_v42  ;;  %v4829_v52 = vmul.f32 %v6577_v24, %v10953_v4  ;;  %v4828_v38 = vmul.f32 %v6577_v24, %v10954_v15 }
 0x839   : > { %v6579_v44 = vpop.eup %6578 }
 0x83a   : > { %5112 = vmatmul.mubr.f32.gmra.mxu1 %v4818_v45  ;;  %v4831_v23 = vmul.f32 %v6579_v44, %v10955_v61  ;;  %v6581_v5 = vpop.eup %6580  ;;  %v4830_v58 = vmul.f32 %v6579_v44, %v10956_v27 }
 0x83b   : > { %5116 = vmatprep.mubr.f32.mxu1 %v4821_v55  ;;  %v4833_v7 = vmul.f32 %v6581_v5, %v10957_v9  ;;  %v4832_v2 = vmul.f32 %v6581_v5, %v10958_v41  ;;  %v3216_v40 = vpop.trf.xlu1 }
 0x83c   : > { %v3184_v34 = vpop.trf.xlu0  ;;  %3233 = vst [vmem:[%s10263_s15 + $0x8] sm:$0xff] %v3216_v40 }
 0x83d   : > { %v6583_v63 = vpop.eup %6582  ;;  %3232 = vst [vmem:[%s10263_s15] sm:$0xff] %v3184_v34 }
 0x83e   : > { %5117 = vmatmul.mubr.f32.gmra.mxu1 %v4820_v60  ;;  %v4835_v33 = vmul.f32 %v6583_v63, %v10959_v39  ;;  %v4834_v0 = vmul.f32 %v6583_v63, %v10960_v18 }
 0x83f   : > { %5121 = vmatprep.mubr.f32.mxu1 %v4823_v30 }
 0x842   : > { %5122 = vmatmul.mubr.f32.gmra.mxu1 %v4822_v1 }
 0x843   : > { %5126 = vmatprep.mubr.f32.mxu1 %v4825_v13 }
 0x846   : > { %5127 = vmatmul.mubr.f32.gmra.mxu1 %v4824_v47 }
 0x847   : > { %5131 = vmatprep.mubr.f32.mxu1 %v4827_v14 }
 0x84a   : > { %5132 = vmatmul.mubr.f32.gmra.mxu1 %v4826_v22 }
 0x84b   : > { %5136 = vmatprep.mubr.f32.mxu1 %v4829_v52 }
 0x84e   : > { %5137 = vmatmul.mubr.f32.gmra.mxu1 %v4828_v38 }
 0x84f   : > { %5141 = vmatprep.mubr.f32.mxu1 %v4831_v23 }
 0x852   : > { %5142 = vmatmul.mubr.f32.gmra.mxu1 %v4830_v58 }
 0x853   : > { %5146 = vmatprep.mubr.f32.mxu1 %v4833_v7 }
 0x856   : > { %5147 = vmatmul.mubr.f32.gmra.mxu1 %v4832_v2 }
 0x857   : > { %5151 = vmatprep.mubr.f32.mxu1 %v4835_v33 }
 0x85a   : > { %5152 = vmatmul.mubr.f32.gmra.mxu1 %v4834_v0 }
 0x889   : > { %v5013_v56 = vpop.f32.mrf.mxu1 }
 0x88b   : > { %v5015_v49 = vpop.f32.mrf.mxu1 }
 0x88d   : > { %v5018_v17 = vpop.f32.mrf.mxu1 }
 0x88f   : > { %v5020_v50 = vpop.f32.mrf.mxu1 }
 0x891   : > { %v5023_v25 = vpop.f32.mrf.mxu1 }
 0x893   : > { %v5025_v62 = vpop.f32.mrf.mxu1 }
 0x895   : > { %v5028_v48 = vpop.f32.mrf.mxu1 }
 0x897   : > { %v5030_v16 = vpop.f32.mrf.mxu1 }
 0x899   : > { %v5033_v57 = vpop.f32.mrf.mxu1 }
 0x89b   : > { %v5035_v3 = vpop.f32.mrf.mxu1 }
 0x89d   : > { %v5038_v54 = vpop.f32.mrf.mxu1 }
 0x89f   : > { %v5040_v32 = vpop.f32.mrf.mxu1 }
 0x8a1   : > { %v5043_v6 = vpop.f32.mrf.mxu1 }
 0x8a3   : > { %v5045_v11 = vpop.f32.mrf.mxu1 }
 0x8a5   : > { %v5048_v46 = vpop.f32.mrf.mxu1 }
 0x8a7   : > { %v5050_v51 = vpop.f32.mrf.mxu1 }
 0x8ca   : > { %v5053_v28 = vpop.f32.mrf.mxu1 }
 0x8cc   : > { %v5055_v36 = vpop.f32.mrf.mxu1 }
 0x8ce   : > { %v5058_v29 = vpop.f32.mrf.mxu1 }
 0x8d0   : > { %v5060_v19 = vpop.f32.mrf.mxu1 }
 0x8d2   : > { %v5063_v43 = vpop.f32.mrf.mxu1 }
 0x8d4   : > { %v5065_v53 = vpop.f32.mrf.mxu1 }
 0x8d6   : > { %v10267_v42 = vpop.f32.mrf.mxu1 }
 0x8d8   : > { %v5070_v10 = vpop.f32.mrf.mxu1 }
 0x8da   : > { %v4998_v37 = vpop.f32.mrf.mxu0  ;;  %v10269_v45 = vpop.f32.mrf.mxu1 }
 0x8db   : > { %5157 = vxpose.xlu0.b32.start [1/16] (narrow) %v4998_v37, 8 }
 0x8dc   : > { %v5000_v8 = vpop.f32.mrf.mxu0  ;;  %v5075_v55 = vpop.f32.mrf.mxu1 }
 0x8de   : > { %v5078_v59 = vpop.f32.mrf.mxu1  ;;  %v5003_v31 = vpop.f32.mrf.mxu0 }
 0x8df   : > { %5189 = vxpose.xlu1.b32.start [1/16] (narrow) %v5078_v59, 8  ;;  %5158 = vxpose.xlu0.b32.cont [2/16] (narrow) %v5003_v31, 8 }
 0x8e0   : > { %v5080_v21 = vpop.f32.mrf.mxu1  ;;  %v5005_v60 = vpop.f32.mrf.mxu0 }
 0x8e2   : > { %v5083_v30 = vpop.f32.mrf.mxu1  ;;  %v5008_v20 = vpop.f32.mrf.mxu0 }
 0x8e3   : > { %5190 = vxpose.xlu1.b32.cont [2/16] (narrow) %v5083_v30, 8  ;;  %5159 = vxpose.xlu0.b32.cont [3/16] (narrow) %v5008_v20, 8 }
 0x8e4   : > { %v5085_v26 = vpop.f32.mrf.mxu1  ;;  %v5010_v1 = vpop.f32.mrf.mxu0 }
 0x8e6   : > { %v5088_v13 = vpop.f32.mrf.mxu1 }
 0x8e7   : > { %5191 = vxpose.xlu1.b32.cont [3/16] (narrow) %v5088_v13, 8  ;;  %5160 = vxpose.xlu0.b32.cont [4/16] (narrow) %v5013_v56, 8 }
 0x8e8   : > { %v5090_v12 = vpop.f32.mrf.mxu1 }
 0x8ea   : > { %v5093_v35 = vpop.f32.mrf.mxu1 }
 0x8eb   : > { %5192 = vxpose.xlu1.b32.cont [4/16] (narrow) %v5093_v35, 8  ;;  %5161 = vxpose.xlu0.b32.cont [5/16] (narrow) %v5018_v17, 8 }
 0x8ec   : > { %v5095_v47 = vpop.f32.mrf.mxu1 }
 0x8ee   : > { %v5098_v14 = vpop.f32.mrf.mxu1 }
 0x8ef   : > { %5193 = vxpose.xlu1.b32.cont [5/16] (narrow) %v5098_v14, 8  ;;  %5162 = vxpose.xlu0.b32.cont [6/16] (narrow) %v5023_v25, 8 }
 0x8f0   : > { %v5100_v24 = vpop.f32.mrf.mxu1 }
 0x8f2   : > { %v5103_v22 = vpop.f32.mrf.mxu1 }
 0x8f3   : > { %5194 = vxpose.xlu1.b32.cont [6/16] (narrow) %v5103_v22, 8  ;;  %5163 = vxpose.xlu0.b32.cont [7/16] (narrow) %v5028_v48, 8 }
 0x8f4   : > { %v5105_v4 = vpop.f32.mrf.mxu1 }
 0x8f6   : > { %v5108_v52 = vpop.f32.mrf.mxu1 }
 0x8f7   : > { %5195 = vxpose.xlu1.b32.cont [7/16] (narrow) %v5108_v52, 8  ;;  %5164 = vxpose.xlu0.b32.cont [8/16] (narrow) %v5033_v57, 8 }
 0x8f8   : > { %v5110_v44 = vpop.f32.mrf.mxu1 }
 0x8fa   : > { %v5113_v15 = vpop.f32.mrf.mxu1 }
 0x8fb   : > { %5196 = vxpose.xlu1.b32.cont [8/16] (narrow) %v5113_v15, 8  ;;  %5165 = vxpose.xlu0.b32.cont [9/16] (narrow) %v5038_v54, 8 }
 0x8fc   : > { %v5115_v38 = vpop.f32.mrf.mxu1 }
 0x8fe   : > { %v5118_v61 = vpop.f32.mrf.mxu1 }
 0x8ff   : > { %5197 = vxpose.xlu1.b32.cont [9/16] (narrow) %v5118_v61, 8  ;;  %5166 = vxpose.xlu0.b32.cont [10/16] (narrow) %v5043_v6, 8 }
 0x900   : > { %v5120_v23 = vpop.f32.mrf.mxu1 }
 0x902   : > { %v5123_v5 = vpop.f32.mrf.mxu1 }
 0x903   : > { %5198 = vxpose.xlu1.b32.cont [10/16] (narrow) %v5123_v5, 8  ;;  %5167 = vxpose.xlu0.b32.cont [11/16] (narrow) %v5048_v46, 8 }
 0x904   : > { %v5125_v27 = vpop.f32.mrf.mxu1 }
 0x906   : > { %v5128_v58 = vpop.f32.mrf.mxu1 }
 0x907   : > { %5199 = vxpose.xlu1.b32.cont [11/16] (narrow) %v5128_v58, 8  ;;  %5168 = vxpose.xlu0.b32.cont [12/16] (narrow) %v5053_v28, 8 }
 0x908   : > { %v5130_v9 = vpop.f32.mrf.mxu1 }
 0x90a   : > { %v5133_v7 = vpop.f32.mrf.mxu1 }
 0x90b   : > { %5200 = vxpose.xlu1.b32.cont [12/16] (narrow) %v5133_v7, 8  ;;  %5169 = vxpose.xlu0.b32.cont [13/16] (narrow) %v5058_v29, 8 }
 0x90c   : > { %v5135_v63 = vpop.f32.mrf.mxu1 }
 0x90e   : > { %v5138_v41 = vpop.f32.mrf.mxu1 }
 0x90f   : > { %5201 = vxpose.xlu1.b32.cont [13/16] (narrow) %v5138_v41, 8  ;;  %5170 = vxpose.xlu0.b32.cont [14/16] (narrow) %v5063_v43, 8 }
 0x910   : > { %v5140_v2 = vpop.f32.mrf.mxu1 }
 0x912   : > { %v5143_v39 = vpop.f32.mrf.mxu1 }
 0x913   : > { %5202 = vxpose.xlu1.b32.cont [14/16] (narrow) %v5143_v39, 8  ;;  %5171 = vxpose.xlu0.b32.cont [15/16] (narrow) %v10267_v42, 8 }
 0x914   : > { %v5145_v33 = vpop.f32.mrf.mxu1 }
 0x916   : > { %v5148_v18 = vpop.f32.mrf.mxu1 }
 0x917   : > { %5203 = vxpose.xlu1.b32.cont [15/16] (narrow) %v5148_v18, 8  ;;  %5172 = vxpose.xlu0.b32.end [16/16] (narrow) %v10269_v45, 8 }
 0x918   : > { %v5150_v0 = vpop.f32.mrf.mxu1 }
 0x91a   : > { %v5153_v56 = vpop.f32.mrf.mxu1 }
 0x91b   : > { %5204 = vxpose.xlu1.b32.end [16/16] (narrow) %v5153_v56, 8 }
 0x91c   : > { %v5155_v49 = vpop.f32.mrf.mxu1 }
 0x957   : > { %v5173_v17 = vpop.trf.xlu0 }
 0x958   : > { %5541 = vst [vmem:[%s10263_s15 + $0x10] sm:$0xff] %v5173_v17 }
 0x95b   : > { %v5205_v50 = vpop.trf.xlu1 }
 0x95c   : > { %5542 = vst [vmem:[%s10263_s15 + $0x18] sm:$0xff] %v5205_v50 }
 0x95d   : > { %6745 = shalt.err (!%p6742_p3)
}
 0x95e   : > { %s6746_s9 = scalar_lea.hbm %s10281_s6, 512  ;;  %s6750_s12 = scalar_lea.hbm %s10331_s5, 1024 }
 0x95f   : > { %p6747_p2 = scmp.ne.s32.totalorder %s10281_s6, %s6746_s9  ;;  %p6751_p6 = scmp.lt.s32.totalorder %s10281_s6, %s10331_s5 }
 0x960   : > { %p6752_p9 = scmp.lt.s32.totalorder %s6750_s12, %s6746_s9 }
 0x961   : > { %p6748_p4 = pnand %p6747_p2, %p6885_p5 }
 0x962   : > { %p6753_p7 = por %p6752_p9, %p6751_p6 }
 0x963   : > { %p6749_p13 = pneg %p6748_p4 }
 0x965   : > { %p6754_p10 = pnand %p6753_p7, %p6749_p13 }
 0x967   : > { %6757 = shalt.err (!%p6754_p10)
}
 0x968   : > { %s6814_s15 = smov 256   ;;  %s6815_s17 = smov 512  }
 0x969   : > { %s6816_s23 = smov 16  }
 0x96a   : > { %5815 = dma.vmem_to_hbm [thread:$0]  (%p6885_p5), %s10275_s16, 512, %s10281_s6, %s10286_s7, %s6814_s15, %s6815_s17, %s6816_s23  }
 0x96b PF: > { %p5832_p12 = scmp.ge.s32.totalorder %s6800_s21, 2  ;;  %s5253_s25 = sand.u32 1, %s6788_s18  }
 0x96c   : > { %p10961_p8 = scmp.ne.s32.totalorder %s10513_s29, 0  ;;  %s5254_s30 = scalar_lea.sflag [#allocation4], %s5253_s25 }
 0x96e   : > { %p5825_p11 = pnand %p5832_p12, %p10961_p8 }
 0x970   : > { %p5826_p0 = pneg %p5825_p11 }
 0x972   : > { %6783 = dma.done.wait (%p5826_p0), %s5254_s30, 512  }
 0x973   : > { %6785 = vsyncadd (%p5826_p0), %s5254_s30, 4294966784  ;;  %p17_p1 = scmp.ge.s32.totalorder %s6872_s24, 4   ;;  %s10962_s18 = smov %s6792_s19 }
 0x974   : > { %s10963_s19 = smov %s6796_s20  ;;  %s10964_s20 = smov %s6883_s27 }
 0x975   : > { %s10965_s21 = smov %s6872_s24  ;;  %19 = sbr.rel (!%p17_p1) target bundleno = 5 (0x5), region = 88 }
 0x97a   :  { %5259 = vsyncpa [#allocation3], 1 }
 0x97b   :  { %5261 = vsyncpa [#allocation3 + $0x1], 1 }
 0x97c   :  { %5262 = vsyncpa [#allocation6], 1 }
 0x97d   :  { %5263 = vsyncpa [#allocation4], 1 }
 0x97e   :  { %5265 = vsyncpa [#allocation4 + $0x1], 1 }

</bundles_post_ra>
